<compile_context>
chip_gen: v6e
topology: v6e:2x2x1
jax: 0.10.0
libtpu: 0.0.40
codegen_flags: <defaults>
</compile_context>

<pallas_src>
import jax
import jax.numpy as jnp
from jax.experimental import pallas as pl
from jax.experimental.pallas import tpu as pltpu


_MAX_BATCH_BLOCK = 256            # images per grid step (multiple of 8)
_VMEM_LIMIT = 32 * 1024 * 1024    # explicit scoped-VMEM limit (v5e default is 16 MiB)

# Only the top-left 11x11 region of conv1's 13x13 output (and the top-left 5x5
# of conv2's 6x6 output) is consumed by conv3 -> logits, so only that region is
# computed.  Semantics of the returned logits are unchanged.
_C1_ROWS = 11
_C1_COLS = 11
_C1_W = _C1_COLS * 32             # lane-dense conv1 row width (352 >= 128)


def _round_up(x, m):
    return (x + m - 1) // m * m


def _batch_tiling(n):
    """(block, grid) over the batch dim.  No padding: grid = cdiv(n, block) and
    Pallas masks the ragged final block.  When the whole batch would fit one
    block but is big enough, force >=2 grid steps so v7x's second TensorCore
    is used (free on v5e/v6e)."""
    if n <= _MAX_BATCH_BLOCK:
        if n >= 32:
            nb = _round_up(pl.cdiv(n, 2), 8)
        else:
            nb = n                      # block == full dim -> always legal
    else:
        nb = _MAX_BATCH_BLOCK
    return nb, pl.cdiv(n, nb)


# ----------------------------------------------------------------------------
# The fused kernel: conv1 -> conv2 -> conv3 -> fc1 -> fc2 (ReLUs fused,
# Dropout layers are inference identities).
# ----------------------------------------------------------------------------
def _cnn_fused_kernel(x_ref, s1_ref, b1_ref, w2_ref, b2_ref, w3_ref, b3_ref,
                      w4_ref, b4_ref, w5_ref, b5_ref, o_ref, y1_ref, y2_ref):
    f32 = jnp.float32
    bf16 = jnp.bfloat16

    # ---- conv1 + ReLU: stride-2 3x3 conv as one (nb,84)@(84,352) MXU matmul
    # per output row.  The stride-2 window gather is baked into the sparse
    # scatter matrix s1 (built once in prepare_params), so only contiguous
    # lane slices of the flattened 28x28 image are read.
    s1 = s1_ref[...]
    b1 = b1_ref[...]
    for oh in range(_C1_ROWS):
        xs = x_ref[:, 56 * oh:56 * oh + 84].astype(bf16)      # input rows 2oh..2oh+2
        a = jnp.dot(xs, s1, preferred_element_type=f32)       # (nb, 11*32)
        y1_ref[:, oh, :] = jnp.maximum(a + b1, 0.0).astype(bf16)

    # ---- conv2 + ReLU: per output position, 3 row-taps of (nb,96)@(96,64).
    # y1 is lane-dense (nb, 11, 11*32), so each tap is a contiguous 96-lane
    # slice (lane index = w*32 + c_in, matching the pre-packed weight rows).
    w2 = [w2_ref[i] for i in range(3)]
    b2 = b2_ref[...]
    for oh in range(5):
        for ow in range(5):
            acc = None
            for di in range(3):
                xs = y1_ref[:, 2 * oh + di, 64 * ow:64 * ow + 96]
                d = jnp.dot(xs, w2[di], preferred_element_type=f32)
                acc = d if acc is None else acc + d
            y2_ref[:, oh, ow, :] = jnp.maximum(acc + b2, 0.0).astype(bf16)

    # ---- conv3 + ReLU + flatten + fc1 + ReLU + fc2, all in VMEM.
    # The PyTorch NCHW flatten never materializes: fc1 weights are pre-split
    # into one (128,512) block per conv3 spatial position, so fc1 is
    # accumulated directly from the four per-position conv3 outputs.
    w3 = [w3_ref[i] for i in range(9)]
    b3 = b3_ref[...]
    w4 = [w4_ref[i] for i in range(4)]
    h1 = None
    for h in range(2):
        for w in range(2):
            acc = None
            for di in range(3):
                for dj in range(3):
                    v = y2_ref[:, 2 * h + di, 2 * w + dj, :]          # (nb, 64)
                    d = jnp.dot(v, w3[di * 3 + dj], preferred_element_type=f32)
                    acc = d if acc is None else acc + d
            c3 = jnp.maximum(acc + b3, 0.0).astype(bf16)              # (nb, 128)
            d = jnp.dot(c3, w4[h * 2 + w], preferred_element_type=f32)
            h1 = d if h1 is None else h1 + d
    h1 = jnp.maximum(h1 + b4_ref[...], 0.0).astype(bf16)              # (nb, 512)
    logits = jnp.dot(h1, w5_ref[...], preferred_element_type=f32) + b5_ref[...]
    o_ref[...] = logits.astype(o_ref.dtype)


# ----------------------------------------------------------------------------
# Full CNN forward (single pallas_call)
# ----------------------------------------------------------------------------
@jax.jit
def cnn_forward(x_nchw, params):
    n = x_nchw.shape[0]
    k_out = params["w5"].shape[1]
    x = x_nchw.reshape(n, 28 * 28).astype(jnp.float32)   # free reshape (C=1)
    nb, gn = _batch_tiling(n)

    return pl.pallas_call(
        _cnn_fused_kernel,
        out_shape=jax.ShapeDtypeStruct((n, k_out), jnp.float32),
        grid=(gn,),
        in_specs=[
            pl.BlockSpec((nb, 784), lambda i: (i, 0)),           # image block
            pl.BlockSpec((84, _C1_W), lambda i: (0, 0)),         # conv1 scatter matrix
            pl.BlockSpec((1, _C1_W), lambda i: (0, 0)),          # conv1 bias (tiled)
            pl.BlockSpec((3, 96, 64), lambda i: (0, 0, 0)),      # conv2 weights / row tap
            pl.BlockSpec((1, 64), lambda i: (0, 0)),             # conv2 bias
            pl.BlockSpec((9, 64, 128), lambda i: (0, 0, 0)),     # conv3 weights / tap
            pl.BlockSpec((1, 128), lambda i: (0, 0)),            # conv3 bias
            pl.BlockSpec((4, 128, 512), lambda i: (0, 0, 0)),    # fc1 weights / position
            pl.BlockSpec((1, 512), lambda i: (0, 0)),            # fc1 bias
            pl.BlockSpec((512, k_out), lambda i: (0, 0)),        # fc2 weights
            pl.BlockSpec((1, k_out), lambda i: (0, 0)),          # fc2 bias
        ],
        out_specs=pl.BlockSpec((nb, k_out), lambda i: (i, 0)),
        scratch_shapes=[
            pltpu.VMEM((nb, _C1_ROWS, _C1_W), jnp.bfloat16),     # conv1 activation
            pltpu.VMEM((nb, 5, 5, 64), jnp.bfloat16),            # conv2 activation
        ],
        compiler_params=pltpu.CompilerParams(
            dimension_semantics=("parallel",),
            vmem_limit_bytes=_VMEM_LIMIT,
        ),
    )(x, params["s1"], params["b1"], params["w2"], params["b2"],
      params["w3"], params["b3"], params["w4"], params["b4"],
      params["w5"], params["b5"])


# ----------------------------------------------------------------------------
# Parameters: PyTorch-layout init + one-time layout prep
# ----------------------------------------------------------------------------
def init_params(key, k_classes):
    ks = jax.random.split(key, 10)
    s = 0.05
    return {
        "conv1_w": s * jax.random.normal(ks[0], (32, 1, 3, 3), jnp.float32),
        "conv1_b": s * jax.random.normal(ks[1], (32,), jnp.float32),
        "conv2_w": s * jax.random.normal(ks[2], (64, 32, 3, 3), jnp.float32),
        "conv2_b": s * jax.random.normal(ks[3], (64,), jnp.float32),
        "conv3_w": s * jax.random.normal(ks[4], (128, 64, 3, 3), jnp.float32),
        "conv3_b": s * jax.random.normal(ks[5], (128,), jnp.float32),
        "fc1_w": s * jax.random.normal(ks[6], (512, 128 * 2 * 2), jnp.float32),
        "fc1_b": s * jax.random.normal(ks[7], (512,), jnp.float32),
        "fc2_w": s * jax.random.normal(ks[8], (k_classes, 512), jnp.float32),
        "fc2_b": s * jax.random.normal(ks[9], (k_classes,), jnp.float32),
    }


def prepare_params(p):
    """One-time weight layout prep (never touches activations in the forward).

    conv1 (32,1,3,3)  -> sparse scatter matrix s1 (84, 11*32):
        s1[di*28 + (2*ow+dj), ow*32 + oc] = W1[oc,0,di,dj]  (stride-2 window
        selection baked in; conv1 = one dense matmul per output row).
    conv2 (64,32,3,3) -> (3, 3*32, 64):  [di][dj*32 + cin, cout]
    conv3 (128,64,3,3)-> (9, 64, 128):   [di*3+dj][cin, cout]
    fc1   (512, 512)  -> (4, 128, 512):  [h*2+w][c, out]   (absorbs the PyTorch
        NCHW flatten: original input index was c*4 + h*2 + w)
    fc2   (K, 512)    -> (512, K)
    """
    bf16, f32 = jnp.bfloat16, jnp.float32

    # conv1 scatter matrix
    w1 = jnp.transpose(p["conv1_w"][:, 0], (1, 2, 0))        # (3, 3, 32) [di, dj, oc]
    s1 = jnp.zeros((3, 28, _C1_COLS, 32), f32)
    ow = jnp.arange(_C1_COLS)
    for di in range(3):
        for dj in range(3):
            s1 = s1.at[di, 2 * ow + dj, ow, :].set(w1[di, dj])
    s1 = s1.reshape(3 * 28, _C1_W)

    def conv_taps(w, taps_leading):
        o, i, kh, kw = w.shape
        t = jnp.transpose(w, (2, 3, 1, 0))                    # (kh, kw, cin, cout)
        return t.reshape(taps_leading, (kh * kw * i) // taps_leading, o)

    fc1 = jnp.transpose(p["fc1_w"].reshape(512, 128, 2, 2), (2, 3, 1, 0))  # (2,2,128,512)

    return {
        "s1": s1.astype(bf16),
        "b1": jnp.tile(p["conv1_b"], _C1_COLS).reshape(1, _C1_W).astype(f32),
        "w2": conv_taps(p["conv2_w"], 3).astype(bf16),        # (3, 96, 64)
        "b2": p["conv2_b"].reshape(1, 64).astype(f32),
        "w3": conv_taps(p["conv3_w"], 9).astype(bf16),        # (9, 64, 128)
        "b3": p["conv3_b"].reshape(1, 128).astype(f32),
        "w4": fc1.reshape(4, 128, 512).astype(bf16),
        "b4": p["fc1_b"].reshape(1, 512).astype(f32),
        "w5": jnp.transpose(p["fc2_w"]).astype(bf16),         # (512, K)
        "b5": p["fc2_b"].reshape(1, -1).astype(f32),
    }


if __name__ == "__main__":
    k_classes = 10                     # Fashion-MNIST has 10 classes
    key = jax.random.PRNGKey(0)
    kp, kx = jax.random.split(key)
    params = prepare_params(init_params(kp, k_classes))

    # batch=2, 1 channel, 28x28 (spatial size fixed by the conv arithmetic that
    # yields the 128*2*2 flattened feature expected by the dense layers)
    x = jax.random.normal(kx, (2, 1, 28, 28), jnp.float32)

    logits = cnn_forward(x, params)
    jax.block_until_ready(logits)
    assert logits.shape == (2, k_classes)
    assert bool(jnp.all(jnp.isfinite(logits)))
    print("KERNEL_OK")
</pallas_src>

<mosaic_0001>
module attributes {stable_mosaic.version = 11 : i64} {
  func.func @_cnn_fused_kernel(%arg0: i32, %arg1: memref<2x784xf32, #tpu.memory_space<vmem>>, %arg2: memref<84x352xbf16, #tpu.memory_space<vmem>>, %arg3: memref<1x352xf32, #tpu.memory_space<vmem>>, %arg4: memref<3x96x64xbf16, #tpu.memory_space<vmem>>, %arg5: memref<1x64xf32, #tpu.memory_space<vmem>>, %arg6: memref<9x64x128xbf16, #tpu.memory_space<vmem>>, %arg7: memref<1x128xf32, #tpu.memory_space<vmem>>, %arg8: memref<4x128x512xbf16, #tpu.memory_space<vmem>>, %arg9: memref<1x512xf32, #tpu.memory_space<vmem>>, %arg10: memref<512x10xbf16, #tpu.memory_space<vmem>>, %arg11: memref<1x10xf32, #tpu.memory_space<vmem>>, %arg12: memref<2x10xf32, #tpu.memory_space<vmem>>, %arg13: memref<2x11x352xbf16, #tpu.memory_space<vmem>>, %arg14: memref<2x5x5x64xbf16, #tpu.memory_space<vmem>>) attributes {dimension_semantics = [#tpu.dimension_semantics<parallel>], iteration_bounds = array<i64: 1>, scalar_prefetch = 0 : i64, scratch_operands = 2 : i64, tpu.core_type = #tpu.core_type<tc>, window_params = [{transform_indices = @transform_0, window_bounds = array<i64: 2, 784>}, {pipeline_mode = #tpu.pipeline_mode<synchronous>, transform_indices = @transform_1, window_bounds = array<i64: 84, 352>}, {pipeline_mode = #tpu.pipeline_mode<synchronous>, transform_indices = @transform_2, window_bounds = array<i64: 1, 352>}, {pipeline_mode = #tpu.pipeline_mode<synchronous>, transform_indices = @transform_3, window_bounds = array<i64: 3, 96, 64>}, {pipeline_mode = #tpu.pipeline_mode<synchronous>, transform_indices = @transform_4, window_bounds = array<i64: 1, 64>}, {pipeline_mode = #tpu.pipeline_mode<synchronous>, transform_indices = @transform_5, window_bounds = array<i64: 9, 64, 128>}, {pipeline_mode = #tpu.pipeline_mode<synchronous>, transform_indices = @transform_6, window_bounds = array<i64: 1, 128>}, {pipeline_mode = #tpu.pipeline_mode<synchronous>, transform_indices = @transform_7, window_bounds = array<i64: 4, 128, 512>}, {pipeline_mode = #tpu.pipeline_mode<synchronous>, transform_indices = @transform_8, window_bounds = array<i64: 1, 512>}, {pipeline_mode = #tpu.pipeline_mode<synchronous>, transform_indices = @transform_9, window_bounds = array<i64: 512, 10>}, {pipeline_mode = #tpu.pipeline_mode<synchronous>, transform_indices = @transform_10, window_bounds = array<i64: 1, 10>}, {transform_indices = @transform_11, window_bounds = array<i64: 2, 10>}]} {
    %c0 = arith.constant 0 : index
    %c0_0 = arith.constant 0 : index
    %0 = vector.load %arg2[%c0, %c0_0] : memref<84x352xbf16, #tpu.memory_space<vmem>>, vector<84x352xbf16>
    %c0_1 = arith.constant 0 : index
    %c0_2 = arith.constant 0 : index
    %1 = vector.load %arg3[%c0_1, %c0_2] : memref<1x352xf32, #tpu.memory_space<vmem>>, vector<1x352xf32>
    %c0_3 = arith.constant 0 : index
    %c0_4 = arith.constant 0 : index
    %2 = vector.load %arg1[%c0_3, %c0_4] : memref<2x784xf32, #tpu.memory_space<vmem>>, vector<2x84xf32>
    %3 = arith.truncf %2 : vector<2x84xf32> to vector<2x84xbf16>
    %cst = arith.constant dense<0.000000e+00> : vector<2x352xf32>
    %4 = tpu.matmul %3, %0, %cst {dimension_numbers = #tpu.dot_dimension_numbers<[1], [0], [0], [1], [0, 0, 1, 1], [], []>} : vector<2x84xbf16>, vector<84x352xbf16>, vector<2x352xf32> -> vector<2x352xf32>
    %5 = vector.broadcast %1 : vector<1x352xf32> to vector<2x352xf32>
    %6 = arith.addf %4, %5 : vector<2x352xf32>
    %cst_5 = arith.constant 0.000000e+00 : f32
    %7 = vector.broadcast %cst_5 : f32 to vector<2x352xf32>
    %8 = arith.maximumf %6, %7 : vector<2x352xf32>
    %9 = arith.truncf %8 : vector<2x352xf32> to vector<2x352xbf16>
    %c0_6 = arith.constant 0 : index
    %c0_7 = arith.constant 0 : index
    %c0_8 = arith.constant 0 : index
    %10 = vector.load %arg13[%c0_6, %c0_7, %c0_8] : memref<2x11x352xbf16, #tpu.memory_space<vmem>>, vector<2x1x352xbf16>
    %11 = vector.shape_cast %10 : vector<2x1x352xbf16> to vector<2x352xbf16>
    %12 = vector.shape_cast %9 : vector<2x352xbf16> to vector<2x1x352xbf16>
    tpu.vector_store %arg13[%c0_6, %c0_7, %c0_8], %12 {strides = array<i32>} : memref<2x11x352xbf16, #tpu.memory_space<vmem>>, vector<2x1x352xbf16>,
    %c0_9 = arith.constant 0 : index
    %c56 = arith.constant 56 : index
    %13 = vector.load %arg1[%c0_9, %c56] : memref<2x784xf32, #tpu.memory_space<vmem>>, vector<2x84xf32>
    %14 = arith.truncf %13 : vector<2x84xf32> to vector<2x84xbf16>
    %cst_10 = arith.constant dense<0.000000e+00> : vector<2x352xf32>
    %15 = tpu.matmul %14, %0, %cst_10 {dimension_numbers = #tpu.dot_dimension_numbers<[1], [0], [0], [1], [0, 0, 1, 1], [], []>} : vector<2x84xbf16>, vector<84x352xbf16>, vector<2x352xf32> -> vector<2x352xf32>
    %16 = vector.broadcast %1 : vector<1x352xf32> to vector<2x352xf32>
    %17 = arith.addf %15, %16 : vector<2x352xf32>
    %cst_11 = arith.constant 0.000000e+00 : f32
    %18 = vector.broadcast %cst_11 : f32 to vector<2x352xf32>
    %19 = arith.maximumf %17, %18 : vector<2x352xf32>
    %20 = arith.truncf %19 : vector<2x352xf32> to vector<2x352xbf16>
    %c0_12 = arith.constant 0 : index
    %c1 = arith.constant 1 : index
    %c0_13 = arith.constant 0 : index
    %21 = vector.load %arg13[%c0_12, %c1, %c0_13] : memref<2x11x352xbf16, #tpu.memory_space<vmem>>, vector<2x1x352xbf16>
    %22 = vector.shape_cast %21 : vector<2x1x352xbf16> to vector<2x352xbf16>
    %23 = vector.shape_cast %20 : vector<2x352xbf16> to vector<2x1x352xbf16>
    tpu.vector_store %arg13[%c0_12, %c1, %c0_13], %23 {strides = array<i32>} : memref<2x11x352xbf16, #tpu.memory_space<vmem>>, vector<2x1x352xbf16>,
    %c0_14 = arith.constant 0 : index
    %c112 = arith.constant 112 : index
    %24 = vector.load %arg1[%c0_14, %c112] : memref<2x784xf32, #tpu.memory_space<vmem>>, vector<2x84xf32>
    %25 = arith.truncf %24 : vector<2x84xf32> to vector<2x84xbf16>
    %cst_15 = arith.constant dense<0.000000e+00> : vector<2x352xf32>
    %26 = tpu.matmul %25, %0, %cst_15 {dimension_numbers = #tpu.dot_dimension_numbers<[1], [0], [0], [1], [0, 0, 1, 1], [], []>} : vector<2x84xbf16>, vector<84x352xbf16>, vector<2x352xf32> -> vector<2x352xf32>
    %27 = vector.broadcast %1 : vector<1x352xf32> to vector<2x352xf32>
    %28 = arith.addf %26, %27 : vector<2x352xf32>
    %cst_16 = arith.constant 0.000000e+00 : f32
    %29 = vector.broadcast %cst_16 : f32 to vector<2x352xf32>
    %30 = arith.maximumf %28, %29 : vector<2x352xf32>
    %31 = arith.truncf %30 : vector<2x352xf32> to vector<2x352xbf16>
    %c0_17 = arith.constant 0 : index
    %c2 = arith.constant 2 : index
    %c0_18 = arith.constant 0 : index
    %32 = vector.load %arg13[%c0_17, %c2, %c0_18] : memref<2x11x352xbf16, #tpu.memory_space<vmem>>, vector<2x1x352xbf16>
    %33 = vector.shape_cast %32 : vector<2x1x352xbf16> to vector<2x352xbf16>
    %34 = vector.shape_cast %31 : vector<2x352xbf16> to vector<2x1x352xbf16>
    tpu.vector_store %arg13[%c0_17, %c2, %c0_18], %34 {strides = array<i32>} : memref<2x11x352xbf16, #tpu.memory_space<vmem>>, vector<2x1x352xbf16>,
    %c0_19 = arith.constant 0 : index
    %c168 = arith.constant 168 : index
    %35 = vector.load %arg1[%c0_19, %c168] : memref<2x784xf32, #tpu.memory_space<vmem>>, vector<2x84xf32>
    %36 = arith.truncf %35 : vector<2x84xf32> to vector<2x84xbf16>
    %cst_20 = arith.constant dense<0.000000e+00> : vector<2x352xf32>
    %37 = tpu.matmul %36, %0, %cst_20 {dimension_numbers = #tpu.dot_dimension_numbers<[1], [0], [0], [1], [0, 0, 1, 1], [], []>} : vector<2x84xbf16>, vector<84x352xbf16>, vector<2x352xf32> -> vector<2x352xf32>
    %38 = vector.broadcast %1 : vector<1x352xf32> to vector<2x352xf32>
    %39 = arith.addf %37, %38 : vector<2x352xf32>
    %cst_21 = arith.constant 0.000000e+00 : f32
    %40 = vector.broadcast %cst_21 : f32 to vector<2x352xf32>
    %41 = arith.maximumf %39, %40 : vector<2x352xf32>
    %42 = arith.truncf %41 : vector<2x352xf32> to vector<2x352xbf16>
    %c0_22 = arith.constant 0 : index
    %c3 = arith.constant 3 : index
    %c0_23 = arith.constant 0 : index
    %43 = vector.load %arg13[%c0_22, %c3, %c0_23] : memref<2x11x352xbf16, #tpu.memory_space<vmem>>, vector<2x1x352xbf16>
    %44 = vector.shape_cast %43 : vector<2x1x352xbf16> to vector<2x352xbf16>
    %45 = vector.shape_cast %42 : vector<2x352xbf16> to vector<2x1x352xbf16>
    tpu.vector_store %arg13[%c0_22, %c3, %c0_23], %45 {strides = array<i32>} : memref<2x11x352xbf16, #tpu.memory_space<vmem>>, vector<2x1x352xbf16>,
    %c0_24 = arith.constant 0 : index
    %c224 = arith.constant 224 : index
    %46 = vector.load %arg1[%c0_24, %c224] : memref<2x784xf32, #tpu.memory_space<vmem>>, vector<2x84xf32>
    %47 = arith.truncf %46 : vector<2x84xf32> to vector<2x84xbf16>
    %cst_25 = arith.constant dense<0.000000e+00> : vector<2x352xf32>
    %48 = tpu.matmul %47, %0, %cst_25 {dimension_numbers = #tpu.dot_dimension_numbers<[1], [0], [0], [1], [0, 0, 1, 1], [], []>} : vector<2x84xbf16>, vector<84x352xbf16>, vector<2x352xf32> -> vector<2x352xf32>
    %49 = vector.broadcast %1 : vector<1x352xf32> to vector<2x352xf32>
    %50 = arith.addf %48, %49 : vector<2x352xf32>
    %cst_26 = arith.constant 0.000000e+00 : f32
    %51 = vector.broadcast %cst_26 : f32 to vector<2x352xf32>
    %52 = arith.maximumf %50, %51 : vector<2x352xf32>
    %53 = arith.truncf %52 : vector<2x352xf32> to vector<2x352xbf16>
    %c0_27 = arith.constant 0 : index
    %c4 = arith.constant 4 : index
    %c0_28 = arith.constant 0 : index
    %54 = vector.load %arg13[%c0_27, %c4, %c0_28] : memref<2x11x352xbf16, #tpu.memory_space<vmem>>, vector<2x1x352xbf16>
    %55 = vector.shape_cast %54 : vector<2x1x352xbf16> to vector<2x352xbf16>
    %56 = vector.shape_cast %53 : vector<2x352xbf16> to vector<2x1x352xbf16>
    tpu.vector_store %arg13[%c0_27, %c4, %c0_28], %56 {strides = array<i32>} : memref<2x11x352xbf16, #tpu.memory_space<vmem>>, vector<2x1x352xbf16>,
    %c0_29 = arith.constant 0 : index
    %c280 = arith.constant 280 : index
    %57 = vector.load %arg1[%c0_29, %c280] : memref<2x784xf32, #tpu.memory_space<vmem>>, vector<2x84xf32>
    %58 = arith.truncf %57 : vector<2x84xf32> to vector<2x84xbf16>
    %cst_30 = arith.constant dense<0.000000e+00> : vector<2x352xf32>
    %59 = tpu.matmul %58, %0, %cst_30 {dimension_numbers = #tpu.dot_dimension_numbers<[1], [0], [0], [1], [0, 0, 1, 1], [], []>} : vector<2x84xbf16>, vector<84x352xbf16>, vector<2x352xf32> -> vector<2x352xf32>
    %60 = vector.broadcast %1 : vector<1x352xf32> to vector<2x352xf32>
    %61 = arith.addf %59, %60 : vector<2x352xf32>
    %cst_31 = arith.constant 0.000000e+00 : f32
    %62 = vector.broadcast %cst_31 : f32 to vector<2x352xf32>
    %63 = arith.maximumf %61, %62 : vector<2x352xf32>
    %64 = arith.truncf %63 : vector<2x352xf32> to vector<2x352xbf16>
    %c0_32 = arith.constant 0 : index
    %c5 = arith.constant 5 : index
    %c0_33 = arith.constant 0 : index
    %65 = vector.load %arg13[%c0_32, %c5, %c0_33] : memref<2x11x352xbf16, #tpu.memory_space<vmem>>, vector<2x1x352xbf16>
    %66 = vector.shape_cast %65 : vector<2x1x352xbf16> to vector<2x352xbf16>
    %67 = vector.shape_cast %64 : vector<2x352xbf16> to vector<2x1x352xbf16>
    tpu.vector_store %arg13[%c0_32, %c5, %c0_33], %67 {strides = array<i32>} : memref<2x11x352xbf16, #tpu.memory_space<vmem>>, vector<2x1x352xbf16>,
    %c0_34 = arith.constant 0 : index
    %c336 = arith.constant 336 : index
    %68 = vector.load %arg1[%c0_34, %c336] : memref<2x784xf32, #tpu.memory_space<vmem>>, vector<2x84xf32>
    %69 = arith.truncf %68 : vector<2x84xf32> to vector<2x84xbf16>
    %cst_35 = arith.constant dense<0.000000e+00> : vector<2x352xf32>
    %70 = tpu.matmul %69, %0, %cst_35 {dimension_numbers = #tpu.dot_dimension_numbers<[1], [0], [0], [1], [0, 0, 1, 1], [], []>} : vector<2x84xbf16>, vector<84x352xbf16>, vector<2x352xf32> -> vector<2x352xf32>
    %71 = vector.broadcast %1 : vector<1x352xf32> to vector<2x352xf32>
    %72 = arith.addf %70, %71 : vector<2x352xf32>
    %cst_36 = arith.constant 0.000000e+00 : f32
    %73 = vector.broadcast %cst_36 : f32 to vector<2x352xf32>
    %74 = arith.maximumf %72, %73 : vector<2x352xf32>
    %75 = arith.truncf %74 : vector<2x352xf32> to vector<2x352xbf16>
    %c0_37 = arith.constant 0 : index
    %c6 = arith.constant 6 : index
    %c0_38 = arith.constant 0 : index
    %76 = vector.load %arg13[%c0_37, %c6, %c0_38] : memref<2x11x352xbf16, #tpu.memory_space<vmem>>, vector<2x1x352xbf16>
    %77 = vector.shape_cast %76 : vector<2x1x352xbf16> to vector<2x352xbf16>
    %78 = vector.shape_cast %75 : vector<2x352xbf16> to vector<2x1x352xbf16>
    tpu.vector_store %arg13[%c0_37, %c6, %c0_38], %78 {strides = array<i32>} : memref<2x11x352xbf16, #tpu.memory_space<vmem>>, vector<2x1x352xbf16>,
    %c0_39 = arith.constant 0 : index
    %c392 = arith.constant 392 : index
    %79 = vector.load %arg1[%c0_39, %c392] : memref<2x784xf32, #tpu.memory_space<vmem>>, vector<2x84xf32>
    %80 = arith.truncf %79 : vector<2x84xf32> to vector<2x84xbf16>
    %cst_40 = arith.constant dense<0.000000e+00> : vector<2x352xf32>
    %81 = tpu.matmul %80, %0, %cst_40 {dimension_numbers = #tpu.dot_dimension_numbers<[1], [0], [0], [1], [0, 0, 1, 1], [], []>} : vector<2x84xbf16>, vector<84x352xbf16>, vector<2x352xf32> -> vector<2x352xf32>
    %82 = vector.broadcast %1 : vector<1x352xf32> to vector<2x352xf32>
    %83 = arith.addf %81, %82 : vector<2x352xf32>
    %cst_41 = arith.constant 0.000000e+00 : f32
    %84 = vector.broadcast %cst_41 : f32 to vector<2x352xf32>
    %85 = arith.maximumf %83, %84 : vector<2x352xf32>
    %86 = arith.truncf %85 : vector<2x352xf32> to vector<2x352xbf16>
    %c0_42 = arith.constant 0 : index
    %c7 = arith.constant 7 : index
    %c0_43 = arith.constant 0 : index
    %87 = vector.load %arg13[%c0_42, %c7, %c0_43] : memref<2x11x352xbf16, #tpu.memory_space<vmem>>, vector<2x1x352xbf16>
    %88 = vector.shape_cast %87 : vector<2x1x352xbf16> to vector<2x352xbf16>
    %89 = vector.shape_cast %86 : vector<2x352xbf16> to vector<2x1x352xbf16>
    tpu.vector_store %arg13[%c0_42, %c7, %c0_43], %89 {strides = array<i32>} : memref<2x11x352xbf16, #tpu.memory_space<vmem>>, vector<2x1x352xbf16>,
    %c0_44 = arith.constant 0 : index
    %c448 = arith.constant 448 : index
    %90 = vector.load %arg1[%c0_44, %c448] : memref<2x784xf32, #tpu.memory_space<vmem>>, vector<2x84xf32>
    %91 = arith.truncf %90 : vector<2x84xf32> to vector<2x84xbf16>
    %cst_45 = arith.constant dense<0.000000e+00> : vector<2x352xf32>
    %92 = tpu.matmul %91, %0, %cst_45 {dimension_numbers = #tpu.dot_dimension_numbers<[1], [0], [0], [1], [0, 0, 1, 1], [], []>} : vector<2x84xbf16>, vector<84x352xbf16>, vector<2x352xf32> -> vector<2x352xf32>
    %93 = vector.broadcast %1 : vector<1x352xf32> to vector<2x352xf32>
    %94 = arith.addf %92, %93 : vector<2x352xf32>
    %cst_46 = arith.constant 0.000000e+00 : f32
    %95 = vector.broadcast %cst_46 : f32 to vector<2x352xf32>
    %96 = arith.maximumf %94, %95 : vector<2x352xf32>
    %97 = arith.truncf %96 : vector<2x352xf32> to vector<2x352xbf16>
    %c0_47 = arith.constant 0 : index
    %c8 = arith.constant 8 : index
    %c0_48 = arith.constant 0 : index
    %98 = vector.load %arg13[%c0_47, %c8, %c0_48] : memref<2x11x352xbf16, #tpu.memory_space<vmem>>, vector<2x1x352xbf16>
    %99 = vector.shape_cast %98 : vector<2x1x352xbf16> to vector<2x352xbf16>
    %100 = vector.shape_cast %97 : vector<2x352xbf16> to vector<2x1x352xbf16>
    tpu.vector_store %arg13[%c0_47, %c8, %c0_48], %100 {strides = array<i32>} : memref<2x11x352xbf16, #tpu.memory_space<vmem>>, vector<2x1x352xbf16>,
    %c0_49 = arith.constant 0 : index
    %c504 = arith.constant 504 : index
    %101 = vector.load %arg1[%c0_49, %c504] : memref<2x784xf32, #tpu.memory_space<vmem>>, vector<2x84xf32>
    %102 = arith.truncf %101 : vector<2x84xf32> to vector<2x84xbf16>
    %cst_50 = arith.constant dense<0.000000e+00> : vector<2x352xf32>
    %103 = tpu.matmul %102, %0, %cst_50 {dimension_numbers = #tpu.dot_dimension_numbers<[1], [0], [0], [1], [0, 0, 1, 1], [], []>} : vector<2x84xbf16>, vector<84x352xbf16>, vector<2x352xf32> -> vector<2x352xf32>
    %104 = vector.broadcast %1 : vector<1x352xf32> to vector<2x352xf32>
    %105 = arith.addf %103, %104 : vector<2x352xf32>
    %cst_51 = arith.constant 0.000000e+00 : f32
    %106 = vector.broadcast %cst_51 : f32 to vector<2x352xf32>
    %107 = arith.maximumf %105, %106 : vector<2x352xf32>
    %108 = arith.truncf %107 : vector<2x352xf32> to vector<2x352xbf16>
    %c0_52 = arith.constant 0 : index
    %c9 = arith.constant 9 : index
    %c0_53 = arith.constant 0 : index
    %109 = vector.load %arg13[%c0_52, %c9, %c0_53] : memref<2x11x352xbf16, #tpu.memory_space<vmem>>, vector<2x1x352xbf16>
    %110 = vector.shape_cast %109 : vector<2x1x352xbf16> to vector<2x352xbf16>
    %111 = vector.shape_cast %108 : vector<2x352xbf16> to vector<2x1x352xbf16>
    tpu.vector_store %arg13[%c0_52, %c9, %c0_53], %111 {strides = array<i32>} : memref<2x11x352xbf16, #tpu.memory_space<vmem>>, vector<2x1x352xbf16>,
    %c0_54 = arith.constant 0 : index
    %c560 = arith.constant 560 : index
    %112 = vector.load %arg1[%c0_54, %c560] : memref<2x784xf32, #tpu.memory_space<vmem>>, vector<2x84xf32>
    %113 = arith.truncf %112 : vector<2x84xf32> to vector<2x84xbf16>
    %cst_55 = arith.constant dense<0.000000e+00> : vector<2x352xf32>
    %114 = tpu.matmul %113, %0, %cst_55 {dimension_numbers = #tpu.dot_dimension_numbers<[1], [0], [0], [1], [0, 0, 1, 1], [], []>} : vector<2x84xbf16>, vector<84x352xbf16>, vector<2x352xf32> -> vector<2x352xf32>
    %115 = vector.broadcast %1 : vector<1x352xf32> to vector<2x352xf32>
    %116 = arith.addf %114, %115 : vector<2x352xf32>
    %cst_56 = arith.constant 0.000000e+00 : f32
    %117 = vector.broadcast %cst_56 : f32 to vector<2x352xf32>
    %118 = arith.maximumf %116, %117 : vector<2x352xf32>
    %119 = arith.truncf %118 : vector<2x352xf32> to vector<2x352xbf16>
    %c0_57 = arith.constant 0 : index
    %c10 = arith.constant 10 : index
    %c0_58 = arith.constant 0 : index
    %120 = vector.load %arg13[%c0_57, %c10, %c0_58] : memref<2x11x352xbf16, #tpu.memory_space<vmem>>, vector<2x1x352xbf16>
    %121 = vector.shape_cast %120 : vector<2x1x352xbf16> to vector<2x352xbf16>
    %122 = vector.shape_cast %119 : vector<2x352xbf16> to vector<2x1x352xbf16>
    tpu.vector_store %arg13[%c0_57, %c10, %c0_58], %122 {strides = array<i32>} : memref<2x11x352xbf16, #tpu.memory_space<vmem>>, vector<2x1x352xbf16>,
    %c0_59 = arith.constant 0 : index
    %c0_60 = arith.constant 0 : index
    %c0_61 = arith.constant 0 : index
    %123 = vector.load %arg4[%c0_59, %c0_60, %c0_61] : memref<3x96x64xbf16, #tpu.memory_space<vmem>>, vector<1x96x64xbf16>
    %124 = vector.shape_cast %123 : vector<1x96x64xbf16> to vector<96x64xbf16>
    %c1_62 = arith.constant 1 : index
    %c0_63 = arith.constant 0 : index
    %c0_64 = arith.constant 0 : index
    %125 = vector.load %arg4[%c1_62, %c0_63, %c0_64] : memref<3x96x64xbf16, #tpu.memory_space<vmem>>, vector<1x96x64xbf16>
    %126 = vector.shape_cast %125 : vector<1x96x64xbf16> to vector<96x64xbf16>
    %c2_65 = arith.constant 2 : index
    %c0_66 = arith.constant 0 : index
    %c0_67 = arith.constant 0 : index
    %127 = vector.load %arg4[%c2_65, %c0_66, %c0_67] : memref<3x96x64xbf16, #tpu.memory_space<vmem>>, vector<1x96x64xbf16>
    %128 = vector.shape_cast %127 : vector<1x96x64xbf16> to vector<96x64xbf16>
    %c0_68 = arith.constant 0 : index
    %c0_69 = arith.constant 0 : index
    %129 = vector.load %arg5[%c0_68, %c0_69] : memref<1x64xf32, #tpu.memory_space<vmem>>, vector<1x64xf32>
    %c0_70 = arith.constant 0 : index
    %c0_71 = arith.constant 0 : index
    %c0_72 = arith.constant 0 : index
    %130 = vector.load %arg13[%c0_70, %c0_71, %c0_72] : memref<2x11x352xbf16, #tpu.memory_space<vmem>>, vector<2x1x96xbf16>
    %131 = vector.shape_cast %130 : vector<2x1x96xbf16> to vector<2x96xbf16>
    %cst_73 = arith.constant dense<0.000000e+00> : vector<2x64xf32>
    %132 = tpu.matmul %131, %124, %cst_73 {dimension_numbers = #tpu.dot_dimension_numbers<[1], [0], [0], [1], [0, 0, 1, 1], [], []>} : vector<2x96xbf16>, vector<96x64xbf16>, vector<2x64xf32> -> vector<2x64xf32>
    %c0_74 = arith.constant 0 : index
    %c1_75 = arith.constant 1 : index
    %c0_76 = arith.constant 0 : index
    %133 = vector.load %arg13[%c0_74, %c1_75, %c0_76] : memref<2x11x352xbf16, #tpu.memory_space<vmem>>, vector<2x1x96xbf16>
    %134 = vector.shape_cast %133 : vector<2x1x96xbf16> to vector<2x96xbf16>
    %cst_77 = arith.constant dense<0.000000e+00> : vector<2x64xf32>
    %135 = tpu.matmul %134, %126, %cst_77 {dimension_numbers = #tpu.dot_dimension_numbers<[1], [0], [0], [1], [0, 0, 1, 1], [], []>} : vector<2x96xbf16>, vector<96x64xbf16>, vector<2x64xf32> -> vector<2x64xf32>
    %136 = arith.addf %132, %135 : vector<2x64xf32>
    %c0_78 = arith.constant 0 : index
    %c2_79 = arith.constant 2 : index
    %c0_80 = arith.constant 0 : index
    %137 = vector.load %arg13[%c0_78, %c2_79, %c0_80] : memref<2x11x352xbf16, #tpu.memory_space<vmem>>, vector<2x1x96xbf16>
    %138 = vector.shape_cast %137 : vector<2x1x96xbf16> to vector<2x96xbf16>
    %cst_81 = arith.constant dense<0.000000e+00> : vector<2x64xf32>
    %139 = tpu.matmul %138, %128, %cst_81 {dimension_numbers = #tpu.dot_dimension_numbers<[1], [0], [0], [1], [0, 0, 1, 1], [], []>} : vector<2x96xbf16>, vector<96x64xbf16>, vector<2x64xf32> -> vector<2x64xf32>
    %140 = arith.addf %136, %139 : vector<2x64xf32>
    %141 = vector.broadcast %129 : vector<1x64xf32> to vector<2x64xf32>
    %142 = arith.addf %140, %141 : vector<2x64xf32>
    %cst_82 = arith.constant 0.000000e+00 : f32
    %143 = vector.broadcast %cst_82 : f32 to vector<2x64xf32>
    %144 = arith.maximumf %142, %143 : vector<2x64xf32>
    %145 = arith.truncf %144 : vector<2x64xf32> to vector<2x64xbf16>
    %c0_83 = arith.constant 0 : index
    %c0_84 = arith.constant 0 : index
    %c0_85 = arith.constant 0 : index
    %c0_86 = arith.constant 0 : index
    %146 = vector.load %arg14[%c0_83, %c0_84, %c0_85, %c0_86] : memref<2x5x5x64xbf16, #tpu.memory_space<vmem>>, vector<2x1x1x64xbf16>
    %147 = vector.shape_cast %146 : vector<2x1x1x64xbf16> to vector<2x64xbf16>
    %148 = vector.shape_cast %145 : vector<2x64xbf16> to vector<2x1x1x64xbf16>
    tpu.vector_store %arg14[%c0_83, %c0_84, %c0_85, %c0_86], %148 {strides = array<i32>} : memref<2x5x5x64xbf16, #tpu.memory_space<vmem>>, vector<2x1x1x64xbf16>,
    %c0_87 = arith.constant 0 : index
    %c0_88 = arith.constant 0 : index
    %c64 = arith.constant 64 : index
    %149 = vector.load %arg13[%c0_87, %c0_88, %c64] : memref<2x11x352xbf16, #tpu.memory_space<vmem>>, vector<2x1x96xbf16>
    %150 = vector.shape_cast %149 : vector<2x1x96xbf16> to vector<2x96xbf16>
    %cst_89 = arith.constant dense<0.000000e+00> : vector<2x64xf32>
    %151 = tpu.matmul %150, %124, %cst_89 {dimension_numbers = #tpu.dot_dimension_numbers<[1], [0], [0], [1], [0, 0, 1, 1], [], []>} : vector<2x96xbf16>, vector<96x64xbf16>, vector<2x64xf32> -> vector<2x64xf32>
    %c0_90 = arith.constant 0 : index
    %c1_91 = arith.constant 1 : index
    %c64_92 = arith.constant 64 : index
    %152 = vector.load %arg13[%c0_90, %c1_91, %c64_92] : memref<2x11x352xbf16, #tpu.memory_space<vmem>>, vector<2x1x96xbf16>
    %153 = vector.shape_cast %152 : vector<2x1x96xbf16> to vector<2x96xbf16>
    %cst_93 = arith.constant dense<0.000000e+00> : vector<2x64xf32>
    %154 = tpu.matmul %153, %126, %cst_93 {dimension_numbers = #tpu.dot_dimension_numbers<[1], [0], [0], [1], [0, 0, 1, 1], [], []>} : vector<2x96xbf16>, vector<96x64xbf16>, vector<2x64xf32> -> vector<2x64xf32>
    %155 = arith.addf %151, %154 : vector<2x64xf32>
    %c0_94 = arith.constant 0 : index
    %c2_95 = arith.constant 2 : index
    %c64_96 = arith.constant 64 : index
    %156 = vector.load %arg13[%c0_94, %c2_95, %c64_96] : memref<2x11x352xbf16, #tpu.memory_space<vmem>>, vector<2x1x96xbf16>
    %157 = vector.shape_cast %156 : vector<2x1x96xbf16> to vector<2x96xbf16>
    %cst_97 = arith.constant dense<0.000000e+00> : vector<2x64xf32>
    %158 = tpu.matmul %157, %128, %cst_97 {dimension_numbers = #tpu.dot_dimension_numbers<[1], [0], [0], [1], [0, 0, 1, 1], [], []>} : vector<2x96xbf16>, vector<96x64xbf16>, vector<2x64xf32> -> vector<2x64xf32>
    %159 = arith.addf %155, %158 : vector<2x64xf32>
    %160 = vector.broadcast %129 : vector<1x64xf32> to vector<2x64xf32>
    %161 = arith.addf %159, %160 : vector<2x64xf32>
    %cst_98 = arith.constant 0.000000e+00 : f32
    %162 = vector.broadcast %cst_98 : f32 to vector<2x64xf32>
    %163 = arith.maximumf %161, %162 : vector<2x64xf32>
    %164 = arith.truncf %163 : vector<2x64xf32> to vector<2x64xbf16>
    %c0_99 = arith.constant 0 : index
    %c0_100 = arith.constant 0 : index
    %c1_101 = arith.constant 1 : index
    %c0_102 = arith.constant 0 : index
    %165 = vector.load %arg14[%c0_99, %c0_100, %c1_101, %c0_102] : memref<2x5x5x64xbf16, #tpu.memory_space<vmem>>, vector<2x1x1x64xbf16>
    %166 = vector.shape_cast %165 : vector<2x1x1x64xbf16> to vector<2x64xbf16>
    %167 = vector.shape_cast %164 : vector<2x64xbf16> to vector<2x1x1x64xbf16>
    tpu.vector_store %arg14[%c0_99, %c0_100, %c1_101, %c0_102], %167 {strides = array<i32>} : memref<2x5x5x64xbf16, #tpu.memory_space<vmem>>, vector<2x1x1x64xbf16>,
    %c0_103 = arith.constant 0 : index
    %c0_104 = arith.constant 0 : index
    %c128 = arith.constant 128 : index
    %168 = vector.load %arg13[%c0_103, %c0_104, %c128] : memref<2x11x352xbf16, #tpu.memory_space<vmem>>, vector<2x1x96xbf16>
    %169 = vector.shape_cast %168 : vector<2x1x96xbf16> to vector<2x96xbf16>
    %cst_105 = arith.constant dense<0.000000e+00> : vector<2x64xf32>
    %170 = tpu.matmul %169, %124, %cst_105 {dimension_numbers = #tpu.dot_dimension_numbers<[1], [0], [0], [1], [0, 0, 1, 1], [], []>} : vector<2x96xbf16>, vector<96x64xbf16>, vector<2x64xf32> -> vector<2x64xf32>
    %c0_106 = arith.constant 0 : index
    %c1_107 = arith.constant 1 : index
    %c128_108 = arith.constant 128 : index
    %171 = vector.load %arg13[%c0_106, %c1_107, %c128_108] : memref<2x11x352xbf16, #tpu.memory_space<vmem>>, vector<2x1x96xbf16>
    %172 = vector.shape_cast %171 : vector<2x1x96xbf16> to vector<2x96xbf16>
    %cst_109 = arith.constant dense<0.000000e+00> : vector<2x64xf32>
    %173 = tpu.matmul %172, %126, %cst_109 {dimension_numbers = #tpu.dot_dimension_numbers<[1], [0], [0], [1], [0, 0, 1, 1], [], []>} : vector<2x96xbf16>, vector<96x64xbf16>, vector<2x64xf32> -> vector<2x64xf32>
    %174 = arith.addf %170, %173 : vector<2x64xf32>
    %c0_110 = arith.constant 0 : index
    %c2_111 = arith.constant 2 : index
    %c128_112 = arith.constant 128 : index
    %175 = vector.load %arg13[%c0_110, %c2_111, %c128_112] : memref<2x11x352xbf16, #tpu.memory_space<vmem>>, vector<2x1x96xbf16>
    %176 = vector.shape_cast %175 : vector<2x1x96xbf16> to vector<2x96xbf16>
    %cst_113 = arith.constant dense<0.000000e+00> : vector<2x64xf32>
    %177 = tpu.matmul %176, %128, %cst_113 {dimension_numbers = #tpu.dot_dimension_numbers<[1], [0], [0], [1], [0, 0, 1, 1], [], []>} : vector<2x96xbf16>, vector<96x64xbf16>, vector<2x64xf32> -> vector<2x64xf32>
    %178 = arith.addf %174, %177 : vector<2x64xf32>
    %179 = vector.broadcast %129 : vector<1x64xf32> to vector<2x64xf32>
    %180 = arith.addf %178, %179 : vector<2x64xf32>
    %cst_114 = arith.constant 0.000000e+00 : f32
    %181 = vector.broadcast %cst_114 : f32 to vector<2x64xf32>
    %182 = arith.maximumf %180, %181 : vector<2x64xf32>
    %183 = arith.truncf %182 : vector<2x64xf32> to vector<2x64xbf16>
    %c0_115 = arith.constant 0 : index
    %c0_116 = arith.constant 0 : index
    %c2_117 = arith.constant 2 : index
    %c0_118 = arith.constant 0 : index
    %184 = vector.load %arg14[%c0_115, %c0_116, %c2_117, %c0_118] : memref<2x5x5x64xbf16, #tpu.memory_space<vmem>>, vector<2x1x1x64xbf16>
    %185 = vector.shape_cast %184 : vector<2x1x1x64xbf16> to vector<2x64xbf16>
    %186 = vector.shape_cast %183 : vector<2x64xbf16> to vector<2x1x1x64xbf16>
    tpu.vector_store %arg14[%c0_115, %c0_116, %c2_117, %c0_118], %186 {strides = array<i32>} : memref<2x5x5x64xbf16, #tpu.memory_space<vmem>>, vector<2x1x1x64xbf16>,
    %c0_119 = arith.constant 0 : index
    %c0_120 = arith.constant 0 : index
    %c192 = arith.constant 192 : index
    %187 = vector.load %arg13[%c0_119, %c0_120, %c192] : memref<2x11x352xbf16, #tpu.memory_space<vmem>>, vector<2x1x96xbf16>
    %188 = vector.shape_cast %187 : vector<2x1x96xbf16> to vector<2x96xbf16>
    %cst_121 = arith.constant dense<0.000000e+00> : vector<2x64xf32>
    %189 = tpu.matmul %188, %124, %cst_121 {dimension_numbers = #tpu.dot_dimension_numbers<[1], [0], [0], [1], [0, 0, 1, 1], [], []>} : vector<2x96xbf16>, vector<96x64xbf16>, vector<2x64xf32> -> vector<2x64xf32>
    %c0_122 = arith.constant 0 : index
    %c1_123 = arith.constant 1 : index
    %c192_124 = arith.constant 192 : index
    %190 = vector.load %arg13[%c0_122, %c1_123, %c192_124] : memref<2x11x352xbf16, #tpu.memory_space<vmem>>, vector<2x1x96xbf16>
    %191 = vector.shape_cast %190 : vector<2x1x96xbf16> to vector<2x96xbf16>
    %cst_125 = arith.constant dense<0.000000e+00> : vector<2x64xf32>
    %192 = tpu.matmul %191, %126, %cst_125 {dimension_numbers = #tpu.dot_dimension_numbers<[1], [0], [0], [1], [0, 0, 1, 1], [], []>} : vector<2x96xbf16>, vector<96x64xbf16>, vector<2x64xf32> -> vector<2x64xf32>
    %193 = arith.addf %189, %192 : vector<2x64xf32>
    %c0_126 = arith.constant 0 : index
    %c2_127 = arith.constant 2 : index
    %c192_128 = arith.constant 192 : index
    %194 = vector.load %arg13[%c0_126, %c2_127, %c192_128] : memref<2x11x352xbf16, #tpu.memory_space<vmem>>, vector<2x1x96xbf16>
    %195 = vector.shape_cast %194 : vector<2x1x96xbf16> to vector<2x96xbf16>
    %cst_129 = arith.constant dense<0.000000e+00> : vector<2x64xf32>
    %196 = tpu.matmul %195, %128, %cst_129 {dimension_numbers = #tpu.dot_dimension_numbers<[1], [0], [0], [1], [0, 0, 1, 1], [], []>} : vector<2x96xbf16>, vector<96x64xbf16>, vector<2x64xf32> -> vector<2x64xf32>
    %197 = arith.addf %193, %196 : vector<2x64xf32>
    %198 = vector.broadcast %129 : vector<1x64xf32> to vector<2x64xf32>
    %199 = arith.addf %197, %198 : vector<2x64xf32>
    %cst_130 = arith.constant 0.000000e+00 : f32
    %200 = vector.broadcast %cst_130 : f32 to vector<2x64xf32>
    %201 = arith.maximumf %199, %200 : vector<2x64xf32>
    %202 = arith.truncf %201 : vector<2x64xf32> to vector<2x64xbf16>
    %c0_131 = arith.constant 0 : index
    %c0_132 = arith.constant 0 : index
    %c3_133 = arith.constant 3 : index
    %c0_134 = arith.constant 0 : index
    %203 = vector.load %arg14[%c0_131, %c0_132, %c3_133, %c0_134] : memref<2x5x5x64xbf16, #tpu.memory_space<vmem>>, vector<2x1x1x64xbf16>
    %204 = vector.shape_cast %203 : vector<2x1x1x64xbf16> to vector<2x64xbf16>
    %205 = vector.shape_cast %202 : vector<2x64xbf16> to vector<2x1x1x64xbf16>
    tpu.vector_store %arg14[%c0_131, %c0_132, %c3_133, %c0_134], %205 {strides = array<i32>} : memref<2x5x5x64xbf16, #tpu.memory_space<vmem>>, vector<2x1x1x64xbf16>,
    %c0_135 = arith.constant 0 : index
    %c0_136 = arith.constant 0 : index
    %c256 = arith.constant 256 : index
    %206 = vector.load %arg13[%c0_135, %c0_136, %c256] : memref<2x11x352xbf16, #tpu.memory_space<vmem>>, vector<2x1x96xbf16>
    %207 = vector.shape_cast %206 : vector<2x1x96xbf16> to vector<2x96xbf16>
    %cst_137 = arith.constant dense<0.000000e+00> : vector<2x64xf32>
    %208 = tpu.matmul %207, %124, %cst_137 {dimension_numbers = #tpu.dot_dimension_numbers<[1], [0], [0], [1], [0, 0, 1, 1], [], []>} : vector<2x96xbf16>, vector<96x64xbf16>, vector<2x64xf32> -> vector<2x64xf32>
    %c0_138 = arith.constant 0 : index
    %c1_139 = arith.constant 1 : index
    %c256_140 = arith.constant 256 : index
    %209 = vector.load %arg13[%c0_138, %c1_139, %c256_140] : memref<2x11x352xbf16, #tpu.memory_space<vmem>>, vector<2x1x96xbf16>
    %210 = vector.shape_cast %209 : vector<2x1x96xbf16> to vector<2x96xbf16>
    %cst_141 = arith.constant dense<0.000000e+00> : vector<2x64xf32>
    %211 = tpu.matmul %210, %126, %cst_141 {dimension_numbers = #tpu.dot_dimension_numbers<[1], [0], [0], [1], [0, 0, 1, 1], [], []>} : vector<2x96xbf16>, vector<96x64xbf16>, vector<2x64xf32> -> vector<2x64xf32>
    %212 = arith.addf %208, %211 : vector<2x64xf32>
    %c0_142 = arith.constant 0 : index
    %c2_143 = arith.constant 2 : index
    %c256_144 = arith.constant 256 : index
    %213 = vector.load %arg13[%c0_142, %c2_143, %c256_144] : memref<2x11x352xbf16, #tpu.memory_space<vmem>>, vector<2x1x96xbf16>
    %214 = vector.shape_cast %213 : vector<2x1x96xbf16> to vector<2x96xbf16>
    %cst_145 = arith.constant dense<0.000000e+00> : vector<2x64xf32>
    %215 = tpu.matmul %214, %128, %cst_145 {dimension_numbers = #tpu.dot_dimension_numbers<[1], [0], [0], [1], [0, 0, 1, 1], [], []>} : vector<2x96xbf16>, vector<96x64xbf16>, vector<2x64xf32> -> vector<2x64xf32>
    %216 = arith.addf %212, %215 : vector<2x64xf32>
    %217 = vector.broadcast %129 : vector<1x64xf32> to vector<2x64xf32>
    %218 = arith.addf %216, %217 : vector<2x64xf32>
    %cst_146 = arith.constant 0.000000e+00 : f32
    %219 = vector.broadcast %cst_146 : f32 to vector<2x64xf32>
    %220 = arith.maximumf %218, %219 : vector<2x64xf32>
    %221 = arith.truncf %220 : vector<2x64xf32> to vector<2x64xbf16>
    %c0_147 = arith.constant 0 : index
    %c0_148 = arith.constant 0 : index
    %c4_149 = arith.constant 4 : index
    %c0_150 = arith.constant 0 : index
    %222 = vector.load %arg14[%c0_147, %c0_148, %c4_149, %c0_150] : memref<2x5x5x64xbf16, #tpu.memory_space<vmem>>, vector<2x1x1x64xbf16>
    %223 = vector.shape_cast %222 : vector<2x1x1x64xbf16> to vector<2x64xbf16>
    %224 = vector.shape_cast %221 : vector<2x64xbf16> to vector<2x1x1x64xbf16>
    tpu.vector_store %arg14[%c0_147, %c0_148, %c4_149, %c0_150], %224 {strides = array<i32>} : memref<2x5x5x64xbf16, #tpu.memory_space<vmem>>, vector<2x1x1x64xbf16>,
    %c0_151 = arith.constant 0 : index
    %c2_152 = arith.constant 2 : index
    %c0_153 = arith.constant 0 : index
    %225 = vector.load %arg13[%c0_151, %c2_152, %c0_153] : memref<2x11x352xbf16, #tpu.memory_space<vmem>>, vector<2x1x96xbf16>
    %226 = vector.shape_cast %225 : vector<2x1x96xbf16> to vector<2x96xbf16>
    %cst_154 = arith.constant dense<0.000000e+00> : vector<2x64xf32>
    %227 = tpu.matmul %226, %124, %cst_154 {dimension_numbers = #tpu.dot_dimension_numbers<[1], [0], [0], [1], [0, 0, 1, 1], [], []>} : vector<2x96xbf16>, vector<96x64xbf16>, vector<2x64xf32> -> vector<2x64xf32>
    %c0_155 = arith.constant 0 : index
    %c3_156 = arith.constant 3 : index
    %c0_157 = arith.constant 0 : index
    %228 = vector.load %arg13[%c0_155, %c3_156, %c0_157] : memref<2x11x352xbf16, #tpu.memory_space<vmem>>, vector<2x1x96xbf16>
    %229 = vector.shape_cast %228 : vector<2x1x96xbf16> to vector<2x96xbf16>
    %cst_158 = arith.constant dense<0.000000e+00> : vector<2x64xf32>
    %230 = tpu.matmul %229, %126, %cst_158 {dimension_numbers = #tpu.dot_dimension_numbers<[1], [0], [0], [1], [0, 0, 1, 1], [], []>} : vector<2x96xbf16>, vector<96x64xbf16>, vector<2x64xf32> -> vector<2x64xf32>
    %231 = arith.addf %227, %230 : vector<2x64xf32>
    %c0_159 = arith.constant 0 : index
    %c4_160 = arith.constant 4 : index
    %c0_161 = arith.constant 0 : index
    %232 = vector.load %arg13[%c0_159, %c4_160, %c0_161] : memref<2x11x352xbf16, #tpu.memory_space<vmem>>, vector<2x1x96xbf16>
    %233 = vector.shape_cast %232 : vector<2x1x96xbf16> to vector<2x96xbf16>
    %cst_162 = arith.constant dense<0.000000e+00> : vector<2x64xf32>
    %234 = tpu.matmul %233, %128, %cst_162 {dimension_numbers = #tpu.dot_dimension_numbers<[1], [0], [0], [1], [0, 0, 1, 1], [], []>} : vector<2x96xbf16>, vector<96x64xbf16>, vector<2x64xf32> -> vector<2x64xf32>
    %235 = arith.addf %231, %234 : vector<2x64xf32>
    %236 = vector.broadcast %129 : vector<1x64xf32> to vector<2x64xf32>
    %237 = arith.addf %235, %236 : vector<2x64xf32>
    %cst_163 = arith.constant 0.000000e+00 : f32
    %238 = vector.broadcast %cst_163 : f32 to vector<2x64xf32>
    %239 = arith.maximumf %237, %238 : vector<2x64xf32>
    %240 = arith.truncf %239 : vector<2x64xf32> to vector<2x64xbf16>
    %c0_164 = arith.constant 0 : index
    %c1_165 = arith.constant 1 : index
    %c0_166 = arith.constant 0 : index
    %c0_167 = arith.constant 0 : index
    %241 = vector.load %arg14[%c0_164, %c1_165, %c0_166, %c0_167] : memref<2x5x5x64xbf16, #tpu.memory_space<vmem>>, vector<2x1x1x64xbf16>
    %242 = vector.shape_cast %241 : vector<2x1x1x64xbf16> to vector<2x64xbf16>
    %243 = vector.shape_cast %240 : vector<2x64xbf16> to vector<2x1x1x64xbf16>
    tpu.vector_store %arg14[%c0_164, %c1_165, %c0_166, %c0_167], %243 {strides = array<i32>} : memref<2x5x5x64xbf16, #tpu.memory_space<vmem>>, vector<2x1x1x64xbf16>,
    %c0_168 = arith.constant 0 : index
    %c2_169 = arith.constant 2 : index
    %c64_170 = arith.constant 64 : index
    %244 = vector.load %arg13[%c0_168, %c2_169, %c64_170] : memref<2x11x352xbf16, #tpu.memory_space<vmem>>, vector<2x1x96xbf16>
    %245 = vector.shape_cast %244 : vector<2x1x96xbf16> to vector<2x96xbf16>
    %cst_171 = arith.constant dense<0.000000e+00> : vector<2x64xf32>
    %246 = tpu.matmul %245, %124, %cst_171 {dimension_numbers = #tpu.dot_dimension_numbers<[1], [0], [0], [1], [0, 0, 1, 1], [], []>} : vector<2x96xbf16>, vector<96x64xbf16>, vector<2x64xf32> -> vector<2x64xf32>
    %c0_172 = arith.constant 0 : index
    %c3_173 = arith.constant 3 : index
    %c64_174 = arith.constant 64 : index
    %247 = vector.load %arg13[%c0_172, %c3_173, %c64_174] : memref<2x11x352xbf16, #tpu.memory_space<vmem>>, vector<2x1x96xbf16>
    %248 = vector.shape_cast %247 : vector<2x1x96xbf16> to vector<2x96xbf16>
    %cst_175 = arith.constant dense<0.000000e+00> : vector<2x64xf32>
    %249 = tpu.matmul %248, %126, %cst_175 {dimension_numbers = #tpu.dot_dimension_numbers<[1], [0], [0], [1], [0, 0, 1, 1], [], []>} : vector<2x96xbf16>, vector<96x64xbf16>, vector<2x64xf32> -> vector<2x64xf32>
    %250 = arith.addf %246, %249 : vector<2x64xf32>
    %c0_176 = arith.constant 0 : index
    %c4_177 = arith.constant 4 : index
    %c64_178 = arith.constant 64 : index
    %251 = vector.load %arg13[%c0_176, %c4_177, %c64_178] : memref<2x11x352xbf16, #tpu.memory_space<vmem>>, vector<2x1x96xbf16>
    %252 = vector.shape_cast %251 : vector<2x1x96xbf16> to vector<2x96xbf16>
    %cst_179 = arith.constant dense<0.000000e+00> : vector<2x64xf32>
    %253 = tpu.matmul %252, %128, %cst_179 {dimension_numbers = #tpu.dot_dimension_numbers<[1], [0], [0], [1], [0, 0, 1, 1], [], []>} : vector<2x96xbf16>, vector<96x64xbf16>, vector<2x64xf32> -> vector<2x64xf32>
    %254 = arith.addf %250, %253 : vector<2x64xf32>
    %255 = vector.broadcast %129 : vector<1x64xf32> to vector<2x64xf32>
    %256 = arith.addf %254, %255 : vector<2x64xf32>
    %cst_180 = arith.constant 0.000000e+00 : f32
    %257 = vector.broadcast %cst_180 : f32 to vector<2x64xf32>
    %258 = arith.maximumf %256, %257 : vector<2x64xf32>
    %259 = arith.truncf %258 : vector<2x64xf32> to vector<2x64xbf16>
    %c0_181 = arith.constant 0 : index
    %c1_182 = arith.constant 1 : index
    %c1_183 = arith.constant 1 : index
    %c0_184 = arith.constant 0 : index
    %260 = vector.load %arg14[%c0_181, %c1_182, %c1_183, %c0_184] : memref<2x5x5x64xbf16, #tpu.memory_space<vmem>>, vector<2x1x1x64xbf16>
    %261 = vector.shape_cast %260 : vector<2x1x1x64xbf16> to vector<2x64xbf16>
    %262 = vector.shape_cast %259 : vector<2x64xbf16> to vector<2x1x1x64xbf16>
    tpu.vector_store %arg14[%c0_181, %c1_182, %c1_183, %c0_184], %262 {strides = array<i32>} : memref<2x5x5x64xbf16, #tpu.memory_space<vmem>>, vector<2x1x1x64xbf16>,
    %c0_185 = arith.constant 0 : index
    %c2_186 = arith.constant 2 : index
    %c128_187 = arith.constant 128 : index
    %263 = vector.load %arg13[%c0_185, %c2_186, %c128_187] : memref<2x11x352xbf16, #tpu.memory_space<vmem>>, vector<2x1x96xbf16>
    %264 = vector.shape_cast %263 : vector<2x1x96xbf16> to vector<2x96xbf16>
    %cst_188 = arith.constant dense<0.000000e+00> : vector<2x64xf32>
    %265 = tpu.matmul %264, %124, %cst_188 {dimension_numbers = #tpu.dot_dimension_numbers<[1], [0], [0], [1], [0, 0, 1, 1], [], []>} : vector<2x96xbf16>, vector<96x64xbf16>, vector<2x64xf32> -> vector<2x64xf32>
    %c0_189 = arith.constant 0 : index
    %c3_190 = arith.constant 3 : index
    %c128_191 = arith.constant 128 : index
    %266 = vector.load %arg13[%c0_189, %c3_190, %c128_191] : memref<2x11x352xbf16, #tpu.memory_space<vmem>>, vector<2x1x96xbf16>
    %267 = vector.shape_cast %266 : vector<2x1x96xbf16> to vector<2x96xbf16>
    %cst_192 = arith.constant dense<0.000000e+00> : vector<2x64xf32>
    %268 = tpu.matmul %267, %126, %cst_192 {dimension_numbers = #tpu.dot_dimension_numbers<[1], [0], [0], [1], [0, 0, 1, 1], [], []>} : vector<2x96xbf16>, vector<96x64xbf16>, vector<2x64xf32> -> vector<2x64xf32>
    %269 = arith.addf %265, %268 : vector<2x64xf32>
    %c0_193 = arith.constant 0 : index
    %c4_194 = arith.constant 4 : index
    %c128_195 = arith.constant 128 : index
    %270 = vector.load %arg13[%c0_193, %c4_194, %c128_195] : memref<2x11x352xbf16, #tpu.memory_space<vmem>>, vector<2x1x96xbf16>
    %271 = vector.shape_cast %270 : vector<2x1x96xbf16> to vector<2x96xbf16>
    %cst_196 = arith.constant dense<0.000000e+00> : vector<2x64xf32>
    %272 = tpu.matmul %271, %128, %cst_196 {dimension_numbers = #tpu.dot_dimension_numbers<[1], [0], [0], [1], [0, 0, 1, 1], [], []>} : vector<2x96xbf16>, vector<96x64xbf16>, vector<2x64xf32> -> vector<2x64xf32>
    %273 = arith.addf %269, %272 : vector<2x64xf32>
    %274 = vector.broadcast %129 : vector<1x64xf32> to vector<2x64xf32>
    %275 = arith.addf %273, %274 : vector<2x64xf32>
    %cst_197 = arith.constant 0.000000e+00 : f32
    %276 = vector.broadcast %cst_197 : f32 to vector<2x64xf32>
    %277 = arith.maximumf %275, %276 : vector<2x64xf32>
    %278 = arith.truncf %277 : vector<2x64xf32> to vector<2x64xbf16>
    %c0_198 = arith.constant 0 : index
    %c1_199 = arith.constant 1 : index
    %c2_200 = arith.constant 2 : index
    %c0_201 = arith.constant 0 : index
    %279 = vector.load %arg14[%c0_198, %c1_199, %c2_200, %c0_201] : memref<2x5x5x64xbf16, #tpu.memory_space<vmem>>, vector<2x1x1x64xbf16>
    %280 = vector.shape_cast %279 : vector<2x1x1x64xbf16> to vector<2x64xbf16>
    %281 = vector.shape_cast %278 : vector<2x64xbf16> to vector<2x1x1x64xbf16>
    tpu.vector_store %arg14[%c0_198, %c1_199, %c2_200, %c0_201], %281 {strides = array<i32>} : memref<2x5x5x64xbf16, #tpu.memory_space<vmem>>, vector<2x1x1x64xbf16>,
    %c0_202 = arith.constant 0 : index
    %c2_203 = arith.constant 2 : index
    %c192_204 = arith.constant 192 : index
    %282 = vector.load %arg13[%c0_202, %c2_203, %c192_204] : memref<2x11x352xbf16, #tpu.memory_space<vmem>>, vector<2x1x96xbf16>
    %283 = vector.shape_cast %282 : vector<2x1x96xbf16> to vector<2x96xbf16>
    %cst_205 = arith.constant dense<0.000000e+00> : vector<2x64xf32>
    %284 = tpu.matmul %283, %124, %cst_205 {dimension_numbers = #tpu.dot_dimension_numbers<[1], [0], [0], [1], [0, 0, 1, 1], [], []>} : vector<2x96xbf16>, vector<96x64xbf16>, vector<2x64xf32> -> vector<2x64xf32>
    %c0_206 = arith.constant 0 : index
    %c3_207 = arith.constant 3 : index
    %c192_208 = arith.constant 192 : index
    %285 = vector.load %arg13[%c0_206, %c3_207, %c192_208] : memref<2x11x352xbf16, #tpu.memory_space<vmem>>, vector<2x1x96xbf16>
    %286 = vector.shape_cast %285 : vector<2x1x96xbf16> to vector<2x96xbf16>
    %cst_209 = arith.constant dense<0.000000e+00> : vector<2x64xf32>
    %287 = tpu.matmul %286, %126, %cst_209 {dimension_numbers = #tpu.dot_dimension_numbers<[1], [0], [0], [1], [0, 0, 1, 1], [], []>} : vector<2x96xbf16>, vector<96x64xbf16>, vector<2x64xf32> -> vector<2x64xf32>
    %288 = arith.addf %284, %287 : vector<2x64xf32>
    %c0_210 = arith.constant 0 : index
    %c4_211 = arith.constant 4 : index
    %c192_212 = arith.constant 192 : index
    %289 = vector.load %arg13[%c0_210, %c4_211, %c192_212] : memref<2x11x352xbf16, #tpu.memory_space<vmem>>, vector<2x1x96xbf16>
    %290 = vector.shape_cast %289 : vector<2x1x96xbf16> to vector<2x96xbf16>
    %cst_213 = arith.constant dense<0.000000e+00> : vector<2x64xf32>
    %291 = tpu.matmul %290, %128, %cst_213 {dimension_numbers = #tpu.dot_dimension_numbers<[1], [0], [0], [1], [0, 0, 1, 1], [], []>} : vector<2x96xbf16>, vector<96x64xbf16>, vector<2x64xf32> -> vector<2x64xf32>
    %292 = arith.addf %288, %291 : vector<2x64xf32>
    %293 = vector.broadcast %129 : vector<1x64xf32> to vector<2x64xf32>
    %294 = arith.addf %292, %293 : vector<2x64xf32>
    %cst_214 = arith.constant 0.000000e+00 : f32
    %295 = vector.broadcast %cst_214 : f32 to vector<2x64xf32>
    %296 = arith.maximumf %294, %295 : vector<2x64xf32>
    %297 = arith.truncf %296 : vector<2x64xf32> to vector<2x64xbf16>
    %c0_215 = arith.constant 0 : index
    %c1_216 = arith.constant 1 : index
    %c3_217 = arith.constant 3 : index
    %c0_218 = arith.constant 0 : index
    %298 = vector.load %arg14[%c0_215, %c1_216, %c3_217, %c0_218] : memref<2x5x5x64xbf16, #tpu.memory_space<vmem>>, vector<2x1x1x64xbf16>
    %299 = vector.shape_cast %298 : vector<2x1x1x64xbf16> to vector<2x64xbf16>
    %300 = vector.shape_cast %297 : vector<2x64xbf16> to vector<2x1x1x64xbf16>
    tpu.vector_store %arg14[%c0_215, %c1_216, %c3_217, %c0_218], %300 {strides = array<i32>} : memref<2x5x5x64xbf16, #tpu.memory_space<vmem>>, vector<2x1x1x64xbf16>,
    %c0_219 = arith.constant 0 : index
    %c2_220 = arith.constant 2 : index
    %c256_221 = arith.constant 256 : index
    %301 = vector.load %arg13[%c0_219, %c2_220, %c256_221] : memref<2x11x352xbf16, #tpu.memory_space<vmem>>, vector<2x1x96xbf16>
    %302 = vector.shape_cast %301 : vector<2x1x96xbf16> to vector<2x96xbf16>
    %cst_222 = arith.constant dense<0.000000e+00> : vector<2x64xf32>
    %303 = tpu.matmul %302, %124, %cst_222 {dimension_numbers = #tpu.dot_dimension_numbers<[1], [0], [0], [1], [0, 0, 1, 1], [], []>} : vector<2x96xbf16>, vector<96x64xbf16>, vector<2x64xf32> -> vector<2x64xf32>
    %c0_223 = arith.constant 0 : index
    %c3_224 = arith.constant 3 : index
    %c256_225 = arith.constant 256 : index
    %304 = vector.load %arg13[%c0_223, %c3_224, %c256_225] : memref<2x11x352xbf16, #tpu.memory_space<vmem>>, vector<2x1x96xbf16>
    %305 = vector.shape_cast %304 : vector<2x1x96xbf16> to vector<2x96xbf16>
    %cst_226 = arith.constant dense<0.000000e+00> : vector<2x64xf32>
    %306 = tpu.matmul %305, %126, %cst_226 {dimension_numbers = #tpu.dot_dimension_numbers<[1], [0], [0], [1], [0, 0, 1, 1], [], []>} : vector<2x96xbf16>, vector<96x64xbf16>, vector<2x64xf32> -> vector<2x64xf32>
    %307 = arith.addf %303, %306 : vector<2x64xf32>
    %c0_227 = arith.constant 0 : index
    %c4_228 = arith.constant 4 : index
    %c256_229 = arith.constant 256 : index
    %308 = vector.load %arg13[%c0_227, %c4_228, %c256_229] : memref<2x11x352xbf16, #tpu.memory_space<vmem>>, vector<2x1x96xbf16>
    %309 = vector.shape_cast %308 : vector<2x1x96xbf16> to vector<2x96xbf16>
    %cst_230 = arith.constant dense<0.000000e+00> : vector<2x64xf32>
    %310 = tpu.matmul %309, %128, %cst_230 {dimension_numbers = #tpu.dot_dimension_numbers<[1], [0], [0], [1], [0, 0, 1, 1], [], []>} : vector<2x96xbf16>, vector<96x64xbf16>, vector<2x64xf32> -> vector<2x64xf32>
    %311 = arith.addf %307, %310 : vector<2x64xf32>
    %312 = vector.broadcast %129 : vector<1x64xf32> to vector<2x64xf32>
    %313 = arith.addf %311, %312 : vector<2x64xf32>
    %cst_231 = arith.constant 0.000000e+00 : f32
    %314 = vector.broadcast %cst_231 : f32 to vector<2x64xf32>
    %315 = arith.maximumf %313, %314 : vector<2x64xf32>
    %316 = arith.truncf %315 : vector<2x64xf32> to vector<2x64xbf16>
    %c0_232 = arith.constant 0 : index
    %c1_233 = arith.constant 1 : index
    %c4_234 = arith.constant 4 : index
    %c0_235 = arith.constant 0 : index
    %317 = vector.load %arg14[%c0_232, %c1_233, %c4_234, %c0_235] : memref<2x5x5x64xbf16, #tpu.memory_space<vmem>>, vector<2x1x1x64xbf16>
    %318 = vector.shape_cast %317 : vector<2x1x1x64xbf16> to vector<2x64xbf16>
    %319 = vector.shape_cast %316 : vector<2x64xbf16> to vector<2x1x1x64xbf16>
    tpu.vector_store %arg14[%c0_232, %c1_233, %c4_234, %c0_235], %319 {strides = array<i32>} : memref<2x5x5x64xbf16, #tpu.memory_space<vmem>>, vector<2x1x1x64xbf16>,
    %c0_236 = arith.constant 0 : index
    %c4_237 = arith.constant 4 : index
    %c0_238 = arith.constant 0 : index
    %320 = vector.load %arg13[%c0_236, %c4_237, %c0_238] : memref<2x11x352xbf16, #tpu.memory_space<vmem>>, vector<2x1x96xbf16>
    %321 = vector.shape_cast %320 : vector<2x1x96xbf16> to vector<2x96xbf16>
    %cst_239 = arith.constant dense<0.000000e+00> : vector<2x64xf32>
    %322 = tpu.matmul %321, %124, %cst_239 {dimension_numbers = #tpu.dot_dimension_numbers<[1], [0], [0], [1], [0, 0, 1, 1], [], []>} : vector<2x96xbf16>, vector<96x64xbf16>, vector<2x64xf32> -> vector<2x64xf32>
    %c0_240 = arith.constant 0 : index
    %c5_241 = arith.constant 5 : index
    %c0_242 = arith.constant 0 : index
    %323 = vector.load %arg13[%c0_240, %c5_241, %c0_242] : memref<2x11x352xbf16, #tpu.memory_space<vmem>>, vector<2x1x96xbf16>
    %324 = vector.shape_cast %323 : vector<2x1x96xbf16> to vector<2x96xbf16>
    %cst_243 = arith.constant dense<0.000000e+00> : vector<2x64xf32>
    %325 = tpu.matmul %324, %126, %cst_243 {dimension_numbers = #tpu.dot_dimension_numbers<[1], [0], [0], [1], [0, 0, 1, 1], [], []>} : vector<2x96xbf16>, vector<96x64xbf16>, vector<2x64xf32> -> vector<2x64xf32>
    %326 = arith.addf %322, %325 : vector<2x64xf32>
    %c0_244 = arith.constant 0 : index
    %c6_245 = arith.constant 6 : index
    %c0_246 = arith.constant 0 : index
    %327 = vector.load %arg13[%c0_244, %c6_245, %c0_246] : memref<2x11x352xbf16, #tpu.memory_space<vmem>>, vector<2x1x96xbf16>
    %328 = vector.shape_cast %327 : vector<2x1x96xbf16> to vector<2x96xbf16>
    %cst_247 = arith.constant dense<0.000000e+00> : vector<2x64xf32>
    %329 = tpu.matmul %328, %128, %cst_247 {dimension_numbers = #tpu.dot_dimension_numbers<[1], [0], [0], [1], [0, 0, 1, 1], [], []>} : vector<2x96xbf16>, vector<96x64xbf16>, vector<2x64xf32> -> vector<2x64xf32>
    %330 = arith.addf %326, %329 : vector<2x64xf32>
    %331 = vector.broadcast %129 : vector<1x64xf32> to vector<2x64xf32>
    %332 = arith.addf %330, %331 : vector<2x64xf32>
    %cst_248 = arith.constant 0.000000e+00 : f32
    %333 = vector.broadcast %cst_248 : f32 to vector<2x64xf32>
    %334 = arith.maximumf %332, %333 : vector<2x64xf32>
    %335 = arith.truncf %334 : vector<2x64xf32> to vector<2x64xbf16>
    %c0_249 = arith.constant 0 : index
    %c2_250 = arith.constant 2 : index
    %c0_251 = arith.constant 0 : index
    %c0_252 = arith.constant 0 : index
    %336 = vector.load %arg14[%c0_249, %c2_250, %c0_251, %c0_252] : memref<2x5x5x64xbf16, #tpu.memory_space<vmem>>, vector<2x1x1x64xbf16>
    %337 = vector.shape_cast %336 : vector<2x1x1x64xbf16> to vector<2x64xbf16>
    %338 = vector.shape_cast %335 : vector<2x64xbf16> to vector<2x1x1x64xbf16>
    tpu.vector_store %arg14[%c0_249, %c2_250, %c0_251, %c0_252], %338 {strides = array<i32>} : memref<2x5x5x64xbf16, #tpu.memory_space<vmem>>, vector<2x1x1x64xbf16>,
    %c0_253 = arith.constant 0 : index
    %c4_254 = arith.constant 4 : index
    %c64_255 = arith.constant 64 : index
    %339 = vector.load %arg13[%c0_253, %c4_254, %c64_255] : memref<2x11x352xbf16, #tpu.memory_space<vmem>>, vector<2x1x96xbf16>
    %340 = vector.shape_cast %339 : vector<2x1x96xbf16> to vector<2x96xbf16>
    %cst_256 = arith.constant dense<0.000000e+00> : vector<2x64xf32>
    %341 = tpu.matmul %340, %124, %cst_256 {dimension_numbers = #tpu.dot_dimension_numbers<[1], [0], [0], [1], [0, 0, 1, 1], [], []>} : vector<2x96xbf16>, vector<96x64xbf16>, vector<2x64xf32> -> vector<2x64xf32>
    %c0_257 = arith.constant 0 : index
    %c5_258 = arith.constant 5 : index
    %c64_259 = arith.constant 64 : index
    %342 = vector.load %arg13[%c0_257, %c5_258, %c64_259] : memref<2x11x352xbf16, #tpu.memory_space<vmem>>, vector<2x1x96xbf16>
    %343 = vector.shape_cast %342 : vector<2x1x96xbf16> to vector<2x96xbf16>
    %cst_260 = arith.constant dense<0.000000e+00> : vector<2x64xf32>
    %344 = tpu.matmul %343, %126, %cst_260 {dimension_numbers = #tpu.dot_dimension_numbers<[1], [0], [0], [1], [0, 0, 1, 1], [], []>} : vector<2x96xbf16>, vector<96x64xbf16>, vector<2x64xf32> -> vector<2x64xf32>
    %345 = arith.addf %341, %344 : vector<2x64xf32>
    %c0_261 = arith.constant 0 : index
    %c6_262 = arith.constant 6 : index
    %c64_263 = arith.constant 64 : index
    %346 = vector.load %arg13[%c0_261, %c6_262, %c64_263] : memref<2x11x352xbf16, #tpu.memory_space<vmem>>, vector<2x1x96xbf16>
    %347 = vector.shape_cast %346 : vector<2x1x96xbf16> to vector<2x96xbf16>
    %cst_264 = arith.constant dense<0.000000e+00> : vector<2x64xf32>
    %348 = tpu.matmul %347, %128, %cst_264 {dimension_numbers = #tpu.dot_dimension_numbers<[1], [0], [0], [1], [0, 0, 1, 1], [], []>} : vector<2x96xbf16>, vector<96x64xbf16>, vector<2x64xf32> -> vector<2x64xf32>
    %349 = arith.addf %345, %348 : vector<2x64xf32>
    %350 = vector.broadcast %129 : vector<1x64xf32> to vector<2x64xf32>
    %351 = arith.addf %349, %350 : vector<2x64xf32>
    %cst_265 = arith.constant 0.000000e+00 : f32
    %352 = vector.broadcast %cst_265 : f32 to vector<2x64xf32>
    %353 = arith.maximumf %351, %352 : vector<2x64xf32>
    %354 = arith.truncf %353 : vector<2x64xf32> to vector<2x64xbf16>
    %c0_266 = arith.constant 0 : index
    %c2_267 = arith.constant 2 : index
    %c1_268 = arith.constant 1 : index
    %c0_269 = arith.constant 0 : index
    %355 = vector.load %arg14[%c0_266, %c2_267, %c1_268, %c0_269] : memref<2x5x5x64xbf16, #tpu.memory_space<vmem>>, vector<2x1x1x64xbf16>
    %356 = vector.shape_cast %355 : vector<2x1x1x64xbf16> to vector<2x64xbf16>
    %357 = vector.shape_cast %354 : vector<2x64xbf16> to vector<2x1x1x64xbf16>
    tpu.vector_store %arg14[%c0_266, %c2_267, %c1_268, %c0_269], %357 {strides = array<i32>} : memref<2x5x5x64xbf16, #tpu.memory_space<vmem>>, vector<2x1x1x64xbf16>,
    %c0_270 = arith.constant 0 : index
    %c4_271 = arith.constant 4 : index
    %c128_272 = arith.constant 128 : index
    %358 = vector.load %arg13[%c0_270, %c4_271, %c128_272] : memref<2x11x352xbf16, #tpu.memory_space<vmem>>, vector<2x1x96xbf16>
    %359 = vector.shape_cast %358 : vector<2x1x96xbf16> to vector<2x96xbf16>
    %cst_273 = arith.constant dense<0.000000e+00> : vector<2x64xf32>
    %360 = tpu.matmul %359, %124, %cst_273 {dimension_numbers = #tpu.dot_dimension_numbers<[1], [0], [0], [1], [0, 0, 1, 1], [], []>} : vector<2x96xbf16>, vector<96x64xbf16>, vector<2x64xf32> -> vector<2x64xf32>
    %c0_274 = arith.constant 0 : index
    %c5_275 = arith.constant 5 : index
    %c128_276 = arith.constant 128 : index
    %361 = vector.load %arg13[%c0_274, %c5_275, %c128_276] : memref<2x11x352xbf16, #tpu.memory_space<vmem>>, vector<2x1x96xbf16>
    %362 = vector.shape_cast %361 : vector<2x1x96xbf16> to vector<2x96xbf16>
    %cst_277 = arith.constant dense<0.000000e+00> : vector<2x64xf32>
    %363 = tpu.matmul %362, %126, %cst_277 {dimension_numbers = #tpu.dot_dimension_numbers<[1], [0], [0], [1], [0, 0, 1, 1], [], []>} : vector<2x96xbf16>, vector<96x64xbf16>, vector<2x64xf32> -> vector<2x64xf32>
    %364 = arith.addf %360, %363 : vector<2x64xf32>
    %c0_278 = arith.constant 0 : index
    %c6_279 = arith.constant 6 : index
    %c128_280 = arith.constant 128 : index
    %365 = vector.load %arg13[%c0_278, %c6_279, %c128_280] : memref<2x11x352xbf16, #tpu.memory_space<vmem>>, vector<2x1x96xbf16>
    %366 = vector.shape_cast %365 : vector<2x1x96xbf16> to vector<2x96xbf16>
    %cst_281 = arith.constant dense<0.000000e+00> : vector<2x64xf32>
    %367 = tpu.matmul %366, %128, %cst_281 {dimension_numbers = #tpu.dot_dimension_numbers<[1], [0], [0], [1], [0, 0, 1, 1], [], []>} : vector<2x96xbf16>, vector<96x64xbf16>, vector<2x64xf32> -> vector<2x64xf32>
    %368 = arith.addf %364, %367 : vector<2x64xf32>
    %369 = vector.broadcast %129 : vector<1x64xf32> to vector<2x64xf32>
    %370 = arith.addf %368, %369 : vector<2x64xf32>
    %cst_282 = arith.constant 0.000000e+00 : f32
    %371 = vector.broadcast %cst_282 : f32 to vector<2x64xf32>
    %372 = arith.maximumf %370, %371 : vector<2x64xf32>
    %373 = arith.truncf %372 : vector<2x64xf32> to vector<2x64xbf16>
    %c0_283 = arith.constant 0 : index
    %c2_284 = arith.constant 2 : index
    %c2_285 = arith.constant 2 : index
    %c0_286 = arith.constant 0 : index
    %374 = vector.load %arg14[%c0_283, %c2_284, %c2_285, %c0_286] : memref<2x5x5x64xbf16, #tpu.memory_space<vmem>>, vector<2x1x1x64xbf16>
    %375 = vector.shape_cast %374 : vector<2x1x1x64xbf16> to vector<2x64xbf16>
    %376 = vector.shape_cast %373 : vector<2x64xbf16> to vector<2x1x1x64xbf16>
    tpu.vector_store %arg14[%c0_283, %c2_284, %c2_285, %c0_286], %376 {strides = array<i32>} : memref<2x5x5x64xbf16, #tpu.memory_space<vmem>>, vector<2x1x1x64xbf16>,
    %c0_287 = arith.constant 0 : index
    %c4_288 = arith.constant 4 : index
    %c192_289 = arith.constant 192 : index
    %377 = vector.load %arg13[%c0_287, %c4_288, %c192_289] : memref<2x11x352xbf16, #tpu.memory_space<vmem>>, vector<2x1x96xbf16>
    %378 = vector.shape_cast %377 : vector<2x1x96xbf16> to vector<2x96xbf16>
    %cst_290 = arith.constant dense<0.000000e+00> : vector<2x64xf32>
    %379 = tpu.matmul %378, %124, %cst_290 {dimension_numbers = #tpu.dot_dimension_numbers<[1], [0], [0], [1], [0, 0, 1, 1], [], []>} : vector<2x96xbf16>, vector<96x64xbf16>, vector<2x64xf32> -> vector<2x64xf32>
    %c0_291 = arith.constant 0 : index
    %c5_292 = arith.constant 5 : index
    %c192_293 = arith.constant 192 : index
    %380 = vector.load %arg13[%c0_291, %c5_292, %c192_293] : memref<2x11x352xbf16, #tpu.memory_space<vmem>>, vector<2x1x96xbf16>
    %381 = vector.shape_cast %380 : vector<2x1x96xbf16> to vector<2x96xbf16>
    %cst_294 = arith.constant dense<0.000000e+00> : vector<2x64xf32>
    %382 = tpu.matmul %381, %126, %cst_294 {dimension_numbers = #tpu.dot_dimension_numbers<[1], [0], [0], [1], [0, 0, 1, 1], [], []>} : vector<2x96xbf16>, vector<96x64xbf16>, vector<2x64xf32> -> vector<2x64xf32>
    %383 = arith.addf %379, %382 : vector<2x64xf32>
    %c0_295 = arith.constant 0 : index
    %c6_296 = arith.constant 6 : index
    %c192_297 = arith.constant 192 : index
    %384 = vector.load %arg13[%c0_295, %c6_296, %c192_297] : memref<2x11x352xbf16, #tpu.memory_space<vmem>>, vector<2x1x96xbf16>
    %385 = vector.shape_cast %384 : vector<2x1x96xbf16> to vector<2x96xbf16>
    %cst_298 = arith.constant dense<0.000000e+00> : vector<2x64xf32>
    %386 = tpu.matmul %385, %128, %cst_298 {dimension_numbers = #tpu.dot_dimension_numbers<[1], [0], [0], [1], [0, 0, 1, 1], [], []>} : vector<2x96xbf16>, vector<96x64xbf16>, vector<2x64xf32> -> vector<2x64xf32>
    %387 = arith.addf %383, %386 : vector<2x64xf32>
    %388 = vector.broadcast %129 : vector<1x64xf32> to vector<2x64xf32>
    %389 = arith.addf %387, %388 : vector<2x64xf32>
    %cst_299 = arith.constant 0.000000e+00 : f32
    %390 = vector.broadcast %cst_299 : f32 to vector<2x64xf32>
    %391 = arith.maximumf %389, %390 : vector<2x64xf32>
    %392 = arith.truncf %391 : vector<2x64xf32> to vector<2x64xbf16>
    %c0_300 = arith.constant 0 : index
    %c2_301 = arith.constant 2 : index
    %c3_302 = arith.constant 3 : index
    %c0_303 = arith.constant 0 : index
    %393 = vector.load %arg14[%c0_300, %c2_301, %c3_302, %c0_303] : memref<2x5x5x64xbf16, #tpu.memory_space<vmem>>, vector<2x1x1x64xbf16>
    %394 = vector.shape_cast %393 : vector<2x1x1x64xbf16> to vector<2x64xbf16>
    %395 = vector.shape_cast %392 : vector<2x64xbf16> to vector<2x1x1x64xbf16>
    tpu.vector_store %arg14[%c0_300, %c2_301, %c3_302, %c0_303], %395 {strides = array<i32>} : memref<2x5x5x64xbf16, #tpu.memory_space<vmem>>, vector<2x1x1x64xbf16>,
    %c0_304 = arith.constant 0 : index
    %c4_305 = arith.constant 4 : index
    %c256_306 = arith.constant 256 : index
    %396 = vector.load %arg13[%c0_304, %c4_305, %c256_306] : memref<2x11x352xbf16, #tpu.memory_space<vmem>>, vector<2x1x96xbf16>
    %397 = vector.shape_cast %396 : vector<2x1x96xbf16> to vector<2x96xbf16>
    %cst_307 = arith.constant dense<0.000000e+00> : vector<2x64xf32>
    %398 = tpu.matmul %397, %124, %cst_307 {dimension_numbers = #tpu.dot_dimension_numbers<[1], [0], [0], [1], [0, 0, 1, 1], [], []>} : vector<2x96xbf16>, vector<96x64xbf16>, vector<2x64xf32> -> vector<2x64xf32>
    %c0_308 = arith.constant 0 : index
    %c5_309 = arith.constant 5 : index
    %c256_310 = arith.constant 256 : index
    %399 = vector.load %arg13[%c0_308, %c5_309, %c256_310] : memref<2x11x352xbf16, #tpu.memory_space<vmem>>, vector<2x1x96xbf16>
    %400 = vector.shape_cast %399 : vector<2x1x96xbf16> to vector<2x96xbf16>
    %cst_311 = arith.constant dense<0.000000e+00> : vector<2x64xf32>
    %401 = tpu.matmul %400, %126, %cst_311 {dimension_numbers = #tpu.dot_dimension_numbers<[1], [0], [0], [1], [0, 0, 1, 1], [], []>} : vector<2x96xbf16>, vector<96x64xbf16>, vector<2x64xf32> -> vector<2x64xf32>
    %402 = arith.addf %398, %401 : vector<2x64xf32>
    %c0_312 = arith.constant 0 : index
    %c6_313 = arith.constant 6 : index
    %c256_314 = arith.constant 256 : index
    %403 = vector.load %arg13[%c0_312, %c6_313, %c256_314] : memref<2x11x352xbf16, #tpu.memory_space<vmem>>, vector<2x1x96xbf16>
    %404 = vector.shape_cast %403 : vector<2x1x96xbf16> to vector<2x96xbf16>
    %cst_315 = arith.constant dense<0.000000e+00> : vector<2x64xf32>
    %405 = tpu.matmul %404, %128, %cst_315 {dimension_numbers = #tpu.dot_dimension_numbers<[1], [0], [0], [1], [0, 0, 1, 1], [], []>} : vector<2x96xbf16>, vector<96x64xbf16>, vector<2x64xf32> -> vector<2x64xf32>
    %406 = arith.addf %402, %405 : vector<2x64xf32>
    %407 = vector.broadcast %129 : vector<1x64xf32> to vector<2x64xf32>
    %408 = arith.addf %406, %407 : vector<2x64xf32>
    %cst_316 = arith.constant 0.000000e+00 : f32
    %409 = vector.broadcast %cst_316 : f32 to vector<2x64xf32>
    %410 = arith.maximumf %408, %409 : vector<2x64xf32>
    %411 = arith.truncf %410 : vector<2x64xf32> to vector<2x64xbf16>
    %c0_317 = arith.constant 0 : index
    %c2_318 = arith.constant 2 : index
    %c4_319 = arith.constant 4 : index
    %c0_320 = arith.constant 0 : index
    %412 = vector.load %arg14[%c0_317, %c2_318, %c4_319, %c0_320] : memref<2x5x5x64xbf16, #tpu.memory_space<vmem>>, vector<2x1x1x64xbf16>
    %413 = vector.shape_cast %412 : vector<2x1x1x64xbf16> to vector<2x64xbf16>
    %414 = vector.shape_cast %411 : vector<2x64xbf16> to vector<2x1x1x64xbf16>
    tpu.vector_store %arg14[%c0_317, %c2_318, %c4_319, %c0_320], %414 {strides = array<i32>} : memref<2x5x5x64xbf16, #tpu.memory_space<vmem>>, vector<2x1x1x64xbf16>,
    %c0_321 = arith.constant 0 : index
    %c6_322 = arith.constant 6 : index
    %c0_323 = arith.constant 0 : index
    %415 = vector.load %arg13[%c0_321, %c6_322, %c0_323] : memref<2x11x352xbf16, #tpu.memory_space<vmem>>, vector<2x1x96xbf16>
    %416 = vector.shape_cast %415 : vector<2x1x96xbf16> to vector<2x96xbf16>
    %cst_324 = arith.constant dense<0.000000e+00> : vector<2x64xf32>
    %417 = tpu.matmul %416, %124, %cst_324 {dimension_numbers = #tpu.dot_dimension_numbers<[1], [0], [0], [1], [0, 0, 1, 1], [], []>} : vector<2x96xbf16>, vector<96x64xbf16>, vector<2x64xf32> -> vector<2x64xf32>
    %c0_325 = arith.constant 0 : index
    %c7_326 = arith.constant 7 : index
    %c0_327 = arith.constant 0 : index
    %418 = vector.load %arg13[%c0_325, %c7_326, %c0_327] : memref<2x11x352xbf16, #tpu.memory_space<vmem>>, vector<2x1x96xbf16>
    %419 = vector.shape_cast %418 : vector<2x1x96xbf16> to vector<2x96xbf16>
    %cst_328 = arith.constant dense<0.000000e+00> : vector<2x64xf32>
    %420 = tpu.matmul %419, %126, %cst_328 {dimension_numbers = #tpu.dot_dimension_numbers<[1], [0], [0], [1], [0, 0, 1, 1], [], []>} : vector<2x96xbf16>, vector<96x64xbf16>, vector<2x64xf32> -> vector<2x64xf32>
    %421 = arith.addf %417, %420 : vector<2x64xf32>
    %c0_329 = arith.constant 0 : index
    %c8_330 = arith.constant 8 : index
    %c0_331 = arith.constant 0 : index
    %422 = vector.load %arg13[%c0_329, %c8_330, %c0_331] : memref<2x11x352xbf16, #tpu.memory_space<vmem>>, vector<2x1x96xbf16>
    %423 = vector.shape_cast %422 : vector<2x1x96xbf16> to vector<2x96xbf16>
    %cst_332 = arith.constant dense<0.000000e+00> : vector<2x64xf32>
    %424 = tpu.matmul %423, %128, %cst_332 {dimension_numbers = #tpu.dot_dimension_numbers<[1], [0], [0], [1], [0, 0, 1, 1], [], []>} : vector<2x96xbf16>, vector<96x64xbf16>, vector<2x64xf32> -> vector<2x64xf32>
    %425 = arith.addf %421, %424 : vector<2x64xf32>
    %426 = vector.broadcast %129 : vector<1x64xf32> to vector<2x64xf32>
    %427 = arith.addf %425, %426 : vector<2x64xf32>
    %cst_333 = arith.constant 0.000000e+00 : f32
    %428 = vector.broadcast %cst_333 : f32 to vector<2x64xf32>
    %429 = arith.maximumf %427, %428 : vector<2x64xf32>
    %430 = arith.truncf %429 : vector<2x64xf32> to vector<2x64xbf16>
    %c0_334 = arith.constant 0 : index
    %c3_335 = arith.constant 3 : index
    %c0_336 = arith.constant 0 : index
    %c0_337 = arith.constant 0 : index
    %431 = vector.load %arg14[%c0_334, %c3_335, %c0_336, %c0_337] : memref<2x5x5x64xbf16, #tpu.memory_space<vmem>>, vector<2x1x1x64xbf16>
    %432 = vector.shape_cast %431 : vector<2x1x1x64xbf16> to vector<2x64xbf16>
    %433 = vector.shape_cast %430 : vector<2x64xbf16> to vector<2x1x1x64xbf16>
    tpu.vector_store %arg14[%c0_334, %c3_335, %c0_336, %c0_337], %433 {strides = array<i32>} : memref<2x5x5x64xbf16, #tpu.memory_space<vmem>>, vector<2x1x1x64xbf16>,
    %c0_338 = arith.constant 0 : index
    %c6_339 = arith.constant 6 : index
    %c64_340 = arith.constant 64 : index
    %434 = vector.load %arg13[%c0_338, %c6_339, %c64_340] : memref<2x11x352xbf16, #tpu.memory_space<vmem>>, vector<2x1x96xbf16>
    %435 = vector.shape_cast %434 : vector<2x1x96xbf16> to vector<2x96xbf16>
    %cst_341 = arith.constant dense<0.000000e+00> : vector<2x64xf32>
    %436 = tpu.matmul %435, %124, %cst_341 {dimension_numbers = #tpu.dot_dimension_numbers<[1], [0], [0], [1], [0, 0, 1, 1], [], []>} : vector<2x96xbf16>, vector<96x64xbf16>, vector<2x64xf32> -> vector<2x64xf32>
    %c0_342 = arith.constant 0 : index
    %c7_343 = arith.constant 7 : index
    %c64_344 = arith.constant 64 : index
    %437 = vector.load %arg13[%c0_342, %c7_343, %c64_344] : memref<2x11x352xbf16, #tpu.memory_space<vmem>>, vector<2x1x96xbf16>
    %438 = vector.shape_cast %437 : vector<2x1x96xbf16> to vector<2x96xbf16>
    %cst_345 = arith.constant dense<0.000000e+00> : vector<2x64xf32>
    %439 = tpu.matmul %438, %126, %cst_345 {dimension_numbers = #tpu.dot_dimension_numbers<[1], [0], [0], [1], [0, 0, 1, 1], [], []>} : vector<2x96xbf16>, vector<96x64xbf16>, vector<2x64xf32> -> vector<2x64xf32>
    %440 = arith.addf %436, %439 : vector<2x64xf32>
    %c0_346 = arith.constant 0 : index
    %c8_347 = arith.constant 8 : index
    %c64_348 = arith.constant 64 : index
    %441 = vector.load %arg13[%c0_346, %c8_347, %c64_348] : memref<2x11x352xbf16, #tpu.memory_space<vmem>>, vector<2x1x96xbf16>
    %442 = vector.shape_cast %441 : vector<2x1x96xbf16> to vector<2x96xbf16>
    %cst_349 = arith.constant dense<0.000000e+00> : vector<2x64xf32>
    %443 = tpu.matmul %442, %128, %cst_349 {dimension_numbers = #tpu.dot_dimension_numbers<[1], [0], [0], [1], [0, 0, 1, 1], [], []>} : vector<2x96xbf16>, vector<96x64xbf16>, vector<2x64xf32> -> vector<2x64xf32>
    %444 = arith.addf %440, %443 : vector<2x64xf32>
    %445 = vector.broadcast %129 : vector<1x64xf32> to vector<2x64xf32>
    %446 = arith.addf %444, %445 : vector<2x64xf32>
    %cst_350 = arith.constant 0.000000e+00 : f32
    %447 = vector.broadcast %cst_350 : f32 to vector<2x64xf32>
    %448 = arith.maximumf %446, %447 : vector<2x64xf32>
    %449 = arith.truncf %448 : vector<2x64xf32> to vector<2x64xbf16>
    %c0_351 = arith.constant 0 : index
    %c3_352 = arith.constant 3 : index
    %c1_353 = arith.constant 1 : index
    %c0_354 = arith.constant 0 : index
    %450 = vector.load %arg14[%c0_351, %c3_352, %c1_353, %c0_354] : memref<2x5x5x64xbf16, #tpu.memory_space<vmem>>, vector<2x1x1x64xbf16>
    %451 = vector.shape_cast %450 : vector<2x1x1x64xbf16> to vector<2x64xbf16>
    %452 = vector.shape_cast %449 : vector<2x64xbf16> to vector<2x1x1x64xbf16>
    tpu.vector_store %arg14[%c0_351, %c3_352, %c1_353, %c0_354], %452 {strides = array<i32>} : memref<2x5x5x64xbf16, #tpu.memory_space<vmem>>, vector<2x1x1x64xbf16>,
    %c0_355 = arith.constant 0 : index
    %c6_356 = arith.constant 6 : index
    %c128_357 = arith.constant 128 : index
    %453 = vector.load %arg13[%c0_355, %c6_356, %c128_357] : memref<2x11x352xbf16, #tpu.memory_space<vmem>>, vector<2x1x96xbf16>
    %454 = vector.shape_cast %453 : vector<2x1x96xbf16> to vector<2x96xbf16>
    %cst_358 = arith.constant dense<0.000000e+00> : vector<2x64xf32>
    %455 = tpu.matmul %454, %124, %cst_358 {dimension_numbers = #tpu.dot_dimension_numbers<[1], [0], [0], [1], [0, 0, 1, 1], [], []>} : vector<2x96xbf16>, vector<96x64xbf16>, vector<2x64xf32> -> vector<2x64xf32>
    %c0_359 = arith.constant 0 : index
    %c7_360 = arith.constant 7 : index
    %c128_361 = arith.constant 128 : index
    %456 = vector.load %arg13[%c0_359, %c7_360, %c128_361] : memref<2x11x352xbf16, #tpu.memory_space<vmem>>, vector<2x1x96xbf16>
    %457 = vector.shape_cast %456 : vector<2x1x96xbf16> to vector<2x96xbf16>
    %cst_362 = arith.constant dense<0.000000e+00> : vector<2x64xf32>
    %458 = tpu.matmul %457, %126, %cst_362 {dimension_numbers = #tpu.dot_dimension_numbers<[1], [0], [0], [1], [0, 0, 1, 1], [], []>} : vector<2x96xbf16>, vector<96x64xbf16>, vector<2x64xf32> -> vector<2x64xf32>
    %459 = arith.addf %455, %458 : vector<2x64xf32>
    %c0_363 = arith.constant 0 : index
    %c8_364 = arith.constant 8 : index
    %c128_365 = arith.constant 128 : index
    %460 = vector.load %arg13[%c0_363, %c8_364, %c128_365] : memref<2x11x352xbf16, #tpu.memory_space<vmem>>, vector<2x1x96xbf16>
    %461 = vector.shape_cast %460 : vector<2x1x96xbf16> to vector<2x96xbf16>
    %cst_366 = arith.constant dense<0.000000e+00> : vector<2x64xf32>
    %462 = tpu.matmul %461, %128, %cst_366 {dimension_numbers = #tpu.dot_dimension_numbers<[1], [0], [0], [1], [0, 0, 1, 1], [], []>} : vector<2x96xbf16>, vector<96x64xbf16>, vector<2x64xf32> -> vector<2x64xf32>
    %463 = arith.addf %459, %462 : vector<2x64xf32>
    %464 = vector.broadcast %129 : vector<1x64xf32> to vector<2x64xf32>
    %465 = arith.addf %463, %464 : vector<2x64xf32>
    %cst_367 = arith.constant 0.000000e+00 : f32
    %466 = vector.broadcast %cst_367 : f32 to vector<2x64xf32>
    %467 = arith.maximumf %465, %466 : vector<2x64xf32>
    %468 = arith.truncf %467 : vector<2x64xf32> to vector<2x64xbf16>
    %c0_368 = arith.constant 0 : index
    %c3_369 = arith.constant 3 : index
    %c2_370 = arith.constant 2 : index
    %c0_371 = arith.constant 0 : index
    %469 = vector.load %arg14[%c0_368, %c3_369, %c2_370, %c0_371] : memref<2x5x5x64xbf16, #tpu.memory_space<vmem>>, vector<2x1x1x64xbf16>
    %470 = vector.shape_cast %469 : vector<2x1x1x64xbf16> to vector<2x64xbf16>
    %471 = vector.shape_cast %468 : vector<2x64xbf16> to vector<2x1x1x64xbf16>
    tpu.vector_store %arg14[%c0_368, %c3_369, %c2_370, %c0_371], %471 {strides = array<i32>} : memref<2x5x5x64xbf16, #tpu.memory_space<vmem>>, vector<2x1x1x64xbf16>,
    %c0_372 = arith.constant 0 : index
    %c6_373 = arith.constant 6 : index
    %c192_374 = arith.constant 192 : index
    %472 = vector.load %arg13[%c0_372, %c6_373, %c192_374] : memref<2x11x352xbf16, #tpu.memory_space<vmem>>, vector<2x1x96xbf16>
    %473 = vector.shape_cast %472 : vector<2x1x96xbf16> to vector<2x96xbf16>
    %cst_375 = arith.constant dense<0.000000e+00> : vector<2x64xf32>
    %474 = tpu.matmul %473, %124, %cst_375 {dimension_numbers = #tpu.dot_dimension_numbers<[1], [0], [0], [1], [0, 0, 1, 1], [], []>} : vector<2x96xbf16>, vector<96x64xbf16>, vector<2x64xf32> -> vector<2x64xf32>
    %c0_376 = arith.constant 0 : index
    %c7_377 = arith.constant 7 : index
    %c192_378 = arith.constant 192 : index
    %475 = vector.load %arg13[%c0_376, %c7_377, %c192_378] : memref<2x11x352xbf16, #tpu.memory_space<vmem>>, vector<2x1x96xbf16>
    %476 = vector.shape_cast %475 : vector<2x1x96xbf16> to vector<2x96xbf16>
    %cst_379 = arith.constant dense<0.000000e+00> : vector<2x64xf32>
    %477 = tpu.matmul %476, %126, %cst_379 {dimension_numbers = #tpu.dot_dimension_numbers<[1], [0], [0], [1], [0, 0, 1, 1], [], []>} : vector<2x96xbf16>, vector<96x64xbf16>, vector<2x64xf32> -> vector<2x64xf32>
    %478 = arith.addf %474, %477 : vector<2x64xf32>
    %c0_380 = arith.constant 0 : index
    %c8_381 = arith.constant 8 : index
    %c192_382 = arith.constant 192 : index
    %479 = vector.load %arg13[%c0_380, %c8_381, %c192_382] : memref<2x11x352xbf16, #tpu.memory_space<vmem>>, vector<2x1x96xbf16>
    %480 = vector.shape_cast %479 : vector<2x1x96xbf16> to vector<2x96xbf16>
    %cst_383 = arith.constant dense<0.000000e+00> : vector<2x64xf32>
    %481 = tpu.matmul %480, %128, %cst_383 {dimension_numbers = #tpu.dot_dimension_numbers<[1], [0], [0], [1], [0, 0, 1, 1], [], []>} : vector<2x96xbf16>, vector<96x64xbf16>, vector<2x64xf32> -> vector<2x64xf32>
    %482 = arith.addf %478, %481 : vector<2x64xf32>
    %483 = vector.broadcast %129 : vector<1x64xf32> to vector<2x64xf32>
    %484 = arith.addf %482, %483 : vector<2x64xf32>
    %cst_384 = arith.constant 0.000000e+00 : f32
    %485 = vector.broadcast %cst_384 : f32 to vector<2x64xf32>
    %486 = arith.maximumf %484, %485 : vector<2x64xf32>
    %487 = arith.truncf %486 : vector<2x64xf32> to vector<2x64xbf16>
    %c0_385 = arith.constant 0 : index
    %c3_386 = arith.constant 3 : index
    %c3_387 = arith.constant 3 : index
    %c0_388 = arith.constant 0 : index
    %488 = vector.load %arg14[%c0_385, %c3_386, %c3_387, %c0_388] : memref<2x5x5x64xbf16, #tpu.memory_space<vmem>>, vector<2x1x1x64xbf16>
    %489 = vector.shape_cast %488 : vector<2x1x1x64xbf16> to vector<2x64xbf16>
    %490 = vector.shape_cast %487 : vector<2x64xbf16> to vector<2x1x1x64xbf16>
    tpu.vector_store %arg14[%c0_385, %c3_386, %c3_387, %c0_388], %490 {strides = array<i32>} : memref<2x5x5x64xbf16, #tpu.memory_space<vmem>>, vector<2x1x1x64xbf16>,
    %c0_389 = arith.constant 0 : index
    %c6_390 = arith.constant 6 : index
    %c256_391 = arith.constant 256 : index
    %491 = vector.load %arg13[%c0_389, %c6_390, %c256_391] : memref<2x11x352xbf16, #tpu.memory_space<vmem>>, vector<2x1x96xbf16>
    %492 = vector.shape_cast %491 : vector<2x1x96xbf16> to vector<2x96xbf16>
    %cst_392 = arith.constant dense<0.000000e+00> : vector<2x64xf32>
    %493 = tpu.matmul %492, %124, %cst_392 {dimension_numbers = #tpu.dot_dimension_numbers<[1], [0], [0], [1], [0, 0, 1, 1], [], []>} : vector<2x96xbf16>, vector<96x64xbf16>, vector<2x64xf32> -> vector<2x64xf32>
    %c0_393 = arith.constant 0 : index
    %c7_394 = arith.constant 7 : index
    %c256_395 = arith.constant 256 : index
    %494 = vector.load %arg13[%c0_393, %c7_394, %c256_395] : memref<2x11x352xbf16, #tpu.memory_space<vmem>>, vector<2x1x96xbf16>
    %495 = vector.shape_cast %494 : vector<2x1x96xbf16> to vector<2x96xbf16>
    %cst_396 = arith.constant dense<0.000000e+00> : vector<2x64xf32>
    %496 = tpu.matmul %495, %126, %cst_396 {dimension_numbers = #tpu.dot_dimension_numbers<[1], [0], [0], [1], [0, 0, 1, 1], [], []>} : vector<2x96xbf16>, vector<96x64xbf16>, vector<2x64xf32> -> vector<2x64xf32>
    %497 = arith.addf %493, %496 : vector<2x64xf32>
    %c0_397 = arith.constant 0 : index
    %c8_398 = arith.constant 8 : index
    %c256_399 = arith.constant 256 : index
    %498 = vector.load %arg13[%c0_397, %c8_398, %c256_399] : memref<2x11x352xbf16, #tpu.memory_space<vmem>>, vector<2x1x96xbf16>
    %499 = vector.shape_cast %498 : vector<2x1x96xbf16> to vector<2x96xbf16>
    %cst_400 = arith.constant dense<0.000000e+00> : vector<2x64xf32>
    %500 = tpu.matmul %499, %128, %cst_400 {dimension_numbers = #tpu.dot_dimension_numbers<[1], [0], [0], [1], [0, 0, 1, 1], [], []>} : vector<2x96xbf16>, vector<96x64xbf16>, vector<2x64xf32> -> vector<2x64xf32>
    %501 = arith.addf %497, %500 : vector<2x64xf32>
    %502 = vector.broadcast %129 : vector<1x64xf32> to vector<2x64xf32>
    %503 = arith.addf %501, %502 : vector<2x64xf32>
    %cst_401 = arith.constant 0.000000e+00 : f32
    %504 = vector.broadcast %cst_401 : f32 to vector<2x64xf32>
    %505 = arith.maximumf %503, %504 : vector<2x64xf32>
    %506 = arith.truncf %505 : vector<2x64xf32> to vector<2x64xbf16>
    %c0_402 = arith.constant 0 : index
    %c3_403 = arith.constant 3 : index
    %c4_404 = arith.constant 4 : index
    %c0_405 = arith.constant 0 : index
    %507 = vector.load %arg14[%c0_402, %c3_403, %c4_404, %c0_405] : memref<2x5x5x64xbf16, #tpu.memory_space<vmem>>, vector<2x1x1x64xbf16>
    %508 = vector.shape_cast %507 : vector<2x1x1x64xbf16> to vector<2x64xbf16>
    %509 = vector.shape_cast %506 : vector<2x64xbf16> to vector<2x1x1x64xbf16>
    tpu.vector_store %arg14[%c0_402, %c3_403, %c4_404, %c0_405], %509 {strides = array<i32>} : memref<2x5x5x64xbf16, #tpu.memory_space<vmem>>, vector<2x1x1x64xbf16>,
    %c0_406 = arith.constant 0 : index
    %c8_407 = arith.constant 8 : index
    %c0_408 = arith.constant 0 : index
    %510 = vector.load %arg13[%c0_406, %c8_407, %c0_408] : memref<2x11x352xbf16, #tpu.memory_space<vmem>>, vector<2x1x96xbf16>
    %511 = vector.shape_cast %510 : vector<2x1x96xbf16> to vector<2x96xbf16>
    %cst_409 = arith.constant dense<0.000000e+00> : vector<2x64xf32>
    %512 = tpu.matmul %511, %124, %cst_409 {dimension_numbers = #tpu.dot_dimension_numbers<[1], [0], [0], [1], [0, 0, 1, 1], [], []>} : vector<2x96xbf16>, vector<96x64xbf16>, vector<2x64xf32> -> vector<2x64xf32>
    %c0_410 = arith.constant 0 : index
    %c9_411 = arith.constant 9 : index
    %c0_412 = arith.constant 0 : index
    %513 = vector.load %arg13[%c0_410, %c9_411, %c0_412] : memref<2x11x352xbf16, #tpu.memory_space<vmem>>, vector<2x1x96xbf16>
    %514 = vector.shape_cast %513 : vector<2x1x96xbf16> to vector<2x96xbf16>
    %cst_413 = arith.constant dense<0.000000e+00> : vector<2x64xf32>
    %515 = tpu.matmul %514, %126, %cst_413 {dimension_numbers = #tpu.dot_dimension_numbers<[1], [0], [0], [1], [0, 0, 1, 1], [], []>} : vector<2x96xbf16>, vector<96x64xbf16>, vector<2x64xf32> -> vector<2x64xf32>
    %516 = arith.addf %512, %515 : vector<2x64xf32>
    %c0_414 = arith.constant 0 : index
    %c10_415 = arith.constant 10 : index
    %c0_416 = arith.constant 0 : index
    %517 = vector.load %arg13[%c0_414, %c10_415, %c0_416] : memref<2x11x352xbf16, #tpu.memory_space<vmem>>, vector<2x1x96xbf16>
    %518 = vector.shape_cast %517 : vector<2x1x96xbf16> to vector<2x96xbf16>
    %cst_417 = arith.constant dense<0.000000e+00> : vector<2x64xf32>
    %519 = tpu.matmul %518, %128, %cst_417 {dimension_numbers = #tpu.dot_dimension_numbers<[1], [0], [0], [1], [0, 0, 1, 1], [], []>} : vector<2x96xbf16>, vector<96x64xbf16>, vector<2x64xf32> -> vector<2x64xf32>
    %520 = arith.addf %516, %519 : vector<2x64xf32>
    %521 = vector.broadcast %129 : vector<1x64xf32> to vector<2x64xf32>
    %522 = arith.addf %520, %521 : vector<2x64xf32>
    %cst_418 = arith.constant 0.000000e+00 : f32
    %523 = vector.broadcast %cst_418 : f32 to vector<2x64xf32>
    %524 = arith.maximumf %522, %523 : vector<2x64xf32>
    %525 = arith.truncf %524 : vector<2x64xf32> to vector<2x64xbf16>
    %c0_419 = arith.constant 0 : index
    %c4_420 = arith.constant 4 : index
    %c0_421 = arith.constant 0 : index
    %c0_422 = arith.constant 0 : index
    %526 = vector.load %arg14[%c0_419, %c4_420, %c0_421, %c0_422] : memref<2x5x5x64xbf16, #tpu.memory_space<vmem>>, vector<2x1x1x64xbf16>
    %527 = vector.shape_cast %526 : vector<2x1x1x64xbf16> to vector<2x64xbf16>
    %528 = vector.shape_cast %525 : vector<2x64xbf16> to vector<2x1x1x64xbf16>
    tpu.vector_store %arg14[%c0_419, %c4_420, %c0_421, %c0_422], %528 {strides = array<i32>} : memref<2x5x5x64xbf16, #tpu.memory_space<vmem>>, vector<2x1x1x64xbf16>,
    %c0_423 = arith.constant 0 : index
    %c8_424 = arith.constant 8 : index
    %c64_425 = arith.constant 64 : index
    %529 = vector.load %arg13[%c0_423, %c8_424, %c64_425] : memref<2x11x352xbf16, #tpu.memory_space<vmem>>, vector<2x1x96xbf16>
    %530 = vector.shape_cast %529 : vector<2x1x96xbf16> to vector<2x96xbf16>
    %cst_426 = arith.constant dense<0.000000e+00> : vector<2x64xf32>
    %531 = tpu.matmul %530, %124, %cst_426 {dimension_numbers = #tpu.dot_dimension_numbers<[1], [0], [0], [1], [0, 0, 1, 1], [], []>} : vector<2x96xbf16>, vector<96x64xbf16>, vector<2x64xf32> -> vector<2x64xf32>
    %c0_427 = arith.constant 0 : index
    %c9_428 = arith.constant 9 : index
    %c64_429 = arith.constant 64 : index
    %532 = vector.load %arg13[%c0_427, %c9_428, %c64_429] : memref<2x11x352xbf16, #tpu.memory_space<vmem>>, vector<2x1x96xbf16>
    %533 = vector.shape_cast %532 : vector<2x1x96xbf16> to vector<2x96xbf16>
    %cst_430 = arith.constant dense<0.000000e+00> : vector<2x64xf32>
    %534 = tpu.matmul %533, %126, %cst_430 {dimension_numbers = #tpu.dot_dimension_numbers<[1], [0], [0], [1], [0, 0, 1, 1], [], []>} : vector<2x96xbf16>, vector<96x64xbf16>, vector<2x64xf32> -> vector<2x64xf32>
    %535 = arith.addf %531, %534 : vector<2x64xf32>
    %c0_431 = arith.constant 0 : index
    %c10_432 = arith.constant 10 : index
    %c64_433 = arith.constant 64 : index
    %536 = vector.load %arg13[%c0_431, %c10_432, %c64_433] : memref<2x11x352xbf16, #tpu.memory_space<vmem>>, vector<2x1x96xbf16>
    %537 = vector.shape_cast %536 : vector<2x1x96xbf16> to vector<2x96xbf16>
    %cst_434 = arith.constant dense<0.000000e+00> : vector<2x64xf32>
    %538 = tpu.matmul %537, %128, %cst_434 {dimension_numbers = #tpu.dot_dimension_numbers<[1], [0], [0], [1], [0, 0, 1, 1], [], []>} : vector<2x96xbf16>, vector<96x64xbf16>, vector<2x64xf32> -> vector<2x64xf32>
    %539 = arith.addf %535, %538 : vector<2x64xf32>
    %540 = vector.broadcast %129 : vector<1x64xf32> to vector<2x64xf32>
    %541 = arith.addf %539, %540 : vector<2x64xf32>
    %cst_435 = arith.constant 0.000000e+00 : f32
    %542 = vector.broadcast %cst_435 : f32 to vector<2x64xf32>
    %543 = arith.maximumf %541, %542 : vector<2x64xf32>
    %544 = arith.truncf %543 : vector<2x64xf32> to vector<2x64xbf16>
    %c0_436 = arith.constant 0 : index
    %c4_437 = arith.constant 4 : index
    %c1_438 = arith.constant 1 : index
    %c0_439 = arith.constant 0 : index
    %545 = vector.load %arg14[%c0_436, %c4_437, %c1_438, %c0_439] : memref<2x5x5x64xbf16, #tpu.memory_space<vmem>>, vector<2x1x1x64xbf16>
    %546 = vector.shape_cast %545 : vector<2x1x1x64xbf16> to vector<2x64xbf16>
    %547 = vector.shape_cast %544 : vector<2x64xbf16> to vector<2x1x1x64xbf16>
    tpu.vector_store %arg14[%c0_436, %c4_437, %c1_438, %c0_439], %547 {strides = array<i32>} : memref<2x5x5x64xbf16, #tpu.memory_space<vmem>>, vector<2x1x1x64xbf16>,
    %c0_440 = arith.constant 0 : index
    %c8_441 = arith.constant 8 : index
    %c128_442 = arith.constant 128 : index
    %548 = vector.load %arg13[%c0_440, %c8_441, %c128_442] : memref<2x11x352xbf16, #tpu.memory_space<vmem>>, vector<2x1x96xbf16>
    %549 = vector.shape_cast %548 : vector<2x1x96xbf16> to vector<2x96xbf16>
    %cst_443 = arith.constant dense<0.000000e+00> : vector<2x64xf32>
    %550 = tpu.matmul %549, %124, %cst_443 {dimension_numbers = #tpu.dot_dimension_numbers<[1], [0], [0], [1], [0, 0, 1, 1], [], []>} : vector<2x96xbf16>, vector<96x64xbf16>, vector<2x64xf32> -> vector<2x64xf32>
    %c0_444 = arith.constant 0 : index
    %c9_445 = arith.constant 9 : index
    %c128_446 = arith.constant 128 : index
    %551 = vector.load %arg13[%c0_444, %c9_445, %c128_446] : memref<2x11x352xbf16, #tpu.memory_space<vmem>>, vector<2x1x96xbf16>
    %552 = vector.shape_cast %551 : vector<2x1x96xbf16> to vector<2x96xbf16>
    %cst_447 = arith.constant dense<0.000000e+00> : vector<2x64xf32>
    %553 = tpu.matmul %552, %126, %cst_447 {dimension_numbers = #tpu.dot_dimension_numbers<[1], [0], [0], [1], [0, 0, 1, 1], [], []>} : vector<2x96xbf16>, vector<96x64xbf16>, vector<2x64xf32> -> vector<2x64xf32>
    %554 = arith.addf %550, %553 : vector<2x64xf32>
    %c0_448 = arith.constant 0 : index
    %c10_449 = arith.constant 10 : index
    %c128_450 = arith.constant 128 : index
    %555 = vector.load %arg13[%c0_448, %c10_449, %c128_450] : memref<2x11x352xbf16, #tpu.memory_space<vmem>>, vector<2x1x96xbf16>
    %556 = vector.shape_cast %555 : vector<2x1x96xbf16> to vector<2x96xbf16>
    %cst_451 = arith.constant dense<0.000000e+00> : vector<2x64xf32>
    %557 = tpu.matmul %556, %128, %cst_451 {dimension_numbers = #tpu.dot_dimension_numbers<[1], [0], [0], [1], [0, 0, 1, 1], [], []>} : vector<2x96xbf16>, vector<96x64xbf16>, vector<2x64xf32> -> vector<2x64xf32>
    %558 = arith.addf %554, %557 : vector<2x64xf32>
    %559 = vector.broadcast %129 : vector<1x64xf32> to vector<2x64xf32>
    %560 = arith.addf %558, %559 : vector<2x64xf32>
    %cst_452 = arith.constant 0.000000e+00 : f32
    %561 = vector.broadcast %cst_452 : f32 to vector<2x64xf32>
    %562 = arith.maximumf %560, %561 : vector<2x64xf32>
    %563 = arith.truncf %562 : vector<2x64xf32> to vector<2x64xbf16>
    %c0_453 = arith.constant 0 : index
    %c4_454 = arith.constant 4 : index
    %c2_455 = arith.constant 2 : index
    %c0_456 = arith.constant 0 : index
    %564 = vector.load %arg14[%c0_453, %c4_454, %c2_455, %c0_456] : memref<2x5x5x64xbf16, #tpu.memory_space<vmem>>, vector<2x1x1x64xbf16>
    %565 = vector.shape_cast %564 : vector<2x1x1x64xbf16> to vector<2x64xbf16>
    %566 = vector.shape_cast %563 : vector<2x64xbf16> to vector<2x1x1x64xbf16>
    tpu.vector_store %arg14[%c0_453, %c4_454, %c2_455, %c0_456], %566 {strides = array<i32>} : memref<2x5x5x64xbf16, #tpu.memory_space<vmem>>, vector<2x1x1x64xbf16>,
    %c0_457 = arith.constant 0 : index
    %c8_458 = arith.constant 8 : index
    %c192_459 = arith.constant 192 : index
    %567 = vector.load %arg13[%c0_457, %c8_458, %c192_459] : memref<2x11x352xbf16, #tpu.memory_space<vmem>>, vector<2x1x96xbf16>
    %568 = vector.shape_cast %567 : vector<2x1x96xbf16> to vector<2x96xbf16>
    %cst_460 = arith.constant dense<0.000000e+00> : vector<2x64xf32>
    %569 = tpu.matmul %568, %124, %cst_460 {dimension_numbers = #tpu.dot_dimension_numbers<[1], [0], [0], [1], [0, 0, 1, 1], [], []>} : vector<2x96xbf16>, vector<96x64xbf16>, vector<2x64xf32> -> vector<2x64xf32>
    %c0_461 = arith.constant 0 : index
    %c9_462 = arith.constant 9 : index
    %c192_463 = arith.constant 192 : index
    %570 = vector.load %arg13[%c0_461, %c9_462, %c192_463] : memref<2x11x352xbf16, #tpu.memory_space<vmem>>, vector<2x1x96xbf16>
    %571 = vector.shape_cast %570 : vector<2x1x96xbf16> to vector<2x96xbf16>
    %cst_464 = arith.constant dense<0.000000e+00> : vector<2x64xf32>
    %572 = tpu.matmul %571, %126, %cst_464 {dimension_numbers = #tpu.dot_dimension_numbers<[1], [0], [0], [1], [0, 0, 1, 1], [], []>} : vector<2x96xbf16>, vector<96x64xbf16>, vector<2x64xf32> -> vector<2x64xf32>
    %573 = arith.addf %569, %572 : vector<2x64xf32>
    %c0_465 = arith.constant 0 : index
    %c10_466 = arith.constant 10 : index
    %c192_467 = arith.constant 192 : index
    %574 = vector.load %arg13[%c0_465, %c10_466, %c192_467] : memref<2x11x352xbf16, #tpu.memory_space<vmem>>, vector<2x1x96xbf16>
    %575 = vector.shape_cast %574 : vector<2x1x96xbf16> to vector<2x96xbf16>
    %cst_468 = arith.constant dense<0.000000e+00> : vector<2x64xf32>
    %576 = tpu.matmul %575, %128, %cst_468 {dimension_numbers = #tpu.dot_dimension_numbers<[1], [0], [0], [1], [0, 0, 1, 1], [], []>} : vector<2x96xbf16>, vector<96x64xbf16>, vector<2x64xf32> -> vector<2x64xf32>
    %577 = arith.addf %573, %576 : vector<2x64xf32>
    %578 = vector.broadcast %129 : vector<1x64xf32> to vector<2x64xf32>
    %579 = arith.addf %577, %578 : vector<2x64xf32>
    %cst_469 = arith.constant 0.000000e+00 : f32
    %580 = vector.broadcast %cst_469 : f32 to vector<2x64xf32>
    %581 = arith.maximumf %579, %580 : vector<2x64xf32>
    %582 = arith.truncf %581 : vector<2x64xf32> to vector<2x64xbf16>
    %c0_470 = arith.constant 0 : index
    %c4_471 = arith.constant 4 : index
    %c3_472 = arith.constant 3 : index
    %c0_473 = arith.constant 0 : index
    %583 = vector.load %arg14[%c0_470, %c4_471, %c3_472, %c0_473] : memref<2x5x5x64xbf16, #tpu.memory_space<vmem>>, vector<2x1x1x64xbf16>
    %584 = vector.shape_cast %583 : vector<2x1x1x64xbf16> to vector<2x64xbf16>
    %585 = vector.shape_cast %582 : vector<2x64xbf16> to vector<2x1x1x64xbf16>
    tpu.vector_store %arg14[%c0_470, %c4_471, %c3_472, %c0_473], %585 {strides = array<i32>} : memref<2x5x5x64xbf16, #tpu.memory_space<vmem>>, vector<2x1x1x64xbf16>,
    %c0_474 = arith.constant 0 : index
    %c8_475 = arith.constant 8 : index
    %c256_476 = arith.constant 256 : index
    %586 = vector.load %arg13[%c0_474, %c8_475, %c256_476] : memref<2x11x352xbf16, #tpu.memory_space<vmem>>, vector<2x1x96xbf16>
    %587 = vector.shape_cast %586 : vector<2x1x96xbf16> to vector<2x96xbf16>
    %cst_477 = arith.constant dense<0.000000e+00> : vector<2x64xf32>
    %588 = tpu.matmul %587, %124, %cst_477 {dimension_numbers = #tpu.dot_dimension_numbers<[1], [0], [0], [1], [0, 0, 1, 1], [], []>} : vector<2x96xbf16>, vector<96x64xbf16>, vector<2x64xf32> -> vector<2x64xf32>
    %c0_478 = arith.constant 0 : index
    %c9_479 = arith.constant 9 : index
    %c256_480 = arith.constant 256 : index
    %589 = vector.load %arg13[%c0_478, %c9_479, %c256_480] : memref<2x11x352xbf16, #tpu.memory_space<vmem>>, vector<2x1x96xbf16>
    %590 = vector.shape_cast %589 : vector<2x1x96xbf16> to vector<2x96xbf16>
    %cst_481 = arith.constant dense<0.000000e+00> : vector<2x64xf32>
    %591 = tpu.matmul %590, %126, %cst_481 {dimension_numbers = #tpu.dot_dimension_numbers<[1], [0], [0], [1], [0, 0, 1, 1], [], []>} : vector<2x96xbf16>, vector<96x64xbf16>, vector<2x64xf32> -> vector<2x64xf32>
    %592 = arith.addf %588, %591 : vector<2x64xf32>
    %c0_482 = arith.constant 0 : index
    %c10_483 = arith.constant 10 : index
    %c256_484 = arith.constant 256 : index
    %593 = vector.load %arg13[%c0_482, %c10_483, %c256_484] : memref<2x11x352xbf16, #tpu.memory_space<vmem>>, vector<2x1x96xbf16>
    %594 = vector.shape_cast %593 : vector<2x1x96xbf16> to vector<2x96xbf16>
    %cst_485 = arith.constant dense<0.000000e+00> : vector<2x64xf32>
    %595 = tpu.matmul %594, %128, %cst_485 {dimension_numbers = #tpu.dot_dimension_numbers<[1], [0], [0], [1], [0, 0, 1, 1], [], []>} : vector<2x96xbf16>, vector<96x64xbf16>, vector<2x64xf32> -> vector<2x64xf32>
    %596 = arith.addf %592, %595 : vector<2x64xf32>
    %597 = vector.broadcast %129 : vector<1x64xf32> to vector<2x64xf32>
    %598 = arith.addf %596, %597 : vector<2x64xf32>
    %cst_486 = arith.constant 0.000000e+00 : f32
    %599 = vector.broadcast %cst_486 : f32 to vector<2x64xf32>
    %600 = arith.maximumf %598, %599 : vector<2x64xf32>
    %601 = arith.truncf %600 : vector<2x64xf32> to vector<2x64xbf16>
    %c0_487 = arith.constant 0 : index
    %c4_488 = arith.constant 4 : index
    %c4_489 = arith.constant 4 : index
    %c0_490 = arith.constant 0 : index
    %602 = vector.load %arg14[%c0_487, %c4_488, %c4_489, %c0_490] : memref<2x5x5x64xbf16, #tpu.memory_space<vmem>>, vector<2x1x1x64xbf16>
    %603 = vector.shape_cast %602 : vector<2x1x1x64xbf16> to vector<2x64xbf16>
    %604 = vector.shape_cast %601 : vector<2x64xbf16> to vector<2x1x1x64xbf16>
    tpu.vector_store %arg14[%c0_487, %c4_488, %c4_489, %c0_490], %604 {strides = array<i32>} : memref<2x5x5x64xbf16, #tpu.memory_space<vmem>>, vector<2x1x1x64xbf16>,
    %c0_491 = arith.constant 0 : index
    %c0_492 = arith.constant 0 : index
    %c0_493 = arith.constant 0 : index
    %605 = vector.load %arg6[%c0_491, %c0_492, %c0_493] : memref<9x64x128xbf16, #tpu.memory_space<vmem>>, vector<1x64x128xbf16>
    %606 = vector.shape_cast %605 : vector<1x64x128xbf16> to vector<64x128xbf16>
    %c1_494 = arith.constant 1 : index
    %c0_495 = arith.constant 0 : index
    %c0_496 = arith.constant 0 : index
    %607 = vector.load %arg6[%c1_494, %c0_495, %c0_496] : memref<9x64x128xbf16, #tpu.memory_space<vmem>>, vector<1x64x128xbf16>
    %608 = vector.shape_cast %607 : vector<1x64x128xbf16> to vector<64x128xbf16>
    %c2_497 = arith.constant 2 : index
    %c0_498 = arith.constant 0 : index
    %c0_499 = arith.constant 0 : index
    %609 = vector.load %arg6[%c2_497, %c0_498, %c0_499] : memref<9x64x128xbf16, #tpu.memory_space<vmem>>, vector<1x64x128xbf16>
    %610 = vector.shape_cast %609 : vector<1x64x128xbf16> to vector<64x128xbf16>
    %c3_500 = arith.constant 3 : index
    %c0_501 = arith.constant 0 : index
    %c0_502 = arith.constant 0 : index
    %611 = vector.load %arg6[%c3_500, %c0_501, %c0_502] : memref<9x64x128xbf16, #tpu.memory_space<vmem>>, vector<1x64x128xbf16>
    %612 = vector.shape_cast %611 : vector<1x64x128xbf16> to vector<64x128xbf16>
    %c4_503 = arith.constant 4 : index
    %c0_504 = arith.constant 0 : index
    %c0_505 = arith.constant 0 : index
    %613 = vector.load %arg6[%c4_503, %c0_504, %c0_505] : memref<9x64x128xbf16, #tpu.memory_space<vmem>>, vector<1x64x128xbf16>
    %614 = vector.shape_cast %613 : vector<1x64x128xbf16> to vector<64x128xbf16>
    %c5_506 = arith.constant 5 : index
    %c0_507 = arith.constant 0 : index
    %c0_508 = arith.constant 0 : index
    %615 = vector.load %arg6[%c5_506, %c0_507, %c0_508] : memref<9x64x128xbf16, #tpu.memory_space<vmem>>, vector<1x64x128xbf16>
    %616 = vector.shape_cast %615 : vector<1x64x128xbf16> to vector<64x128xbf16>
    %c6_509 = arith.constant 6 : index
    %c0_510 = arith.constant 0 : index
    %c0_511 = arith.constant 0 : index
    %617 = vector.load %arg6[%c6_509, %c0_510, %c0_511] : memref<9x64x128xbf16, #tpu.memory_space<vmem>>, vector<1x64x128xbf16>
    %618 = vector.shape_cast %617 : vector<1x64x128xbf16> to vector<64x128xbf16>
    %c7_512 = arith.constant 7 : index
    %c0_513 = arith.constant 0 : index
    %c0_514 = arith.constant 0 : index
    %619 = vector.load %arg6[%c7_512, %c0_513, %c0_514] : memref<9x64x128xbf16, #tpu.memory_space<vmem>>, vector<1x64x128xbf16>
    %620 = vector.shape_cast %619 : vector<1x64x128xbf16> to vector<64x128xbf16>
    %c8_515 = arith.constant 8 : index
    %c0_516 = arith.constant 0 : index
    %c0_517 = arith.constant 0 : index
    %621 = vector.load %arg6[%c8_515, %c0_516, %c0_517] : memref<9x64x128xbf16, #tpu.memory_space<vmem>>, vector<1x64x128xbf16>
    %622 = vector.shape_cast %621 : vector<1x64x128xbf16> to vector<64x128xbf16>
    %c0_518 = arith.constant 0 : index
    %c0_519 = arith.constant 0 : index
    %623 = vector.load %arg7[%c0_518, %c0_519] : memref<1x128xf32, #tpu.memory_space<vmem>>, vector<1x128xf32>
    %c0_520 = arith.constant 0 : index
    %c0_521 = arith.constant 0 : index
    %c0_522 = arith.constant 0 : index
    %624 = vector.load %arg8[%c0_520, %c0_521, %c0_522] : memref<4x128x512xbf16, #tpu.memory_space<vmem>>, vector<1x128x512xbf16>
    %625 = vector.shape_cast %624 : vector<1x128x512xbf16> to vector<128x512xbf16>
    %c1_523 = arith.constant 1 : index
    %c0_524 = arith.constant 0 : index
    %c0_525 = arith.constant 0 : index
    %626 = vector.load %arg8[%c1_523, %c0_524, %c0_525] : memref<4x128x512xbf16, #tpu.memory_space<vmem>>, vector<1x128x512xbf16>
    %627 = vector.shape_cast %626 : vector<1x128x512xbf16> to vector<128x512xbf16>
    %c2_526 = arith.constant 2 : index
    %c0_527 = arith.constant 0 : index
    %c0_528 = arith.constant 0 : index
    %628 = vector.load %arg8[%c2_526, %c0_527, %c0_528] : memref<4x128x512xbf16, #tpu.memory_space<vmem>>, vector<1x128x512xbf16>
    %629 = vector.shape_cast %628 : vector<1x128x512xbf16> to vector<128x512xbf16>
    %c3_529 = arith.constant 3 : index
    %c0_530 = arith.constant 0 : index
    %c0_531 = arith.constant 0 : index
    %630 = vector.load %arg8[%c3_529, %c0_530, %c0_531] : memref<4x128x512xbf16, #tpu.memory_space<vmem>>, vector<1x128x512xbf16>
    %631 = vector.shape_cast %630 : vector<1x128x512xbf16> to vector<128x512xbf16>
    %c0_532 = arith.constant 0 : index
    %c0_533 = arith.constant 0 : index
    %c0_534 = arith.constant 0 : index
    %c0_535 = arith.constant 0 : index
    %632 = vector.load %arg14[%c0_532, %c0_533, %c0_534, %c0_535] : memref<2x5x5x64xbf16, #tpu.memory_space<vmem>>, vector<2x1x1x64xbf16>
    %633 = vector.shape_cast %632 : vector<2x1x1x64xbf16> to vector<2x64xbf16>
    %cst_536 = arith.constant dense<0.000000e+00> : vector<2x128xf32>
    %634 = tpu.matmul %633, %606, %cst_536 {dimension_numbers = #tpu.dot_dimension_numbers<[1], [0], [0], [1], [0, 0, 1, 1], [], []>} : vector<2x64xbf16>, vector<64x128xbf16>, vector<2x128xf32> -> vector<2x128xf32>
    %c0_537 = arith.constant 0 : index
    %c0_538 = arith.constant 0 : index
    %c1_539 = arith.constant 1 : index
    %c0_540 = arith.constant 0 : index
    %635 = vector.load %arg14[%c0_537, %c0_538, %c1_539, %c0_540] : memref<2x5x5x64xbf16, #tpu.memory_space<vmem>>, vector<2x1x1x64xbf16>
    %636 = vector.shape_cast %635 : vector<2x1x1x64xbf16> to vector<2x64xbf16>
    %cst_541 = arith.constant dense<0.000000e+00> : vector<2x128xf32>
    %637 = tpu.matmul %636, %608, %cst_541 {dimension_numbers = #tpu.dot_dimension_numbers<[1], [0], [0], [1], [0, 0, 1, 1], [], []>} : vector<2x64xbf16>, vector<64x128xbf16>, vector<2x128xf32> -> vector<2x128xf32>
    %638 = arith.addf %634, %637 : vector<2x128xf32>
    %c0_542 = arith.constant 0 : index
    %c0_543 = arith.constant 0 : index
    %c2_544 = arith.constant 2 : index
    %c0_545 = arith.constant 0 : index
    %639 = vector.load %arg14[%c0_542, %c0_543, %c2_544, %c0_545] : memref<2x5x5x64xbf16, #tpu.memory_space<vmem>>, vector<2x1x1x64xbf16>
    %640 = vector.shape_cast %639 : vector<2x1x1x64xbf16> to vector<2x64xbf16>
    %cst_546 = arith.constant dense<0.000000e+00> : vector<2x128xf32>
    %641 = tpu.matmul %640, %610, %cst_546 {dimension_numbers = #tpu.dot_dimension_numbers<[1], [0], [0], [1], [0, 0, 1, 1], [], []>} : vector<2x64xbf16>, vector<64x128xbf16>, vector<2x128xf32> -> vector<2x128xf32>
    %642 = arith.addf %638, %641 : vector<2x128xf32>
    %c0_547 = arith.constant 0 : index
    %c1_548 = arith.constant 1 : index
    %c0_549 = arith.constant 0 : index
    %c0_550 = arith.constant 0 : index
    %643 = vector.load %arg14[%c0_547, %c1_548, %c0_549, %c0_550] : memref<2x5x5x64xbf16, #tpu.memory_space<vmem>>, vector<2x1x1x64xbf16>
    %644 = vector.shape_cast %643 : vector<2x1x1x64xbf16> to vector<2x64xbf16>
    %cst_551 = arith.constant dense<0.000000e+00> : vector<2x128xf32>
    %645 = tpu.matmul %644, %612, %cst_551 {dimension_numbers = #tpu.dot_dimension_numbers<[1], [0], [0], [1], [0, 0, 1, 1], [], []>} : vector<2x64xbf16>, vector<64x128xbf16>, vector<2x128xf32> -> vector<2x128xf32>
    %646 = arith.addf %642, %645 : vector<2x128xf32>
    %c0_552 = arith.constant 0 : index
    %c1_553 = arith.constant 1 : index
    %c1_554 = arith.constant 1 : index
    %c0_555 = arith.constant 0 : index
    %647 = vector.load %arg14[%c0_552, %c1_553, %c1_554, %c0_555] : memref<2x5x5x64xbf16, #tpu.memory_space<vmem>>, vector<2x1x1x64xbf16>
    %648 = vector.shape_cast %647 : vector<2x1x1x64xbf16> to vector<2x64xbf16>
    %cst_556 = arith.constant dense<0.000000e+00> : vector<2x128xf32>
    %649 = tpu.matmul %648, %614, %cst_556 {dimension_numbers = #tpu.dot_dimension_numbers<[1], [0], [0], [1], [0, 0, 1, 1], [], []>} : vector<2x64xbf16>, vector<64x128xbf16>, vector<2x128xf32> -> vector<2x128xf32>
    %650 = arith.addf %646, %649 : vector<2x128xf32>
    %c0_557 = arith.constant 0 : index
    %c1_558 = arith.constant 1 : index
    %c2_559 = arith.constant 2 : index
    %c0_560 = arith.constant 0 : index
    %651 = vector.load %arg14[%c0_557, %c1_558, %c2_559, %c0_560] : memref<2x5x5x64xbf16, #tpu.memory_space<vmem>>, vector<2x1x1x64xbf16>
    %652 = vector.shape_cast %651 : vector<2x1x1x64xbf16> to vector<2x64xbf16>
    %cst_561 = arith.constant dense<0.000000e+00> : vector<2x128xf32>
    %653 = tpu.matmul %652, %616, %cst_561 {dimension_numbers = #tpu.dot_dimension_numbers<[1], [0], [0], [1], [0, 0, 1, 1], [], []>} : vector<2x64xbf16>, vector<64x128xbf16>, vector<2x128xf32> -> vector<2x128xf32>
    %654 = arith.addf %650, %653 : vector<2x128xf32>
    %c0_562 = arith.constant 0 : index
    %c2_563 = arith.constant 2 : index
    %c0_564 = arith.constant 0 : index
    %c0_565 = arith.constant 0 : index
    %655 = vector.load %arg14[%c0_562, %c2_563, %c0_564, %c0_565] : memref<2x5x5x64xbf16, #tpu.memory_space<vmem>>, vector<2x1x1x64xbf16>
    %656 = vector.shape_cast %655 : vector<2x1x1x64xbf16> to vector<2x64xbf16>
    %cst_566 = arith.constant dense<0.000000e+00> : vector<2x128xf32>
    %657 = tpu.matmul %656, %618, %cst_566 {dimension_numbers = #tpu.dot_dimension_numbers<[1], [0], [0], [1], [0, 0, 1, 1], [], []>} : vector<2x64xbf16>, vector<64x128xbf16>, vector<2x128xf32> -> vector<2x128xf32>
    %658 = arith.addf %654, %657 : vector<2x128xf32>
    %c0_567 = arith.constant 0 : index
    %c2_568 = arith.constant 2 : index
    %c1_569 = arith.constant 1 : index
    %c0_570 = arith.constant 0 : index
    %659 = vector.load %arg14[%c0_567, %c2_568, %c1_569, %c0_570] : memref<2x5x5x64xbf16, #tpu.memory_space<vmem>>, vector<2x1x1x64xbf16>
    %660 = vector.shape_cast %659 : vector<2x1x1x64xbf16> to vector<2x64xbf16>
    %cst_571 = arith.constant dense<0.000000e+00> : vector<2x128xf32>
    %661 = tpu.matmul %660, %620, %cst_571 {dimension_numbers = #tpu.dot_dimension_numbers<[1], [0], [0], [1], [0, 0, 1, 1], [], []>} : vector<2x64xbf16>, vector<64x128xbf16>, vector<2x128xf32> -> vector<2x128xf32>
    %662 = arith.addf %658, %661 : vector<2x128xf32>
    %c0_572 = arith.constant 0 : index
    %c2_573 = arith.constant 2 : index
    %c2_574 = arith.constant 2 : index
    %c0_575 = arith.constant 0 : index
    %663 = vector.load %arg14[%c0_572, %c2_573, %c2_574, %c0_575] : memref<2x5x5x64xbf16, #tpu.memory_space<vmem>>, vector<2x1x1x64xbf16>
    %664 = vector.shape_cast %663 : vector<2x1x1x64xbf16> to vector<2x64xbf16>
    %cst_576 = arith.constant dense<0.000000e+00> : vector<2x128xf32>
    %665 = tpu.matmul %664, %622, %cst_576 {dimension_numbers = #tpu.dot_dimension_numbers<[1], [0], [0], [1], [0, 0, 1, 1], [], []>} : vector<2x64xbf16>, vector<64x128xbf16>, vector<2x128xf32> -> vector<2x128xf32>
    %666 = arith.addf %662, %665 : vector<2x128xf32>
    %667 = vector.broadcast %623 : vector<1x128xf32> to vector<2x128xf32>
    %668 = arith.addf %666, %667 : vector<2x128xf32>
    %cst_577 = arith.constant 0.000000e+00 : f32
    %669 = vector.broadcast %cst_577 : f32 to vector<2x128xf32>
    %670 = arith.maximumf %668, %669 : vector<2x128xf32>
    %671 = arith.truncf %670 : vector<2x128xf32> to vector<2x128xbf16>
    %cst_578 = arith.constant dense<0.000000e+00> : vector<2x512xf32>
    %672 = tpu.matmul %671, %625, %cst_578 {dimension_numbers = #tpu.dot_dimension_numbers<[1], [0], [0], [1], [0, 0, 1, 1], [], []>} : vector<2x128xbf16>, vector<128x512xbf16>, vector<2x512xf32> -> vector<2x512xf32>
    %c0_579 = arith.constant 0 : index
    %c0_580 = arith.constant 0 : index
    %c2_581 = arith.constant 2 : index
    %c0_582 = arith.constant 0 : index
    %673 = vector.load %arg14[%c0_579, %c0_580, %c2_581, %c0_582] : memref<2x5x5x64xbf16, #tpu.memory_space<vmem>>, vector<2x1x1x64xbf16>
    %674 = vector.shape_cast %673 : vector<2x1x1x64xbf16> to vector<2x64xbf16>
    %cst_583 = arith.constant dense<0.000000e+00> : vector<2x128xf32>
    %675 = tpu.matmul %674, %606, %cst_583 {dimension_numbers = #tpu.dot_dimension_numbers<[1], [0], [0], [1], [0, 0, 1, 1], [], []>} : vector<2x64xbf16>, vector<64x128xbf16>, vector<2x128xf32> -> vector<2x128xf32>
    %c0_584 = arith.constant 0 : index
    %c0_585 = arith.constant 0 : index
    %c3_586 = arith.constant 3 : index
    %c0_587 = arith.constant 0 : index
    %676 = vector.load %arg14[%c0_584, %c0_585, %c3_586, %c0_587] : memref<2x5x5x64xbf16, #tpu.memory_space<vmem>>, vector<2x1x1x64xbf16>
    %677 = vector.shape_cast %676 : vector<2x1x1x64xbf16> to vector<2x64xbf16>
    %cst_588 = arith.constant dense<0.000000e+00> : vector<2x128xf32>
    %678 = tpu.matmul %677, %608, %cst_588 {dimension_numbers = #tpu.dot_dimension_numbers<[1], [0], [0], [1], [0, 0, 1, 1], [], []>} : vector<2x64xbf16>, vector<64x128xbf16>, vector<2x128xf32> -> vector<2x128xf32>
    %679 = arith.addf %675, %678 : vector<2x128xf32>
    %c0_589 = arith.constant 0 : index
    %c0_590 = arith.constant 0 : index
    %c4_591 = arith.constant 4 : index
    %c0_592 = arith.constant 0 : index
    %680 = vector.load %arg14[%c0_589, %c0_590, %c4_591, %c0_592] : memref<2x5x5x64xbf16, #tpu.memory_space<vmem>>, vector<2x1x1x64xbf16>
    %681 = vector.shape_cast %680 : vector<2x1x1x64xbf16> to vector<2x64xbf16>
    %cst_593 = arith.constant dense<0.000000e+00> : vector<2x128xf32>
    %682 = tpu.matmul %681, %610, %cst_593 {dimension_numbers = #tpu.dot_dimension_numbers<[1], [0], [0], [1], [0, 0, 1, 1], [], []>} : vector<2x64xbf16>, vector<64x128xbf16>, vector<2x128xf32> -> vector<2x128xf32>
    %683 = arith.addf %679, %682 : vector<2x128xf32>
    %c0_594 = arith.constant 0 : index
    %c1_595 = arith.constant 1 : index
    %c2_596 = arith.constant 2 : index
    %c0_597 = arith.constant 0 : index
    %684 = vector.load %arg14[%c0_594, %c1_595, %c2_596, %c0_597] : memref<2x5x5x64xbf16, #tpu.memory_space<vmem>>, vector<2x1x1x64xbf16>
    %685 = vector.shape_cast %684 : vector<2x1x1x64xbf16> to vector<2x64xbf16>
    %cst_598 = arith.constant dense<0.000000e+00> : vector<2x128xf32>
    %686 = tpu.matmul %685, %612, %cst_598 {dimension_numbers = #tpu.dot_dimension_numbers<[1], [0], [0], [1], [0, 0, 1, 1], [], []>} : vector<2x64xbf16>, vector<64x128xbf16>, vector<2x128xf32> -> vector<2x128xf32>
    %687 = arith.addf %683, %686 : vector<2x128xf32>
    %c0_599 = arith.constant 0 : index
    %c1_600 = arith.constant 1 : index
    %c3_601 = arith.constant 3 : index
    %c0_602 = arith.constant 0 : index
    %688 = vector.load %arg14[%c0_599, %c1_600, %c3_601, %c0_602] : memref<2x5x5x64xbf16, #tpu.memory_space<vmem>>, vector<2x1x1x64xbf16>
    %689 = vector.shape_cast %688 : vector<2x1x1x64xbf16> to vector<2x64xbf16>
    %cst_603 = arith.constant dense<0.000000e+00> : vector<2x128xf32>
    %690 = tpu.matmul %689, %614, %cst_603 {dimension_numbers = #tpu.dot_dimension_numbers<[1], [0], [0], [1], [0, 0, 1, 1], [], []>} : vector<2x64xbf16>, vector<64x128xbf16>, vector<2x128xf32> -> vector<2x128xf32>
    %691 = arith.addf %687, %690 : vector<2x128xf32>
    %c0_604 = arith.constant 0 : index
    %c1_605 = arith.constant 1 : index
    %c4_606 = arith.constant 4 : index
    %c0_607 = arith.constant 0 : index
    %692 = vector.load %arg14[%c0_604, %c1_605, %c4_606, %c0_607] : memref<2x5x5x64xbf16, #tpu.memory_space<vmem>>, vector<2x1x1x64xbf16>
    %693 = vector.shape_cast %692 : vector<2x1x1x64xbf16> to vector<2x64xbf16>
    %cst_608 = arith.constant dense<0.000000e+00> : vector<2x128xf32>
    %694 = tpu.matmul %693, %616, %cst_608 {dimension_numbers = #tpu.dot_dimension_numbers<[1], [0], [0], [1], [0, 0, 1, 1], [], []>} : vector<2x64xbf16>, vector<64x128xbf16>, vector<2x128xf32> -> vector<2x128xf32>
    %695 = arith.addf %691, %694 : vector<2x128xf32>
    %c0_609 = arith.constant 0 : index
    %c2_610 = arith.constant 2 : index
    %c2_611 = arith.constant 2 : index
    %c0_612 = arith.constant 0 : index
    %696 = vector.load %arg14[%c0_609, %c2_610, %c2_611, %c0_612] : memref<2x5x5x64xbf16, #tpu.memory_space<vmem>>, vector<2x1x1x64xbf16>
    %697 = vector.shape_cast %696 : vector<2x1x1x64xbf16> to vector<2x64xbf16>
    %cst_613 = arith.constant dense<0.000000e+00> : vector<2x128xf32>
    %698 = tpu.matmul %697, %618, %cst_613 {dimension_numbers = #tpu.dot_dimension_numbers<[1], [0], [0], [1], [0, 0, 1, 1], [], []>} : vector<2x64xbf16>, vector<64x128xbf16>, vector<2x128xf32> -> vector<2x128xf32>
    %699 = arith.addf %695, %698 : vector<2x128xf32>
    %c0_614 = arith.constant 0 : index
    %c2_615 = arith.constant 2 : index
    %c3_616 = arith.constant 3 : index
    %c0_617 = arith.constant 0 : index
    %700 = vector.load %arg14[%c0_614, %c2_615, %c3_616, %c0_617] : memref<2x5x5x64xbf16, #tpu.memory_space<vmem>>, vector<2x1x1x64xbf16>
    %701 = vector.shape_cast %700 : vector<2x1x1x64xbf16> to vector<2x64xbf16>
    %cst_618 = arith.constant dense<0.000000e+00> : vector<2x128xf32>
    %702 = tpu.matmul %701, %620, %cst_618 {dimension_numbers = #tpu.dot_dimension_numbers<[1], [0], [0], [1], [0, 0, 1, 1], [], []>} : vector<2x64xbf16>, vector<64x128xbf16>, vector<2x128xf32> -> vector<2x128xf32>
    %703 = arith.addf %699, %702 : vector<2x128xf32>
    %c0_619 = arith.constant 0 : index
    %c2_620 = arith.constant 2 : index
    %c4_621 = arith.constant 4 : index
    %c0_622 = arith.constant 0 : index
    %704 = vector.load %arg14[%c0_619, %c2_620, %c4_621, %c0_622] : memref<2x5x5x64xbf16, #tpu.memory_space<vmem>>, vector<2x1x1x64xbf16>
    %705 = vector.shape_cast %704 : vector<2x1x1x64xbf16> to vector<2x64xbf16>
    %cst_623 = arith.constant dense<0.000000e+00> : vector<2x128xf32>
    %706 = tpu.matmul %705, %622, %cst_623 {dimension_numbers = #tpu.dot_dimension_numbers<[1], [0], [0], [1], [0, 0, 1, 1], [], []>} : vector<2x64xbf16>, vector<64x128xbf16>, vector<2x128xf32> -> vector<2x128xf32>
    %707 = arith.addf %703, %706 : vector<2x128xf32>
    %708 = vector.broadcast %623 : vector<1x128xf32> to vector<2x128xf32>
    %709 = arith.addf %707, %708 : vector<2x128xf32>
    %cst_624 = arith.constant 0.000000e+00 : f32
    %710 = vector.broadcast %cst_624 : f32 to vector<2x128xf32>
    %711 = arith.maximumf %709, %710 : vector<2x128xf32>
    %712 = arith.truncf %711 : vector<2x128xf32> to vector<2x128xbf16>
    %cst_625 = arith.constant dense<0.000000e+00> : vector<2x512xf32>
    %713 = tpu.matmul %712, %627, %cst_625 {dimension_numbers = #tpu.dot_dimension_numbers<[1], [0], [0], [1], [0, 0, 1, 1], [], []>} : vector<2x128xbf16>, vector<128x512xbf16>, vector<2x512xf32> -> vector<2x512xf32>
    %714 = arith.addf %672, %713 : vector<2x512xf32>
    %c0_626 = arith.constant 0 : index
    %c2_627 = arith.constant 2 : index
    %c0_628 = arith.constant 0 : index
    %c0_629 = arith.constant 0 : index
    %715 = vector.load %arg14[%c0_626, %c2_627, %c0_628, %c0_629] : memref<2x5x5x64xbf16, #tpu.memory_space<vmem>>, vector<2x1x1x64xbf16>
    %716 = vector.shape_cast %715 : vector<2x1x1x64xbf16> to vector<2x64xbf16>
    %cst_630 = arith.constant dense<0.000000e+00> : vector<2x128xf32>
    %717 = tpu.matmul %716, %606, %cst_630 {dimension_numbers = #tpu.dot_dimension_numbers<[1], [0], [0], [1], [0, 0, 1, 1], [], []>} : vector<2x64xbf16>, vector<64x128xbf16>, vector<2x128xf32> -> vector<2x128xf32>
    %c0_631 = arith.constant 0 : index
    %c2_632 = arith.constant 2 : index
    %c1_633 = arith.constant 1 : index
    %c0_634 = arith.constant 0 : index
    %718 = vector.load %arg14[%c0_631, %c2_632, %c1_633, %c0_634] : memref<2x5x5x64xbf16, #tpu.memory_space<vmem>>, vector<2x1x1x64xbf16>
    %719 = vector.shape_cast %718 : vector<2x1x1x64xbf16> to vector<2x64xbf16>
    %cst_635 = arith.constant dense<0.000000e+00> : vector<2x128xf32>
    %720 = tpu.matmul %719, %608, %cst_635 {dimension_numbers = #tpu.dot_dimension_numbers<[1], [0], [0], [1], [0, 0, 1, 1], [], []>} : vector<2x64xbf16>, vector<64x128xbf16>, vector<2x128xf32> -> vector<2x128xf32>
    %721 = arith.addf %717, %720 : vector<2x128xf32>
    %c0_636 = arith.constant 0 : index
    %c2_637 = arith.constant 2 : index
    %c2_638 = arith.constant 2 : index
    %c0_639 = arith.constant 0 : index
    %722 = vector.load %arg14[%c0_636, %c2_637, %c2_638, %c0_639] : memref<2x5x5x64xbf16, #tpu.memory_space<vmem>>, vector<2x1x1x64xbf16>
    %723 = vector.shape_cast %722 : vector<2x1x1x64xbf16> to vector<2x64xbf16>
    %cst_640 = arith.constant dense<0.000000e+00> : vector<2x128xf32>
    %724 = tpu.matmul %723, %610, %cst_640 {dimension_numbers = #tpu.dot_dimension_numbers<[1], [0], [0], [1], [0, 0, 1, 1], [], []>} : vector<2x64xbf16>, vector<64x128xbf16>, vector<2x128xf32> -> vector<2x128xf32>
    %725 = arith.addf %721, %724 : vector<2x128xf32>
    %c0_641 = arith.constant 0 : index
    %c3_642 = arith.constant 3 : index
    %c0_643 = arith.constant 0 : index
    %c0_644 = arith.constant 0 : index
    %726 = vector.load %arg14[%c0_641, %c3_642, %c0_643, %c0_644] : memref<2x5x5x64xbf16, #tpu.memory_space<vmem>>, vector<2x1x1x64xbf16>
    %727 = vector.shape_cast %726 : vector<2x1x1x64xbf16> to vector<2x64xbf16>
    %cst_645 = arith.constant dense<0.000000e+00> : vector<2x128xf32>
    %728 = tpu.matmul %727, %612, %cst_645 {dimension_numbers = #tpu.dot_dimension_numbers<[1], [0], [0], [1], [0, 0, 1, 1], [], []>} : vector<2x64xbf16>, vector<64x128xbf16>, vector<2x128xf32> -> vector<2x128xf32>
    %729 = arith.addf %725, %728 : vector<2x128xf32>
    %c0_646 = arith.constant 0 : index
    %c3_647 = arith.constant 3 : index
    %c1_648 = arith.constant 1 : index
    %c0_649 = arith.constant 0 : index
    %730 = vector.load %arg14[%c0_646, %c3_647, %c1_648, %c0_649] : memref<2x5x5x64xbf16, #tpu.memory_space<vmem>>, vector<2x1x1x64xbf16>
    %731 = vector.shape_cast %730 : vector<2x1x1x64xbf16> to vector<2x64xbf16>
    %cst_650 = arith.constant dense<0.000000e+00> : vector<2x128xf32>
    %732 = tpu.matmul %731, %614, %cst_650 {dimension_numbers = #tpu.dot_dimension_numbers<[1], [0], [0], [1], [0, 0, 1, 1], [], []>} : vector<2x64xbf16>, vector<64x128xbf16>, vector<2x128xf32> -> vector<2x128xf32>
    %733 = arith.addf %729, %732 : vector<2x128xf32>
    %c0_651 = arith.constant 0 : index
    %c3_652 = arith.constant 3 : index
    %c2_653 = arith.constant 2 : index
    %c0_654 = arith.constant 0 : index
    %734 = vector.load %arg14[%c0_651, %c3_652, %c2_653, %c0_654] : memref<2x5x5x64xbf16, #tpu.memory_space<vmem>>, vector<2x1x1x64xbf16>
    %735 = vector.shape_cast %734 : vector<2x1x1x64xbf16> to vector<2x64xbf16>
    %cst_655 = arith.constant dense<0.000000e+00> : vector<2x128xf32>
    %736 = tpu.matmul %735, %616, %cst_655 {dimension_numbers = #tpu.dot_dimension_numbers<[1], [0], [0], [1], [0, 0, 1, 1], [], []>} : vector<2x64xbf16>, vector<64x128xbf16>, vector<2x128xf32> -> vector<2x128xf32>
    %737 = arith.addf %733, %736 : vector<2x128xf32>
    %c0_656 = arith.constant 0 : index
    %c4_657 = arith.constant 4 : index
    %c0_658 = arith.constant 0 : index
    %c0_659 = arith.constant 0 : index
    %738 = vector.load %arg14[%c0_656, %c4_657, %c0_658, %c0_659] : memref<2x5x5x64xbf16, #tpu.memory_space<vmem>>, vector<2x1x1x64xbf16>
    %739 = vector.shape_cast %738 : vector<2x1x1x64xbf16> to vector<2x64xbf16>
    %cst_660 = arith.constant dense<0.000000e+00> : vector<2x128xf32>
    %740 = tpu.matmul %739, %618, %cst_660 {dimension_numbers = #tpu.dot_dimension_numbers<[1], [0], [0], [1], [0, 0, 1, 1], [], []>} : vector<2x64xbf16>, vector<64x128xbf16>, vector<2x128xf32> -> vector<2x128xf32>
    %741 = arith.addf %737, %740 : vector<2x128xf32>
    %c0_661 = arith.constant 0 : index
    %c4_662 = arith.constant 4 : index
    %c1_663 = arith.constant 1 : index
    %c0_664 = arith.constant 0 : index
    %742 = vector.load %arg14[%c0_661, %c4_662, %c1_663, %c0_664] : memref<2x5x5x64xbf16, #tpu.memory_space<vmem>>, vector<2x1x1x64xbf16>
    %743 = vector.shape_cast %742 : vector<2x1x1x64xbf16> to vector<2x64xbf16>
    %cst_665 = arith.constant dense<0.000000e+00> : vector<2x128xf32>
    %744 = tpu.matmul %743, %620, %cst_665 {dimension_numbers = #tpu.dot_dimension_numbers<[1], [0], [0], [1], [0, 0, 1, 1], [], []>} : vector<2x64xbf16>, vector<64x128xbf16>, vector<2x128xf32> -> vector<2x128xf32>
    %745 = arith.addf %741, %744 : vector<2x128xf32>
    %c0_666 = arith.constant 0 : index
    %c4_667 = arith.constant 4 : index
    %c2_668 = arith.constant 2 : index
    %c0_669 = arith.constant 0 : index
    %746 = vector.load %arg14[%c0_666, %c4_667, %c2_668, %c0_669] : memref<2x5x5x64xbf16, #tpu.memory_space<vmem>>, vector<2x1x1x64xbf16>
    %747 = vector.shape_cast %746 : vector<2x1x1x64xbf16> to vector<2x64xbf16>
    %cst_670 = arith.constant dense<0.000000e+00> : vector<2x128xf32>
    %748 = tpu.matmul %747, %622, %cst_670 {dimension_numbers = #tpu.dot_dimension_numbers<[1], [0], [0], [1], [0, 0, 1, 1], [], []>} : vector<2x64xbf16>, vector<64x128xbf16>, vector<2x128xf32> -> vector<2x128xf32>
    %749 = arith.addf %745, %748 : vector<2x128xf32>
    %750 = vector.broadcast %623 : vector<1x128xf32> to vector<2x128xf32>
    %751 = arith.addf %749, %750 : vector<2x128xf32>
    %cst_671 = arith.constant 0.000000e+00 : f32
    %752 = vector.broadcast %cst_671 : f32 to vector<2x128xf32>
    %753 = arith.maximumf %751, %752 : vector<2x128xf32>
    %754 = arith.truncf %753 : vector<2x128xf32> to vector<2x128xbf16>
    %cst_672 = arith.constant dense<0.000000e+00> : vector<2x512xf32>
    %755 = tpu.matmul %754, %629, %cst_672 {dimension_numbers = #tpu.dot_dimension_numbers<[1], [0], [0], [1], [0, 0, 1, 1], [], []>} : vector<2x128xbf16>, vector<128x512xbf16>, vector<2x512xf32> -> vector<2x512xf32>
    %756 = arith.addf %714, %755 : vector<2x512xf32>
    %c0_673 = arith.constant 0 : index
    %c2_674 = arith.constant 2 : index
    %c2_675 = arith.constant 2 : index
    %c0_676 = arith.constant 0 : index
    %757 = vector.load %arg14[%c0_673, %c2_674, %c2_675, %c0_676] : memref<2x5x5x64xbf16, #tpu.memory_space<vmem>>, vector<2x1x1x64xbf16>
    %758 = vector.shape_cast %757 : vector<2x1x1x64xbf16> to vector<2x64xbf16>
    %cst_677 = arith.constant dense<0.000000e+00> : vector<2x128xf32>
    %759 = tpu.matmul %758, %606, %cst_677 {dimension_numbers = #tpu.dot_dimension_numbers<[1], [0], [0], [1], [0, 0, 1, 1], [], []>} : vector<2x64xbf16>, vector<64x128xbf16>, vector<2x128xf32> -> vector<2x128xf32>
    %c0_678 = arith.constant 0 : index
    %c2_679 = arith.constant 2 : index
    %c3_680 = arith.constant 3 : index
    %c0_681 = arith.constant 0 : index
    %760 = vector.load %arg14[%c0_678, %c2_679, %c3_680, %c0_681] : memref<2x5x5x64xbf16, #tpu.memory_space<vmem>>, vector<2x1x1x64xbf16>
    %761 = vector.shape_cast %760 : vector<2x1x1x64xbf16> to vector<2x64xbf16>
    %cst_682 = arith.constant dense<0.000000e+00> : vector<2x128xf32>
    %762 = tpu.matmul %761, %608, %cst_682 {dimension_numbers = #tpu.dot_dimension_numbers<[1], [0], [0], [1], [0, 0, 1, 1], [], []>} : vector<2x64xbf16>, vector<64x128xbf16>, vector<2x128xf32> -> vector<2x128xf32>
    %763 = arith.addf %759, %762 : vector<2x128xf32>
    %c0_683 = arith.constant 0 : index
    %c2_684 = arith.constant 2 : index
    %c4_685 = arith.constant 4 : index
    %c0_686 = arith.constant 0 : index
    %764 = vector.load %arg14[%c0_683, %c2_684, %c4_685, %c0_686] : memref<2x5x5x64xbf16, #tpu.memory_space<vmem>>, vector<2x1x1x64xbf16>
    %765 = vector.shape_cast %764 : vector<2x1x1x64xbf16> to vector<2x64xbf16>
    %cst_687 = arith.constant dense<0.000000e+00> : vector<2x128xf32>
    %766 = tpu.matmul %765, %610, %cst_687 {dimension_numbers = #tpu.dot_dimension_numbers<[1], [0], [0], [1], [0, 0, 1, 1], [], []>} : vector<2x64xbf16>, vector<64x128xbf16>, vector<2x128xf32> -> vector<2x128xf32>
    %767 = arith.addf %763, %766 : vector<2x128xf32>
    %c0_688 = arith.constant 0 : index
    %c3_689 = arith.constant 3 : index
    %c2_690 = arith.constant 2 : index
    %c0_691 = arith.constant 0 : index
    %768 = vector.load %arg14[%c0_688, %c3_689, %c2_690, %c0_691] : memref<2x5x5x64xbf16, #tpu.memory_space<vmem>>, vector<2x1x1x64xbf16>
    %769 = vector.shape_cast %768 : vector<2x1x1x64xbf16> to vector<2x64xbf16>
    %cst_692 = arith.constant dense<0.000000e+00> : vector<2x128xf32>
    %770 = tpu.matmul %769, %612, %cst_692 {dimension_numbers = #tpu.dot_dimension_numbers<[1], [0], [0], [1], [0, 0, 1, 1], [], []>} : vector<2x64xbf16>, vector<64x128xbf16>, vector<2x128xf32> -> vector<2x128xf32>
    %771 = arith.addf %767, %770 : vector<2x128xf32>
    %c0_693 = arith.constant 0 : index
    %c3_694 = arith.constant 3 : index
    %c3_695 = arith.constant 3 : index
    %c0_696 = arith.constant 0 : index
    %772 = vector.load %arg14[%c0_693, %c3_694, %c3_695, %c0_696] : memref<2x5x5x64xbf16, #tpu.memory_space<vmem>>, vector<2x1x1x64xbf16>
    %773 = vector.shape_cast %772 : vector<2x1x1x64xbf16> to vector<2x64xbf16>
    %cst_697 = arith.constant dense<0.000000e+00> : vector<2x128xf32>
    %774 = tpu.matmul %773, %614, %cst_697 {dimension_numbers = #tpu.dot_dimension_numbers<[1], [0], [0], [1], [0, 0, 1, 1], [], []>} : vector<2x64xbf16>, vector<64x128xbf16>, vector<2x128xf32> -> vector<2x128xf32>
    %775 = arith.addf %771, %774 : vector<2x128xf32>
    %c0_698 = arith.constant 0 : index
    %c3_699 = arith.constant 3 : index
    %c4_700 = arith.constant 4 : index
    %c0_701 = arith.constant 0 : index
    %776 = vector.load %arg14[%c0_698, %c3_699, %c4_700, %c0_701] : memref<2x5x5x64xbf16, #tpu.memory_space<vmem>>, vector<2x1x1x64xbf16>
    %777 = vector.shape_cast %776 : vector<2x1x1x64xbf16> to vector<2x64xbf16>
    %cst_702 = arith.constant dense<0.000000e+00> : vector<2x128xf32>
    %778 = tpu.matmul %777, %616, %cst_702 {dimension_numbers = #tpu.dot_dimension_numbers<[1], [0], [0], [1], [0, 0, 1, 1], [], []>} : vector<2x64xbf16>, vector<64x128xbf16>, vector<2x128xf32> -> vector<2x128xf32>
    %779 = arith.addf %775, %778 : vector<2x128xf32>
    %c0_703 = arith.constant 0 : index
    %c4_704 = arith.constant 4 : index
    %c2_705 = arith.constant 2 : index
    %c0_706 = arith.constant 0 : index
    %780 = vector.load %arg14[%c0_703, %c4_704, %c2_705, %c0_706] : memref<2x5x5x64xbf16, #tpu.memory_space<vmem>>, vector<2x1x1x64xbf16>
    %781 = vector.shape_cast %780 : vector<2x1x1x64xbf16> to vector<2x64xbf16>
    %cst_707 = arith.constant dense<0.000000e+00> : vector<2x128xf32>
    %782 = tpu.matmul %781, %618, %cst_707 {dimension_numbers = #tpu.dot_dimension_numbers<[1], [0], [0], [1], [0, 0, 1, 1], [], []>} : vector<2x64xbf16>, vector<64x128xbf16>, vector<2x128xf32> -> vector<2x128xf32>
    %783 = arith.addf %779, %782 : vector<2x128xf32>
    %c0_708 = arith.constant 0 : index
    %c4_709 = arith.constant 4 : index
    %c3_710 = arith.constant 3 : index
    %c0_711 = arith.constant 0 : index
    %784 = vector.load %arg14[%c0_708, %c4_709, %c3_710, %c0_711] : memref<2x5x5x64xbf16, #tpu.memory_space<vmem>>, vector<2x1x1x64xbf16>
    %785 = vector.shape_cast %784 : vector<2x1x1x64xbf16> to vector<2x64xbf16>
    %cst_712 = arith.constant dense<0.000000e+00> : vector<2x128xf32>
    %786 = tpu.matmul %785, %620, %cst_712 {dimension_numbers = #tpu.dot_dimension_numbers<[1], [0], [0], [1], [0, 0, 1, 1], [], []>} : vector<2x64xbf16>, vector<64x128xbf16>, vector<2x128xf32> -> vector<2x128xf32>
    %787 = arith.addf %783, %786 : vector<2x128xf32>
    %c0_713 = arith.constant 0 : index
    %c4_714 = arith.constant 4 : index
    %c4_715 = arith.constant 4 : index
    %c0_716 = arith.constant 0 : index
    %788 = vector.load %arg14[%c0_713, %c4_714, %c4_715, %c0_716] : memref<2x5x5x64xbf16, #tpu.memory_space<vmem>>, vector<2x1x1x64xbf16>
    %789 = vector.shape_cast %788 : vector<2x1x1x64xbf16> to vector<2x64xbf16>
    %cst_717 = arith.constant dense<0.000000e+00> : vector<2x128xf32>
    %790 = tpu.matmul %789, %622, %cst_717 {dimension_numbers = #tpu.dot_dimension_numbers<[1], [0], [0], [1], [0, 0, 1, 1], [], []>} : vector<2x64xbf16>, vector<64x128xbf16>, vector<2x128xf32> -> vector<2x128xf32>
    %791 = arith.addf %787, %790 : vector<2x128xf32>
    %792 = vector.broadcast %623 : vector<1x128xf32> to vector<2x128xf32>
    %793 = arith.addf %791, %792 : vector<2x128xf32>
    %cst_718 = arith.constant 0.000000e+00 : f32
    %794 = vector.broadcast %cst_718 : f32 to vector<2x128xf32>
    %795 = arith.maximumf %793, %794 : vector<2x128xf32>
    %796 = arith.truncf %795 : vector<2x128xf32> to vector<2x128xbf16>
    %cst_719 = arith.constant dense<0.000000e+00> : vector<2x512xf32>
    %797 = tpu.matmul %796, %631, %cst_719 {dimension_numbers = #tpu.dot_dimension_numbers<[1], [0], [0], [1], [0, 0, 1, 1], [], []>} : vector<2x128xbf16>, vector<128x512xbf16>, vector<2x512xf32> -> vector<2x512xf32>
    %798 = arith.addf %756, %797 : vector<2x512xf32>
    %c0_720 = arith.constant 0 : index
    %c0_721 = arith.constant 0 : index
    %799 = vector.load %arg9[%c0_720, %c0_721] : memref<1x512xf32, #tpu.memory_space<vmem>>, vector<1x512xf32>
    %800 = vector.broadcast %799 : vector<1x512xf32> to vector<2x512xf32>
    %801 = arith.addf %798, %800 : vector<2x512xf32>
    %cst_722 = arith.constant 0.000000e+00 : f32
    %802 = vector.broadcast %cst_722 : f32 to vector<2x512xf32>
    %803 = arith.maximumf %801, %802 : vector<2x512xf32>
    %804 = arith.truncf %803 : vector<2x512xf32> to vector<2x512xbf16>
    %c0_723 = arith.constant 0 : index
    %c0_724 = arith.constant 0 : index
    %805 = vector.load %arg10[%c0_723, %c0_724] : memref<512x10xbf16, #tpu.memory_space<vmem>>, vector<512x10xbf16>
    %cst_725 = arith.constant dense<0.000000e+00> : vector<2x10xf32>
    %806 = tpu.matmul %804, %805, %cst_725 {dimension_numbers = #tpu.dot_dimension_numbers<[1], [0], [0], [1], [0, 0, 1, 1], [], []>} : vector<2x512xbf16>, vector<512x10xbf16>, vector<2x10xf32> -> vector<2x10xf32>
    %c0_726 = arith.constant 0 : index
    %c0_727 = arith.constant 0 : index
    %807 = vector.load %arg11[%c0_726, %c0_727] : memref<1x10xf32, #tpu.memory_space<vmem>>, vector<1x10xf32>
    %808 = vector.broadcast %807 : vector<1x10xf32> to vector<2x10xf32>
    %809 = arith.addf %806, %808 : vector<2x10xf32>
    %c0_728 = arith.constant 0 : index
    %c0_729 = arith.constant 0 : index
    %810 = vector.load %arg12[%c0_728, %c0_729] : memref<2x10xf32, #tpu.memory_space<vmem>>, vector<2x10xf32>
    tpu.vector_store %arg12[%c0_728, %c0_729], %809 {strides = array<i32>} : memref<2x10xf32, #tpu.memory_space<vmem>>, vector<2x10xf32>,
    return
  }
  func.func @transform_0(%arg0: i32) -> (i32, i32) {
    %c0_i32 = arith.constant 0 : i32
    %c0_i32_0 = arith.constant 0 : i32
    return %arg0, %c0_i32 : i32, i32
  }
  func.func @transform_1(%arg0: i32) -> (i32, i32) {
    %c0_i32 = arith.constant 0 : i32
    %c0_i32_0 = arith.constant 0 : i32
    %c0_i32_1 = arith.constant 0 : i32
    return %c0_i32, %c0_i32_0 : i32, i32
  }
  func.func @transform_2(%arg0: i32) -> (i32, i32) {
    %c0_i32 = arith.constant 0 : i32
    %c0_i32_0 = arith.constant 0 : i32
    %c0_i32_1 = arith.constant 0 : i32
    return %c0_i32, %c0_i32_0 : i32, i32
  }
  func.func @transform_3(%arg0: i32) -> (i32, i32, i32) {
    %c0_i32 = arith.constant 0 : i32
    %c0_i32_0 = arith.constant 0 : i32
    %c0_i32_1 = arith.constant 0 : i32
    %c0_i32_2 = arith.constant 0 : i32
    return %c0_i32, %c0_i32_0, %c0_i32_1 : i32, i32, i32
  }
  func.func @transform_4(%arg0: i32) -> (i32, i32) {
    %c0_i32 = arith.constant 0 : i32
    %c0_i32_0 = arith.constant 0 : i32
    %c0_i32_1 = arith.constant 0 : i32
    return %c0_i32, %c0_i32_0 : i32, i32
  }
  func.func @transform_5(%arg0: i32) -> (i32, i32, i32) {
    %c0_i32 = arith.constant 0 : i32
    %c0_i32_0 = arith.constant 0 : i32
    %c0_i32_1 = arith.constant 0 : i32
    %c0_i32_2 = arith.constant 0 : i32
    return %c0_i32, %c0_i32_0, %c0_i32_1 : i32, i32, i32
  }
  func.func @transform_6(%arg0: i32) -> (i32, i32) {
    %c0_i32 = arith.constant 0 : i32
    %c0_i32_0 = arith.constant 0 : i32
    %c0_i32_1 = arith.constant 0 : i32
    return %c0_i32, %c0_i32_0 : i32, i32
  }
  func.func @transform_7(%arg0: i32) -> (i32, i32, i32) {
    %c0_i32 = arith.constant 0 : i32
    %c0_i32_0 = arith.constant 0 : i32
    %c0_i32_1 = arith.constant 0 : i32
    %c0_i32_2 = arith.constant 0 : i32
    return %c0_i32, %c0_i32_0, %c0_i32_1 : i32, i32, i32
  }
  func.func @transform_8(%arg0: i32) -> (i32, i32) {
    %c0_i32 = arith.constant 0 : i32
    %c0_i32_0 = arith.constant 0 : i32
    %c0_i32_1 = arith.constant 0 : i32
    return %c0_i32, %c0_i32_0 : i32, i32
  }
  func.func @transform_9(%arg0: i32) -> (i32, i32) {
    %c0_i32 = arith.constant 0 : i32
    %c0_i32_0 = arith.constant 0 : i32
    %c0_i32_1 = arith.constant 0 : i32
    return %c0_i32, %c0_i32_0 : i32, i32
  }
  func.func @transform_10(%arg0: i32) -> (i32, i32) {
    %c0_i32 = arith.constant 0 : i32
    %c0_i32_0 = arith.constant 0 : i32
    %c0_i32_1 = arith.constant 0 : i32
    return %c0_i32, %c0_i32_0 : i32, i32
  }
  func.func @transform_11(%arg0: i32) -> (i32, i32) {
    %c0_i32 = arith.constant 0 : i32
    %c0_i32_0 = arith.constant 0 : i32
    return %arg0, %c0_i32 : i32, i32
  }
}

</mosaic_0001>

<bundles_post_ra>
// kernel: cnn_forward.1
= control target key start
LH: loop header
LB: loop body
LE: loop exit
PB: predicated region body
PF: predicated region fallthrough
CT: control target
= control target key end

     0   :  { %16 = vsyncpa [#allocation5], 0  ;;  %s19950_s0 = inlined_call_operand.vmem [shape: f32[2,784], index: 0, kind: input, shape index: {}]   ;;  %s19951_s1 = inlined_call_operand.vmem [shape: bf16[84,352], index: 1, kind: input, shape index: {}]   ;;  %s19952_s2 = inlined_call_operand.vmem [shape: f32[1,352], index: 2, kind: input, shape index: {}]   ;;  %s19953_s3 = inlined_call_operand.vmem [shape: bf16[3,96,64], index: 3, kind: input, shape index: {}]   ;;  %s19954_s4 = inlined_call_operand.vmem [shape: f32[1,64], index: 4, kind: input, shape index: {}]   ;;  %s19955_s5 = inlined_call_operand.vmem [shape: bf16[9,64,128], index: 5, kind: input, shape index: {}]   ;;  %s19956_s6 = inlined_call_operand.vmem [shape: f32[1,128], index: 6, kind: input, shape index: {}]   ;;  %s19957_s7 = inlined_call_operand.hbm [shape: bf16[4,128,512], index: 7, kind: input, shape index: {}]   ;;  %s19958_s8 = inlined_call_operand.vmem [shape: f32[1,512], index: 8, kind: input, shape index: {}]   ;;  %s19959_s9 = inlined_call_operand.vmem [shape: bf16[512,10], index: 9, kind: input, shape index: {}]   ;;  %s19960_s10 = inlined_call_operand.vmem [shape: f32[1,10], index: 10, kind: input, shape index: {}]   ;;  %s19961_s11 = inlined_call_operand.hbm [shape: f32[2,10], index: 11, kind: output, shape index: {}]  }
   0x1   :  { %17 = vsyncpa [#allocation6], 0  ;;  %s15486_s17 = smov [#allocation4]  }
   0x2   :  { %s37_s18 = sshll.u32 %s15486_s17, 4  ;;  %s38_s18 = int_to_ptr.vmem [resolvable:$true] %s37_s18 }
   0x3   :  { %s15450_s19 = scalar_lea.vmem %s38_s18, 16384  ;;  %p15455_p1 = scmp.lt.s32.totalorder %s38_s18, %s38_s18 }
   0x4   :  { %p15451_p0 = scmp.ne.s32.totalorder %s38_s18, %s15450_s19  ;;  %p15456_p2 = scmp.lt.s32.totalorder %s15450_s19, %s15450_s19 }
   0x6   :  { %p15457_p3 = por %p15456_p2, %p15455_p1 }
   0x8   :  { %p15458_p4 = pnand %p15457_p3, %p15451_p0 }
   0xa   :  { %15461 = shalt.err (!%p15458_p4)
}
   0xb   :  { %s15487_s20 = smov 256   ;;  %s15488_s21 = smov 16  }
   0xc   :  { %43 = dma.hbm_to_vmem [thread:$0]  %s19957_s7, 16384, %s38_s18, [#allocation5], %s15487_s20, %s15487_s20, %s15488_s21  }
   0xd   :  { %15482 = dma.done.wait [#allocation5], 16384  }
   0xe   :  { %15483 = vsyncadd [#allocation5], 4294950912  ;;  %v19991_v0 = vmov 0.0   ;;  %v19980_v1 = vmov 0   ;;  %vm19967_vm0 = vmmov 0   ;;  %vm187_vm1 = vcmask 1041408  }
   0xf   :  { %13016 = vmatprep.subr.bf16.mxu1 %v19991_v0  ;;  %229 = vmatprep.mubr.bf16.mxu0 %v19980_v1  ;;  %v11522_v2 = vld.sshfl [vmem:[%s19950_s0] sm:$0x33 pattern:$0x76325410]  ;;  %v74_v5 = vld [vmem:[%s19951_s1 + $0x78] sm:$0x33] }
  0x10   :  { %13028 = vmatprep.mubr.msk.bf16.mxu1 %vm19967_vm0, %v19991_v0  ;;  %v379_v3 = vpack.c.bf16 %v11522_v2, %v11522_v2  ;;  %v376_v4 = vcombine.high %v11522_v2, %v11522_v2  ;;  %v15579_v6 = vcombine.high %v74_v5, %v74_v5  ;;  %v11514_v7 = vcombine.low %v74_v5, %v74_v5  ;;  %v14845_v8 = vld [vmem:[%s19951_s1 + $0x80] ss:$0 sps:$4 sm:$0x33]   ;;  %v15587_v9 = vld [vmem:[%s19951_s1 + $0x64] ss:$12 sps:$4 sm:$0xff]   ;;  %s15492_s12 = smov 72  }
  0x11   :  { %v754_v11 = vld [vmem:[%s19950_s0 + $0x2] sm:$0x3]  ;;  %v15599_v13 = vsel %vm187_vm1, %v14845_v8, 0  ;;  %v15611_v15 = vld [vmem:[%s19951_s1 + $0x68] ss:$12 sps:$4 sm:$0xff]   ;;  %s15493_s28 = smov 88  }
  0x12   :  { %383 = vrot.lane.b32.xlu0 %v379_v3, %s15492_s12  ;;  %v380_v10 = vpack.c.bf16 %v376_v4, %v376_v4  ;;  %575 = vrot.lane.b32.xlu1 %v379_v3, %s15488_s21  ;;  %v15596_v12 = vsel %vm187_vm1, %v11514_v7, 0  ;;  %v15604_v14 = vld [vmem:[%s19951_s1 + $0x60] ss:$12 sps:$4 sm:$0xff]   ;;  %v755_v18 = vpack.c.bf16 %v754_v11, %v754_v11  ;;  %v15629_v21 = vld [vmem:[%s19951_s1 + $0x48] ss:$12 sps:$4 sm:$0xff]   ;;  %s15494_s29 = smov 32   ;;  %v80_v7 = vlaneseq }
  0x13   :  { %11517 = vmatprep.subr.msk.bf16.mxu0 %vm187_vm1, %v15579_v6  ;;  %13017 = vmatpush3.bf16.msra.mxu1 %v15599_v13  ;;  %v15618_v16 = vld [vmem:[%s19951_s1 + $0x4c] ss:$12 sps:$4 sm:$0xff]   ;;  %v11539_v17 = vld.sshfl [vmem:[%s19950_s0 + $0x2] sm:$0x33 pattern:$0x76325410] }
  0x14   :  { %202 = vmatpush1.bf16.msra.mxu0 %v15596_v12  ;;  %13018 = vmatprep.subr.bf16.mxu1 %v19991_v0  ;;  %v941_v19 = vpack.c.bf16 %v11539_v17, %v11539_v17  ;;  %v938_v20 = vcombine.high %v11539_v17, %v11539_v17  ;;  %v15634_v22 = vld [vmem:[%s19951_s1 + $0x50] ss:$12 sps:$4 sm:$0xff]   ;;  %v15641_v23 = vld [vmem:[%s19951_s1 + $0x34] ss:$12 sps:$4 sm:$0xff]   ;;  %v15653_v26 = vld [vmem:[%s19951_s1 + $0x38] ss:$12 sps:$4 sm:$0xff]  }
  0x15   :  { %203 = vmatprep.subr.bf16.mxu0 %v15587_v9  ;;  %v15646_v25 = vld [vmem:[%s19951_s1 + $0x30] ss:$12 sps:$4 sm:$0xff]   ;;  %v15665_v28 = vld [vmem:[%s19951_s1 + $0x18] ss:$12 sps:$4 sm:$0xff]   ;;  %v15670_v29 = vld [vmem:[%s19951_s1 + $0x20] ss:$12 sps:$4 sm:$0xff]  }
  0x16   :  { %385 = vrot.lane.b32.xlu0 %v380_v10, %s15492_s12  ;;  %577 = vrot.lane.b32.xlu1 %v380_v10, %s15488_s21  ;;  %v942_v24 = vpack.c.bf16 %v938_v20, %v938_v20  ;;  %v15660_v27 = vld [vmem:[%s19951_s1 + $0x1c] ss:$12 sps:$4 sm:$0xff]   ;;  %v15675_v30 = vld [vmem:[%s19951_s1 + $0x4] ss:$12 sps:$4 sm:$0xff]   ;;  %vm183_vm2 = vcmask 687104   ;;  %s15495_s13 = smov 104  }
  0x17   :  { %13019 = vmatpush3.bf16.msra.mxu1 %v15611_v15  ;;  %v1124_v31 = vld [vmem:[%s19950_s0 + $0x4] sm:$0x3]  ;;  %v15690_v36 = vld [vmem:[%s19951_s1] ss:$12 sps:$4 sm:$0xff]   ;;  %v15695_v37 = vld [vmem:[%s19951_s1 + $0x8] ss:$12 sps:$4 sm:$0xff]  }
  0x18   :  { %204 = vmatpush1.bf16.msra.mxu0 %v15604_v14  ;;  %13020 = vmatprep.subr.bf16.mxu1 %v19991_v0  ;;  %v11550_v32 = vld.sshfl [vmem:[%s19950_s0 + $0x4] sm:$0x33 pattern:$0x76325410]  ;;  %v1125_v33 = vpack.c.bf16 %v1124_v31, %v1124_v31  ;;  %v77_v38 = vld [vmem:[%s19950_s0] sm:$0x3] }
  0x19   :  { %205 = vmatprep.subr.bf16.mxu0 %v15618_v16  ;;  %v1308_v34 = vcombine.high %v11550_v32, %v11550_v32  ;;  %v1311_v35 = vpack.c.bf16 %v11550_v32, %v11550_v32  ;;  %s15496_s14 = smov 48   ;;  %v1494_v40 = vld [vmem:[%s19950_s0 + $0x6] sm:$0x3]  ;;  %v78_v42 = vpack.c.bf16 %v77_v38, %v77_v38  ;;  %s15497_s17 = smov 120   ;;  %vm387_vm3 = vcmask 588800  }
  0x1a   :  { %757 = vrot.lane.b32.xlu0 %v755_v18, %s15493_s28  ;;  %945 = vrot.lane.b32.xlu1 %v941_v19, %s15494_s29  ;;  %v1495_v41 = vpack.c.bf16 %v1494_v40, %v1494_v40  ;;  %v11561_v43 = vld.sshfl [vmem:[%s19950_s0 + $0x6] sm:$0x33 pattern:$0x76325410]  ;;  %s15498_s20 = smov 64   ;;  %s15499_s22 = smov 8  }
  0x1b   :  { %13021 = vmatpush3.bf16.msra.mxu1 %v15634_v22  ;;  %v1312_v39 = vpack.c.bf16 %v1308_v34, %v1308_v34  ;;  %v1678_v44 = vcombine.high %v11561_v43, %v11561_v43  ;;  %v1681_v45 = vpack.c.bf16 %v11561_v43, %v11561_v43  ;;  %v11573_v47 = vld.sshfl [vmem:[%s19950_s0 + $0x8] sm:$0x33 pattern:$0x76325410]  ;;  %s15500_s25 = smov 80   ;;  %vm579_vm4 = vcmask 130048  }
  0x1c   :  { %206 = vmatpush1.bf16.msra.mxu0 %v15629_v21  ;;  %13022 = vmatprep.subr.bf16.mxu1 %v19991_v0  ;;  %v2050_v48 = vcombine.high %v11573_v47, %v11573_v47  ;;  %v2053_v49 = vpack.c.bf16 %v11573_v47, %v11573_v47  ;;  %vm949_vm5 = vcmask 261120   ;;  %v15847_v61 = vld [vmem:[%s19951_s1 + $0x64] ss:$12 sps:$4 sm:$0xff]   ;;  %v15857_v62 = vld [vmem:[%s19951_s1 + $0x60] ss:$12 sps:$4 sm:$0xff]   ;;  %vm346_vm6 = vcmask 1040384  }
  0x1d   :  { %207 = vmatprep.subr.bf16.mxu0 %v15641_v23  ;;  %v1682_v46 = vpack.c.bf16 %v1678_v44, %v1678_v44  ;;  %v15863_v63 = vld [vmem:[%s19951_s1 + $0x68] ss:$12 sps:$4 sm:$0xff]   ;;  %v15869_v2 = vld [vmem:[%s19951_s1 + $0x4c] ss:$12 sps:$4 sm:$0xff]   ;;  %v15882_v4 = vld [vmem:[%s19951_s1 + $0x50] ss:$12 sps:$4 sm:$0xff]  }
  0x1e   :  { %947 = vrot.lane.b32.xlu0 %v942_v24, %s15494_s29  ;;  %1127 = vrot.lane.b32.xlu1 %v1125_v33, %s15495_s13  ;;  %v2054_v50 = vpack.c.bf16 %v2050_v48, %v2050_v48  ;;  %v15876_v3 = vld [vmem:[%s19951_s1 + $0x48] ss:$12 sps:$4 sm:$0xff]   ;;  %vm541_vm7 = vsmask.f32 7938  ;;  %vm543_vm8 = vsmask.f32 7954 }
  0x1f   :  { %13023 = vmatpush3.bf16.msra.mxu1 %v15653_v26  ;;  %v15888_v5 = vld [vmem:[%s19951_s1 + $0x34] ss:$12 sps:$4 sm:$0xff]   ;;  %vm349_vm9 = vcmask 1044484   ;;  %vm542_vm10 = vmand %vm346_vm6, %vm541_vm7  ;;  %vm19962_vm13 = vcmask 516096   ;;  %v15908_v10 = vshrl.u32 %v80_v7, 7 }
  0x20   :  { %208 = vmatpush1.bf16.msra.mxu0 %v15646_v25  ;;  %13024 = vmatprep.subr.bf16.mxu1 %v19991_v0  ;;  %vm544_vm11 = vmand %vm349_vm9, %vm543_vm8  ;;  %v15501_v17 = vmov 1966171168   ;;  %vm19964_vm15 = vsmask.f32 256  ;;  %v353_v7 = vld [vmem:[#allocation2] sm:$0x11] }
  0x21   :  { %209 = vmatprep.subr.bf16.mxu0 %v15660_v27  ;;  %vm15895_vm12 = vmor %vm544_vm11, %vm542_vm10  ;;  %20001 = vst [vmem:[#allocation10_spill] sm:$0xff] %v15908_v10  ;;  %v289_v18 = vunpack.c.l.s4 %v15501_v17  ;;  %v19970_v19 = vsub.s32 1, %v15908_v10  ;;  %v358_v17 = vld [vmem:[#allocation2 + $0x8] sm:$0x1]  ;;  %vm1319_vm10 = vcmask 392192   ;;  %vm19965_vm11 = vcmask 523264  }
  0x22   :  { %1315 = vrot.lane.b32.xlu0 %v1311_v35, %s15496_s14  ;;  %1317 = vrot.lane.b32.xlu1 %v1312_v39, %s15496_s14  ;;  %vm15912_vm14 = vmand %vm19962_vm13, %vm541_vm7  ;;  %v15503_v39 = vmov 858989090  }
  0x23   :  { %13025 = vmatpush3.bf16.msra.mxu1 %v15670_v29  ;;  %v322_v40 = vunpack.c.l.s4 %v15503_v39 }
  0x24   :  { %210 = vmatpush1.bf16.msra.mxu0 %v15665_v28  ;;  %13026 = vmatprep.subr.bf16.mxu1 %v19991_v0 }
  0x25   :  { %211 = vmatprep.subr.bf16.mxu0 %v15675_v30  ;;  %v323_v48 = vunpack.c.0.s8 %v322_v40 }
  0x26   :  { %1497 = vrot.lane.b32.xlu0 %v1495_v41, %s15497_s17  ;;  %1685 = vrot.lane.b32.xlu1 %v1681_v45, %s15498_s20 }
  0x27   :  { %13027 = vmatpush3.bf16.msra.mxu1 %v15695_v37 }
  0x28   :  { %212 = vmatpush1.bf16.msra.mxu0 %v15690_v36  ;;  %13032 = vmatprep.subr.bf16.mxu1 %v19991_v0 }
  0x29   :  { %11523 = vmatprep.subr.msk.bf16.mxu0 %vm187_vm1, %v15579_v6 }
  0x2a   :  { %13029 = vmatmul.mubr.msk.bf16.vlgmr.msra.gmra.mxu1 %vm183_vm2, %v78_v42  ;;  %1687 = vrot.lane.b32.xlu0 %v1682_v46, %s15498_s20 }
  0x2b   :  { %11518 = vmatmul.mubr.msk.bf16.vlgmr.msra.gmra.mxu0 %vm183_vm2, %v78_v42  ;;  %13033 = vmatpush3.bf16.msra.mxu1 %v15599_v13 }
  0x2c   :  { %397 = vmatpush1.bf16.msra.mxu0 %v15596_v12  ;;  %13034 = vmatprep.subr.bf16.mxu1 %v19991_v0 }
  0x2d   :  { %398 = vmatprep.subr.bf16.mxu0 %v15587_v9  ;;  %424 = vmatprep.mubr.bf16.mxu0 %v19980_v1 }
  0x2e   :  { %13044 = vmatprep.mubr.msk.bf16.mxu1 %vm19967_vm0, %v19991_v0  ;;  %1871 = vrot.lane.b32.xlu1 %v1681_v45, %s15499_s22 }
  0x2f   :  { %13035 = vmatpush3.bf16.msra.mxu1 %v15611_v15  ;;  %1873 = vrot.lane.b32.xlu0 %v1682_v46, %s15499_s22 }
  0x30   :  { %399 = vmatpush1.bf16.msra.mxu0 %v15604_v14  ;;  %13036 = vmatprep.subr.bf16.mxu1 %v19991_v0 }
  0x31   :  { %400 = vmatprep.subr.bf16.mxu0 %v15618_v16 }
  0x32   :  { %2057 = vrot.lane.b32.xlu1 %v2053_v49, %s15500_s25 }
  0x33   :  { %13037 = vmatpush3.bf16.msra.mxu1 %v15634_v22  ;;  %2059 = vrot.lane.b32.xlu0 %v2054_v50, %s15500_s25 }
  0x34   :  { %401 = vmatpush1.bf16.msra.mxu0 %v15629_v21  ;;  %13038 = vmatprep.subr.bf16.mxu1 %v19991_v0 }
  0x35   :  { %402 = vmatprep.subr.bf16.mxu0 %v15641_v23 }
  0x37   :  { %13039 = vmatpush3.bf16.msra.mxu1 %v15653_v26 }
  0x38   :  { %403 = vmatpush1.bf16.msra.mxu0 %v15646_v25  ;;  %13040 = vmatprep.subr.bf16.mxu1 %v19991_v0 }
  0x39   :  { %404 = vmatprep.subr.bf16.mxu0 %v15660_v27 }
  0x3b   :  { %13041 = vmatpush3.bf16.msra.mxu1 %v15670_v29 }
  0x3c   :  { %405 = vmatpush1.bf16.msra.mxu0 %v15665_v28  ;;  %13042 = vmatprep.subr.bf16.mxu1 %v19991_v0 }
  0x3d   :  { %406 = vmatprep.subr.bf16.mxu0 %v15675_v30 }
  0x3f   :  { %13043 = vmatpush3.bf16.msra.mxu1 %v15695_v37 }
  0x40   :  { %407 = vmatpush1.bf16.msra.mxu0 %v15690_v36  ;;  %13048 = vmatprep.subr.bf16.mxu1 %v19991_v0 }
  0x41   :  { %11529 = vmatprep.subr.msk.bf16.mxu0 %vm187_vm1, %v15579_v6 }
  0x84   :  { %v384_v51 = vpop.permute.xlu0 %383  ;;  %v576_v54 = vpop.permute.xlu1 %575 }
  0x88   :  { %v386_v52 = vpop.permute.xlu0 %385  ;;  %v578_v55 = vpop.permute.xlu1 %577 }
  0x89   :  { %v388_v53 = vsel %vm387_vm3, %v384_v51, %v386_v52  ;;  %v580_v56 = vsel %vm579_vm4, %v576_v54, %v578_v55  ;;  %vm350_vm3 = vsmask.f32 4352  ;;  %vm348_vm4 = vmand %vm346_vm6, %vm19964_vm15  ;;  %v15974_v51 = vld [vmem:[%s19951_s1 + $0x38] ss:$12 sps:$4 sm:$0xff]   ;;  %v15981_v52 = vld [vmem:[%s19951_s1 + $0x1c] ss:$12 sps:$4 sm:$0xff]   ;;  %v15989_v54 = vsub.s32 %v323_v48, %v15908_v10 }
  0x8a   :  { %11524 = vmatmul.mubr.msk.bf16.vlgmr.msra.gmra.mxu0 %vm183_vm2, %v388_v53  ;;  %13045 = vmatmul.mubr.msk.bf16.vlgmr.msra.gmra.mxu1 %vm183_vm2, %v388_v53  ;;  %vm356_vm6 = vcmask 778240  }
  0x8b   :  { %589 = vmatpush1.bf16.msra.mxu0 %v15596_v12  ;;  %13049 = vmatpush3.bf16.msra.mxu1 %v15599_v13 }
  0x8c   :  { %590 = vmatprep.subr.bf16.mxu0 %v15587_v9  ;;  %13050 = vmatprep.subr.bf16.mxu1 %v19991_v0  ;;  %v758_v57 = vpop.permute.xlu0 %757  ;;  %v946_v58 = vpop.permute.xlu1 %945 }
  0x8d   :  { %616 = vmatprep.mubr.bf16.mxu0 %v19980_v1  ;;  %13060 = vmatprep.mubr.msk.bf16.mxu1 %vm19967_vm0, %v19991_v0 }
  0x8f   :  { %591 = vmatpush1.bf16.msra.mxu0 %v15604_v14  ;;  %13051 = vmatpush3.bf16.msra.mxu1 %v15611_v15 }
  0x90   :  { %592 = vmatprep.subr.bf16.mxu0 %v15618_v16  ;;  %13052 = vmatprep.subr.bf16.mxu1 %v19991_v0  ;;  %v948_v59 = vpop.permute.xlu0 %947  ;;  %v1128_v20 = vpop.permute.xlu1 %1127 }
  0x91   :  { %v950_v60 = vsel %vm949_vm5, %v946_v58, %v948_v59  ;;  %vm351_vm5 = vmand %vm349_vm9, %vm350_vm3  ;;  %v15999_v59 = vld [vmem:[%s19951_s1 + $0x18] ss:$12 sps:$4 sm:$0xff]   ;;  %vm1875_vm3 = vcmask 64512  }
  0x92   :  { %vm15992_vm8 = vmor %vm351_vm5, %vm348_vm4  ;;  %vm19963_vm4 = vsmask.f32 1280  ;;  %vm736_vm5 = vcmask 1045509  }
  0x93   :  { %593 = vmatpush1.bf16.msra.mxu0 %v15629_v21  ;;  %13053 = vmatpush3.bf16.msra.mxu1 %v15634_v22  ;;  %vm16010_vm9 = vmand %vm356_vm6, %vm19964_vm15 }
  0x94   :  { %594 = vmatprep.subr.bf16.mxu0 %v15641_v23  ;;  %13054 = vmatprep.subr.bf16.mxu1 %v19991_v0 }
  0x97   :  { %595 = vmatpush1.bf16.msra.mxu0 %v15646_v25  ;;  %13055 = vmatpush3.bf16.msra.mxu1 %v15653_v26 }
  0x98   :  { %596 = vmatprep.subr.bf16.mxu0 %v15660_v27  ;;  %13056 = vmatprep.subr.bf16.mxu1 %v19991_v0 }
  0x9b   :  { %597 = vmatpush1.bf16.msra.mxu0 %v15665_v28  ;;  %13057 = vmatpush3.bf16.msra.mxu1 %v15670_v29 }
  0x9c   :  { %598 = vmatprep.subr.bf16.mxu0 %v15675_v30  ;;  %13058 = vmatprep.subr.bf16.mxu1 %v19991_v0 }
  0x9f   :  { %599 = vmatpush1.bf16.msra.mxu0 %v15690_v36  ;;  %13059 = vmatpush3.bf16.msra.mxu1 %v15695_v37 }
  0xa0   :  { %11534 = vmatprep.subr.msk.bf16.mxu0 %vm187_vm1, %v15579_v6  ;;  %13064 = vmatprep.subr.bf16.mxu1 %v19991_v0 }
  0xa2   :  { %11530 = vmatmul.mubr.msk.bf16.vlgmr.msra.gmra.mxu0 %vm183_vm2, %v580_v56  ;;  %13061 = vmatmul.mubr.msk.bf16.vlgmr.msra.gmra.mxu1 %vm183_vm2, %v580_v56 }
  0xa3   :  { %767 = vmatpush1.bf16.msra.mxu0 %v15596_v12  ;;  %13065 = vmatpush3.bf16.msra.mxu1 %v15599_v13 }
  0xa4   :  { %768 = vmatprep.subr.bf16.mxu0 %v15587_v9  ;;  %13066 = vmatprep.subr.bf16.mxu1 %v19991_v0 }
  0xa5   :  { %794 = vmatprep.mubr.bf16.mxu0 %v19980_v1  ;;  %13076 = vmatprep.mubr.msk.bf16.mxu1 %vm19967_vm0, %v19991_v0 }
  0xa7   :  { %769 = vmatpush1.bf16.msra.mxu0 %v15604_v14  ;;  %13067 = vmatpush3.bf16.msra.mxu1 %v15611_v15 }
  0xa8   :  { %770 = vmatprep.subr.bf16.mxu0 %v15618_v16  ;;  %13068 = vmatprep.subr.bf16.mxu1 %v19991_v0 }
  0xab   :  { %771 = vmatpush1.bf16.msra.mxu0 %v15629_v21  ;;  %13069 = vmatpush3.bf16.msra.mxu1 %v15634_v22 }
  0xac   :  { %772 = vmatprep.subr.bf16.mxu0 %v15641_v23  ;;  %13070 = vmatprep.subr.bf16.mxu1 %v19991_v0 }
  0xaf   :  { %773 = vmatpush1.bf16.msra.mxu0 %v15646_v25  ;;  %13071 = vmatpush3.bf16.msra.mxu1 %v15653_v26 }
  0xb0   :  { %774 = vmatprep.subr.bf16.mxu0 %v15660_v27  ;;  %13072 = vmatprep.subr.bf16.mxu1 %v19991_v0 }
  0xb3   :  { %775 = vmatpush1.bf16.msra.mxu0 %v15665_v28  ;;  %13073 = vmatpush3.bf16.msra.mxu1 %v15670_v29 }
  0xb4   :  { %776 = vmatprep.subr.bf16.mxu0 %v15675_v30  ;;  %13074 = vmatprep.subr.bf16.mxu1 %v19991_v0 }
  0xb7   :  { %777 = vmatpush1.bf16.msra.mxu0 %v15690_v36  ;;  %13075 = vmatpush3.bf16.msra.mxu1 %v15695_v37 }
  0xb8   :  { %11540 = vmatprep.subr.msk.bf16.mxu0 %vm187_vm1, %v15579_v6  ;;  %13080 = vmatprep.subr.bf16.mxu1 %v19991_v0 }
  0xba   :  { %11535 = vmatmul.mubr.msk.bf16.vlgmr.msra.gmra.mxu0 %vm183_vm2, %v758_v57  ;;  %13077 = vmatmul.mubr.msk.bf16.vlgmr.msra.gmra.mxu1 %vm183_vm2, %v758_v57 }
  0xbb   :  { %959 = vmatpush1.bf16.msra.mxu0 %v15596_v12  ;;  %13081 = vmatpush3.bf16.msra.mxu1 %v15599_v13 }
  0xbc   :  { %960 = vmatprep.subr.bf16.mxu0 %v15587_v9  ;;  %13082 = vmatprep.subr.bf16.mxu1 %v19991_v0  ;;  %v15902_v9 = vld [vmem:[%s19951_s1 + $0x30] ss:$12 sps:$4 sm:$0xff]  }
  0xbd   :  { %986 = vmatprep.mubr.bf16.mxu0 %v19980_v1  ;;  %13092 = vmatprep.mubr.msk.bf16.mxu1 %vm19967_vm0, %v19991_v0 }
  0xbf   :  { %961 = vmatpush1.bf16.msra.mxu0 %v15604_v14  ;;  %13083 = vmatpush3.bf16.msra.mxu1 %v15611_v15  ;;  %v19977_v14 = vsub.s32 0, %v15908_v10  ;;  %v19976_v15 = vsub.s32 2, %v15908_v10 }
  0xc0   :  { %962 = vmatprep.subr.bf16.mxu0 %v15618_v16  ;;  %13084 = vmatprep.subr.bf16.mxu1 %v19991_v0  ;;  %v76_v16 = vld [vmem:[%s19952_s2] sm:$0x7] }
  0xc1   :  { %v15943_v24 = vrot.slane %v76_v16, %v19970_v19 }
  0xc3   :  { %963 = vmatpush1.bf16.msra.mxu0 %v15629_v21  ;;  %13085 = vmatpush3.bf16.msra.mxu1 %v15634_v22  ;;  %v15933_v21 = vrot.slane %v76_v16, %v19977_v14  ;;  %v15937_v22 = vrot.slane %v76_v16, %v19976_v15 }
  0xc4   :  { %964 = vmatprep.subr.bf16.mxu0 %v15641_v23  ;;  %13086 = vmatprep.subr.bf16.mxu1 %v19991_v0  ;;  %v290_v23 = vunpack.c.0.s8 %v289_v18  ;;  %v16017_v18 = vld [vmem:[%s19951_s1 + $0x4] ss:$12 sps:$4 sm:$0xff]  }
  0xc6   :  { %v15955_v32 = vsub.s32 %v290_v23, %v15908_v10  ;;  %v1316_v23 = vpop.permute.xlu0 %1315 }
  0xc7   :  { %965 = vmatpush1.bf16.msra.mxu0 %v15646_v25  ;;  %13087 = vmatpush3.bf16.msra.mxu1 %v15653_v26 }
  0xc8   :  { %966 = vmatprep.subr.bf16.mxu0 %v15660_v27  ;;  %13088 = vmatprep.subr.bf16.mxu1 %v19991_v0 }
  0xca   :  { %v1498_v40 = vpop.permute.xlu0 %1497 }
  0xcb   :  { %967 = vmatpush1.bf16.msra.mxu0 %v15665_v28  ;;  %13089 = vmatpush3.bf16.msra.mxu1 %v15670_v29 }
  0xcc   :  { %968 = vmatprep.subr.bf16.mxu0 %v15675_v30  ;;  %13090 = vmatprep.subr.bf16.mxu1 %v19991_v0 }
  0xcf   :  { %969 = vmatpush1.bf16.msra.mxu0 %v15690_v36  ;;  %13091 = vmatpush3.bf16.msra.mxu1 %v15695_v37 }
  0xd0   :  { %11545 = vmatprep.subr.msk.bf16.mxu0 %vm187_vm1, %v15579_v6  ;;  %13096 = vmatprep.subr.bf16.mxu1 %v19991_v0 }
  0xd2   :  { %11541 = vmatmul.mubr.msk.bf16.vlgmr.msra.gmra.mxu0 %vm183_vm2, %v950_v60  ;;  %13093 = vmatmul.mubr.msk.bf16.vlgmr.msra.gmra.mxu1 %vm183_vm2, %v950_v60  ;;  %v16005_v60 = vld [vmem:[%s19951_s1 + $0x20] ss:$12 sps:$4 sm:$0xff]  }
  0xd3   :  { %1137 = vmatpush1.bf16.msra.mxu0 %v15596_v12  ;;  %13097 = vmatpush3.bf16.msra.mxu1 %v15599_v13 }
  0xd4   :  { %1138 = vmatprep.subr.bf16.mxu0 %v15847_v61  ;;  %13098 = vmatprep.subr.bf16.mxu1 %v19991_v0 }
  0xd5   :  { %1164 = vmatprep.mubr.bf16.mxu0 %v19980_v1  ;;  %13108 = vmatprep.mubr.msk.bf16.mxu1 %vm19967_vm0, %v19991_v0 }
  0xd7   :  { %1139 = vmatpush1.bf16.msra.mxu0 %v15857_v62  ;;  %13099 = vmatpush3.bf16.msra.mxu1 %v15863_v63 }
  0xd8   :  { %1140 = vmatprep.subr.bf16.mxu0 %v15869_v2  ;;  %13100 = vmatprep.subr.bf16.mxu1 %v19991_v0 }
  0xdb   :  { %1141 = vmatpush1.bf16.msra.mxu0 %v15876_v3  ;;  %13101 = vmatpush3.bf16.msra.mxu1 %v15882_v4 }
  0xdc   :  { %1142 = vmatprep.subr.bf16.mxu0 %v15888_v5  ;;  %13102 = vmatprep.subr.bf16.mxu1 %v19991_v0 }
  0xdf   :  { %1143 = vmatpush1.bf16.msra.mxu0 %v15902_v9  ;;  %13103 = vmatpush3.bf16.msra.mxu1 %v15653_v26 }
  0xe0   :  { %1144 = vmatprep.subr.bf16.mxu0 %v15660_v27  ;;  %13104 = vmatprep.subr.bf16.mxu1 %v19991_v0 }
  0xe3   :  { %1145 = vmatpush1.bf16.msra.mxu0 %v15665_v28  ;;  %13105 = vmatpush3.bf16.msra.mxu1 %v15670_v29 }
  0xe4   :  { %1146 = vmatprep.subr.bf16.mxu0 %v15675_v30  ;;  %13106 = vmatprep.subr.bf16.mxu1 %v19991_v0 }
  0xe7   :  { %1147 = vmatpush1.bf16.msra.mxu0 %v15690_v36  ;;  %13107 = vmatpush3.bf16.msra.mxu1 %v15695_v37  ;;  %v15502_v37 = vmov 286326784  }
  0xe8   :  { %11551 = vmatprep.subr.msk.bf16.mxu0 %vm187_vm1, %v15579_v6  ;;  %13112 = vmatprep.subr.bf16.mxu1 %v19991_v0  ;;  %v315_v38 = vunpack.c.l.s4 %v15502_v37 }
  0xea   :  { %11546 = vmatmul.mubr.msk.bf16.vlgmr.msra.gmra.mxu0 %vm183_vm2, %v1128_v20  ;;  %13109 = vmatmul.mubr.msk.bf16.vlgmr.msra.gmra.mxu1 %vm183_vm2, %v1128_v20  ;;  %v272_v26 = vpop.f32.mrf.mxu1  ;;  %v316_v47 = vunpack.c.0.s8 %v315_v38  ;;  %v1318_v20 = vpop.permute.xlu1 %1317 }
  0xeb   :  { %1329 = vmatpush1.bf16.msra.mxu0 %v15596_v12  ;;  %13113 = vmatpush3.bf16.msra.mxu1 %v15599_v13  ;;  %v231_v25 = vpop.f32.mrf.mxu0  ;;  %v273_v28 = vadd.f32 %v272_v26, %v15937_v22  ;;  %v1320_v37 = vsel %vm1319_vm10, %v1316_v23, %v1318_v20 }
  0xec   :  { %1330 = vmatprep.subr.bf16.mxu0 %v15847_v61  ;;  %13114 = vmatprep.subr.bf16.mxu1 %v19991_v0  ;;  %v232_v27 = vadd.f32 %v231_v25, %v15933_v21  ;;  %v13030_v30 = vpop.f32.mrf.mxu1  ;;  %v15986_v53 = vsub.s32 %v316_v47, %v15908_v10 }
  0xed   :  { %1356 = vmatprep.mubr.bf16.mxu0 %v19980_v1  ;;  %13124 = vmatprep.mubr.msk.bf16.mxu1 %vm19967_vm0, %v19991_v0  ;;  %v233_v29 = vpop.f32.mrf.mxu0  ;;  %v280_v34 = vmax.f32 %v273_v28, 0.0  ;;  %v361_v28 = vld [vmem:[#allocation2 + $0x18] sm:$0x11] }
  0xee   :  { %v278_v31 = vmax.f32 %v232_v27, 0.0  ;;  %v234_v33 = vadd.f32 %v233_v29, %v15943_v24  ;;  %v275_v36 = vpop.f32.mrf.mxu1  ;;  %v364_v29 = vld [vmem:[#allocation2 + $0x20] sm:$0x1] }
  0xef   :  { %1331 = vmatpush1.bf16.msra.mxu0 %v15857_v62  ;;  %13115 = vmatpush3.bf16.msra.mxu1 %v15863_v63  ;;  %v235_v35 = vpop.f32.mrf.mxu0  ;;  %v283_v42 = vpack.c.bf16 %v280_v34, %v280_v34  ;;  %v16038_v36 = vld [vmem:[%s19951_s1 + $0x8] ss:$12 sps:$4 sm:$0xff]  }
  0xf0   :  { %1332 = vmatprep.subr.bf16.mxu0 %v15869_v2  ;;  %13116 = vmatprep.subr.bf16.mxu1 %v19991_v0  ;;  %v279_v41 = vmax.f32 %v234_v33, 0.0  ;;  %v13031_v44 = vpop.f32.mrf.mxu1  ;;  %v16032_v35 = vld [vmem:[%s19951_s1] ss:$12 sps:$4 sm:$0xff]  }
  0xf1   :  { %v236_v43 = vpop.f32.mrf.mxu0  ;;  %v301_v46 = vrot.slane %v283_v42, %v15955_v32  ;;  %v1688_v42 = vpop.permute.xlu0 %1687 }
  0xf2   :  { %v11520_v45 = vpack.c.bf16 %v279_v41, %v278_v31  ;;  %v1686_v41 = vpop.permute.xlu1 %1685 }
  0xf3   :  { %1333 = vmatpush1.bf16.msra.mxu0 %v15876_v3  ;;  %13117 = vmatpush3.bf16.msra.mxu1 %v15882_v4  ;;  %v1690_v43 = vsel %vm19965_vm11, %v1686_v41, %v1688_v42  ;;  %v16198_v41 = vld [vmem:[%s19953_s3 + $0x28] sm:$0xff]  }
  0xf4   :  { %1334 = vmatprep.subr.bf16.mxu0 %v15888_v5  ;;  %13118 = vmatprep.subr.bf16.mxu1 %v19991_v0  ;;  %v294_v49 = vrot.slane %v11520_v45, %v15955_v32 }
  0xf5   :  { %v1874_v45 = vpop.permute.xlu0 %1873 }
  0xf6   :  { %v302_v50 = vcombine.low %v294_v49, %v301_v46  ;;  %v1872_v44 = vpop.permute.xlu1 %1871 }
  0xf7   :  { %1335 = vmatpush1.bf16.msra.mxu0 %v15902_v9  ;;  %13119 = vmatpush3.bf16.msra.mxu1 %v15974_v51  ;;  %v1876_v46 = vsel %vm1875_vm3, %v1872_v44, %v1874_v45  ;;  %v16211_v44 = vld [vmem:[%s19953_s3 + $0x50] sm:$0xff]   ;;  %v16216_v45 = vld [vmem:[%s19953_s3 + $0x20] sm:$0xff]  }
  0xf8   :  { %1336 = vmatprep.subr.bf16.mxu0 %v15981_v52  ;;  %13120 = vmatprep.subr.bf16.mxu1 %v19991_v0  ;;  %v309_v55 = vrot.slane %v302_v50, %v15955_v32 }
  0xfa   :  { %v311_v56 = vunpack.i.h.s16 %v309_v55  ;;  %v11521_v57 = vpack.i.b16 %v309_v55, %v309_v55 }
  0xfb   :  { %1337 = vmatpush1.bf16.msra.mxu0 %v15999_v59  ;;  %13121 = vmatpush3.bf16.msra.mxu1 %v16005_v60 }
  0xfc   :  { %1338 = vmatprep.subr.bf16.mxu0 %v16017_v18  ;;  %13122 = vmatprep.subr.bf16.mxu1 %v19991_v0  ;;  %v313_v25 = vpack.i.b16 %v311_v56, %v311_v56  ;;  %v320_v26 = vrot.slane %v11521_v57, %v15986_v53  ;;  %v327_v27 = vrot.slane %v11521_v57, %v15989_v54 }
  0xfe   :  { %v334_v30 = vrot.slane %v313_v25, %v15986_v53  ;;  %v341_v31 = vrot.slane %v313_v25, %v15989_v54  ;;  %v354_v33 = vsel %vm15992_vm8, %v320_v26, %v353_v7  ;;  %v359_v34 = vsel %vm16010_vm9, %v327_v27, %v358_v17 }
  0xff   :  { %1339 = vmatpush1.bf16.msra.mxu0 %v16032_v35  ;;  %13123 = vmatpush3.bf16.msra.mxu1 %v16038_v36  ;;  %355 = vst [vmem:[#allocation2] sm:$0x11] %v354_v33  ;;  %360 = vst [vmem:[#allocation2 + $0x8] sm:$0x1] %v359_v34 }
 0x100   :  { %11556 = vmatprep.subr.msk.bf16.mxu0 %vm187_vm1, %v15579_v6  ;;  %13128 = vmatprep.subr.bf16.mxu1 %v19991_v0  ;;  %v362_v38 = vsel %vm15992_vm8, %v334_v30, %v361_v28  ;;  %v365_v39 = vsel %vm16010_vm9, %v341_v31, %v364_v29  ;;  %v2060_v30 = vpop.permute.xlu0 %2059 }
 0x101   :  { %363 = vst [vmem:[#allocation2 + $0x18] sm:$0x11] %v362_v38  ;;  %366 = vst [vmem:[#allocation2 + $0x20] sm:$0x1] %v365_v39 }
 0x102   :  { %11552 = vmatmul.mubr.msk.bf16.vlgmr.msra.gmra.mxu0 %vm183_vm2, %v1320_v37  ;;  %13125 = vmatmul.mubr.msk.bf16.vlgmr.msra.gmra.mxu1 %vm183_vm2, %v1320_v37 }
 0x103   :  { %1507 = vmatpush1.bf16.msra.mxu0 %v15596_v12  ;;  %13129 = vmatpush3.bf16.msra.mxu1 %v15599_v13 }
 0x104   :  { %1508 = vmatprep.subr.bf16.mxu0 %v15847_v61  ;;  %13130 = vmatprep.subr.bf16.mxu1 %v19991_v0 }
 0x105   :  { %1534 = vmatprep.mubr.bf16.mxu0 %v19980_v1  ;;  %13140 = vmatprep.mubr.msk.bf16.mxu1 %vm19967_vm0, %v19991_v0 }
 0x107   :  { %1509 = vmatpush1.bf16.msra.mxu0 %v15857_v62  ;;  %13131 = vmatpush3.bf16.msra.mxu1 %v15863_v63 }
 0x108   :  { %1510 = vmatprep.subr.bf16.mxu0 %v15869_v2  ;;  %13132 = vmatprep.subr.bf16.mxu1 %v19991_v0  ;;  %v556_v37 = vld [vmem:[#allocation2 + $0x20] sm:$0x1] }
 0x10b   :  { %1511 = vmatpush1.bf16.msra.mxu0 %v15876_v3  ;;  %13133 = vmatpush3.bf16.msra.mxu1 %v15882_v4 }
 0x10c   :  { %1512 = vmatprep.subr.bf16.mxu0 %v15888_v5  ;;  %13134 = vmatprep.subr.bf16.mxu1 %v19991_v0 }
 0x10f   :  { %1513 = vmatpush1.bf16.msra.mxu0 %v15902_v9  ;;  %13135 = vmatpush3.bf16.msra.mxu1 %v15974_v51 }
 0x110   :  { %1514 = vmatprep.subr.bf16.mxu0 %v15981_v52  ;;  %13136 = vmatprep.subr.bf16.mxu1 %v19991_v0 }
 0x113   :  { %1515 = vmatpush1.bf16.msra.mxu0 %v15999_v59  ;;  %13137 = vmatpush3.bf16.msra.mxu1 %v16005_v60 }
 0x114   :  { %1516 = vmatprep.subr.bf16.mxu0 %v16017_v18  ;;  %13138 = vmatprep.subr.bf16.mxu1 %v19991_v0 }
 0x117   :  { %1517 = vmatpush1.bf16.msra.mxu0 %v16032_v35  ;;  %13139 = vmatpush3.bf16.msra.mxu1 %v16038_v36 }
 0x118   :  { %11562 = vmatprep.subr.msk.bf16.mxu0 %vm187_vm1, %v15579_v6  ;;  %13144 = vmatprep.subr.bf16.mxu1 %v19991_v0 }
 0x11a   :  { %11557 = vmatmul.mubr.msk.bf16.vlgmr.msra.gmra.mxu0 %vm183_vm2, %v1498_v40  ;;  %13141 = vmatmul.mubr.msk.bf16.vlgmr.msra.gmra.mxu1 %vm183_vm2, %v1498_v40  ;;  %v16193_v40 = vld [vmem:[%s19953_s3 + $0x58] sm:$0xff]  }
 0x11b   :  { %1699 = vmatpush1.bf16.msra.mxu0 %v15596_v12  ;;  %13145 = vmatpush3.bf16.msra.mxu1 %v15599_v13 }
 0x11c   :  { %1700 = vmatprep.subr.bf16.mxu0 %v15847_v61  ;;  %13146 = vmatprep.subr.bf16.mxu1 %v19991_v0 }
 0x11d   :  { %1726 = vmatprep.mubr.bf16.mxu0 %v19980_v1  ;;  %13156 = vmatprep.mubr.msk.bf16.mxu1 %vm19967_vm0, %v19991_v0 }
 0x11f   :  { %1701 = vmatpush1.bf16.msra.mxu0 %v15857_v62  ;;  %13147 = vmatpush3.bf16.msra.mxu1 %v15863_v63 }
 0x120   :  { %1702 = vmatprep.subr.bf16.mxu0 %v15869_v2  ;;  %13148 = vmatprep.subr.bf16.mxu1 %v19991_v0 }
 0x123   :  { %1703 = vmatpush1.bf16.msra.mxu0 %v15876_v3  ;;  %13149 = vmatpush3.bf16.msra.mxu1 %v15882_v4 }
 0x124   :  { %1704 = vmatprep.subr.bf16.mxu0 %v15888_v5  ;;  %13150 = vmatprep.subr.bf16.mxu1 %v19991_v0 }
 0x127   :  { %1705 = vmatpush1.bf16.msra.mxu0 %v15902_v9  ;;  %13151 = vmatpush3.bf16.msra.mxu1 %v15974_v51 }
 0x128   :  { %1706 = vmatprep.subr.bf16.mxu0 %v15981_v52  ;;  %13152 = vmatprep.subr.bf16.mxu1 %v19991_v0 }
 0x12b   :  { %1707 = vmatpush1.bf16.msra.mxu0 %v15999_v59  ;;  %13153 = vmatpush3.bf16.msra.mxu1 %v16005_v60 }
 0x12c   :  { %1708 = vmatprep.subr.bf16.mxu0 %v16017_v18  ;;  %13154 = vmatprep.subr.bf16.mxu1 %v19991_v0 }
 0x12f   :  { %1709 = vmatpush1.bf16.msra.mxu0 %v16032_v35  ;;  %13155 = vmatpush3.bf16.msra.mxu1 %v16038_v36 }
 0x130   :  { %11568 = vmatprep.subr.msk.bf16.mxu0 %vm187_vm1, %v15579_v6  ;;  %13160 = vmatprep.subr.bf16.mxu1 %v19991_v0 }
 0x132   :  { %11563 = vmatmul.mubr.msk.bf16.vlgmr.msra.gmra.mxu0 %vm183_vm2, %v1690_v43  ;;  %13157 = vmatmul.mubr.msk.bf16.vlgmr.msra.gmra.mxu1 %vm183_vm2, %v1690_v43 }
 0x133   :  { %1885 = vmatpush1.bf16.msra.mxu0 %v15596_v12  ;;  %13161 = vmatpush3.bf16.msra.mxu1 %v15599_v13 }
 0x134   :  { %1886 = vmatprep.subr.bf16.mxu0 %v15847_v61  ;;  %13162 = vmatprep.subr.bf16.mxu1 %v19991_v0 }
 0x135   :  { %1912 = vmatprep.mubr.bf16.mxu0 %v19980_v1  ;;  %13172 = vmatprep.mubr.msk.bf16.mxu1 %vm19967_vm0, %v19991_v0 }
 0x137   :  { %1887 = vmatpush1.bf16.msra.mxu0 %v15857_v62  ;;  %13163 = vmatpush3.bf16.msra.mxu1 %v15863_v63 }
 0x138   :  { %1888 = vmatprep.subr.bf16.mxu0 %v15869_v2  ;;  %13164 = vmatprep.subr.bf16.mxu1 %v19991_v0 }
 0x13b   :  { %1889 = vmatpush1.bf16.msra.mxu0 %v15876_v3  ;;  %13165 = vmatpush3.bf16.msra.mxu1 %v15882_v4 }
 0x13c   :  { %1890 = vmatprep.subr.bf16.mxu0 %v15888_v5  ;;  %13166 = vmatprep.subr.bf16.mxu1 %v19991_v0 }
 0x13f   :  { %1891 = vmatpush1.bf16.msra.mxu0 %v15902_v9  ;;  %13167 = vmatpush3.bf16.msra.mxu1 %v15974_v51 }
 0x140   :  { %1892 = vmatprep.subr.bf16.mxu0 %v15981_v52  ;;  %13168 = vmatprep.subr.bf16.mxu1 %v19991_v0 }
 0x143   :  { %1893 = vmatpush1.bf16.msra.mxu0 %v15999_v59  ;;  %13169 = vmatpush3.bf16.msra.mxu1 %v16005_v60 }
 0x144   :  { %1894 = vmatprep.subr.bf16.mxu0 %v16017_v18  ;;  %13170 = vmatprep.subr.bf16.mxu1 %v19991_v0 }
 0x147   :  { %1895 = vmatpush1.bf16.msra.mxu0 %v16032_v35  ;;  %13171 = vmatpush3.bf16.msra.mxu1 %v16038_v36 }
 0x148   :  { %11574 = vmatprep.subr.msk.bf16.mxu0 %vm187_vm1, %v15579_v6  ;;  %13176 = vmatprep.subr.bf16.mxu1 %v19991_v0  ;;  %vm16168_vm1 = vmand %vm356_vm6, %vm541_vm7  ;;  %vm2061_vm7 = vcmask 654336   ;;  %vm737_vm6 = vsmask.f32 5376 }
 0x149   :  { %vm738_vm3 = vmand %vm736_vm5, %vm737_vm6 }
 0x14a   :  { %v426_v47 = vpop.f32.mrf.mxu0  ;;  %v467_v48 = vpop.f32.mrf.mxu1  ;;  %11569 = vmatmul.mubr.msk.bf16.vlgmr.msra.gmra.mxu0 %vm183_vm2, %v1876_v46  ;;  %13173 = vmatmul.mubr.msk.bf16.vlgmr.msra.gmra.mxu1 %vm183_vm2, %v1876_v46 }
 0x14b   :  { %v427_v49 = vadd.f32 %v426_v47, %v15933_v21  ;;  %v468_v50 = vadd.f32 %v467_v48, %v15937_v22  ;;  %2071 = vmatpush1.bf16.msra.mxu0 %v15596_v12  ;;  %13177 = vmatpush3.bf16.msra.mxu1 %v15599_v13 }
 0x14c   :  { %v428_v55 = vpop.f32.mrf.mxu0  ;;  %v13046_v56 = vpop.f32.mrf.mxu1  ;;  %2072 = vmatprep.subr.bf16.mxu0 %v15847_v61  ;;  %13178 = vmatprep.subr.bf16.mxu1 %v19991_v0 }
 0x14d   :  { %v475_v6 = vmax.f32 %v468_v50, 0.0  ;;  %v429_v57 = vadd.f32 %v428_v55, %v15943_v24  ;;  %2098 = vmatprep.mubr.bf16.mxu0 %v19980_v1  ;;  %13188 = vmatprep.mubr.msk.bf16.mxu1 %vm19967_vm0, %v19991_v0  ;;  %v473_v20 = vmax.f32 %v427_v49, 0.0 }
 0x14e   :  { %v430_v7 = vpop.f32.mrf.mxu0  ;;  %v470_v17 = vpop.f32.mrf.mxu1 }
 0x14f   :  { %v478_v12 = vpack.c.bf16 %v475_v6, %v475_v6  ;;  %v474_v23 = vmax.f32 %v429_v57, 0.0  ;;  %2073 = vmatpush1.bf16.msra.mxu0 %v15857_v62  ;;  %13179 = vmatpush3.bf16.msra.mxu1 %v15863_v63  ;;  %v16228_v6 = vld [vmem:[%s19953_s3 + $0x48] sm:$0xff]   ;;  %v16233_v57 = vld [vmem:[%s19953_s3 + $0x18] sm:$0xff]  }
 0x150   :  { %v431_v13 = vpop.f32.mrf.mxu0  ;;  %v13047_v61 = vpop.f32.mrf.mxu1  ;;  %2074 = vmatprep.subr.bf16.mxu0 %v15869_v2  ;;  %13180 = vmatprep.subr.bf16.mxu1 %v19991_v0 }
 0x151   :  { %v11526_v25 = vpack.c.bf16 %v474_v23, %v473_v20  ;;  %v496_v26 = vrot.slane %v478_v12, %v15955_v32 }
 0x153   :  { %v489_v27 = vrot.slane %v11526_v25, %v15955_v32  ;;  %2075 = vmatpush1.bf16.msra.mxu0 %v15876_v3  ;;  %13181 = vmatpush3.bf16.msra.mxu1 %v15882_v4 }
 0x154   :  { %2076 = vmatprep.subr.bf16.mxu0 %v15888_v5  ;;  %13182 = vmatprep.subr.bf16.mxu1 %v19991_v0 }
 0x155   :  { %v497_v62 = vcombine.low %v489_v27, %v496_v26 }
 0x157   :  { %v504_v63 = vrot.slane %v497_v62, %v15955_v32  ;;  %2077 = vmatpush1.bf16.msra.mxu0 %v15902_v9  ;;  %13183 = vmatpush3.bf16.msra.mxu1 %v15974_v51  ;;  %v546_v9 = vld [vmem:[#allocation2] sm:$0x11]  ;;  %v550_v51 = vld [vmem:[#allocation2 + $0x8] sm:$0x1] }
 0x158   :  { %2078 = vmatprep.subr.bf16.mxu0 %v15981_v52  ;;  %13184 = vmatprep.subr.bf16.mxu1 %v19991_v0  ;;  %v2058_v52 = vpop.permute.xlu1 %2057 }
 0x159   :  { %v506_v2 = vunpack.i.h.s16 %v504_v63  ;;  %v11527_v28 = vpack.i.b16 %v504_v63, %v504_v63  ;;  %v2062_v39 = vsel %vm2061_vm7, %v2058_v52, %v2060_v30  ;;  %vm743_vm7 = vcmask 779265  }
 0x15a   :  { %vm16301_vm13 = vmand %vm743_vm7, %vm19963_vm4 }
 0x15b   :  { %v508_v4 = vpack.i.b16 %v506_v2, %v506_v2  ;;  %v515_v5 = vrot.slane %v11527_v28, %v15986_v53  ;;  %v522_v29 = vrot.slane %v11527_v28, %v15989_v54  ;;  %2079 = vmatpush1.bf16.msra.mxu0 %v15999_v59  ;;  %13185 = vmatpush3.bf16.msra.mxu1 %v16005_v60  ;;  %v553_v60 = vld [vmem:[#allocation2 + $0x18] sm:$0x11] }
 0x15c   :  { %2080 = vmatprep.subr.bf16.mxu0 %v16017_v18  ;;  %13186 = vmatprep.subr.bf16.mxu1 %v19991_v0 }
 0x15d   :  { %v529_v31 = vrot.slane %v508_v4, %v15986_v53  ;;  %v536_v33 = vrot.slane %v508_v4, %v15989_v54  ;;  %v547_v34 = vsel %vm15895_vm12, %v515_v5, %v546_v9  ;;  %v551_v59 = vsel %vm16168_vm1, %v522_v29, %v550_v51  ;;  %v16246_v5 = vld [vmem:[%s19953_s3 + $0x40] sm:$0xff]  }
 0x15e   :  { %548 = vst [vmem:[#allocation2] sm:$0x11] %v547_v34  ;;  %552 = vst [vmem:[#allocation2 + $0x8] sm:$0x1] %v551_v59 }
 0x15f   :  { %v554_v18 = vsel %vm15895_vm12, %v529_v31, %v553_v60  ;;  %v557_v38 = vsel %vm16168_vm1, %v536_v33, %v556_v37  ;;  %2081 = vmatpush1.bf16.msra.mxu0 %v16032_v35  ;;  %13187 = vmatpush3.bf16.msra.mxu1 %v16038_v36  ;;  %v16261_v33 = vld [vmem:[%s19953_s3 + $0x10] sm:$0xff]  }
 0x160   :  { %555 = vst [vmem:[#allocation2 + $0x18] sm:$0x11] %v554_v18  ;;  %558 = vst [vmem:[#allocation2 + $0x20] sm:$0x1] %v557_v38  ;;  %13192 = vmatprep.subr.bf16.mxu0 %v19991_v0  ;;  %13208 = vmatprep.subr.bf16.mxu1 %v19991_v0 }
 0x162   :  { %v618_v35 = vpop.f32.mrf.mxu0  ;;  %v659_v42 = vpop.f32.mrf.mxu1  ;;  %11575 = vmatmul.mubr.msk.bf16.vlgmr.msra.gmra.mxu0 %vm183_vm2, %v2062_v39  ;;  %13189 = vmatmul.mubr.msk.bf16.vlgmr.msra.gmra.mxu1 %vm183_vm2, %v2062_v39  ;;  %vm19974_vm2 = vcmask 1041409  }
 0x163   :  { %v619_v36 = vadd.f32 %v618_v35, %v15933_v21  ;;  %v660_v43 = vadd.f32 %v659_v42, %v15937_v22  ;;  %13193 = vmatpush3.bf16.msra.mxu0 %v16193_v40  ;;  %13209 = vmatpush3.bf16.msra.mxu1 %v16198_v41  ;;  %vm16271_vm10 = vmand %vm19974_vm2, %vm19963_vm4  ;;  %vm913_vm4 = vsmask.f32 7958 }
 0x164   :  { %v620_v46 = vpop.f32.mrf.mxu0  ;;  %v13062_v47 = vpop.f32.mrf.mxu1  ;;  %13194 = vmatprep.subr.bf16.mxu0 %v19991_v0  ;;  %13210 = vmatprep.subr.bf16.mxu1 %v19991_v0  ;;  %vm16293_vm6 = vmor %vm738_vm3, %vm16271_vm10  ;;  %vm19972_vm10 = vcmask 785408   ;;  %vm19966_vm3 = vsmask.f32 7942 }
 0x165   :  { %v667_v48 = vmax.f32 %v660_v43, 0.0  ;;  %v621_v49 = vadd.f32 %v620_v46, %v15943_v24  ;;  %v2588_v50 = vld [vmem:[#allocation2] sm:$0x11]  ;;  %13204 = vmatprep.mubr.msk.bf16.mxu0 %vm19967_vm0, %v19991_v0  ;;  %13220 = vmatprep.mubr.msk.bf16.mxu1 %vm19967_vm0, %v19991_v0  ;;  %v665_v20 = vmax.f32 %v619_v36, 0.0  ;;  %v16282_v36 = vld [vmem:[%s19953_s3 + $0x38] sm:$0xff]   ;;  %v16287_v43 = vld [vmem:[%s19953_s3 + $0x8] sm:$0xff]  }
 0x166   :  { %v622_v55 = vpop.f32.mrf.mxu0  ;;  %v662_v56 = vpop.f32.mrf.mxu1  ;;  %v11631_v7 = vcombine.high %v2588_v50, %v2588_v50  ;;  %v11630_v17 = vcombine.low %v2588_v50, %v2588_v50  ;;  %v14882_v2 = vld [vmem:[#allocation2] ss:$0 sps:$4 sm:$0x11]   ;;  %vm16381_vm15 = vmand %vm19974_vm2, %vm19966_vm3 }
 0x167   :  { %v670_v12 = vpack.c.bf16 %v667_v48, %v667_v48  ;;  %v666_v23 = vmax.f32 %v621_v49, 0.0  ;;  %13195 = vmatpush3.bf16.msra.mxu0 %v16211_v44  ;;  %13211 = vmatpush3.bf16.msra.mxu1 %v16216_v45  ;;  %v2589_v13 = vld [vmem:[#allocation2 + $0x18] sm:$0x11]  ;;  %v2274_v60 = vunpack.c.l.b16 %v14882_v2  ;;  %v740_v55 = vld [vmem:[#allocation2] sm:$0x22]  ;;  %vm16387_vm11 = vmand %vm736_vm5, %vm913_vm4 }
 0x168   :  { %v623_v61 = vpop.f32.mrf.mxu0  ;;  %v13063_v25 = vpop.f32.mrf.mxu1  ;;  %13196 = vmatprep.subr.bf16.mxu0 %v19991_v0  ;;  %13212 = vmatprep.subr.bf16.mxu1 %v19991_v0  ;;  %v11633_v26 = vcombine.high %v2589_v13, %v2589_v13  ;;  %v16239_v27 = vunpack.c.l.b16 %v11631_v7  ;;  %v11632_v62 = vcombine.low %v2589_v13, %v2589_v13  ;;  %v16241_v63 = vunpack.c.l.b16 %v11630_v17  ;;  %v14883_v28 = vld [vmem:[#allocation2 + $0x18] ss:$0 sps:$4 sm:$0x11]   ;;  %v745_v7 = vld [vmem:[#allocation2 + $0x8] sm:$0x2]  ;;  %v16317_v13 = vld [vmem:[%s19953_s3] sm:$0xff]  }
 0x169   :  { %v11532_v4 = vpack.c.bf16 %v666_v23, %v665_v20  ;;  %v688_v30 = vrot.slane %v670_v12, %v15955_v32  ;;  %v2275_v37 = vunpack.c.l.b16 %v14883_v28  ;;  %v2276_v46 = vrot.slane %v2274_v60, 1  ;;  %v16312_v23 = vld [vmem:[%s19953_s3 + $0x30] sm:$0xff]   ;;  %v748_v61 = vld [vmem:[#allocation2 + $0x18] sm:$0x22]  ;;  %v751_v25 = vld [vmem:[#allocation2 + $0x20] sm:$0x2] }
 0x16a   :  { %v16248_v29 = vunpack.c.l.b16 %v11633_v26  ;;  %v2606_v9 = vrot.slane %v16239_v27, 1  ;;  %v16251_v51 = vunpack.c.l.b16 %v11632_v62  ;;  %v2604_v52 = vrot.slane %v16241_v63, 1  ;;  %vm915_vm4 = vmor %vm16387_vm11, %vm16381_vm15 }
 0x16b   :  { %v681_v31 = vrot.slane %v11532_v4, %v15955_v32  ;;  %13197 = vmatpush3.bf16.msra.mxu0 %v16228_v6  ;;  %13213 = vmatpush3.bf16.msra.mxu1 %v16233_v57  ;;  %v2360_v47 = vrot.slane %v2275_v37, 7  ;;  %v2278_v26 = vsel %vm19974_vm2, %v2275_v37, %v2276_v46  ;;  %vm16407_vm5 = vmand %vm743_vm7, %vm19966_vm3  ;;  %vm1103_vm15 = vcmask 1042434  }
 0x16c   :  { %13198 = vmatprep.subr.bf16.mxu0 %v19991_v0  ;;  %13214 = vmatprep.subr.bf16.mxu1 %v19991_v0  ;;  %v2607_v34 = vsel %vm19974_vm2, %v16248_v29, %v2606_v9  ;;  %v2605_v59 = vsel %vm19974_vm2, %v16251_v51, %v2604_v52  ;;  %vm19971_vm11 = vsmask.f32 2304  ;;  %vm19969_vm7 = vcmask 1046534  }
 0x16d   :  { %v689_v18 = vcombine.low %v681_v31, %v688_v30  ;;  %v2609_v39 = vpack.c.b16 %v2607_v34, %v2607_v34  ;;  %v2608_v35 = vpack.c.b16 %v2605_v59, %v2605_v59  ;;  %v2361_v62 = vsel %vm19974_vm2, %v2360_v47, %v2274_v60  ;;  %v16338_v31 = vld [vmem:[%s19953_s3 + $0x88] sm:$0xff]   ;;  %vm16473_vm3 = vmand %vm1103_vm15, %vm19971_vm11 }
 0x16e   :  { %v2279_v34 = vpack.c.b16 %v2278_v26, %v2278_v26  ;;  %v2362_v59 = vpack.c.b16 %v2361_v62, %v2361_v62  ;;  %v16375_v62 = vld [vmem:[%s19953_s3 + $0x70] sm:$0xff]  }
 0x16f   :  { %v696_v42 = vrot.slane %v689_v18, %v15955_v32  ;;  %13199 = vmatpush3.bf16.msra.mxu0 %v16246_v5  ;;  %13215 = vmatpush3.bf16.msra.mxu1 %v16261_v33 }
 0x170   :  { %2612 = vrot.lane.b32.xlu0 %v2609_v39, %s15498_s20  ;;  %2610 = vrot.lane.b32.xlu1 %v2608_v35, %s15498_s20  ;;  %v16350_v39 = vld [vmem:[%s19953_s3 + $0x80] sm:$0xff]  }
 0x171   :  { %v698_v48 = vunpack.i.h.s16 %v696_v42  ;;  %v11533_v49 = vpack.i.b16 %v696_v42, %v696_v42  ;;  %13200 = vmatprep.subr.bf16.mxu0 %v19991_v0  ;;  %13216 = vmatprep.subr.bf16.mxu1 %v19991_v0 }
 0x173   :  { %v700_v17 = vpack.i.b16 %v698_v48, %v698_v48  ;;  %v707_v20 = vrot.slane %v11533_v49, %v15986_v53  ;;  %v714_v12 = vrot.slane %v11533_v49, %v15989_v54  ;;  %13201 = vmatpush3.bf16.msra.mxu0 %v16282_v36  ;;  %13217 = vmatpush3.bf16.msra.mxu1 %v16287_v43 }
 0x174   :  { %13202 = vmatprep.subr.bf16.mxu0 %v19991_v0  ;;  %13218 = vmatprep.subr.bf16.mxu1 %v19991_v0 }
 0x175   :  { %v721_v2 = vrot.slane %v700_v17, %v15986_v53  ;;  %v728_v28 = vrot.slane %v700_v17, %v15989_v54  ;;  %v741_v4 = vsel %vm16293_vm6, %v707_v20, %v740_v55  ;;  %v746_v9 = vsel %vm16301_vm13, %v714_v12, %v745_v7  ;;  %v16364_v20 = vld [vmem:[%s19953_s3 + $0x78] sm:$0xff]  }
 0x176   :  { %742 = vst [vmem:[#allocation2] sm:$0x22] %v741_v4  ;;  %747 = vst [vmem:[#allocation2 + $0x8] sm:$0x2] %v746_v9 }
 0x177   :  { %v749_v52 = vsel %vm16293_vm6, %v721_v2, %v748_v61  ;;  %v752_v30 = vsel %vm16301_vm13, %v728_v28, %v751_v25  ;;  %13203 = vmatpush3.bf16.msra.mxu0 %v16312_v23  ;;  %13219 = vmatpush3.bf16.msra.mxu1 %v16317_v13  ;;  %v2658_v2 = vrot.slane %v16251_v51, 7 }
 0x178   :  { %750 = vst [vmem:[#allocation2 + $0x18] sm:$0x22] %v749_v52  ;;  %753 = vst [vmem:[#allocation2 + $0x20] sm:$0x2] %v752_v30  ;;  %13224 = vmatprep.subr.bf16.mxu0 %v19991_v0  ;;  %13240 = vmatprep.subr.bf16.mxu1 %v19991_v0 }
 0x17a   :  { %v796_v60 = vpop.f32.mrf.mxu0  ;;  %v837_v37 = vpop.f32.mrf.mxu1  ;;  %13205 = vmatmul.mubr.msk.bf16.vlgmr.msra.gmra.mxu0 %vm19972_vm10, %v2279_v34  ;;  %13221 = vmatmul.mubr.msk.bf16.vlgmr.msra.gmra.mxu1 %vm19972_vm10, %v2362_v59 }
 0x17b   :  { %v797_v18 = vadd.f32 %v796_v60, %v15933_v21  ;;  %v838_v38 = vadd.f32 %v837_v37, %v15937_v22  ;;  %13225 = vmatpush3.bf16.msra.mxu0 %v16338_v31  ;;  %13236 = vmatprep.mubr.msk.bf16.mxu0 %vm19967_vm0, %v19991_v0  ;;  %v16417_v60 = vld [vmem:[%s19953_s3 + $0x60] sm:$0xff]  }
 0x17c   :  { %v798_v35 = vpop.f32.mrf.mxu0  ;;  %v13078_v42 = vpop.f32.mrf.mxu1  ;;  %13226 = vmatprep.subr.bf16.mxu0 %v19991_v0  ;;  %13241 = vmatpush3.bf16.msra.mxu1 %v16193_v40 }
 0x17d   :  { %v845_v46 = vmax.f32 %v838_v38, 0.0  ;;  %v799_v47 = vadd.f32 %v798_v35, %v15943_v24  ;;  %13242 = vmatprep.subr.bf16.mxu1 %v19991_v0  ;;  %13252 = vmatprep.mubr.msk.bf16.mxu1 %vm19967_vm0, %v19991_v0  ;;  %v843_v55 = vmax.f32 %v797_v18, 0.0  ;;  %v916_v37 = vld [vmem:[#allocation2] sm:$0x22]  ;;  %v920_v18 = vld [vmem:[#allocation2 + $0x8] sm:$0x2] }
 0x17e   :  { %v800_v48 = vpop.f32.mrf.mxu0  ;;  %v840_v49 = vpop.f32.mrf.mxu1 }
 0x17f   :  { %v848_v7 = vpack.c.bf16 %v845_v46, %v845_v46  ;;  %v844_v17 = vmax.f32 %v799_v47, 0.0  ;;  %13227 = vmatpush3.bf16.msra.mxu0 %v16350_v39  ;;  %v923_v47 = vld [vmem:[#allocation2 + $0x18] sm:$0x22]  ;;  %v926_v48 = vld [vmem:[#allocation2 + $0x20] sm:$0x2] }
 0x180   :  { %v801_v40 = vpop.f32.mrf.mxu0  ;;  %v13079_v12 = vpop.f32.mrf.mxu1  ;;  %13228 = vmatprep.subr.bf16.mxu0 %v19991_v0  ;;  %13243 = vmatpush3.bf16.msra.mxu1 %v16211_v44 }
 0x181   :  { %v11537_v61 = vpack.c.bf16 %v844_v17, %v843_v55  ;;  %13244 = vmatprep.subr.bf16.mxu1 %v19991_v0  ;;  %v866_v25 = vrot.slane %v848_v7, %v15955_v32  ;;  %v16439_v7 = vld [vmem:[#allocation2 + $0x1c] sm:$0x11] }
 0x182   :  { %v11653_v28 = vcombine.high %v16439_v7, %v16439_v7 }
 0x183   :  { %v859_v26 = vrot.slane %v11537_v61, %v15955_v32  ;;  %13229 = vmatpush3.bf16.msra.mxu0 %v16364_v20  ;;  %v2660_v61 = vrot.slane %v16248_v29, 7 }
 0x184   :  { %13230 = vmatprep.subr.bf16.mxu0 %v19991_v0  ;;  %13245 = vmatpush3.bf16.msra.mxu1 %v16228_v6  ;;  %v16396_v6 = vld [vmem:[%s19953_s3 + $0x68] sm:$0xff]  }
 0x185   :  { %v867_v44 = vcombine.low %v859_v26, %v866_v25  ;;  %13246 = vmatprep.subr.bf16.mxu1 %v19991_v0  ;;  %v16455_v51 = vsel %vm19974_vm2, %v2660_v61, %v16239_v27  ;;  %v14895_v27 = vld [vmem:[#allocation2 + $0x18] ss:$0 sps:$4 sm:$0x22]  }
 0x187   :  { %v874_v4 = vrot.slane %v867_v44, %v15955_v32  ;;  %13231 = vmatpush3.bf16.msra.mxu0 %v16375_v62 }
 0x188   :  { %13232 = vmatprep.subr.bf16.mxu0 %v19991_v0  ;;  %13247 = vmatpush3.bf16.msra.mxu1 %v16246_v5 }
 0x189   :  { %v876_v9 = vunpack.i.h.s16 %v874_v4  ;;  %v11538_v52 = vpack.i.b16 %v874_v4, %v874_v4  ;;  %13248 = vmatprep.subr.bf16.mxu1 %v19991_v0 }
 0x18b   :  { %v878_v34 = vpack.i.b16 %v876_v9, %v876_v9  ;;  %v885_v59 = vrot.slane %v11538_v52, %v15986_v53  ;;  %v892_v5 = vrot.slane %v11538_v52, %v15989_v54  ;;  %13233 = vmatpush3.bf16.msra.mxu0 %v16396_v6 }
 0x18c   :  { %13234 = vmatprep.subr.bf16.mxu0 %v19991_v0  ;;  %13249 = vmatpush3.bf16.msra.mxu1 %v16282_v36  ;;  %v3036_v36 = vld [vmem:[#allocation2 + $0x4] sm:$0x11] }
 0x18d   :  { %v899_v38 = vrot.slane %v878_v34, %v15986_v53  ;;  %v906_v35 = vrot.slane %v878_v34, %v15989_v54  ;;  %v917_v42 = vsel %vm915_vm4, %v885_v59, %v916_v37  ;;  %v921_v46 = vsel %vm16407_vm5, %v892_v5, %v920_v18  ;;  %13250 = vmatprep.subr.bf16.mxu1 %v19991_v0  ;;  %v14894_v37 = vld [vmem:[#allocation2] ss:$0 sps:$4 sm:$0x22]  }
 0x18e   :  { %918 = vst [vmem:[#allocation2] sm:$0x22] %v917_v42  ;;  %922 = vst [vmem:[#allocation2 + $0x8] sm:$0x2] %v921_v46  ;;  %v11651_v17 = vcombine.high %v3036_v36, %v3036_v36  ;;  %v11650_v25 = vcombine.low %v3036_v36, %v3036_v36  ;;  %v16463_v36 = vunpack.c.l.b16 %v11653_v28 }
 0x18f   :  { %v924_v49 = vsel %vm915_vm4, %v899_v38, %v923_v47  ;;  %v927_v55 = vsel %vm16407_vm5, %v906_v35, %v926_v48  ;;  %13235 = vmatpush3.bf16.msra.mxu0 %v16417_v60  ;;  %vm1107_vm4 = vsmask.f32 6400  ;;  %vm1113_vm5 = vcmask 780290  }
 0x190   :  { %925 = vst [vmem:[#allocation2 + $0x18] sm:$0x22] %v924_v49  ;;  %928 = vst [vmem:[#allocation2 + $0x20] sm:$0x2] %v927_v55  ;;  %13251 = vmatpush3.bf16.msra.mxu1 %v16312_v23  ;;  %13256 = vmatprep.subr.bf16.mxu0 %v19991_v0  ;;  %v16451_v34 = vunpack.c.l.b16 %v11651_v17  ;;  %v16457_v35 = vunpack.c.l.b16 %v11650_v25  ;;  %v16461_v48 = vsel %vm19974_vm2, %v2658_v2, %v16241_v63  ;;  %v2450_v25 = vunpack.c.l.b16 %v14894_v37 }
 0x191   :  { %13272 = vmatprep.subr.bf16.mxu1 %v19991_v0  ;;  %vm16483_vm0 = vmand %vm19969_vm7, %vm1107_vm4 }
 0x192   :  { %v988_v40 = vpop.f32.mrf.mxu0  ;;  %v1029_v12 = vpop.f32.mrf.mxu1  ;;  %v3054_v2 = vrot.slane %v16451_v34, 1  ;;  %v3052_v28 = vrot.slane %v16457_v35, 1  ;;  %vm1109_vm4 = vmor %vm16483_vm0, %vm16473_vm3  ;;  %vm1281_vm0 = vsmask.f32 7946  ;;  %vm1283_vm3 = vsmask.f32 7962 }
 0x193   :  { %v989_v26 = vadd.f32 %v988_v40, %v15933_v21  ;;  %v1030_v44 = vadd.f32 %v1029_v12, %v15937_v22  ;;  %vm16500_vm7 = vmand %vm1113_vm5, %vm19971_vm11  ;;  %vm20028_vm11 = vmmov 0  }
 0x194   :  { %v990_v23 = vpop.f32.mrf.mxu0  ;;  %v13094_v4 = vpop.f32.mrf.mxu1 }
 0x195   :  { %v1035_v9 = vmax.f32 %v989_v26, 0.0  ;;  %v2712_v52 = vld [vmem:[#allocation2] sm:$0x22]  ;;  %v991_v29 = vadd.f32 %v990_v23, %v15943_v24  ;;  %v1037_v30 = vmax.f32 %v1030_v44, 0.0  ;;  %v11652_v4 = vcombine.low %v16439_v7, %v16439_v7 }
 0x196   :  { %v11637_v59 = vcombine.high %v2712_v52, %v2712_v52  ;;  %v11636_v5 = vcombine.low %v2712_v52, %v2712_v52  ;;  %v992_v18 = vpop.f32.mrf.mxu0  ;;  %v1032_v38 = vpop.f32.mrf.mxu1 }
 0x197   :  { %v2713_v42 = vld [vmem:[#allocation2 + $0x18] sm:$0x22]  ;;  %v1036_v46 = vmax.f32 %v991_v29, 0.0  ;;  %v1040_v47 = vpack.c.bf16 %v1037_v30, %v1037_v30  ;;  %v2451_v30 = vunpack.c.l.b16 %v14895_v27 }
 0x198   :  { %v11639_v49 = vcombine.high %v2713_v42, %v2713_v42  ;;  %v2725_v55 = vunpack.c.l.b16 %v11637_v59  ;;  %v11638_v17 = vcombine.low %v2713_v42, %v2713_v42  ;;  %v2724_v40 = vunpack.c.l.b16 %v11636_v5  ;;  %v993_v12 = vpop.f32.mrf.mxu0  ;;  %v13095_v61 = vpop.f32.mrf.mxu1  ;;  %v3161_v26 = vld [vmem:[#allocation2 + $0x1c] sm:$0x22]  ;;  %v3160_v5 = vld [vmem:[#allocation2 + $0x4] sm:$0x22] }
 0x199   :  { %v11543_v44 = vpack.c.bf16 %v1036_v46, %v1035_v9  ;;  %v1058_v23 = vrot.slane %v1040_v47, %v15955_v32  ;;  %v11659_v18 = vcombine.high %v3161_v26, %v3161_v26  ;;  %v11658_v42 = vcombine.low %v3161_v26, %v3161_v26 }
 0x19a   :  { %v2727_v52 = vunpack.c.l.b16 %v11639_v49  ;;  %v2726_v63 = vunpack.c.l.b16 %v11638_v17  ;;  %v2731_v29 = vrot.slane %v2725_v55, 2  ;;  %v2728_v37 = vrot.slane %v2724_v40, 2 }
 0x19b   :  { %v1051_v59 = vrot.slane %v11543_v44, %v15955_v32  ;;  %v2452_v46 = vrot.slane %v2450_v25, 2  ;;  %v2453_v47 = vrot.slane %v2451_v30, 1  ;;  %v16477_v49 = vunpack.c.l.b16 %v11652_v4 }
 0x19c   :  { %v2732_v38 = vrot.slane %v2727_v52, 1  ;;  %v2729_v9 = vrot.slane %v2726_v63, 1  ;;  %v11657_v27 = vcombine.high %v3160_v5, %v3160_v5  ;;  %v11656_v61 = vcombine.low %v3160_v5, %v3160_v5  ;;  %v1110_v52 = vld [vmem:[#allocation2] sm:$0x44] }
 0x19d   :  { %v1059_v12 = vcombine.low %v1051_v59, %v1058_v23  ;;  %v2454_v44 = vsel %vm19974_vm2, %v2453_v47, %v2452_v46  ;;  %v3175_v63 = vunpack.c.l.b16 %v11659_v18  ;;  %v2663_v5 = vpack.c.b16 %v16455_v51, %v16455_v51 }
 0x19e   :  { %v2733_v55 = vsel %vm19974_vm2, %v2732_v38, %v2731_v29  ;;  %v2730_v17 = vsel %vm19974_vm2, %v2729_v9, %v2728_v37  ;;  %v2455_v4 = vpack.c.b16 %v2454_v44, %v2454_v44  ;;  %v3174_v29 = vunpack.c.l.b16 %v11658_v42  ;;  %v3692_v38 = vld [vmem:[#allocation2 + $0x18] sm:$0x22]  ;;  %v1115_v37 = vld [vmem:[#allocation2 + $0x8] sm:$0x4]  ;;  %v1121_v44 = vld [vmem:[#allocation2 + $0x20] sm:$0x4] }
 0x19f   :  { %v2735_v26 = vpack.c.b16 %v2733_v55, %v2733_v55  ;;  %v2734_v25 = vpack.c.b16 %v2730_v17, %v2730_v17  ;;  %v1066_v23 = vrot.slane %v1059_v12, %v15955_v32  ;;  %v2662_v9 = vpack.c.b16 %v16461_v48, %v16461_v48 }
 0x1a0   :  { %13237 = vmatmul.mubr.msk.bf16.vlgmr.msra.gmra.mxu0 %vm19972_vm10, %v2455_v4  ;;  %v3055_v42 = vsel %vm19974_vm2, %v16463_v36, %v3054_v2  ;;  %v3053_v46 = vsel %vm19974_vm2, %v16477_v49, %v3052_v28  ;;  %v3173_v51 = vunpack.c.l.b16 %v11657_v27  ;;  %v3172_v17 = vunpack.c.l.b16 %v11656_v61 }
 0x1a1   :  { %2738 = vrot.lane.b32.xlu0 %v2735_v26, %s15498_s20  ;;  %2736 = vrot.lane.b32.xlu1 %v2734_v25, %s15498_s20  ;;  %v1068_v30 = vunpack.i.h.s16 %v1066_v23  ;;  %v11544_v59 = vpack.i.b16 %v1066_v23, %v1066_v23  ;;  %v3691_v26 = vld [vmem:[#allocation2] sm:$0x22]  ;;  %v1118_v25 = vld [vmem:[#allocation2 + $0x18] sm:$0x44]  ;;  %v3180_v23 = vrot.slane %v3175_v63, 1  ;;  %v3177_v48 = vrot.slane %v3174_v29, 1 }
 0x1a2   :  { %13257 = vmatpush3.bf16.msra.mxu0 %v16198_v41  ;;  %v11681_v4 = vcombine.high %v3692_v38, %v3692_v38  ;;  %v11680_v19 = vcombine.low %v3692_v38, %v3692_v38  ;;  %13268 = vmatprep.mubr.msk.bf16.mxu0 %vm20028_vm11, %v19991_v0  ;;  %v3057_v61 = vpack.c.b16 %v3055_v42, %v3055_v42  ;;  %v3179_v63 = vrot.slane %v3173_v51, 2 }
 0x1a3   :  { %v1070_v47 = vpack.i.b16 %v1068_v30, %v1068_v30  ;;  %v1077_v12 = vrot.slane %v11544_v59, %v15986_v53  ;;  %v1084_v55 = vrot.slane %v11544_v59, %v15989_v54  ;;  %13258 = vmatprep.subr.bf16.mxu0 %v19991_v0  ;;  %v3108_v29 = vrot.slane %v16463_v36, 7 }
 0x1a4   :  { %v11679_v30 = vcombine.high %v3691_v26, %v3691_v26  ;;  %v3176_v38 = vrot.slane %v3172_v17, 2  ;;  %v3106_v36 = vrot.slane %v16477_v49, 7  ;;  %v3706_v42 = vunpack.c.l.b16 %v11681_v4 }
 0x1a5   :  { %v1091_v2 = vrot.slane %v1070_v47, %v15986_v53  ;;  %v1098_v28 = vrot.slane %v1070_v47, %v15989_v54  ;;  %v1111_v41 = vsel %vm1109_vm4, %v1077_v12, %v1110_v52  ;;  %v1116_v27 = vsel %vm16500_vm7, %v1084_v55, %v1115_v37  ;;  %2666 = vrot.lane.b32.xlu0 %v2663_v5, %s15498_s20 }
 0x1a6   :  { %1112 = vst [vmem:[#allocation2] sm:$0x44] %v1111_v41  ;;  %1117 = vst [vmem:[#allocation2 + $0x8] sm:$0x4] %v1116_v27  ;;  %2664 = vrot.lane.b32.xlu1 %v2662_v9, %s15498_s20  ;;  %v11678_v5 = vcombine.low %v3691_v26, %v3691_v26  ;;  %13259 = vmatpush3.bf16.msra.mxu0 %v16216_v45  ;;  %v3056_v37 = vpack.c.b16 %v3053_v46, %v3053_v46  ;;  %v3705_v40 = vunpack.c.l.b16 %v11680_v19 }
 0x1a7   :  { %v1119_v52 = vsel %vm1109_vm4, %v1091_v2, %v1118_v25  ;;  %v1122_v59 = vsel %vm16500_vm7, %v1098_v28, %v1121_v44  ;;  %v3181_v9 = vsel %vm19974_vm2, %v3180_v23, %v3179_v63  ;;  %13260 = vmatprep.subr.bf16.mxu0 %v19991_v0  ;;  %v3178_v7 = vsel %vm19974_vm2, %v3177_v48, %v3176_v38  ;;  %vm16566_vm7 = vmand %vm1103_vm15, %vm1281_vm0 }
 0x1a8   :  { %1120 = vst [vmem:[#allocation2 + $0x18] sm:$0x44] %v1119_v52  ;;  %1123 = vst [vmem:[#allocation2 + $0x20] sm:$0x4] %v1122_v59  ;;  %v3704_v45 = vunpack.c.l.b16 %v11679_v30  ;;  %v3183_v12 = vpack.c.b16 %v3181_v9, %v3181_v9  ;;  %v3703_v55 = vunpack.c.l.b16 %v11678_v5  ;;  %v3182_v17 = vpack.c.b16 %v3178_v7, %v3178_v7 }
 0x1a9   :  { %3060 = vrot.lane.b32.xlu0 %v3057_v61, %s15498_s20  ;;  %v3109_v26 = vsel %vm19974_vm2, %v3108_v29, %v16451_v34  ;;  %v3107_v19 = vsel %vm19974_vm2, %v3106_v36, %v16457_v35  ;;  %v3767_v25 = vrot.slane %v3706_v42, 1  ;;  %v3764_v2 = vrot.slane %v3705_v40, 1 }
 0x1aa   :  { %3058 = vrot.lane.b32.xlu1 %v3056_v37, %s15498_s20  ;;  %v1166_v18 = vpop.f32.mrf.mxu0  ;;  %v1207_v51 = vpop.f32.mrf.mxu1  ;;  %13261 = vmatpush3.bf16.msra.mxu0 %v16233_v57  ;;  %v3766_v57 = vrot.slane %v3704_v45, 2  ;;  %v3111_v61 = vpack.c.b16 %v3109_v26, %v3109_v26  ;;  %v3763_v35 = vrot.slane %v3703_v55, 2  ;;  %v3110_v63 = vpack.c.b16 %v3107_v19, %v3107_v19  ;;  %v4142_v19 = vld [vmem:[#allocation2 + $0x4] sm:$0x22] }
 0x1ab   :  { %v1167_v47 = vadd.f32 %v1166_v18, %v15933_v21  ;;  %v1208_v46 = vadd.f32 %v1207_v51, %v15937_v22  ;;  %13262 = vmatprep.subr.bf16.mxu0 %v19991_v0  ;;  %v3711_v30 = vrot.slane %v3706_v42, 2  ;;  %v3708_v9 = vrot.slane %v3705_v40, 2 }
 0x1ac   :  { %v1168_v49 = vpop.f32.mrf.mxu0  ;;  %v13110_v44 = vpop.f32.mrf.mxu1  ;;  %v3768_v29 = vsel %vm19974_vm2, %v3767_v25, %v3766_v57  ;;  %v3765_v37 = vsel %vm19974_vm2, %v3764_v2, %v3763_v35  ;;  %v3707_v7 = vrot.slane %v3703_v55, 3  ;;  %vm20031_vm4 = vcmask 1046534   ;;  %v4143_v55 = vld [vmem:[#allocation2 + $0x1c] sm:$0x22] }
 0x1ad   :  { %v1213_v23 = vmax.f32 %v1167_v47, 0.0  ;;  %v1169_v48 = vadd.f32 %v1168_v49, %v15943_v24  ;;  %v1215_v4 = vmax.f32 %v1208_v46, 0.0  ;;  %3186 = vrot.lane.b32.xlu0 %v3183_v12, %s15498_s20  ;;  %v3770_v42 = vpack.c.b16 %v3768_v29, %v3768_v29  ;;  %vm16573_vm10 = vmand %vm20031_vm4, %vm1283_vm3  ;;  %v1286_v25 = vld [vmem:[#allocation2] sm:$0x44] }
 0x1ae   :  { %3184 = vrot.lane.b32.xlu1 %v3182_v17, %s15498_s20  ;;  %v1170_v28 = vpop.f32.mrf.mxu0  ;;  %v1210_v41 = vpop.f32.mrf.mxu1  ;;  %13263 = vmatpush3.bf16.msra.mxu0 %v16261_v33  ;;  %v3710_v33 = vrot.slane %v3704_v45, 3  ;;  %v3769_v18 = vpack.c.b16 %v3765_v37, %v3765_v37  ;;  %v3709_v45 = vsel %vm19974_vm2, %v3708_v9, %v3707_v7  ;;  %vm1285_vm15 = vmor %vm16573_vm10, %vm16566_vm7  ;;  %vm1473_vm10 = vcmask 1043459  }
 0x1af   :  { %v1214_v34 = vmax.f32 %v1169_v48, 0.0  ;;  %v1218_v27 = vpack.c.bf16 %v1215_v4, %v1215_v4  ;;  %13264 = vmatprep.subr.bf16.mxu0 %v19991_v0  ;;  %v3713_v49 = vpack.c.b16 %v3709_v45, %v3709_v45  ;;  %vm16588_vm3 = vmand %vm1113_vm5, %vm1281_vm0  ;;  %v1293_v57 = vld [vmem:[#allocation2 + $0x18] sm:$0x44]  ;;  %v1296_v28 = vld [vmem:[#allocation2 + $0x20] sm:$0x4]  ;;  %v11699_v41 = vcombine.high %v4142_v19, %v4142_v19 }
 0x1b0   :  { %v1171_v52 = vpop.f32.mrf.mxu0  ;;  %v13111_v59 = vpop.f32.mrf.mxu1  ;;  %v3712_v51 = vsel %vm19974_vm2, %v3711_v30, %v3710_v33  ;;  %v11700_v30 = vcombine.low %v4143_v55, %v4143_v55  ;;  %vm1474_vm5 = vsmask.f32 3328  ;;  %vm19973_vm0 = vcmask 1047559  }
 0x1b1   :  { %v11548_v38 = vpack.c.bf16 %v1214_v34, %v1213_v23  ;;  %v1236_v5 = vrot.slane %v1218_v27, %v15955_v32  ;;  %3114 = vrot.lane.b32.xlu0 %v3111_v61, %s15498_s20  ;;  %v3714_v12 = vpack.c.b16 %v3712_v51, %v3712_v51  ;;  %v11701_v23 = vcombine.high %v4143_v55, %v4143_v55 }
 0x1b2   :  { %3112 = vrot.lane.b32.xlu1 %v3110_v63, %s15498_s20  ;;  %13265 = vmatpush3.bf16.msra.mxu0 %v16287_v43  ;;  %v11698_v34 = vcombine.low %v4142_v19, %v4142_v19  ;;  %v16618_v9 = vunpack.c.l.b16 %v11700_v30  ;;  %vm1477_vm7 = vsmask.f32 7424  ;;  %vm19975_vm4 = vcmask 781315  }
 0x1b3   :  { %v1229_v36 = vrot.slane %v11548_v38, %v15955_v32  ;;  %13266 = vmatprep.subr.bf16.mxu0 %v19991_v0  ;;  %v16604_v29 = vunpack.c.l.b16 %v11701_v23  ;;  %v16613_v38 = vunpack.c.l.b16 %v11699_v41 }
 0x1b5   :  { %v1237_v47 = vcombine.low %v1229_v36, %v1236_v5  ;;  %3773 = vrot.lane.b32.xlu0 %v3770_v42, %s15498_s20  ;;  %v16615_v5 = vunpack.c.l.b16 %v11698_v34  ;;  %v4218_v37 = vrot.slane %v16604_v29, 1 }
 0x1b6   :  { %3771 = vrot.lane.b32.xlu1 %v3769_v18, %s15498_s20  ;;  %13267 = vmatpush3.bf16.msra.mxu0 %v16317_v13  ;;  %v1290_v13 = vld [vmem:[#allocation2 + $0x8] sm:$0x4]  ;;  %v4217_v18 = vrot.slane %v16613_v38, 2 }
 0x1b7   :  { %v1244_v43 = vrot.slane %v1237_v47, %v15955_v32  ;;  %13288 = vmatprep.subr.bf16.mxu0 %v19991_v0  ;;  %v4214_v51 = vrot.slane %v16615_v5, 2  ;;  %v4161_v47 = vrot.slane %v16613_v38, 3 }
 0x1b8   :  { %v16627_v19 = vsel %vm19974_vm2, %v4218_v37, %v4217_v18 }
 0x1b9   :  { %v1246_v17 = vunpack.i.h.s16 %v1244_v43  ;;  %v11549_v26 = vpack.i.b16 %v1244_v43, %v1244_v43  ;;  %3717 = vrot.lane.b32.xlu0 %v3714_v12, %s15498_s20 }
 0x1ba   :  { %3715 = vrot.lane.b32.xlu1 %v3713_v49, %s15498_s20 }
 0x1bb   :  { %v1248_v48 = vpack.i.b16 %v1246_v17, %v1246_v17  ;;  %v1255_v4 = vrot.slane %v11549_v26, %v15986_v53  ;;  %v1262_v2 = vrot.slane %v11549_v26, %v15989_v54 }
 0x1bd   :  { %v1269_v27 = vrot.slane %v1248_v48, %v15986_v53  ;;  %v1276_v61 = vrot.slane %v1248_v48, %v15989_v54  ;;  %v1287_v35 = vsel %vm1285_vm15, %v1255_v4, %v1286_v25  ;;  %v1291_v63 = vsel %vm16588_vm3, %v1262_v2, %v1290_v13 }
 0x1be   :  { %1288 = vst [vmem:[#allocation2] sm:$0x44] %v1287_v35  ;;  %1292 = vst [vmem:[#allocation2 + $0x8] sm:$0x4] %v1291_v63  ;;  %v4215_v25 = vrot.slane %v16618_v9, 1  ;;  %v4162_v48 = vrot.slane %v16604_v29, 2 }
 0x1bf   :  { %v1294_v52 = vsel %vm1285_vm15, %v1269_v27, %v1293_v57  ;;  %v1297_v59 = vsel %vm16588_vm3, %v1276_v61, %v1296_v28  ;;  %vm16640_vm15 = vmand %vm1473_vm10, %vm1474_vm5 }
 0x1c0   :  { %1295 = vst [vmem:[#allocation2 + $0x18] sm:$0x44] %v1294_v52  ;;  %1298 = vst [vmem:[#allocation2 + $0x20] sm:$0x4] %v1297_v59 }
 0x1c1   :  { %vm16648_vm3 = vmand %vm19973_vm0, %vm1477_vm7 }
 0x1c2   :  { %v1358_v33 = vpop.f32.mrf.mxu0  ;;  %v1399_v36 = vpop.f32.mrf.mxu1  ;;  %vm1479_vm7 = vmor %vm16648_vm3, %vm16640_vm15  ;;  %vm1653_vm15 = vsmask.f32 7966  ;;  %vm20043_vm3 = vcmask 785408  }
 0x1c3   :  { %v1359_v42 = vadd.f32 %v1358_v33, %v15933_v21  ;;  %v1400_v7 = vadd.f32 %v1399_v36, %v15937_v22  ;;  %vm16674_vm0 = vmand %vm19975_vm4, %vm1474_vm5  ;;  %vm1651_vm5 = vsmask.f32 7950 }
 0x1c4   :  { %v1360_v40 = vpop.f32.mrf.mxu0  ;;  %v13126_v45 = vpop.f32.mrf.mxu1 }
 0x1c5   :  { %v3819_v46 = vld [vmem:[#allocation2] sm:$0x44]  ;;  %v1405_v43 = vmax.f32 %v1359_v42, 0.0  ;;  %v1361_v12 = vadd.f32 %v1360_v40, %v15943_v24  ;;  %v1407_v55 = vmax.f32 %v1400_v7, 0.0  ;;  %v4158_v40 = vrot.slane %v16615_v5, 3 }
 0x1c6   :  { %v4270_v49 = vld [vmem:[#allocation2 + $0x4] sm:$0x44]  ;;  %v11685_v17 = vcombine.high %v3819_v46, %v3819_v46  ;;  %v11684_v26 = vcombine.low %v3819_v46, %v3819_v46  ;;  %v1362_v44 = vpop.f32.mrf.mxu0  ;;  %v1402_v13 = vpop.f32.mrf.mxu1  ;;  %v1480_v5 = vld [vmem:[#allocation2] sm:$0x88] }
 0x1c7   :  { %v3820_v23 = vld [vmem:[#allocation2 + $0x18] sm:$0x44]  ;;  %v1406_v4 = vmax.f32 %v1361_v12, 0.0  ;;  %v1410_v2 = vpack.c.bf16 %v1407_v55, %v1407_v55  ;;  %v11705_v28 = vcombine.high %v4270_v49, %v4270_v49  ;;  %v4800_v30 = vld [vmem:[#allocation2] sm:$0x44]  ;;  %v11704_v33 = vcombine.low %v4270_v49, %v4270_v49 }
 0x1c8   :  { %v4271_v57 = vld [vmem:[#allocation2 + $0x1c] sm:$0x44]  ;;  %v11687_v41 = vcombine.high %v3820_v23, %v3820_v23  ;;  %v3832_v34 = vunpack.c.l.b16 %v11685_v17  ;;  %v11686_v27 = vcombine.low %v3820_v23, %v3820_v23  ;;  %v3831_v61 = vunpack.c.l.b16 %v11684_v26  ;;  %v1363_v35 = vpop.f32.mrf.mxu0  ;;  %v13127_v63 = vpop.f32.mrf.mxu1 }
 0x1c9   :  { %v11554_v52 = vpack.c.bf16 %v1406_v4, %v1405_v43  ;;  %v1428_v59 = vrot.slane %v1410_v2, %v15955_v32  ;;  %v11707_v37 = vcombine.high %v4271_v57, %v4271_v57  ;;  %v4801_v36 = vld [vmem:[#allocation2 + $0x18] sm:$0x44]  ;;  %v11706_v46 = vcombine.low %v4271_v57, %v4271_v57 }
 0x1ca   :  { %v3834_v42 = vunpack.c.l.b16 %v11687_v41  ;;  %v3838_v29 = vrot.slane %v3832_v34, 4  ;;  %v3833_v7 = vunpack.c.l.b16 %v11686_v27  ;;  %v3835_v18 = vrot.slane %v3831_v61, 4 }
 0x1cb   :  { %v1421_v45 = vrot.slane %v11554_v52, %v15955_v32  ;;  %v11727_v12 = vcombine.high %v4800_v30, %v4800_v30  ;;  %v4283_v26 = vunpack.c.l.b16 %v11705_v28  ;;  %v4285_v44 = vunpack.c.l.b16 %v11707_v37 }
 0x1cc   :  { %v3839_v55 = vrot.slane %v3834_v42, 3  ;;  %v3836_v17 = vrot.slane %v3833_v7, 3  ;;  %v4221_v43 = vpack.c.b16 %v16627_v19, %v16627_v19  ;;  %v11729_v49 = vcombine.high %v4801_v36, %v4801_v36 }
 0x1cd   :  { %v1429_v13 = vcombine.low %v1421_v45, %v1428_v59  ;;  %v11726_v23 = vcombine.low %v4800_v30, %v4800_v30  ;;  %v4282_v57 = vunpack.c.l.b16 %v11704_v33  ;;  %v4284_v34 = vunpack.c.l.b16 %v11706_v46 }
 0x1ce   :  { %v3840_v4 = vsel %vm19974_vm2, %v3839_v55, %v3838_v29  ;;  %v3837_v2 = vsel %vm19974_vm2, %v3836_v17, %v3835_v18  ;;  %v4159_v61 = vrot.slane %v16618_v9, 2  ;;  %v4216_v63 = vsel %vm19974_vm2, %v4215_v25, %v4214_v51  ;;  %v1491_v55 = vld [vmem:[#allocation2 + $0x20] sm:$0x8] }
 0x1cf   :  { %v3842_v28 = vpack.c.b16 %v3840_v4, %v3840_v4  ;;  %v3841_v27 = vpack.c.b16 %v3837_v2, %v3837_v2  ;;  %v1436_v19 = vrot.slane %v1429_v13, %v15955_v32  ;;  %v4289_v30 = vrot.slane %v4283_v26, 4 }
 0x1d0   :  { %v4290_v52 = vrot.slane %v4285_v44, 3  ;;  %v16655_v59 = vunpack.c.l.b16 %v11727_v12  ;;  %v16659_v33 = vunpack.c.l.b16 %v11729_v49  ;;  %v11728_v42 = vcombine.low %v4801_v36, %v4801_v36  ;;  %v1488_v12 = vld [vmem:[#allocation2 + $0x18] sm:$0x88] }
 0x1d1   :  { %3845 = vrot.lane.b32.xlu0 %v3842_v28, %s15498_s20  ;;  %3843 = vrot.lane.b32.xlu1 %v3841_v27, %s15498_s20  ;;  %v1438_v9 = vunpack.i.h.s16 %v1436_v19  ;;  %v11555_v37 = vpack.i.b16 %v1436_v19, %v1436_v19  ;;  %v4163_v29 = vsel %vm19974_vm2, %v4162_v48, %v4161_v47  ;;  %v4286_v51 = vrot.slane %v4282_v57, 4  ;;  %v1485_v47 = vld [vmem:[#allocation2 + $0x8] sm:$0x8] }
 0x1d2   :  { %v4287_v25 = vrot.slane %v4284_v34, 3  ;;  %v16668_v7 = vunpack.c.l.b16 %v11726_v23  ;;  %v4220_v18 = vpack.c.b16 %v4216_v63, %v4216_v63  ;;  %v4160_v48 = vsel %vm19974_vm2, %v4159_v61, %v4158_v40 }
 0x1d3   :  { %v1440_v45 = vpack.i.b16 %v1438_v9, %v1438_v9  ;;  %v1447_v46 = vrot.slane %v11555_v37, %v15986_v53  ;;  %v1454_v36 = vrot.slane %v11555_v37, %v15989_v54  ;;  %v4291_v17 = vsel %vm19974_vm2, %v4290_v52, %v4289_v30 }
 0x1d4   :  { %v4819_v26 = vrot.slane %v16655_v59, 5  ;;  %v16681_v44 = vunpack.c.l.b16 %v11728_v42  ;;  %v4820_v23 = vrot.slane %v16659_v33, 4  ;;  %v4816_v2 = vrot.slane %v16668_v7, 5 }
 0x1d5   :  { %4224 = vrot.lane.b32.xlu0 %v4221_v43, %s15498_s20  ;;  %4222 = vrot.lane.b32.xlu1 %v4220_v18, %s15498_s20  ;;  %v1461_v13 = vrot.slane %v1440_v45, %v15986_v53  ;;  %v1468_v49 = vrot.slane %v1440_v45, %v15989_v54  ;;  %v1481_v40 = vsel %vm1479_vm7, %v1447_v46, %v1480_v5 }
 0x1d6   :  { %1482 = vst [vmem:[#allocation2] sm:$0x88] %v1481_v40  ;;  %v1486_v4 = vsel %vm16674_vm0, %v1454_v36, %v1485_v47  ;;  %v4288_v43 = vsel %vm19974_vm2, %v4287_v25, %v4286_v51  ;;  %v4817_v57 = vrot.slane %v16681_v44, 4  ;;  %v4165_v34 = vpack.c.b16 %v4163_v29, %v4163_v29 }
 0x1d7   :  { %v4164_v28 = vpack.c.b16 %v4160_v48, %v4160_v48  ;;  %1487 = vst [vmem:[#allocation2 + $0x8] sm:$0x8] %v1486_v4  ;;  %v1489_v27 = vsel %vm1479_vm7, %v1461_v13, %v1488_v12  ;;  %v1492_v61 = vsel %vm16674_vm0, %v1468_v49, %v1491_v55  ;;  %v4293_v19 = vpack.c.b16 %v4291_v17, %v4291_v17  ;;  %vm16722_vm7 = vmand %vm1473_vm10, %vm1651_vm5 }
 0x1d8   :  { %1490 = vst [vmem:[#allocation2 + $0x18] sm:$0x88] %v1489_v27  ;;  %1493 = vst [vmem:[#allocation2 + $0x20] sm:$0x8] %v1492_v61  ;;  %v4292_v63 = vpack.c.b16 %v4288_v43, %v4288_v43  ;;  %v4821_v30 = vsel %vm19974_vm2, %v4820_v23, %v4819_v26  ;;  %v4818_v35 = vsel %vm19974_vm2, %v4817_v57, %v4816_v2  ;;  %vm20042_vm0 = vcmask 523264  }
 0x1d9   :  { %4168 = vrot.lane.b32.xlu0 %v4165_v34, %s15498_s20  ;;  %4166 = vrot.lane.b32.xlu1 %v4164_v28, %s15498_s20  ;;  %v4823_v29 = vpack.c.b16 %v4821_v30, %v4821_v30  ;;  %v4822_v45 = vpack.c.b16 %v4818_v35, %v4818_v35  ;;  %vm20046_vm2 = vcmask 1047559   ;;  %v5251_v30 = vld [vmem:[#allocation2 + $0x4] sm:$0x44]  ;;  %v5252_v35 = vld [vmem:[#allocation2 + $0x1c] sm:$0x44] }
 0x1da   :  { %v1536_v52 = vpop.f32.mrf.mxu0  ;;  %v1577_v9 = vpop.f32.mrf.mxu1  ;;  %vm16730_vm4 = vmand %vm20046_vm2, %vm1653_vm15 }
 0x1db   :  { %v1537_v41 = vadd.f32 %v1536_v52, %v15933_v21  ;;  %v1578_v37 = vadd.f32 %v1577_v9, %v15937_v22  ;;  %vm1655_vm10 = vmor %vm16730_vm4, %vm16722_vm7  ;;  %vm20052_vm4 = vcmask 1041409  }
 0x1dc   :  { %v1538_v42 = vpop.f32.mrf.mxu0  ;;  %v13142_v5 = vpop.f32.mrf.mxu1  ;;  %vm20054_vm15 = vmmov %vm20052_vm4 }
 0x1dd   :  { %v1583_v51 = vmax.f32 %v1537_v41, 0.0  ;;  %v1539_v25 = vadd.f32 %v1538_v42, %v15943_v24  ;;  %v1585_v18 = vmax.f32 %v1578_v37, 0.0  ;;  %4296 = vrot.lane.b32.xlu0 %v4293_v19, %s15498_s20  ;;  %4294 = vrot.lane.b32.xlu1 %v4292_v63, %s15498_s20 }
 0x1de   :  { %v1540_v46 = vpop.f32.mrf.mxu0  ;;  %v1580_v36 = vpop.f32.mrf.mxu1  ;;  %v1660_v27 = vld [vmem:[#allocation2 + $0x8] sm:$0x8] }
 0x1df   :  { %v1584_v38 = vmax.f32 %v1539_v25, 0.0  ;;  %v1588_v47 = vpack.c.bf16 %v1585_v18, %v1585_v18  ;;  %v1663_v52 = vld [vmem:[#allocation2 + $0x18] sm:$0x88]  ;;  %v1666_v9 = vld [vmem:[#allocation2 + $0x20] sm:$0x8]  ;;  %v11749_v25 = vcombine.high %v5252_v35, %v5252_v35  ;;  %v4875_v18 = vrot.slane %v16655_v59, 4 }
 0x1e0   :  { %v1541_v48 = vpop.f32.mrf.mxu0  ;;  %v13143_v12 = vpop.f32.mrf.mxu1 }
 0x1e1   :  { %v11559_v55 = vpack.c.bf16 %v1584_v38, %v1583_v51  ;;  %v1606_v17 = vrot.slane %v1588_v47, %v15955_v32  ;;  %4826 = vrot.lane.b32.xlu0 %v4823_v29, %s15498_s20  ;;  %4824 = vrot.lane.b32.xlu1 %v4822_v45, %s15498_s20  ;;  %v11747_v29 = vcombine.high %v5251_v30, %v5251_v30  ;;  %v16775_v12 = vunpack.c.l.b16 %v11749_v25 }
 0x1e2   :  { %v2613_v26 = vpop.permute.xlu0 %2612  ;;  %v2611_v13 = vpop.permute.xlu1 %2610  ;;  %v11746_v45 = vcombine.low %v5251_v30, %v5251_v30  ;;  %v11748_v38 = vcombine.low %v5252_v35, %v5252_v35 }
 0x1e3   :  { %v2614_v49 = vsel %vm20042_vm0, %v2611_v13, %v2613_v26  ;;  %v1599_v40 = vrot.slane %v11559_v55, %v15955_v32  ;;  %vm20049_vm0 = vcmask 781315   ;;  %v16772_v36 = vunpack.c.l.b16 %v11747_v29 }
 0x1e4   :  { %13253 = vmatmul.mubr.msk.bf16.vlgmr.msra.gmra.mxu1 %vm20043_vm3, %v2614_v49  ;;  %vm16743_vm2 = vmand %vm20049_vm0, %vm1651_vm5 }
 0x1e5   :  { %v1607_v23 = vcombine.low %v1599_v40, %v1606_v17  ;;  %13273 = vmatpush3.bf16.msra.mxu1 %v16338_v31  ;;  %13284 = vmatprep.mubr.msk.bf16.mxu1 %vm20028_vm11, %v19991_v0  ;;  %v1656_v31 = vld [vmem:[#allocation2] sm:$0x88]  ;;  %v16784_v40 = vunpack.c.l.b16 %v11746_v45  ;;  %vm20053_vm5 = vmmov %vm20052_vm4 }
 0x1e6   :  { %13274 = vmatprep.subr.bf16.mxu1 %v19991_v0  ;;  %vm20055_vm3 = vmmov %vm20052_vm4 }
 0x1e7   :  { %v1614_v2 = vrot.slane %v1607_v23, %v15955_v32  ;;  %vm20056_vm7 = vmmov %vm20055_vm3 }
 0x1e8   :  { %vm20058_vm0 = vmmov %vm20055_vm3 }
 0x1e9   :  { %v1616_v57 = vunpack.i.h.s16 %v1614_v2  ;;  %v11560_v34 = vpack.i.b16 %v1614_v2, %v1614_v2  ;;  %13275 = vmatpush3.bf16.msra.mxu1 %v16350_v39 }
 0x1ea   :  { %13276 = vmatprep.subr.bf16.mxu1 %v19991_v0 }
 0x1eb   :  { %v1618_v61 = vpack.i.b16 %v1616_v57, %v1616_v57  ;;  %v1625_v19 = vrot.slane %v11560_v34, %v15986_v53  ;;  %v1632_v63 = vrot.slane %v11560_v34, %v15989_v54  ;;  %v16789_v34 = vunpack.c.l.b16 %v11748_v38 }
 0x1ed   :  { %v1639_v39 = vrot.slane %v1618_v61, %v15986_v53  ;;  %v1646_v41 = vrot.slane %v1618_v61, %v15989_v54  ;;  %v1657_v37 = vsel %vm1655_vm10, %v1625_v19, %v1656_v31  ;;  %v1661_v42 = vsel %vm16743_vm2, %v1632_v63, %v1660_v27  ;;  %13277 = vmatpush3.bf16.msra.mxu1 %v16364_v20 }
 0x1ee   :  { %1658 = vst [vmem:[#allocation2] sm:$0x88] %v1657_v37  ;;  %1662 = vst [vmem:[#allocation2 + $0x8] sm:$0x8] %v1661_v42  ;;  %13278 = vmatprep.subr.bf16.mxu1 %v19991_v0  ;;  %v4876_v20 = vrot.slane %v16659_v33, 3  ;;  %v4872_v33 = vrot.slane %v16668_v7, 4 }
 0x1ef   :  { %v1664_v5 = vsel %vm1655_vm10, %v1639_v39, %v1663_v52  ;;  %v1667_v51 = vsel %vm16743_vm2, %v1646_v41, %v1666_v9  ;;  %v5270_v7 = vrot.slane %v16772_v36, 5  ;;  %vm20057_vm10 = vmmov %vm20055_vm3 }
 0x1f0   :  { %1665 = vst [vmem:[#allocation2 + $0x18] sm:$0x88] %v1664_v5  ;;  %1668 = vst [vmem:[#allocation2 + $0x20] sm:$0x8] %v1667_v51  ;;  %v16779_v59 = vsel %vm20052_vm4, %v4876_v20, %v4875_v18 }
 0x1f1   :  { %13279 = vmatpush3.bf16.msra.mxu1 %v16375_v62  ;;  %v4873_v62 = vrot.slane %v16681_v44, 3  ;;  %v4879_v45 = vpack.c.b16 %v16779_v59, %v16779_v59  ;;  %vm20059_vm2 = vmmov %vm20058_vm0 }
 0x1f2   :  { %13280 = vmatprep.subr.bf16.mxu1 %v19991_v0  ;;  %v1728_v46 = vpop.f32.mrf.mxu0  ;;  %v1769_v47 = vpop.f32.mrf.mxu1  ;;  %vm20060_vm4 = vmmov %vm20058_vm0 }
 0x1f3   :  { %v1729_v48 = vadd.f32 %v1728_v46, %v15933_v21  ;;  %v1770_v55 = vadd.f32 %v1769_v47, %v15937_v22  ;;  %v4874_v46 = vsel %vm20053_vm5, %v4873_v62, %v4872_v33  ;;  %vm20061_vm5 = vmmov %vm20058_vm0 }
 0x1f4   :  { %v1730_v17 = vpop.f32.mrf.mxu0  ;;  %v13158_v26 = vpop.f32.mrf.mxu1 }
 0x1f5   :  { %13281 = vmatpush3.bf16.msra.mxu1 %v16396_v6  ;;  %v4928_v13 = vld [vmem:[#allocation2] sm:$0x88]  ;;  %v1775_v49 = vmax.f32 %v1729_v48, 0.0  ;;  %v1777_v23 = vmax.f32 %v1770_v55, 0.0  ;;  %v1731_v4 = vadd.f32 %v1730_v17, %v15943_v24  ;;  %v5271_v6 = vrot.slane %v16775_v12, 4 }
 0x1f6   :  { %v5379_v43 = vld [vmem:[#allocation2 + $0x4] sm:$0x88]  ;;  %13282 = vmatprep.subr.bf16.mxu1 %v19991_v0  ;;  %v11733_v2 = vcombine.high %v4928_v13, %v4928_v13  ;;  %v11732_v57 = vcombine.low %v4928_v13, %v4928_v13  ;;  %v1732_v44 = vpop.f32.mrf.mxu0  ;;  %v1772_v31 = vpop.f32.mrf.mxu1  ;;  %v5267_v55 = vrot.slane %v16784_v40, 5  ;;  %v5268_v13 = vrot.slane %v16789_v34, 4 }
 0x1f7   :  { %v4929_v28 = vld [vmem:[#allocation2 + $0x18] sm:$0x88]  ;;  %v1780_v27 = vpack.c.bf16 %v1777_v23, %v1777_v23  ;;  %v1776_v61 = vmax.f32 %v1731_v4, 0.0  ;;  %v11753_v63 = vcombine.high %v5379_v43, %v5379_v43  ;;  %v11752_v5 = vcombine.low %v5379_v43, %v5379_v43  ;;  %v5908_v62 = vld [vmem:[#allocation2] sm:$0x88] }
 0x1f8   :  { %v5380_v19 = vld [vmem:[#allocation2 + $0x1c] sm:$0x88]  ;;  %v11735_v30 = vcombine.high %v4929_v28, %v4929_v28  ;;  %v4941_v52 = vunpack.c.l.b16 %v11733_v2  ;;  %v11734_v9 = vcombine.low %v4929_v28, %v4929_v28  ;;  %v4940_v35 = vunpack.c.l.b16 %v11732_v57  ;;  %v1733_v39 = vpop.f32.mrf.mxu0  ;;  %v13159_v41 = vpop.f32.mrf.mxu1 }
 0x1f9   :  { %13283 = vmatpush3.bf16.msra.mxu1 %v16417_v60  ;;  %v1798_v37 = vrot.slane %v1780_v27, %v15955_v32  ;;  %v11565_v42 = vpack.c.bf16 %v1776_v61, %v1775_v49  ;;  %v11755_v29 = vcombine.high %v5380_v19, %v5380_v19  ;;  %v11754_v47 = vcombine.low %v5380_v19, %v5380_v19  ;;  %v5909_v28 = vld [vmem:[#allocation2 + $0x18] sm:$0x88] }
 0x1fa   :  { %13304 = vmatprep.subr.bf16.mxu1 %v19991_v0  ;;  %v4943_v51 = vunpack.c.l.b16 %v11735_v30  ;;  %v4947_v25 = vrot.slane %v4941_v52, 6  ;;  %v4942_v18 = vunpack.c.l.b16 %v11734_v9  ;;  %v4944_v20 = vrot.slane %v4940_v35, 6  ;;  %v1843_v9 = vld [vmem:[#allocation2 + $0xc] sm:$0x11] }
 0x1fb   :  { %v1791_v38 = vrot.slane %v11565_v42, %v15955_v32  ;;  %v5392_v17 = vunpack.c.l.b16 %v11753_v63  ;;  %v5272_v26 = vsel %vm20054_vm15, %v5271_v6, %v5270_v7  ;;  %v5394_v23 = vunpack.c.l.b16 %v11755_v29  ;;  %vm20064_vm15 = vmmov %vm20058_vm0 }
 0x1fc   :  { %v4948_v60 = vrot.slane %v4943_v51, 5  ;;  %v4945_v48 = vrot.slane %v4942_v18, 5  ;;  %v5391_v43 = vunpack.c.l.b16 %v11752_v5  ;;  %v5393_v33 = vunpack.c.l.b16 %v11754_v47  ;;  %v1852_v18 = vld [vmem:[#allocation2 + $0x2c] sm:$0x1] }
 0x1fd   :  { %v1799_v49 = vcombine.low %v1791_v38, %v1798_v37  ;;  %v4878_v44 = vpack.c.b16 %v4874_v46, %v4874_v46  ;;  %v5274_v27 = vpack.c.b16 %v5272_v26, %v5272_v26  ;;  %v5398_v61 = vrot.slane %v5392_v17, 6 }
 0x1fe   :  { %v4949_v4 = vsel %vm20055_vm3, %v4948_v60, %v4947_v25  ;;  %v4946_v59 = vsel %vm20056_vm7, %v4945_v48, %v4944_v20  ;;  %v5326_v7 = vrot.slane %v16772_v36, 4  ;;  %v5327_v6 = vrot.slane %v16775_v12, 3  ;;  %v1846_v12 = vld [vmem:[#allocation2 + $0x14] sm:$0x1]  ;;  %v1849_v25 = vld [vmem:[#allocation2 + $0x24] sm:$0x11] }
 0x1ff   :  { %v4951_v2 = vpack.c.b16 %v4949_v4, %v4949_v4  ;;  %v4950_v57 = vpack.c.b16 %v4946_v59, %v4946_v59  ;;  %v1806_v31 = vrot.slane %v1799_v49, %v15955_v32  ;;  %v5269_v19 = vsel %vm20057_vm10, %v5268_v13, %v5267_v55  ;;  %vm20067_vm10 = vmmov %vm20058_vm0 }
 0x200   :  { %v11775_v52 = vcombine.high %v5908_v62, %v5908_v62  ;;  %v5399_v35 = vrot.slane %v5394_v23, 5  ;;  %v5395_v39 = vrot.slane %v5391_v43, 6  ;;  %v5396_v41 = vrot.slane %v5393_v33, 5 }
 0x201   :  { %4954 = vrot.lane.b32.xlu0 %v4951_v2, %s15498_s20  ;;  %4952 = vrot.lane.b32.xlu1 %v4950_v57, %s15498_s20  ;;  %v1808_v63 = vunpack.i.h.s16 %v1806_v31  ;;  %v11566_v30 = vpack.i.b16 %v1806_v31, %v1806_v31  ;;  %v11777_v37 = vcombine.high %v5909_v28, %v5909_v28  ;;  %v5323_v5 = vrot.slane %v16784_v40, 4 }
 0x202   :  { %v5273_v51 = vpack.c.b16 %v5269_v19, %v5269_v19  ;;  %v5324_v20 = vrot.slane %v16789_v34, 3  ;;  %v11774_v46 = vcombine.low %v5908_v62, %v5908_v62  ;;  %v11776_v38 = vcombine.low %v5909_v28, %v5909_v28 }
 0x203   :  { %v1810_v42 = vpack.i.b16 %v1808_v63, %v1808_v63  ;;  %v1817_v29 = vrot.slane %v11566_v30, %v15986_v53  ;;  %v1824_v36 = vrot.slane %v11566_v30, %v15989_v54  ;;  %v5921_v55 = vunpack.c.l.b16 %v11775_v52 }
 0x204   :  { %v5400_v34 = vsel %vm20058_vm0, %v5399_v35, %v5398_v61  ;;  %v5397_v17 = vsel %vm20059_vm2, %v5396_v41, %v5395_v39  ;;  %v5923_v26 = vunpack.c.l.b16 %v11777_v37  ;;  %v5920_v49 = vunpack.c.l.b16 %v11774_v46 }
 0x205   :  { %4882 = vrot.lane.b32.xlu0 %v4879_v45, %s15498_s20  ;;  %4880 = vrot.lane.b32.xlu1 %v4878_v44, %s15498_s20  ;;  %v1831_v47 = vrot.slane %v1810_v42, %v15986_v53  ;;  %v1838_v60 = vrot.slane %v1810_v42, %v15989_v54  ;;  %v1844_v48 = vsel %vm15992_vm8, %v1817_v29, %v1843_v9  ;;  %v5922_v23 = vunpack.c.l.b16 %v11776_v38 }
 0x206   :  { %1845 = vst [vmem:[#allocation2 + $0xc] sm:$0x11] %v1844_v48  ;;  %v1847_v40 = vsel %vm16010_vm9, %v1824_v36, %v1846_v12  ;;  %v5402_v4 = vpack.c.b16 %v5400_v34, %v5400_v34  ;;  %v5401_v59 = vpack.c.b16 %v5397_v17, %v5397_v17  ;;  %v5328_v43 = vsel %vm20060_vm4, %v5327_v6, %v5326_v7  ;;  %v16850_v17 = vld [vmem:[%s19953_s3 + $0x28] sm:$0xff]  }
 0x207   :  { %1848 = vst [vmem:[#allocation2 + $0x14] sm:$0x1] %v1847_v40  ;;  %v1850_v45 = vsel %vm15992_vm8, %v1831_v47, %v1849_v25  ;;  %v1853_v13 = vsel %vm16010_vm9, %v1838_v60, %v1852_v18  ;;  %v5325_v33 = vsel %vm20061_vm5, %v5324_v20, %v5323_v5  ;;  %v5983_v2 = vrot.slane %v5921_v55, 6  ;;  %vm20062_vm8 = vmmov %vm20058_vm0 }
 0x208   :  { %1851 = vst [vmem:[#allocation2 + $0x24] sm:$0x11] %v1850_v45  ;;  %1854 = vst [vmem:[#allocation2 + $0x2c] sm:$0x1] %v1853_v13  ;;  %v5984_v57 = vrot.slane %v5923_v26, 5  ;;  %v5330_v31 = vpack.c.b16 %v5328_v43, %v5328_v43  ;;  %v5981_v19 = vrot.slane %v5922_v23, 5  ;;  %v5329_v7 = vpack.c.b16 %v5325_v33, %v5325_v33 }
 0x209   :  { %5277 = vrot.lane.b32.xlu0 %v5274_v27, %s15498_s20  ;;  %5275 = vrot.lane.b32.xlu1 %v5273_v51, %s15498_s20  ;;  %v5980_v27 = vrot.slane %v5920_v49, 6  ;;  %v5927_v39 = vrot.slane %v5921_v55, 7  ;;  %v5928_v41 = vrot.slane %v5923_v26, 6  ;;  %vm20063_vm9 = vmmov %vm20058_vm0  ;;  %v5924_v20 = vrot.slane %v5920_v49, 7 }
 0x20a   :  { %v1914_v62 = vpop.f32.mrf.mxu0  ;;  %v1955_v58 = vpop.f32.mrf.mxu1  ;;  %v5985_v35 = vsel %vm20062_vm8, %v5984_v57, %v5983_v2  ;;  %v5925_v46 = vrot.slane %v5922_v23, 6  ;;  %vm20065_vm3 = vcmask 523264   ;;  %vm20066_vm7 = vcmask 785408   ;;  %v16855_v26 = vld [vmem:[#allocation2 + $0x1c] ss:$0 sps:$4 sm:$0x11]  }
 0x20b   :  { %v1915_v16 = vadd.f32 %v1914_v62, %v15933_v21  ;;  %v1956_v44 = vadd.f32 %v1955_v58, %v15937_v22  ;;  %v5982_v12 = vsel %vm20063_vm9, %v5981_v19, %v5980_v27  ;;  %v5987_v25 = vpack.c.b16 %v5985_v35, %v5985_v35  ;;  %vm20068_vm0 = vmmov %vm20065_vm3  ;;  %v6356_v58 = vld [vmem:[#allocation2 + $0x4] sm:$0x88]  ;;  %v6357_v2 = vld [vmem:[#allocation2 + $0x1c] sm:$0x88] }
 0x20c   :  { %v1916_v28 = vpop.f32.mrf.mxu0  ;;  %v13174_v61 = vpop.f32.mrf.mxu1  ;;  %v5929_v18 = vsel %vm20064_vm15, %v5928_v41, %v5927_v39  ;;  %v5986_v48 = vpack.c.b16 %v5982_v12, %v5982_v12  ;;  %v5926_v45 = vsel %vm20067_vm10, %v5925_v46, %v5924_v20  ;;  %vm20069_vm2 = vmmov %vm20066_vm7  ;;  %v16867_v57 = vld [vmem:[%s19953_s3 + $0x20] sm:$0xff]   ;;  %v16891_v41 = vld [vmem:[%s19953_s3 + $0x18] sm:$0xff]  }
 0x20d   :  { %5405 = vrot.lane.b32.xlu0 %v5402_v4, %s15498_s20  ;;  %5403 = vrot.lane.b32.xlu1 %v5401_v59, %s15498_s20  ;;  %v1961_v6 = vmax.f32 %v1915_v16, 0.0  ;;  %v1963_v63 = vmax.f32 %v1956_v44, 0.0  ;;  %v1917_v30 = vadd.f32 %v1916_v28, %v15943_v24  ;;  %v5931_v34 = vpack.c.b16 %v5929_v18, %v5929_v18  ;;  %v14936_v4 = vld [vmem:[#allocation2 + $0x4] ss:$0 sps:$4 sm:$0x11]   ;;  %v16899_v12 = vld [vmem:[%s19953_s3 + $0x50] sm:$0xff]   ;;  %vm20074_vm8 = vmmov %vm20069_vm2 }
 0x20e   :  { %v1918_v52 = vpop.f32.mrf.mxu0  ;;  %v1958_v9 = vpop.f32.mrf.mxu1  ;;  %v5930_v62 = vpack.c.b16 %v5926_v45, %v5926_v45  ;;  %v2029_v16 = vld [vmem:[#allocation2 + $0xc] sm:$0x11]  ;;  %v2839_v44 = vunpack.c.l.b16 %v16855_v26  ;;  %v2032_v19 = vld [vmem:[#allocation2 + $0x14] sm:$0x1]  ;;  %vm20079_vm10 = vmmov %vm20069_vm2 }
 0x20f   :  { %v1966_v37 = vpack.c.bf16 %v1963_v63, %v1963_v63  ;;  %v1962_v42 = vmax.f32 %v1917_v30, 0.0  ;;  %v2838_v63 = vunpack.c.l.b16 %v14936_v4  ;;  %v11795_v30 = vcombine.high %v6356_v58, %v6356_v58  ;;  %v16915_v46 = vld [vmem:[%s19953_s3 + $0x10] sm:$0xff]  }
 0x210   :  { %v1919_v29 = vpop.f32.mrf.mxu0  ;;  %v13175_v36 = vpop.f32.mrf.mxu1  ;;  %v11797_v52 = vcombine.high %v6357_v2, %v6357_v2 }
 0x211   :  { %5333 = vrot.lane.b32.xlu0 %v5330_v31, %s15498_s20  ;;  %5331 = vrot.lane.b32.xlu1 %v5329_v7, %s15498_s20  ;;  %v1984_v5 = vrot.slane %v1966_v37, %v15955_v32  ;;  %v11571_v51 = vpack.c.bf16 %v1962_v42, %v1961_v6  ;;  %v16874_v31 = vld [vmem:[%s19953_s3 + $0x58] sm:$0xff]   ;;  %v2035_v7 = vld [vmem:[#allocation2 + $0x24] sm:$0x11]  ;;  %v2038_v6 = vld [vmem:[#allocation2 + $0x2c] sm:$0x1]  ;;  %v2886_v42 = vrot.slane %v2839_v44, 7  ;;  %v11794_v29 = vcombine.low %v6356_v58, %v6356_v58 }
 0x212   :  { %v11796_v36 = vcombine.low %v6357_v2, %v6357_v2  ;;  %v16908_v18 = vunpack.c.l.b16 %v11795_v30  ;;  %v16910_v20 = vunpack.c.l.b16 %v11797_v52 }
 0x213   :  { %v2739_v38 = vpop.permute.xlu0 %2738  ;;  %v2737_v47 = vpop.permute.xlu1 %2736  ;;  %v1977_v60 = vrot.slane %v11571_v51, %v15955_v32 }
 0x214   :  { %v2740_v55 = vsel %vm20065_vm3, %v2737_v47, %v2739_v38  ;;  %v16921_v47 = vunpack.c.l.b16 %v11794_v29  ;;  %v6431_v45 = vrot.slane %v16908_v18, 6 }
 0x215   :  { %13285 = vmatmul.mubr.msk.bf16.vlgmr.msra.gmra.mxu1 %vm20066_vm7, %v2740_v55  ;;  %v1985_v40 = vcombine.low %v1977_v60, %v1984_v5  ;;  %5990 = vrot.lane.b32.xlu0 %v5987_v25, %s15498_s20  ;;  %v2840_v25 = vrot.slane %v2838_v63, 1  ;;  %v16923_v60 = vunpack.c.l.b16 %v11796_v36 }
 0x216   :  { %13305 = vmatpush3.bf16.msra.mxu1 %v16850_v17  ;;  %13316 = vmatprep.mubr.msk.bf16.mxu1 %vm20028_vm11, %v19991_v0  ;;  %v6428_v2 = vrot.slane %v16921_v47, 6 }
 0x217   :  { %v2667_v13 = vpop.permute.xlu0 %2666  ;;  %13306 = vmatprep.subr.bf16.mxu1 %v19991_v0  ;;  %v1992_v49 = vrot.slane %v1985_v40, %v15955_v32  ;;  %5988 = vrot.lane.b32.xlu1 %v5986_v48, %s15498_s20  ;;  %v16928_v48 = vld [vmem:[%s19953_s3 + $0x48] sm:$0xff]  }
 0x218   :  { %v2665_v23 = vpop.permute.xlu1 %2664 }
 0x219   :  { %v2668_v59 = vsel %vm20068_vm0, %v2665_v23, %v2667_v13  ;;  %v1994_v43 = vunpack.i.h.s16 %v1992_v49  ;;  %v11572_v33 = vpack.i.b16 %v1992_v49, %v1992_v49  ;;  %5934 = vrot.lane.b32.xlu0 %v5931_v34, %s15498_s20  ;;  %v6432_v13 = vrot.slane %v16910_v20, 5 }
 0x21a   :  { %13269 = vmatmul.mubr.msk.bf16.vlgmr.msra.gmra.mxu0 %vm20069_vm2, %v2668_v59  ;;  %13307 = vmatpush3.bf16.msra.mxu1 %v16867_v57 }
 0x21b   :  { %13289 = vmatpush3.bf16.msra.mxu0 %v16874_v31  ;;  %13308 = vmatprep.subr.bf16.mxu1 %v19991_v0  ;;  %v1996_v28 = vpack.i.b16 %v1994_v43, %v1994_v43  ;;  %v2003_v61 = vrot.slane %v11572_v33, %v15986_v53  ;;  %v2010_v27 = vrot.slane %v11572_v33, %v15989_v54 }
 0x21c   :  { %13290 = vmatprep.subr.bf16.mxu0 %v19991_v0  ;;  %13300 = vmatprep.mubr.msk.bf16.mxu0 %vm20028_vm11, %v19991_v0 }
 0x21d   :  { %v2017_v9 = vrot.slane %v1996_v28, %v15986_v53  ;;  %v2024_v35 = vrot.slane %v1996_v28, %v15989_v54  ;;  %v2030_v39 = vsel %vm15895_vm12, %v2003_v61, %v2029_v16  ;;  %5932 = vrot.lane.b32.xlu1 %v5930_v62, %s15498_s20  ;;  %v2033_v37 = vsel %vm16168_vm1, %v2010_v27, %v2032_v19 }
 0x21e   :  { %13309 = vmatpush3.bf16.msra.mxu1 %v16891_v41  ;;  %2031 = vst [vmem:[#allocation2 + $0xc] sm:$0x11] %v2030_v39  ;;  %2034 = vst [vmem:[#allocation2 + $0x14] sm:$0x1] %v2033_v37  ;;  %v6429_v16 = vrot.slane %v16923_v60, 5 }
 0x21f   :  { %13291 = vmatpush3.bf16.msra.mxu0 %v16899_v12  ;;  %13310 = vmatprep.subr.bf16.mxu1 %v19991_v0  ;;  %v2036_v5 = vsel %vm15895_vm12, %v2017_v9, %v2035_v7  ;;  %v2039_v51 = vsel %vm16168_vm1, %v2024_v35, %v2038_v6  ;;  %vm20070_vm12 = vmmov %vm20060_vm4  ;;  %v6375_v7 = vrot.slane %v16908_v18, 7  ;;  %v6376_v35 = vrot.slane %v16910_v20, 6 }
 0x220   :  { %13292 = vmatprep.subr.bf16.mxu0 %v19991_v0  ;;  %2037 = vst [vmem:[#allocation2 + $0x24] sm:$0x11] %v2036_v5  ;;  %2040 = vst [vmem:[#allocation2 + $0x2c] sm:$0x1] %v2039_v51  ;;  %v16919_v8 = vsel %vm20070_vm12, %v2886_v42, %v2838_v63 }
 0x221   :  { %vm20071_vm1 = vmmov %vm20060_vm4  ;;  %v2888_v49 = vpack.c.b16 %v16919_v8, %v16919_v8 }
 0x222   :  { %13311 = vmatpush3.bf16.msra.mxu1 %v16915_v46  ;;  %v2100_v3 = vpop.f32.mrf.mxu0  ;;  %v2141_v38 = vpop.f32.mrf.mxu1  ;;  %v16936_v34 = vsel %vm20071_vm1, %v2839_v44, %v2840_v25  ;;  %vm20072_vm4 = vmmov %vm20071_vm1  ;;  %v16972_v25 = vld [vmem:[%s19953_s3] sm:$0xff]  }
 0x223   :  { %13293 = vmatpush3.bf16.msra.mxu0 %v16928_v48  ;;  %13312 = vmatprep.subr.bf16.mxu1 %v19991_v0  ;;  %v2101_v55 = vadd.f32 %v2100_v3, %v15933_v21  ;;  %v2142_v40 = vadd.f32 %v2141_v38, %v15937_v22  ;;  %v16946_v22 = vld [vmem:[%s19953_s3 + $0x8] sm:$0xff]   ;;  %v2842_v44 = vpack.c.b16 %v16936_v34, %v16936_v34  ;;  %v16978_v38 = vld [vmem:[%s19953_s3 + $0x38] sm:$0xff]   ;;  %vm20073_vm5 = vmmov %vm20071_vm1 }
 0x224   :  { %13294 = vmatprep.subr.bf16.mxu0 %v19991_v0  ;;  %v2102_v26 = vpop.f32.mrf.mxu0  ;;  %v13190_v21 = vpop.f32.mrf.mxu1  ;;  %v16963_v9 = vsel %vm20072_vm4, %v6432_v13, %v6431_v45  ;;  %v6373_v45 = vrot.slane %v16923_v60, 6  ;;  %vm20075_vm9 = vmmov %vm20071_vm1 }
 0x225   :  { %v2147_v23 = vmax.f32 %v2101_v55, 0.0  ;;  %v2149_v4 = vmax.f32 %v2142_v40, 0.0  ;;  %v2103_v59 = vadd.f32 %v2102_v26, %v15943_v24  ;;  %v6036_v43 = vld [vmem:[#allocation2 + $0xc] sm:$0x11]  ;;  %v16954_v24 = vld [vmem:[%s19953_s3 + $0x40] sm:$0xff]   ;;  %v6435_v40 = vpack.c.b16 %v16963_v9, %v16963_v9  ;;  %vm20076_vm15 = vmmov %vm20071_vm1 }
 0x226   :  { %13313 = vmatpush3.bf16.msra.mxu1 %v16946_v22  ;;  %v2104_v33 = vpop.f32.mrf.mxu0  ;;  %v11781_v62 = vcombine.high %v6036_v43, %v6036_v43  ;;  %v11780_v58 = vcombine.low %v6036_v43, %v6036_v43  ;;  %v2144_v27 = vpop.f32.mrf.mxu1  ;;  %v6484_v5 = vld [vmem:[#allocation2 + $0x10] sm:$0x11]  ;;  %v6372_v26 = vrot.slane %v16921_v47, 7  ;;  %vm20077_vm3 = vmmov %vm20071_vm1 }
 0x227   :  { %13295 = vmatpush3.bf16.msra.mxu0 %v16954_v24  ;;  %13314 = vmatprep.subr.bf16.mxu1 %v19991_v0  ;;  %v2152_v28 = vpack.c.bf16 %v2149_v4, %v2149_v4  ;;  %v2148_v61 = vmax.f32 %v2103_v59, 0.0  ;;  %v6037_v19 = vld [vmem:[#allocation2 + $0x24] sm:$0x11]  ;;  %v16967_v51 = vld [vmem:[#allocation2 + $0xc] sm:$0x11]  ;;  %v16989_v4 = vsel %vm20073_vm5, %v6429_v16, %v6428_v2  ;;  %v11801_v59 = vcombine.high %v6484_v5, %v6484_v5  ;;  %vm20078_vm7 = vmmov %vm20071_vm1 }
 0x228   :  { %v6485_v6 = vld [vmem:[#allocation2 + $0x28] sm:$0x11]  ;;  %13296 = vmatprep.subr.bf16.mxu0 %v19991_v0  ;;  %v2105_v63 = vpop.f32.mrf.mxu0  ;;  %v11783_v30 = vcombine.high %v6037_v19, %v6037_v19  ;;  %v11782_v52 = vcombine.low %v6037_v19, %v6037_v19  ;;  %v13191_v42 = vpop.f32.mrf.mxu1  ;;  %v6049_v29 = vunpack.c.l.b16 %v11781_v62  ;;  %v6048_v36 = vunpack.c.l.b16 %v11780_v58  ;;  %v17004_v16 = vld [vmem:[%s19953_s3 + $0x30] sm:$0xff]   ;;  %v14939_v27 = vld [vmem:[#allocation2 + $0x1c] ss:$0 sps:$4 sm:$0x22]  }
 0x229   :  { %v2170_v39 = vrot.slane %v2152_v28, %v15955_v32  ;;  %v11577_v37 = vpack.c.bf16 %v2148_v61, %v2147_v23  ;;  %v11803_v3 = vcombine.high %v6485_v6, %v6485_v6  ;;  %v11802_v20 = vcombine.low %v6485_v6, %v6485_v6  ;;  %v17009_v61 = vld [vmem:[#allocation2 + $0x4] ss:$0 sps:$4 sm:$0x22]   ;;  %vm20080_vm0 = vmmov %vm20071_vm1  ;;  %v7454_v50 = vld [vmem:[#allocation2 + $0x10] sm:$0x11] }
 0x22a   :  { %13315 = vmatpush3.bf16.msra.mxu1 %v16972_v25  ;;  %v6051_v18 = vunpack.c.l.b16 %v11783_v30  ;;  %v6050_v8 = vunpack.c.l.b16 %v11782_v52  ;;  %v11800_v43 = vcombine.low %v6484_v5, %v6484_v5  ;;  %v11823_v33 = vcombine.high %v16967_v51, %v16967_v51  ;;  %vm20081_vm2 = vmmov %vm20080_vm0 }
 0x22b   :  { %13297 = vmatpush3.bf16.msra.mxu0 %v16978_v38  ;;  %13336 = vmatprep.subr.bf16.mxu1 %v19991_v0  ;;  %v2163_v55 = vrot.slane %v11577_v37, %v15955_v32  ;;  %v11822_v47 = vcombine.low %v16967_v51, %v16967_v51  ;;  %v6499_v58 = vunpack.c.l.b16 %v11803_v3  ;;  %v6498_v2 = vunpack.c.l.b16 %v11802_v20  ;;  %v17028_v3 = vld [vmem:[%s19953_s3 + $0x88] sm:$0xff]   ;;  %vm20084_vm12 = vmmov %vm20080_vm0 }
 0x22c   :  { %13298 = vmatprep.subr.bf16.mxu0 %v19991_v0  ;;  %v6054_v13 = vrot.slane %v6051_v18, 7  ;;  %v6052_v23 = vrot.slane %v6050_v8, 7  ;;  %v6434_v63 = vpack.c.b16 %v16989_v4, %v16989_v4  ;;  %v6377_v30 = vsel %vm20077_vm3, %v6376_v35, %v6375_v7  ;;  %v2218_v7 = vld [vmem:[#allocation2 + $0x14] sm:$0x2]  ;;  %vm20086_vm4 = vmmov %vm20080_vm0 }
 0x22d   :  { %13317 = vmatmul.mubr.msk.bf16.vlgmr.msra.gmra.mxu1 %vm20074_vm8, %v2888_v49  ;;  %v2171_v21 = vcombine.low %v2163_v55, %v2170_v39  ;;  %v7010_v49 = vld [vmem:[#allocation2 + $0x24] sm:$0x11]  ;;  %v6374_v52 = vsel %vm20078_vm7, %v6373_v45, %v6372_v26  ;;  %v6497_v39 = vunpack.c.l.b16 %v11801_v59  ;;  %v6502_v35 = vrot.slane %v6499_v58, 7  ;;  %v2221_v26 = vld [vmem:[#allocation2 + $0x24] sm:$0x22]  ;;  %vm20087_vm5 = vmmov %vm20080_vm0 }
 0x22e   :  { %13337 = vmatpush3.bf16.msra.mxu1 %v16874_v31  ;;  %13348 = vmatprep.mubr.msk.bf16.mxu1 %vm20028_vm11, %v19991_v0  ;;  %v6055_v60 = vsel %vm20075_vm9, %v6054_v13, %v6049_v29  ;;  %v6053_v62 = vsel %vm20076_vm15, %v6052_v23, %v6048_v36  ;;  %v2215_v29 = vld [vmem:[#allocation2 + $0xc] sm:$0x22]  ;;  %v6496_v36 = vunpack.c.l.b16 %v11800_v43  ;;  %v11825_v5 = vcombine.high %v7010_v49, %v7010_v49  ;;  %vm20088_vm9 = vmmov %vm20080_vm0 }
 0x22f   :  { %13299 = vmatpush3.bf16.msra.mxu0 %v17004_v16  ;;  %13338 = vmatprep.subr.bf16.mxu1 %v19991_v0  ;;  %v2178_v28 = vrot.slane %v2171_v21, %v15955_v32  ;;  %v6057_v19 = vpack.c.b16 %v6055_v60, %v6055_v60  ;;  %v6056_v6 = vpack.c.b16 %v6053_v62, %v6053_v62  ;;  %v6500_v51 = vrot.slane %v6498_v2, 7  ;;  %v2224_v45 = vld [vmem:[#allocation2 + $0x2c] sm:$0x2]  ;;  %vm20089_vm15 = vmmov %vm20080_vm0 }
 0x230   :  { %13320 = vmatprep.subr.bf16.mxu0 %v19991_v0  ;;  %v17023_v18 = vunpack.c.l.b16 %v11823_v33  ;;  %v11824_v8 = vcombine.low %v7010_v49, %v7010_v49  ;;  %v17034_v55 = vunpack.c.l.b16 %v11822_v47  ;;  %v2940_v13 = vunpack.c.l.b16 %v17009_v61  ;;  %vm20090_vm3 = vmmov %vm20080_vm0 }
 0x231   :  { %v2180_v37 = vunpack.i.h.s16 %v2178_v28  ;;  %v11578_v42 = vpack.i.b16 %v2178_v28, %v2178_v28  ;;  %6060 = vrot.lane.b32.xlu0 %v6057_v19, %s15498_s20  ;;  %6058 = vrot.lane.b32.xlu1 %v6056_v6, %s15498_s20  ;;  %v2941_v23 = vunpack.c.l.b16 %v14939_v27  ;;  %v6379_v4 = vpack.c.b16 %v6377_v30, %v6377_v30  ;;  %v17084_v30 = vld [vmem:[%s19953_s3 + $0x78] sm:$0xff]   ;;  %vm20091_vm7 = vmmov %vm20080_vm0 }
 0x232   :  { %13301 = vmatmul.mubr.msk.bf16.vlgmr.msra.gmra.mxu0 %vm20079_vm10, %v2842_v44  ;;  %13339 = vmatpush3.bf16.msra.mxu1 %v16899_v12  ;;  %v6378_v59 = vpack.c.b16 %v6374_v52, %v6374_v52  ;;  %v6503_v60 = vsel %vm20080_vm0, %v6502_v35, %v6497_v39  ;;  %v17054_v62 = vunpack.c.l.b16 %v11825_v5  ;;  %v7027_v58 = vrot.slane %v17023_v18, 1  ;;  %v7455_v5 = vld [vmem:[#allocation2 + $0x28] sm:$0x11]  ;;  %vm20092_vm10 = vmmov %vm20074_vm8 }
 0x233   :  { %13321 = vmatpush3.bf16.msra.mxu0 %v17028_v3  ;;  %v2182_v20 = vpack.i.b16 %v2180_v37, %v2180_v37  ;;  %v2189_v34 = vrot.slane %v11578_v42, %v15986_v53  ;;  %v2196_v44 = vrot.slane %v11578_v42, %v15989_v54  ;;  %13340 = vmatprep.subr.bf16.mxu1 %v19991_v0  ;;  %v17068_v49 = vunpack.c.l.b16 %v11824_v8 }
 0x234   :  { %13322 = vmatprep.subr.bf16.mxu0 %v19991_v0  ;;  %13332 = vmatprep.mubr.msk.bf16.mxu0 %vm20028_vm11, %v19991_v0  ;;  %v7025_v28 = vrot.slane %v17034_v55, 1  ;;  %v2943_v56 = vrot.slane %v2941_v23, 1  ;;  %v6505_v61 = vpack.c.b16 %v6503_v60, %v6503_v60  ;;  %v2942_v52 = vrot.slane %v2940_v13, 2 }
 0x235   :  { %v2203_v21 = vrot.slane %v2182_v20, %v15986_v53  ;;  %v2210_v43 = vrot.slane %v2182_v20, %v15989_v54  ;;  %v2216_v33 = vsel %vm16293_vm6, %v2189_v34, %v2215_v29  ;;  %v2219_v47 = vsel %vm16301_vm13, %v2196_v44, %v2218_v7  ;;  %6438 = vrot.lane.b32.xlu0 %v6435_v40, %s15498_s20  ;;  %v17064_v40 = vld [vmem:[%s19953_s3 + $0x80] sm:$0xff]  }
 0x236   :  { %2217 = vst [vmem:[#allocation2 + $0xc] sm:$0x22] %v2216_v33  ;;  %2220 = vst [vmem:[#allocation2 + $0x14] sm:$0x2] %v2219_v47  ;;  %13341 = vmatpush3.bf16.msra.mxu1 %v16928_v48  ;;  %6436 = vrot.lane.b32.xlu1 %v6434_v63, %s15498_s20  ;;  %v6501_v54 = vsel %vm20081_vm2, %v6500_v51, %v6496_v36  ;;  %v11843_v37 = vcombine.high %v7454_v50, %v7454_v50  ;;  %v7081_v8 = vrot.slane %v17054_v62, 7  ;;  %vm20085_vm1 = vcmask 523264  }
 0x237   :  { %v2222_v2 = vsel %vm16293_vm6, %v2203_v21, %v2221_v26  ;;  %v2225_v9 = vsel %vm16301_vm13, %v2210_v43, %v2224_v45  ;;  %13323 = vmatpush3.bf16.msra.mxu0 %v17064_v40  ;;  %13342 = vmatprep.subr.bf16.mxu1 %v19991_v0  ;;  %v6504_v6 = vpack.c.b16 %v6501_v54, %v6501_v54  ;;  %vm20082_vm13 = vmmov %vm20080_vm0  ;;  %v7079_v20 = vrot.slane %v17068_v49, 7  ;;  %v17102_v21 = vld [vmem:[%s19953_s3 + $0x70] sm:$0xff]  }
 0x238   :  { %2223 = vst [vmem:[#allocation2 + $0x24] sm:$0x22] %v2222_v2  ;;  %2226 = vst [vmem:[#allocation2 + $0x2c] sm:$0x2] %v2225_v9  ;;  %13324 = vmatprep.subr.bf16.mxu0 %v19991_v0  ;;  %v7028_v63 = vsel %vm20082_vm13, %v17054_v62, %v7027_v58  ;;  %v11842_v42 = vcombine.low %v7454_v50, %v7454_v50  ;;  %v17092_v7 = vsel %vm20084_vm12, %v2943_v56, %v2942_v52 }
 0x239   :  { %6382 = vrot.lane.b32.xlu0 %v6379_v4, %s15498_s20  ;;  %vm20083_vm6 = vmmov %vm20080_vm0  ;;  %v7030_v35 = vpack.c.b16 %v7028_v63, %v7028_v63  ;;  %v3061_v4 = vpop.permute.xlu0 %3060  ;;  %v11845_v33 = vcombine.high %v7455_v5, %v7455_v5  ;;  %v17106_v47 = vunpack.c.l.b16 %v11843_v37  ;;  %v11844_v60 = vcombine.low %v7455_v5, %v7455_v5 }
 0x23a   :  { %13343 = vmatpush3.bf16.msra.mxu1 %v16954_v24  ;;  %v17074_v27 = vpop.f32.mrf.mxu0  ;;  %v17076_v19 = vpop.f32.mrf.mxu1  ;;  %6380 = vrot.lane.b32.xlu1 %v6378_v59, %s15498_s20  ;;  %v7026_v39 = vsel %vm20083_vm6, %v17068_v49, %v7025_v28  ;;  %v17108_v54 = vunpack.c.l.b16 %v11842_v42  ;;  %v7082_v5 = vsel %vm20086_vm4, %v7081_v8, %v17023_v18  ;;  %vm20093_vm2 = vmmov %vm20080_vm0 }
 0x23b   :  { %13325 = vmatpush3.bf16.msra.mxu0 %v17084_v30  ;;  %13344 = vmatprep.subr.bf16.mxu1 %v19991_v0  ;;  %v7029_v45 = vpack.c.b16 %v7026_v39, %v7026_v39  ;;  %v3059_v59 = vpop.permute.xlu1 %3058  ;;  %vm20094_vm13 = vmmov %vm20080_vm0 }
 0x23c   :  { %v13206_v29 = vpop.f32.mrf.mxu0  ;;  %v13222_v36 = vpop.f32.mrf.mxu1  ;;  %13326 = vmatprep.subr.bf16.mxu0 %v19991_v0  ;;  %vm20095_vm6 = vmmov %vm20080_vm0 }
 0x23d   :  { %6508 = vrot.lane.b32.xlu0 %v6505_v61, %s15498_s20  ;;  %v7133_v51 = vld [vmem:[#allocation2 + $0xc] sm:$0x22]  ;;  %v3062_v29 = vsel %vm20085_vm1, %v3059_v59, %v3061_v4  ;;  %v17138_v59 = vld [vmem:[%s19953_s3 + $0x60] sm:$0xff]   ;;  %vm20096_vm12 = vmmov %vm20085_vm1 }
 0x23e   :  { %v7578_v34 = vld [vmem:[#allocation2 + $0x10] sm:$0x22]  ;;  %13345 = vmatpush3.bf16.msra.mxu1 %v16978_v38  ;;  %v2357_v44 = vpop.f32.mrf.mxu0  ;;  %v2439_v26 = vpop.f32.mrf.mxu1  ;;  %6506 = vrot.lane.b32.xlu1 %v6504_v6, %s15498_s20  ;;  %v11829_v13 = vcombine.high %v7133_v51, %v7133_v51  ;;  %v11828_v23 = vcombine.low %v7133_v51, %v7133_v51  ;;  %v17118_v36 = vld [vmem:[%s19953_s3 + $0x68] sm:$0xff]   ;;  %vm20097_vm1 = vmmov %vm20074_vm8 }
 0x23f   :  { %13327 = vmatpush3.bf16.msra.mxu0 %v17102_v21  ;;  %13346 = vmatprep.subr.bf16.mxu1 %v19991_v0  ;;  %v7134_v43 = vld [vmem:[#allocation2 + $0x24] sm:$0x22]  ;;  %v11849_v56 = vcombine.high %v7578_v34, %v7578_v34  ;;  %v11848_v6 = vcombine.low %v7578_v34, %v7578_v34  ;;  %v7469_v44 = vunpack.c.l.b16 %v11845_v33  ;;  %v7472_v26 = vrot.slane %v17106_v47, 1  ;;  %vm20098_vm4 = vmmov %vm20096_vm12 }
 0x240   :  { %v7579_v62 = vld [vmem:[#allocation2 + $0x28] sm:$0x22]  ;;  %v13207_v58 = vpop.f32.mrf.mxu0  ;;  %v13223_v2 = vpop.f32.mrf.mxu1  ;;  %13328 = vmatprep.subr.bf16.mxu0 %v19991_v0  ;;  %v11831_v9 = vcombine.high %v7134_v43, %v7134_v43  ;;  %v7146_v49 = vunpack.c.l.b16 %v11829_v13  ;;  %v11830_v28 = vcombine.low %v7134_v43, %v7134_v43  ;;  %v7145_v50 = vunpack.c.l.b16 %v11828_v23 }
 0x241   :  { %7033 = vrot.lane.b32.xlu0 %v7030_v35, %s15498_s20  ;;  %v11851_v61 = vcombine.high %v7579_v62, %v7579_v62  ;;  %v11850_v63 = vcombine.low %v7579_v62, %v7579_v62  ;;  %v7080_v35 = vsel %vm20087_vm5, %v7079_v20, %v17034_v55  ;;  %v7470_v13 = vrot.slane %v17108_v54, 1  ;;  %vm20099_vm5 = vmmov %vm20097_vm1 }
 0x242   :  { %13347 = vmatpush3.bf16.msra.mxu1 %v17004_v16  ;;  %7031 = vrot.lane.b32.xlu1 %v7029_v45, %s15498_s20  ;;  %v7148_v52 = vunpack.c.l.b16 %v11831_v9  ;;  %v7152_v39 = vrot.slane %v7146_v49, 2  ;;  %v7147_v37 = vunpack.c.l.b16 %v11830_v28  ;;  %v7149_v42 = vrot.slane %v7145_v50, 2 }
 0x243   :  { %13329 = vmatpush3.bf16.msra.mxu0 %v17118_v36  ;;  %13368 = vmatprep.subr.bf16.mxu1 %v19991_v0  ;;  %v7468_v45 = vunpack.c.l.b16 %v11844_v60  ;;  %v7591_v23 = vunpack.c.l.b16 %v11849_v56  ;;  %v7590_v4 = vunpack.c.l.b16 %v11848_v6  ;;  %v7593_v8 = vunpack.c.l.b16 %v11851_v61 }
 0x244   :  { %13330 = vmatprep.subr.bf16.mxu0 %v19991_v0  ;;  %v7153_v51 = vrot.slane %v7148_v52, 1  ;;  %v7150_v34 = vrot.slane %v7147_v37, 1  ;;  %v7592_v20 = vunpack.c.l.b16 %v11850_v63  ;;  %v2945_v60 = vpack.c.b16 %v17092_v7, %v17092_v7 }
 0x245   :  { %13349 = vmatmul.mubr.msk.bf16.vlgmr.msra.gmra.mxu1 %vm20074_vm8, %v3062_v29  ;;  %v7084_v62 = vpack.c.b16 %v7082_v5, %v7082_v5  ;;  %v7083_v58 = vpack.c.b16 %v7080_v35, %v7080_v35  ;;  %v7473_v2 = vsel %vm20090_vm3, %v7469_v44, %v7472_v26  ;;  %v7471_v9 = vsel %vm20091_vm7, %v7468_v45, %v7470_v13  ;;  %vm20104_vm3 = vmmov %vm20080_vm0 }
 0x246   :  { %13369 = vmatpush3.bf16.msra.mxu1 %v17028_v3  ;;  %13380 = vmatprep.mubr.msk.bf16.mxu1 %vm20028_vm11, %v19991_v0  ;;  %v7154_v18 = vsel %vm20088_vm9, %v7153_v51, %v7152_v39  ;;  %v7151_v55 = vsel %vm20089_vm15, %v7150_v34, %v7149_v42  ;;  %v7597_v49 = vrot.slane %v7591_v23, 2  ;;  %v7598_v28 = vrot.slane %v7593_v8, 1  ;;  %v17201_v23 = vld [vmem:[%s19954_s4] ss:$0 sm:$0xff]  ;;  %vm20105_vm7 = vmmov %vm20097_vm1 }
 0x247   :  { %13331 = vmatpush3.bf16.msra.mxu0 %v17138_v59  ;;  %13370 = vmatprep.subr.bf16.mxu1 %v19991_v0  ;;  %v7156_v43 = vpack.c.b16 %v7154_v18, %v7154_v18  ;;  %v7155_v33 = vpack.c.b16 %v7151_v55, %v7151_v55  ;;  %v7594_v50 = vrot.slane %v7590_v4, 2  ;;  %v7595_v7 = vrot.slane %v7592_v20, 1  ;;  %v14961_v8 = vld [vmem:[#allocation2 + $0x20] ss:$0 sps:$4 sm:$0x11]  }
 0x248   :  { %13352 = vmatprep.subr.bf16.mxu0 %v19991_v0  ;;  %v7475_v56 = vpack.c.b16 %v7473_v2, %v7473_v2  ;;  %v7474_v61 = vpack.c.b16 %v7471_v9, %v7471_v9  ;;  %v7599_v6 = vsel %vm20080_vm0, %v7598_v28, %v7597_v49  ;;  %v7526_v52 = vrot.slane %v7469_v44, 7 }
 0x249   :  { %7159 = vrot.lane.b32.xlu0 %v7156_v43, %s15498_s20  ;;  %7157 = vrot.lane.b32.xlu1 %v7155_v33, %s15498_s20  ;;  %v7596_v63 = vsel %vm20093_vm2, %v7595_v7, %v7594_v50  ;;  %v7524_v39 = vrot.slane %v7468_v45, 7  ;;  %v7601_v37 = vpack.c.b16 %v7599_v6, %v7599_v6  ;;  %v2437_v13 = vadd.f32 %v17076_v19, %v17074_v27 }
 0x24a   :  { %13333 = vmatmul.mubr.msk.bf16.vlgmr.msra.gmra.mxu0 %vm20092_vm10, %v2945_v60  ;;  %13371 = vmatpush3.bf16.msra.mxu1 %v17064_v40  ;;  %v7600_v42 = vpack.c.b16 %v7596_v63, %v7596_v63  ;;  %v7527_v29 = vsel %vm20094_vm13, %v7526_v52, %v17106_v47  ;;  %v3187_v47 = vpop.permute.xlu0 %3186  ;;  %v3287_v33 = vunpack.c.l.b16 %v14961_v8  ;;  %vm20100_vm8 = vsmask.f32 256  ;;  %vm20106_vm10 = vmmov %vm20080_vm0 }
 0x24b   :  { %13353 = vmatpush3.bf16.msra.mxu0 %v16850_v17  ;;  %13372 = vmatprep.subr.bf16.mxu1 %v19991_v0  ;;  %v7525_v5 = vsel %vm20095_vm6, %v7524_v39, %v17108_v54  ;;  %v7529_v35 = vpack.c.b16 %v7527_v29, %v7527_v29  ;;  %v3185_v54 = vpop.permute.xlu1 %3184  ;;  %vm20101_vm9 = vcmask 516096   ;;  %v2585_v39 = vld [vmem:[#allocation3 + $0x14] sm:$0x1]  ;;  %vm20107_vm0 = vmmov %vm20097_vm1 }
 0x24c   :  { %13354 = vmatprep.subr.bf16.mxu0 %v19991_v0  ;;  %13364 = vmatprep.mubr.msk.bf16.mxu0 %vm20028_vm11, %v19991_v0  ;;  %v7528_v51 = vpack.c.b16 %v7525_v5, %v7525_v5  ;;  %v3188_v34 = vsel %vm20096_vm12, %v3185_v54, %v3187_v47  ;;  %v3334_v2 = vrot.slane %v3287_v33, 7  ;;  %vm17225_vm15 = vmand %vm20101_vm9, %vm20100_vm8  ;;  %v17254_v47 = vld [vmem:[#allocation2 + $0x18] ss:$0 sps:$4 sm:$0x22]   ;;  %vm20115_vm9 = vcmask 523264  }
 0x24d   :  { %7087 = vrot.lane.b32.xlu0 %v7084_v62, %s15498_s20  ;;  %7085 = vrot.lane.b32.xlu1 %v7083_v58, %s15498_s20  ;;  %v14960_v62 = vld [vmem:[#allocation2 + $0x8] ss:$0 sps:$4 sm:$0x11]   ;;  %v17259_v54 = vld [vmem:[#allocation2] ss:$0 sps:$4 sm:$0x22]   ;;  %vm20108_vm13 = vmmov %vm20107_vm0 }
 0x24e   :  { %13373 = vmatpush3.bf16.msra.mxu1 %v17084_v30  ;;  %v3115_v44 = vpop.permute.xlu0 %3114  ;;  %v3286_v49 = vunpack.c.l.b16 %v14960_v62  ;;  %vm20109_vm6 = vmmov %vm20093_vm2  ;;  %v14979_v62 = vld [vmem:[#allocation2 + $0x18] ss:$0 sps:$4 sm:$0x44]  }
 0x24f   :  { %13355 = vmatpush3.bf16.msra.mxu0 %v16867_v57  ;;  %13374 = vmatprep.subr.bf16.mxu1 %v19991_v0  ;;  %v3113_v26 = vpop.permute.xlu1 %3112  ;;  %vm20110_vm12 = vmmov %vm20107_vm0 }
 0x250   :  { %13356 = vmatprep.subr.bf16.mxu0 %v19991_v0  ;;  %v3116_v45 = vsel %vm20098_vm4, %v3113_v26, %v3115_v44  ;;  %v3288_v52 = vrot.slane %v3286_v49, 1  ;;  %v14977_v44 = vld [vmem:[#allocation2 + $0x20] ss:$0 sps:$4 sm:$0x22]   ;;  %v3492_v26 = vunpack.c.l.b16 %v17259_v54  ;;  %vm20112_vm4 = vmmov %vm20107_vm0 }
 0x251   :  { %7478 = vrot.lane.b32.xlu0 %v7475_v56, %s15498_s20  ;;  %7476 = vrot.lane.b32.xlu1 %v7474_v61, %s15498_s20  ;;  %v2582_v56 = vld [vmem:[#allocation3] sm:$0x1]  ;;  %v3335_v61 = vsel %vm20104_vm3, %v3334_v2, %v3286_v49  ;;  %v3597_v2 = vunpack.c.l.b16 %v14979_v62  ;;  %vm20114_vm8 = vmmov %vm20107_vm0 }
 0x252   :  { %13375 = vmatpush3.bf16.msra.mxu1 %v17102_v21  ;;  %v3336_v29 = vpack.c.b16 %v3335_v61, %v3335_v61  ;;  %v3541_v61 = vrot.slane %v3492_v26, 2  ;;  %vm20116_vm3 = vmmov %vm20107_vm0 }
 0x253   :  { %13357 = vmatpush3.bf16.msra.mxu0 %v16891_v41  ;;  %13376 = vmatprep.subr.bf16.mxu1 %v19991_v0  ;;  %v3599_v49 = vrot.slane %v3597_v2, 3  ;;  %v17427_v2 = vld [vmem:[%s19953_s3 + $0x18] sm:$0xff]  }
 0x254   :  { %13358 = vmatprep.subr.bf16.mxu0 %v19991_v0 }
 0x255   :  { %7604 = vrot.lane.b32.xlu0 %v7601_v37, %s15498_s20  ;;  %7602 = vrot.lane.b32.xlu1 %v7600_v42, %s15498_s20 }
 0x256   :  { %13377 = vmatpush3.bf16.msra.mxu1 %v17118_v36 }
 0x257   :  { %13359 = vmatpush3.bf16.msra.mxu0 %v16915_v46  ;;  %13378 = vmatprep.subr.bf16.mxu1 %v19991_v0 }
 0x258   :  { %13360 = vmatprep.subr.bf16.mxu0 %v19991_v0 }
 0x259   :  { %7532 = vrot.lane.b32.xlu0 %v7529_v35, %s15498_s20  ;;  %7530 = vrot.lane.b32.xlu1 %v7528_v51, %s15498_s20  ;;  %v3289_v35 = vsel %vm20106_vm10, %v3287_v33, %v3288_v52  ;;  %vm20118_vm10 = vmmov %vm20107_vm0 }
 0x25a   :  { %13379 = vmatpush3.bf16.msra.mxu1 %v17138_v59  ;;  %v3290_v51 = vpack.c.b16 %v3289_v35, %v3289_v35 }
 0x25b   :  { %13361 = vmatpush3.bf16.msra.mxu0 %v16946_v22  ;;  %13400 = vmatprep.subr.bf16.mxu1 %v19991_v0 }
 0x25c   :  { %13362 = vmatprep.subr.bf16.mxu0 %v19991_v0 }
 0x25d   :  { %13381 = vmatmul.mubr.msk.bf16.vlgmr.msra.gmra.mxu1 %vm20097_vm1, %v3188_v34  ;;  %v3493_v34 = vunpack.c.l.b16 %v17254_v47  ;;  %vm20111_vm1 = vmmov %vm20093_vm2 }
 0x25e   :  { %13401 = vmatpush3.bf16.msra.mxu1 %v16850_v17  ;;  %13412 = vmatprep.mubr.msk.bf16.mxu1 %vm20028_vm11, %v19991_v0 }
 0x25f   :  { %13363 = vmatpush3.bf16.msra.mxu0 %v16972_v25  ;;  %13402 = vmatprep.subr.bf16.mxu1 %v19991_v0 }
 0x260   :  { %13384 = vmatprep.subr.bf16.mxu0 %v19991_v0  ;;  %v2529_v4 = vpop.f32.mrf.mxu0 }
 0x261   :  { %v2535_v18 = vadd.f32 %v2529_v4, %v2437_v13  ;;  %v3495_v13 = vrot.slane %v3493_v34, 2  ;;  %v3389_v4 = vunpack.c.l.b16 %v14977_v44 }
 0x262   :  { %13365 = vmatmul.mubr.msk.bf16.vlgmr.msra.gmra.mxu0 %vm20099_vm5, %v3116_v45  ;;  %13403 = vmatpush3.bf16.msra.mxu1 %v16867_v57  ;;  %v13238_v55 = vpop.f32.mrf.mxu0  ;;  %v14976_v45 = vld [vmem:[#allocation2 + $0x8] ss:$0 sps:$4 sm:$0x22]   ;;  %vm20113_vm5 = vmmov %vm20111_vm1 }
 0x263   :  { %13385 = vmatpush3.bf16.msra.mxu0 %v16874_v31  ;;  %13404 = vmatprep.subr.bf16.mxu1 %v19991_v0  ;;  %v2542_v27 = vadd.f32 %v17201_v23, %v2535_v18  ;;  %v3494_v18 = vrot.slane %v3492_v26, 3  ;;  %v3388_v55 = vunpack.c.l.b16 %v14976_v45 }
 0x264   :  { %13386 = vmatprep.subr.bf16.mxu0 %v19991_v0  ;;  %13396 = vmatprep.mubr.msk.bf16.mxu0 %vm20028_vm11, %v19991_v0  ;;  %v2532_v19 = vpop.f32.mrf.mxu0 }
 0x265   :  { %v2543_v20 = vmax.f32 %v2542_v27, 0.0  ;;  %v3496_v8 = vsel %vm20093_vm2, %v3495_v13, %v3494_v18  ;;  %v3391_v27 = vrot.slane %v3389_v4, 1  ;;  %vm20120_vm2 = vmmov %vm20116_vm3  ;;  %v17406_v13 = vld [vmem:[%s19953_s3 + $0x28] sm:$0xff]  }
 0x266   :  { %13405 = vmatpush3.bf16.msra.mxu1 %v16891_v41  ;;  %v13239_v43 = vpop.f32.mrf.mxu0  ;;  %v3497_v19 = vpack.c.b16 %v3496_v8, %v3496_v8  ;;  %v14983_v8 = vld [vmem:[#allocation2 + $0x1c] ss:$0 sps:$4 sm:$0x44]  }
 0x267   :  { %13387 = vmatpush3.bf16.msra.mxu0 %v16899_v12  ;;  %13406 = vmatprep.subr.bf16.mxu1 %v19991_v0  ;;  %v2544_v60 = vpack.c.bf16 %v2543_v20, %v2543_v20  ;;  %v3390_v20 = vrot.slane %v3388_v55, 2  ;;  %v14982_v55 = vld [vmem:[#allocation2 + $0x4] ss:$0 sps:$4 sm:$0x44]  }
 0x268   :  { %13388 = vmatprep.subr.bf16.mxu0 %v19991_v0 }
 0x269   :  { %v2552_v58 = vrot.slane %v2544_v60, %v15955_v32  ;;  %v3392_v43 = vsel %vm20109_vm6, %v3391_v27, %v3390_v20  ;;  %v14978_v60 = vld [vmem:[#allocation2] ss:$0 sps:$4 sm:$0x44]   ;;  %vm20122_vm6 = vmmov %vm20120_vm2 }
 0x26a   :  { %13407 = vmatpush3.bf16.msra.mxu1 %v16915_v46  ;;  %v3393_v33 = vpack.c.b16 %v3392_v43, %v3392_v43  ;;  %v17418_v20 = vld [vmem:[%s19953_s3 + $0x20] sm:$0xff]  }
 0x26b   :  { %13389 = vmatpush3.bf16.msra.mxu0 %v16928_v48  ;;  %13408 = vmatprep.subr.bf16.mxu1 %v19991_v0  ;;  %v2559_v9 = vrot.slane %v2552_v58, %v15955_v32  ;;  %v3596_v58 = vunpack.c.l.b16 %v14978_v60  ;;  %v4049_v60 = vunpack.c.l.b16 %v14983_v8 }
 0x26c   :  { %13390 = vmatprep.subr.bf16.mxu0 %v19991_v0 }
 0x26d   :  { %v2561_v28 = vunpack.i.h.s16 %v2559_v9  ;;  %v11629_v50 = vpack.i.b16 %v2559_v9, %v2559_v9  ;;  %v3598_v9 = vrot.slane %v3596_v58, 4 }
 0x26e   :  { %13409 = vmatpush3.bf16.msra.mxu1 %v16946_v22 }
 0x26f   :  { %13391 = vmatpush3.bf16.msra.mxu0 %v16954_v24  ;;  %13410 = vmatprep.subr.bf16.mxu1 %v19991_v0  ;;  %v2563_v6 = vpack.i.b16 %v2561_v28, %v2561_v28  ;;  %v2570_v63 = vrot.slane %v11629_v50, %v15986_v53  ;;  %v3600_v28 = vsel %vm20111_vm1, %v3599_v49, %v3598_v9  ;;  %v3542_v50 = vrot.slane %v3493_v34, 1 }
 0x270   :  { %13392 = vmatprep.subr.bf16.mxu0 %v19991_v0  ;;  %v4051_v49 = vrot.slane %v4049_v60, 3 }
 0x271   :  { %v2577_v37 = vrot.slane %v2563_v6, %v15986_v53  ;;  %v2583_v42 = vsel %vm17225_vm15, %v2570_v63, %v2582_v56  ;;  %v3601_v56 = vpack.c.b16 %v3600_v28, %v3600_v28  ;;  %v3543_v63 = vsel %vm20113_vm5, %v3542_v50, %v3541_v61 }
 0x272   :  { %13411 = vmatpush3.bf16.msra.mxu1 %v16972_v25  ;;  %2584 = vst [vmem:[#allocation3] sm:$0x1] %v2583_v42 }
 0x273   :  { %13393 = vmatpush3.bf16.msra.mxu0 %v16978_v38  ;;  %13432 = vmatprep.subr.bf16.mxu1 %v19991_v0  ;;  %v2586_v5 = vsel %vm17225_vm15, %v2577_v37, %v2585_v39  ;;  %v3544_v37 = vpack.c.b16 %v3543_v63, %v3543_v63 }
 0x274   :  { %13394 = vmatprep.subr.bf16.mxu0 %v19991_v0  ;;  %2587 = vst [vmem:[#allocation3 + $0x14] sm:$0x1] %v2586_v5  ;;  %v17368_v5 = vld [vmem:[#allocation2 + $0x4] ss:$0 sps:$4 sm:$0x22]  }
 0x275   :  { %13413 = vmatmul.mubr.msk.bf16.vlgmr.msra.gmra.mxu1 %vm20105_vm7, %v3336_v29  ;;  %vm20117_vm7 = vmmov %vm20115_vm9  ;;  %v17363_v29 = vld [vmem:[#allocation2 + $0x1c] ss:$0 sps:$4 sm:$0x22]   ;;  %v3944_v35 = vunpack.c.l.b16 %v17368_v5 }
 0x276   :  { %13433 = vmatpush3.bf16.msra.mxu1 %v16874_v31  ;;  %13444 = vmatprep.mubr.msk.bf16.mxu1 %vm20028_vm11, %v19991_v0 }
 0x277   :  { %13395 = vmatpush3.bf16.msra.mxu0 %v17004_v16  ;;  %13434 = vmatprep.subr.bf16.mxu1 %v19991_v0 }
 0x278   :  { %13416 = vmatprep.subr.bf16.mxu0 %v19991_v0 }
 0x27a   :  { %13397 = vmatmul.mubr.msk.bf16.vlgmr.msra.gmra.mxu0 %vm20107_vm0, %v3290_v51  ;;  %13435 = vmatpush3.bf16.msra.mxu1 %v16899_v12  ;;  %v3946_v51 = vrot.slane %v3944_v35, 3  ;;  %vm20119_vm0 = vmmov %vm20111_vm1 }
 0x27b   :  { %13417 = vmatpush3.bf16.msra.mxu0 %v17028_v3  ;;  %13436 = vmatprep.subr.bf16.mxu1 %v19991_v0  ;;  %vm20124_vm1 = vmmov %vm20120_vm2 }
 0x27c   :  { %13418 = vmatprep.subr.bf16.mxu0 %v19991_v0  ;;  %13428 = vmatprep.mubr.msk.bf16.mxu0 %vm20028_vm11, %v19991_v0  ;;  %vm20126_vm5 = vmmov %vm20124_vm1 }
 0x27e   :  { %13437 = vmatpush3.bf16.msra.mxu1 %v16928_v48 }
 0x27f   :  { %13419 = vmatpush3.bf16.msra.mxu0 %v17064_v40  ;;  %13438 = vmatprep.subr.bf16.mxu1 %v19991_v0 }
 0x280   :  { %13420 = vmatprep.subr.bf16.mxu0 %v19991_v0 }
 0x282   :  { %13439 = vmatpush3.bf16.msra.mxu1 %v16954_v24 }
 0x283   :  { %13421 = vmatpush3.bf16.msra.mxu0 %v17084_v30  ;;  %13440 = vmatprep.subr.bf16.mxu1 %v19991_v0 }
 0x284   :  { %13422 = vmatprep.subr.bf16.mxu0 %v19991_v0 }
 0x286   :  { %13441 = vmatpush3.bf16.msra.mxu1 %v16978_v38 }
 0x287   :  { %13423 = vmatpush3.bf16.msra.mxu0 %v17102_v21  ;;  %13442 = vmatprep.subr.bf16.mxu1 %v19991_v0 }
 0x288   :  { %13424 = vmatprep.subr.bf16.mxu0 %v19991_v0 }
 0x28a   :  { %13443 = vmatpush3.bf16.msra.mxu1 %v17004_v16 }
 0x28b   :  { %13425 = vmatpush3.bf16.msra.mxu0 %v17118_v36  ;;  %13464 = vmatprep.subr.bf16.mxu1 %v19991_v0 }
 0x28c   :  { %13426 = vmatprep.subr.bf16.mxu0 %v19991_v0 }
 0x28d   :  { %13445 = vmatmul.mubr.msk.bf16.vlgmr.msra.gmra.mxu1 %vm20108_vm13, %v3497_v19  ;;  %vm20121_vm13 = vmmov %vm20117_vm7 }
 0x28e   :  { %13465 = vmatpush3.bf16.msra.mxu1 %v17028_v3  ;;  %13476 = vmatprep.mubr.msk.bf16.mxu1 %vm20028_vm11, %v19991_v0 }
 0x28f   :  { %13427 = vmatpush3.bf16.msra.mxu0 %v17138_v59  ;;  %13466 = vmatprep.subr.bf16.mxu1 %v19991_v0 }
 0x290   :  { %13448 = vmatprep.subr.bf16.mxu0 %v19991_v0 }
 0x292   :  { %13429 = vmatmul.mubr.msk.bf16.vlgmr.msra.gmra.mxu0 %vm20110_vm12, %v3393_v33  ;;  %13467 = vmatpush3.bf16.msra.mxu1 %v17064_v40  ;;  %v4048_v33 = vunpack.c.l.b16 %v14982_v55  ;;  %vm20123_vm12 = vmmov %vm20119_vm0 }
 0x293   :  { %13449 = vmatpush3.bf16.msra.mxu0 %v16850_v17  ;;  %13468 = vmatprep.subr.bf16.mxu1 %v19991_v0 }
 0x294   :  { %13450 = vmatprep.subr.bf16.mxu0 %v19991_v0  ;;  %13460 = vmatprep.mubr.msk.bf16.mxu0 %vm20028_vm11, %v19991_v0  ;;  %v4050_v9 = vrot.slane %v4048_v33, 4 }
 0x296   :  { %13469 = vmatpush3.bf16.msra.mxu1 %v17084_v30  ;;  %v4052_v61 = vsel %vm20123_vm12, %v4051_v49, %v4050_v9  ;;  %v17543_v49 = vld [vmem:[%s19953_s3 + $0x88] sm:$0xff]  }
 0x297   :  { %13451 = vmatpush3.bf16.msra.mxu0 %v16867_v57  ;;  %13470 = vmatprep.subr.bf16.mxu1 %v19991_v0 }
 0x298   :  { %13452 = vmatprep.subr.bf16.mxu0 %v19991_v0 }
 0x29a   :  { %13471 = vmatpush3.bf16.msra.mxu1 %v17102_v21 }
 0x29b   :  { %13453 = vmatpush3.bf16.msra.mxu0 %v16891_v41  ;;  %13472 = vmatprep.subr.bf16.mxu1 %v19991_v0 }
 0x29c   :  { %13454 = vmatprep.subr.bf16.mxu0 %v19991_v0 }
 0x29e   :  { %13473 = vmatpush3.bf16.msra.mxu1 %v17118_v36 }
 0x29f   :  { %13455 = vmatpush3.bf16.msra.mxu0 %v16915_v46  ;;  %13474 = vmatprep.subr.bf16.mxu1 %v19991_v0 }
 0x2a0   :  { %13456 = vmatprep.subr.bf16.mxu0 %v19991_v0 }
 0x2a2   :  { %13475 = vmatpush3.bf16.msra.mxu1 %v17138_v59 }
 0x2a3   :  { %13457 = vmatpush3.bf16.msra.mxu0 %v16946_v22  ;;  %13496 = vmatprep.subr.bf16.mxu1 %v19991_v0 }
 0x2a4   :  { %v17310_v6 = vpop.f32.mrf.mxu1  ;;  %13458 = vmatprep.subr.bf16.mxu0 %v19991_v0 }
 0x2a5   :  { %13477 = vmatmul.mubr.msk.bf16.vlgmr.msra.gmra.mxu1 %vm20112_vm4, %v3601_v56  ;;  %v17438_v56 = vld [vmem:[%s19953_s3 + $0x10] sm:$0xff]   ;;  %vm20125_vm4 = vmmov %vm20119_vm0 }
 0x2a6   :  { %13497 = vmatpush3.bf16.msra.mxu1 %v16850_v17  ;;  %v13254_v52 = vpop.f32.mrf.mxu1  ;;  %13508 = vmatprep.mubr.msk.bf16.mxu1 %vm20028_vm11, %v19991_v0  ;;  %v3774_v17 = vpop.permute.xlu0 %3773 }
 0x2a7   :  { %13459 = vmatpush3.bf16.msra.mxu0 %v16972_v25  ;;  %13498 = vmatprep.subr.bf16.mxu1 %v19991_v0 }
 0x2a8   :  { %v2655_v39 = vpop.f32.mrf.mxu1  ;;  %13480 = vmatprep.subr.bf16.mxu0 %v19991_v0 }
 0x2aa   :  { %13461 = vmatmul.mubr.msk.bf16.vlgmr.msra.gmra.mxu0 %vm20114_vm8, %v3544_v37  ;;  %13499 = vmatpush3.bf16.msra.mxu1 %v16867_v57  ;;  %v13255_v42 = vpop.f32.mrf.mxu1  ;;  %v3772_v57 = vpop.permute.xlu1 %3771  ;;  %vm20127_vm8 = vmmov %vm20117_vm7 }
 0x2ab   :  { %13481 = vmatpush3.bf16.msra.mxu0 %v16874_v31  ;;  %13500 = vmatprep.subr.bf16.mxu1 %v19991_v0  ;;  %v3775_v31 = vsel %vm20115_vm9, %v3772_v57, %v3774_v17  ;;  %v17451_v42 = vld [vmem:[%s19953_s3 + $0x8] sm:$0xff]   ;;  %v4053_v17 = vpack.c.b16 %v4052_v61, %v4052_v61  ;;  %v3993_v57 = vrot.slane %v3944_v35, 2  ;;  %v17473_v35 = vld [vmem:[%s19953_s3] sm:$0xff]   ;;  %vm20128_vm9 = vmmov %vm20124_vm1 }
 0x2ac   :  { %13482 = vmatprep.subr.bf16.mxu0 %v19991_v0  ;;  %13492 = vmatprep.mubr.msk.bf16.mxu0 %vm20028_vm11, %v19991_v0  ;;  %v17548_v61 = vld [vmem:[#allocation2 + $0x20] ss:$0 sps:$4 sm:$0x22]  }
 0x2ae   :  { %13501 = vmatpush3.bf16.msra.mxu1 %v16891_v41  ;;  %v3718_v41 = vpop.permute.xlu0 %3717 }
 0x2af   :  { %13483 = vmatpush3.bf16.msra.mxu0 %v16899_v12  ;;  %13502 = vmatprep.subr.bf16.mxu1 %v19991_v0 }
 0x2b0   :  { %13484 = vmatprep.subr.bf16.mxu0 %v19991_v0 }
 0x2b2   :  { %13503 = vmatpush3.bf16.msra.mxu1 %v16915_v46  ;;  %v3716_v46 = vpop.permute.xlu1 %3715 }
 0x2b3   :  { %13485 = vmatpush3.bf16.msra.mxu0 %v16928_v48  ;;  %13504 = vmatprep.subr.bf16.mxu1 %v19991_v0 }
 0x2b4   :  { %13486 = vmatprep.subr.bf16.mxu0 %v19991_v0 }
 0x2b6   :  { %13505 = vmatpush3.bf16.msra.mxu1 %v16946_v22  ;;  %v17349_v22 = vld [vmem:[%s19953_s3 + $0x58] sm:$0xff]   ;;  %v3844_v34 = vpop.permute.xlu1 %3843 }
 0x2b7   :  { %13487 = vmatpush3.bf16.msra.mxu0 %v16954_v24  ;;  %13506 = vmatprep.subr.bf16.mxu1 %v19991_v0 }
 0x2b8   :  { %13488 = vmatprep.subr.bf16.mxu0 %v19991_v0 }
 0x2ba   :  { %13507 = vmatpush3.bf16.msra.mxu1 %v16972_v25  ;;  %v3719_v25 = vsel %vm20117_vm7, %v3716_v46, %v3718_v41 }
 0x2bb   :  { %13489 = vmatpush3.bf16.msra.mxu0 %v16978_v38  ;;  %13528 = vmatprep.subr.bf16.mxu1 %v19991_v0 }
 0x2bc   :  { %13490 = vmatprep.subr.bf16.mxu0 %v19991_v0 }
 0x2bd   :  { %13509 = vmatmul.mubr.msk.bf16.vlgmr.msra.gmra.mxu1 %vm20116_vm3, %v3775_v31  ;;  %v2824_v31 = vld [vmem:[#allocation3] sm:$0x1]  ;;  %vm20129_vm3 = vmmov %vm20117_vm7 }
 0x2be   :  { %13529 = vmatpush3.bf16.msra.mxu1 %v17349_v22  ;;  %13540 = vmatprep.mubr.msk.bf16.mxu1 %vm20028_vm11, %v19991_v0  ;;  %vm20130_vm7 = vmmov %vm20124_vm1 }
 0x2bf   :  { %13491 = vmatpush3.bf16.msra.mxu0 %v17004_v16  ;;  %13530 = vmatprep.subr.bf16.mxu1 %v19991_v0  ;;  %vm20136_vm12 = vmmov %vm20129_vm3 }
 0x2c0   :  { %13512 = vmatprep.subr.bf16.mxu0 %v19991_v0 }
 0x2c2   :  { %13493 = vmatmul.mubr.msk.bf16.vlgmr.msra.gmra.mxu0 %vm20118_vm10, %v3719_v25  ;;  %13531 = vmatpush3.bf16.msra.mxu1 %v16899_v12  ;;  %v3945_v12 = vunpack.c.l.b16 %v17363_v29  ;;  %vm3028_vm10 = vcmask 517121  }
 0x2c3   :  { %13513 = vmatpush3.bf16.msra.mxu0 %v17028_v3  ;;  %13532 = vmatprep.subr.bf16.mxu1 %v19991_v0 }
 0x2c4   :  { %13514 = vmatprep.subr.bf16.mxu0 %v19991_v0  ;;  %13524 = vmatprep.mubr.msk.bf16.mxu0 %vm20028_vm11, %v19991_v0  ;;  %v3994_v52 = vrot.slane %v3945_v12, 1 }
 0x2c6   :  { %13533 = vmatpush3.bf16.msra.mxu1 %v16928_v48  ;;  %v3947_v48 = vrot.slane %v3945_v12, 2  ;;  %v3995_v29 = vsel %vm20125_vm4, %v3994_v52, %v3993_v57  ;;  %v2827_v12 = vld [vmem:[#allocation3 + $0x14] sm:$0x1]  ;;  %v17554_v52 = vld [vmem:[#allocation2 + $0x8] ss:$0 sps:$4 sm:$0x22]   ;;  %v4396_v57 = vunpack.c.l.b16 %v17548_v61 }
 0x2c7   :  { %13515 = vmatpush3.bf16.msra.mxu0 %v17064_v40  ;;  %13534 = vmatprep.subr.bf16.mxu1 %v19991_v0 }
 0x2c8   :  { %13516 = vmatprep.subr.bf16.mxu0 %v19991_v0 }
 0x2ca   :  { %13535 = vmatpush3.bf16.msra.mxu1 %v16954_v24  ;;  %v3948_v24 = vsel %vm20119_vm0, %v3947_v48, %v3946_v51  ;;  %v3996_v51 = vpack.c.b16 %v3995_v29, %v3995_v29  ;;  %vm20131_vm0 = vsmask.f32 1280 }
 0x2cb   :  { %13517 = vmatpush3.bf16.msra.mxu0 %v17084_v30  ;;  %13536 = vmatprep.subr.bf16.mxu1 %v19991_v0  ;;  %v3949_v47 = vpack.c.b16 %v3948_v24, %v3948_v24 }
 0x2cc   :  { %13518 = vmatprep.subr.bf16.mxu0 %v19991_v0 }
 0x2ce   :  { %13537 = vmatpush3.bf16.msra.mxu1 %v16978_v38 }
 0x2cf   :  { %13519 = vmatpush3.bf16.msra.mxu0 %v17102_v21  ;;  %13538 = vmatprep.subr.bf16.mxu1 %v19991_v0 }
 0x2d0   :  { %13520 = vmatprep.subr.bf16.mxu0 %v19991_v0 }
 0x2d2   :  { %13539 = vmatpush3.bf16.msra.mxu1 %v17004_v16  ;;  %v3846_v16 = vpop.permute.xlu0 %3845 }
 0x2d3   :  { %13521 = vmatpush3.bf16.msra.mxu0 %v17118_v36  ;;  %13560 = vmatprep.subr.bf16.mxu1 %v19991_v0  ;;  %v3847_v44 = vsel %vm20121_vm13, %v3844_v34, %v3846_v16  ;;  %v17489_v34 = vld [vmem:[%s19953_s3 + $0x50] sm:$0xff]   ;;  %vm20134_vm13 = vmmov %vm20125_vm4 }
 0x2d4   :  { %13522 = vmatprep.subr.bf16.mxu0 %v19991_v0 }
 0x2d5   :  { %13541 = vmatmul.mubr.msk.bf16.vlgmr.msra.gmra.mxu1 %vm20120_vm2, %v3949_v47  ;;  %v2778_v38 = vpop.f32.mrf.mxu1  ;;  %vm17581_vm2 = vmand %vm3028_vm10, %vm20131_vm0 }
 0x2d6   :  { %13561 = vmatpush3.bf16.msra.mxu1 %v17028_v3  ;;  %13572 = vmatprep.mubr.msk.bf16.mxu1 %vm20028_vm11, %v19991_v0  ;;  %vm20144_vm0 = vmmov %vm20124_vm1 }
 0x2d7   :  { %13523 = vmatpush3.bf16.msra.mxu0 %v17138_v59  ;;  %v13286_v54 = vpop.f32.mrf.mxu1  ;;  %13562 = vmatprep.subr.bf16.mxu1 %v19991_v0 }
 0x2d8   :  { %13544 = vmatprep.subr.bf16.mxu0 %v19991_v0 }
 0x2d9   :  { %v2781_v26 = vpop.f32.mrf.mxu1 }
 0x2da   :  { %13525 = vmatmul.mubr.msk.bf16.vlgmr.msra.gmra.mxu0 %vm20122_vm6, %v3847_v44  ;;  %v2706_v45 = vpop.f32.mrf.mxu0  ;;  %13563 = vmatpush3.bf16.msra.mxu1 %v17064_v40  ;;  %v17498_v26 = vld [vmem:[%s19953_s3 + $0x48] sm:$0xff]   ;;  %vm20135_vm6 = vmmov %vm20124_vm1 }
 0x2db   :  { %v2707_v3 = vadd.f32 %v2706_v45, %v17310_v6  ;;  %13545 = vmatpush3.bf16.msra.mxu0 %v17406_v13  ;;  %v13287_v4 = vpop.f32.mrf.mxu1  ;;  %13564 = vmatprep.subr.bf16.mxu1 %v19991_v0  ;;  %v17507_v45 = vld [vmem:[%s19953_s3 + $0x40] sm:$0xff]  }
 0x2dc   :  { %v13270_v18 = vpop.f32.mrf.mxu0  ;;  %13546 = vmatprep.subr.bf16.mxu0 %v19991_v0  ;;  %13556 = vmatprep.mubr.msk.bf16.mxu0 %vm20028_vm11, %v19991_v0  ;;  %v4223_v4 = vpop.permute.xlu1 %4222 }
 0x2dd   :  { %v2784_v40 = vadd.f32 %v2778_v38, %v2707_v3  ;;  %v4225_v3 = vpop.permute.xlu0 %4224  ;;  %v17516_v18 = vld [vmem:[%s19953_s3 + $0x38] sm:$0xff]  }
 0x2de   :  { %v2709_v27 = vpop.f32.mrf.mxu0  ;;  %13565 = vmatpush3.bf16.msra.mxu1 %v17084_v30  ;;  %v4226_v55 = vsel %vm20127_vm8, %v4223_v4, %v4225_v3 }
 0x2df   :  { %v2785_v19 = vadd.f32 %v17201_v23, %v2784_v40  ;;  %13547 = vmatpush3.bf16.msra.mxu0 %v17418_v20  ;;  %13566 = vmatprep.subr.bf16.mxu1 %v19991_v0 }
 0x2e0   :  { %v13271_v43 = vpop.f32.mrf.mxu0  ;;  %13548 = vmatprep.subr.bf16.mxu0 %v19991_v0  ;;  %v4167_v27 = vpop.permute.xlu1 %4166 }
 0x2e1   :  { %v2786_v62 = vmax.f32 %v2785_v19, 0.0  ;;  %v4169_v40 = vpop.permute.xlu0 %4168  ;;  %v17531_v19 = vld [vmem:[%s19953_s3 + $0x30] sm:$0xff]  }
 0x2e2   :  { %13567 = vmatpush3.bf16.msra.mxu1 %v17102_v21  ;;  %v4170_v33 = vsel %vm20129_vm3, %v4167_v27, %v4169_v40  ;;  %vm20141_vm3 = vmmov %vm20125_vm4 }
 0x2e3   :  { %v2787_v58 = vpack.c.bf16 %v2786_v62, %v2786_v62  ;;  %13549 = vmatpush3.bf16.msra.mxu0 %v17427_v2  ;;  %13568 = vmatprep.subr.bf16.mxu1 %v19991_v0 }
 0x2e4   :  { %13550 = vmatprep.subr.bf16.mxu0 %v19991_v0  ;;  %v4295_v40 = vpop.permute.xlu1 %4294 }
 0x2e5   :  { %v2795_v28 = vrot.slane %v2787_v58, %v15955_v32 }
 0x2e6   :  { %13569 = vmatpush3.bf16.msra.mxu1 %v17118_v36 }
 0x2e7   :  { %v2802_v50 = vrot.slane %v2795_v28, %v15955_v32  ;;  %13551 = vmatpush3.bf16.msra.mxu0 %v17438_v56  ;;  %13570 = vmatprep.subr.bf16.mxu1 %v19991_v0 }
 0x2e8   :  { %13552 = vmatprep.subr.bf16.mxu0 %v19991_v0 }
 0x2e9   :  { %v2804_v6 = vunpack.i.h.s16 %v2802_v50  ;;  %v11641_v63 = vpack.i.b16 %v2802_v50, %v2802_v50 }
 0x2ea   :  { %13571 = vmatpush3.bf16.msra.mxu1 %v17138_v59 }
 0x2eb   :  { %v2806_v39 = vpack.i.b16 %v2804_v6, %v2804_v6  ;;  %v2813_v37 = vrot.slane %v11641_v63, %v15986_v53  ;;  %13553 = vmatpush3.bf16.msra.mxu0 %v17451_v42  ;;  %13592 = vmatprep.subr.bf16.mxu1 %v19991_v0 }
 0x2ec   :  { %13554 = vmatprep.subr.bf16.mxu0 %v19991_v0 }
 0x2ed   :  { %v2820_v41 = vrot.slane %v2806_v39, %v15986_v53  ;;  %v2825_v46 = vsel %vm15912_vm14, %v2813_v37, %v2824_v31  ;;  %v17461_v25 = vpop.f32.mrf.mxu1  ;;  %13573 = vmatmul.mubr.msk.bf16.vlgmr.msra.gmra.mxu1 %vm20124_vm1, %v4053_v17  ;;  %v17559_v37 = vld [vmem:[%s19953_s3 + $0x80] sm:$0xff]  }
 0x2ee   :  { %2826 = vst [vmem:[#allocation3] sm:$0x1] %v2825_v46  ;;  %13593 = vmatpush3.bf16.msra.mxu1 %v17406_v13  ;;  %13604 = vmatprep.mubr.msk.bf16.mxu1 %vm20028_vm11, %v19991_v0 }
 0x2ef   :  { %v2828_v5 = vsel %vm15912_vm14, %v2820_v41, %v2827_v12  ;;  %13555 = vmatpush3.bf16.msra.mxu0 %v17473_v35  ;;  %v13318_v48 = vpop.f32.mrf.mxu1  ;;  %13594 = vmatprep.subr.bf16.mxu1 %v19991_v0  ;;  %v4395_v41 = vunpack.c.l.b16 %v17554_v52 }
 0x2f0   :  { %2829 = vst [vmem:[#allocation3 + $0x14] sm:$0x1] %v2828_v5  ;;  %13576 = vmatprep.subr.bf16.mxu0 %v19991_v0 }
 0x2f1   :  { %v2929_v24 = vpop.f32.mrf.mxu1  ;;  %v4397_v12 = vrot.slane %v4395_v41, 3 }
 0x2f2   :  { %v2880_v47 = vpop.f32.mrf.mxu0  ;;  %13557 = vmatmul.mubr.msk.bf16.vlgmr.msra.gmra.mxu0 %vm20126_vm5, %v3996_v51  ;;  %13595 = vmatpush3.bf16.msra.mxu1 %v17418_v20  ;;  %v3030_v51 = vld [vmem:[#allocation3] sm:$0x2]  ;;  %vm20137_vm5 = vsmask.f32 7942 }
 0x2f3   :  { %13577 = vmatpush3.bf16.msra.mxu0 %v17349_v22  ;;  %v13319_v38 = vpop.f32.mrf.mxu1  ;;  %13596 = vmatprep.subr.bf16.mxu1 %v19991_v0  ;;  %v2927_v60 = vadd.f32 %v17461_v25, %v2880_v47  ;;  %v4398_v25 = vrot.slane %v4396_v57, 2  ;;  %vm17648_vm8 = vmand %vm3028_vm10, %vm20137_vm5  ;;  %vm20150_vm5 = vcmask 523264  }
 0x2f4   :  { %v13302_v54 = vpop.f32.mrf.mxu0  ;;  %13578 = vmatprep.subr.bf16.mxu0 %v19991_v0  ;;  %13588 = vmatprep.mubr.msk.bf16.mxu0 %vm20028_vm11, %v19991_v0  ;;  %vm20143_vm10 = vmmov %vm20141_vm3 }
 0x2f5   :  { %v4399_v24 = vsel %vm20134_vm13, %v4398_v25, %v4397_v12  ;;  %v3033_v54 = vld [vmem:[#allocation3 + $0x14] sm:$0x2]  ;;  %vm20145_vm13 = vmmov %vm20141_vm3 }
 0x2f6   :  { %v2883_v16 = vpop.f32.mrf.mxu0  ;;  %13597 = vmatpush3.bf16.msra.mxu1 %v17427_v2 }
 0x2f7   :  { %13579 = vmatpush3.bf16.msra.mxu0 %v17489_v34  ;;  %13598 = vmatprep.subr.bf16.mxu1 %v19991_v0 }
 0x2f8   :  { %v13303_v44 = vpop.f32.mrf.mxu0  ;;  %13580 = vmatprep.subr.bf16.mxu0 %v19991_v0 }
 0x2f9   :  { %v4400_v44 = vpack.c.b16 %v4399_v24, %v4399_v24 }
 0x2fa   :  { %13599 = vmatpush3.bf16.msra.mxu1 %v17438_v56 }
 0x2fb   :  { %13581 = vmatpush3.bf16.msra.mxu0 %v17498_v26  ;;  %13600 = vmatprep.subr.bf16.mxu1 %v19991_v0 }
 0x2fc   :  { %13582 = vmatprep.subr.bf16.mxu0 %v19991_v0 }
 0x2fe   :  { %13601 = vmatpush3.bf16.msra.mxu1 %v17451_v42 }
 0x2ff   :  { %13583 = vmatpush3.bf16.msra.mxu0 %v17507_v45  ;;  %13602 = vmatprep.subr.bf16.mxu1 %v19991_v0 }
 0x300   :  { %13584 = vmatprep.subr.bf16.mxu0 %v19991_v0 }
 0x302   :  { %13603 = vmatpush3.bf16.msra.mxu1 %v17473_v35 }
 0x303   :  { %13585 = vmatpush3.bf16.msra.mxu0 %v17516_v18  ;;  %13624 = vmatprep.subr.bf16.mxu1 %v19991_v0 }
 0x304   :  { %13586 = vmatprep.subr.bf16.mxu0 %v19991_v0 }
 0x305   :  { %v17522_v8 = vpop.f32.mrf.mxu1  ;;  %13605 = vmatmul.mubr.msk.bf16.vlgmr.msra.gmra.mxu1 %vm20128_vm9, %v4226_v55  ;;  %v4297_v55 = vpop.permute.xlu0 %4296  ;;  %vm20140_vm9 = vmmov %vm20124_vm1 }
 0x306   :  { %13625 = vmatpush3.bf16.msra.mxu1 %v17349_v22  ;;  %13636 = vmatprep.mubr.msk.bf16.mxu1 %vm20028_vm11, %v19991_v0  ;;  %v4298_v27 = vsel %vm20136_vm12, %v4295_v40, %v4297_v55  ;;  %vm3476_vm12 = vcmask 518146  }
 0x307   :  { %13587 = vmatpush3.bf16.msra.mxu0 %v17531_v19  ;;  %v13350_v43 = vpop.f32.mrf.mxu1  ;;  %13626 = vmatprep.subr.bf16.mxu1 %v19991_v0 }
 0x308   :  { %13608 = vmatprep.subr.bf16.mxu0 %v19991_v0 }
 0x309   :  { %v3103_v62 = vpop.f32.mrf.mxu1 }
 0x30a   :  { %v2983_v58 = vpop.f32.mrf.mxu0  ;;  %13589 = vmatmul.mubr.msk.bf16.vlgmr.msra.gmra.mxu0 %vm20130_vm7, %v4170_v33  ;;  %13627 = vmatpush3.bf16.msra.mxu1 %v17489_v34  ;;  %vm20142_vm7 = vmmov %vm20124_vm1 }
 0x30b   :  { %v2989_v9 = vadd.f32 %v2983_v58, %v2927_v60  ;;  %13609 = vmatpush3.bf16.msra.mxu0 %v17543_v49  ;;  %v13351_v28 = vpop.f32.mrf.mxu1  ;;  %13628 = vmatprep.subr.bf16.mxu1 %v19991_v0  ;;  %v14986_v58 = vld [vmem:[#allocation2 + $0x8] ss:$0 sps:$4 sm:$0x44]  }
 0x30c   :  { %v13334_v50 = vpop.f32.mrf.mxu0  ;;  %13610 = vmatprep.subr.bf16.mxu0 %v19991_v0  ;;  %13620 = vmatprep.mubr.msk.bf16.mxu0 %vm20028_vm11, %v19991_v0 }
 0x30d   :  { %v2990_v6 = vadd.f32 %v17201_v23, %v2989_v9  ;;  %v14987_v9 = vld [vmem:[#allocation2 + $0x20] ss:$0 sps:$4 sm:$0x44]  }
 0x30e   :  { %v2986_v63 = vpop.f32.mrf.mxu0  ;;  %13629 = vmatpush3.bf16.msra.mxu1 %v17498_v26 }
 0x30f   :  { %v2991_v39 = vmax.f32 %v2990_v6, 0.0  ;;  %13611 = vmatpush3.bf16.msra.mxu0 %v17559_v37  ;;  %13630 = vmatprep.subr.bf16.mxu1 %v19991_v0  ;;  %v17616_v6 = vld [vmem:[%s19953_s3 + $0x78] sm:$0xff]  }
 0x310   :  { %v13335_v17 = vpop.f32.mrf.mxu0  ;;  %13612 = vmatprep.subr.bf16.mxu0 %v19991_v0 }
 0x311   :  { %v2992_v31 = vpack.c.bf16 %v2991_v39, %v2991_v39  ;;  %v4499_v39 = vunpack.c.l.b16 %v14986_v58  ;;  %v4500_v17 = vunpack.c.l.b16 %v14987_v9  ;;  %v14988_v58 = vld [vmem:[#allocation2] ss:$0 sps:$4 sm:$0x44]   ;;  %v14989_v9 = vld [vmem:[#allocation2 + $0x18] ss:$0 sps:$4 sm:$0x44]  }
 0x312   :  { %13631 = vmatpush3.bf16.msra.mxu1 %v17507_v45 }
 0x313   :  { %v3000_v46 = vrot.slane %v2992_v31, %v15955_v32  ;;  %13613 = vmatpush3.bf16.msra.mxu0 %v17084_v30  ;;  %13632 = vmatprep.subr.bf16.mxu1 %v19991_v0 }
 0x314   :  { %13614 = vmatprep.subr.bf16.mxu0 %v19991_v0 }
 0x315   :  { %v3007_v29 = vrot.slane %v3000_v46, %v15955_v32  ;;  %v17626_v46 = vld [vmem:[%s19953_s3 + $0x70] sm:$0xff]  }
 0x316   :  { %13633 = vmatpush3.bf16.msra.mxu1 %v17516_v18 }
 0x317   :  { %v3009_v5 = vunpack.i.h.s16 %v3007_v29  ;;  %v11649_v48 = vpack.i.b16 %v3007_v29, %v3007_v29  ;;  %13615 = vmatpush3.bf16.msra.mxu0 %v17102_v21  ;;  %13634 = vmatprep.subr.bf16.mxu1 %v19991_v0  ;;  %v4502_v29 = vrot.slane %v4500_v17, 3 }
 0x318   :  { %13616 = vmatprep.subr.bf16.mxu0 %v19991_v0 }
 0x319   :  { %v3011_v47 = vpack.i.b16 %v3009_v5, %v3009_v5  ;;  %v3018_v38 = vrot.slane %v11649_v48, %v15986_v53  ;;  %v17636_v5 = vld [vmem:[%s19953_s3 + $0x68] sm:$0xff]  }
 0x31a   :  { %13635 = vmatpush3.bf16.msra.mxu1 %v17531_v19 }
 0x31b   :  { %v3025_v21 = vrot.slane %v3011_v47, %v15986_v53  ;;  %v3031_v16 = vsel %vm17581_vm2, %v3018_v38, %v3030_v51  ;;  %13617 = vmatpush3.bf16.msra.mxu0 %v17118_v36  ;;  %13656 = vmatprep.subr.bf16.mxu1 %v19991_v0  ;;  %v4445_v38 = vrot.slane %v4396_v57, 1  ;;  %v4444_v57 = vrot.slane %v4395_v41, 2 }
 0x31c   :  { %3032 = vst [vmem:[#allocation3] sm:$0x2] %v3031_v16  ;;  %13618 = vmatprep.subr.bf16.mxu0 %v19991_v0 }
 0x31d   :  { %v3034_v3 = vsel %vm17581_vm2, %v3025_v21, %v3033_v54  ;;  %v3226_v4 = vpop.f32.mrf.mxu1  ;;  %13637 = vmatmul.mubr.msk.bf16.vlgmr.msra.gmra.mxu1 %vm20135_vm6, %v4400_v44  ;;  %v17655_v21 = vld [vmem:[%s19953_s3 + $0x60] sm:$0xff]   ;;  %v4446_v40 = vsel %vm20141_vm3, %v4445_v38, %v4444_v57  ;;  %vm20146_vm6 = vmmov %vm20144_vm0 }
 0x31e   :  { %3035 = vst [vmem:[#allocation3 + $0x14] sm:$0x2] %v3034_v3  ;;  %13657 = vmatpush3.bf16.msra.mxu1 %v17543_v49  ;;  %13668 = vmatprep.mubr.msk.bf16.mxu1 %vm20028_vm11, %v19991_v0 }
 0x31f   :  { %13619 = vmatpush3.bf16.msra.mxu0 %v17138_v59  ;;  %v13382_v36 = vpop.f32.mrf.mxu1  ;;  %13658 = vmatprep.subr.bf16.mxu1 %v19991_v0 }
 0x320   :  { %13640 = vmatprep.subr.bf16.mxu0 %v19991_v0 }
 0x321   :  { %v3229_v43 = vpop.f32.mrf.mxu1 }
 0x322   :  { %v3154_v33 = vpop.f32.mrf.mxu0  ;;  %13621 = vmatmul.mubr.msk.bf16.vlgmr.msra.gmra.mxu0 %vm20124_vm1, %v4298_v27  ;;  %13659 = vmatpush3.bf16.msra.mxu1 %v17559_v37  ;;  %v4447_v43 = vpack.c.b16 %v4446_v40, %v4446_v40  ;;  %vm20147_vm1 = vsmask.f32 2304 }
 0x323   :  { %v3155_v60 = vadd.f32 %v3154_v33, %v17522_v8  ;;  %13641 = vmatpush3.bf16.msra.mxu0 %v17406_v13  ;;  %v13383_v59 = vpop.f32.mrf.mxu1  ;;  %13660 = vmatprep.subr.bf16.mxu1 %v19991_v0  ;;  %v3272_v3 = vld [vmem:[#allocation3] sm:$0x2] }
 0x324   :  { %v13366_v62 = vpop.f32.mrf.mxu0  ;;  %13642 = vmatprep.subr.bf16.mxu0 %v19991_v0  ;;  %13652 = vmatprep.mubr.msk.bf16.mxu0 %vm20028_vm11, %v19991_v0 }
 0x325   :  { %v3232_v28 = vadd.f32 %v3226_v4, %v3155_v60  ;;  %v3275_v27 = vld [vmem:[#allocation3 + $0x14] sm:$0x2] }
 0x326   :  { %v3157_v50 = vpop.f32.mrf.mxu0  ;;  %13661 = vmatpush3.bf16.msra.mxu1 %v17616_v6 }
 0x327   :  { %v3233_v8 = vadd.f32 %v17201_v23, %v3232_v28  ;;  %13643 = vmatpush3.bf16.msra.mxu0 %v17418_v20  ;;  %13662 = vmatprep.subr.bf16.mxu1 %v19991_v0  ;;  %v4501_v23 = vrot.slane %v4499_v39, 4 }
 0x328   :  { %v13367_v63 = vpop.f32.mrf.mxu0  ;;  %13644 = vmatprep.subr.bf16.mxu0 %v19991_v0 }
 0x329   :  { %v3234_v31 = vmax.f32 %v3233_v8, 0.0  ;;  %v4503_v51 = vsel %vm20125_vm4, %v4502_v29, %v4501_v23  ;;  %v4601_v8 = vunpack.c.l.b16 %v14988_v58  ;;  %v4602_v63 = vunpack.c.l.b16 %v14989_v9  ;;  %vm17738_vm4 = vmand %vm3476_vm12, %vm20147_vm1 }
 0x32a   :  { %13663 = vmatpush3.bf16.msra.mxu1 %v17626_v46  ;;  %v4504_v61 = vpack.c.b16 %v4503_v51, %v4503_v51  ;;  %vm20156_vm12 = vmmov %vm20141_vm3 }
 0x32b   :  { %v3235_v25 = vpack.c.bf16 %v3234_v31, %v3234_v31  ;;  %13645 = vmatpush3.bf16.msra.mxu0 %v17427_v2  ;;  %13664 = vmatprep.subr.bf16.mxu1 %v19991_v0  ;;  %v4650_v39 = vrot.slane %v4601_v8, 4  ;;  %v4651_v17 = vrot.slane %v4602_v63, 3  ;;  %v4604_v23 = vrot.slane %v4602_v63, 4  ;;  %vm20157_vm1 = vmmov %vm20144_vm0 }
 0x32c   :  { %13646 = vmatprep.subr.bf16.mxu0 %v19991_v0 }
 0x32d   :  { %v3243_v12 = vrot.slane %v3235_v25, %v15955_v32  ;;  %v4652_v31 = vsel %vm20143_vm10, %v4651_v17, %v4650_v39  ;;  %v4603_v25 = vrot.slane %v4601_v8, 5  ;;  %v3481_v17 = vld [vmem:[#allocation3 + $0x14] sm:$0x4]  ;;  %vm20153_vm10 = vmmov %vm20150_vm5 }
 0x32e   :  { %13665 = vmatpush3.bf16.msra.mxu1 %v17636_v5  ;;  %v4653_v29 = vpack.c.b16 %v4652_v31, %v4652_v31  ;;  %v4827_v31 = vpop.permute.xlu0 %4826 }
 0x32f   :  { %v3250_v48 = vrot.slane %v3243_v12, %v15955_v32  ;;  %13647 = vmatpush3.bf16.msra.mxu0 %v17438_v56  ;;  %13666 = vmatprep.subr.bf16.mxu1 %v19991_v0 }
 0x330   :  { %13648 = vmatprep.subr.bf16.mxu0 %v19991_v0 }
 0x331   :  { %v3252_v24 = vunpack.i.h.s16 %v3250_v48  ;;  %v11661_v47 = vpack.i.b16 %v3250_v48, %v3250_v48  ;;  %v4605_v48 = vsel %vm20145_vm13, %v4604_v23, %v4603_v25  ;;  %v4825_v25 = vpop.permute.xlu1 %4824  ;;  %vm20154_vm13 = vmmov %vm20150_vm5 }
 0x332   :  { %13667 = vmatpush3.bf16.msra.mxu1 %v17655_v21 }
 0x333   :  { %v3254_v16 = vpack.i.b16 %v3252_v24, %v3252_v24  ;;  %v3261_v44 = vrot.slane %v11661_v47, %v15986_v53  ;;  %13649 = vmatpush3.bf16.msra.mxu0 %v17451_v42  ;;  %13688 = vmatprep.subr.bf16.mxu1 %v19991_v0  ;;  %v4606_v24 = vpack.c.b16 %v4605_v48, %v4605_v48 }
 0x334   :  { %13650 = vmatprep.subr.bf16.mxu0 %v19991_v0  ;;  %v4828_v48 = vsel %vm20150_vm5, %v4825_v25, %v4827_v31  ;;  %vm20158_vm5 = vmmov %vm20141_vm3 }
 0x335   :  { %v3268_v4 = vrot.slane %v3254_v16, %v15986_v53  ;;  %v3273_v36 = vsel %vm17648_vm8, %v3261_v44, %v3272_v3  ;;  %v3374_v55 = vpop.f32.mrf.mxu1  ;;  %13669 = vmatmul.mubr.msk.bf16.vlgmr.msra.gmra.mxu1 %vm20140_vm9, %v4504_v61  ;;  %v17721_v3 = vld [vmem:[%s19954_s4] ss:$0 sm:$0xff]  ;;  %vm20151_vm9 = vmmov %vm20144_vm0 }
 0x336   :  { %3274 = vst [vmem:[#allocation3] sm:$0x2] %v3273_v36  ;;  %13689 = vmatpush3.bf16.msra.mxu1 %v17406_v13  ;;  %13700 = vmatprep.mubr.msk.bf16.mxu1 %vm20028_vm11, %v19991_v0 }
 0x337   :  { %v3276_v52 = vsel %vm17648_vm8, %v3268_v4, %v3275_v27  ;;  %13651 = vmatpush3.bf16.msra.mxu0 %v17473_v35  ;;  %v13414_v41 = vpop.f32.mrf.mxu1  ;;  %13690 = vmatprep.subr.bf16.mxu1 %v19991_v0 }
 0x338   :  { %3277 = vst [vmem:[#allocation3 + $0x14] sm:$0x2] %v3276_v52  ;;  %13672 = vmatprep.subr.bf16.mxu0 %v19991_v0  ;;  %v14990_v52 = vld [vmem:[#allocation2] ss:$0 sps:$4 sm:$0x88]  }
 0x339   :  { %v3377_v33 = vpop.f32.mrf.mxu1  ;;  %v14991_v41 = vld [vmem:[#allocation2 + $0x18] ss:$0 sps:$4 sm:$0x88]  }
 0x33a   :  { %v3328_v60 = vpop.f32.mrf.mxu0  ;;  %13653 = vmatmul.mubr.msk.bf16.vlgmr.msra.gmra.mxu0 %vm20142_vm7, %v4447_v43  ;;  %13691 = vmatpush3.bf16.msra.mxu1 %v17418_v20  ;;  %vm20152_vm7 = vmmov %vm20144_vm0 }
 0x33b   :  { %13673 = vmatpush3.bf16.msra.mxu0 %v17349_v22  ;;  %v13415_v59 = vpop.f32.mrf.mxu1  ;;  %13692 = vmatprep.subr.bf16.mxu1 %v19991_v0  ;;  %v3375_v47 = vadd.f32 %v3374_v55, %v3328_v60  ;;  %v4705_v60 = vunpack.c.l.b16 %v14990_v52 }
 0x33c   :  { %v13398_v62 = vpop.f32.mrf.mxu0  ;;  %13674 = vmatprep.subr.bf16.mxu0 %v19991_v0  ;;  %13684 = vmatprep.mubr.msk.bf16.mxu0 %vm20028_vm11, %v19991_v0  ;;  %v4706_v59 = vunpack.c.l.b16 %v14991_v41 }
 0x33d   :  { %v4707_v63 = vrot.slane %v4705_v60, 6 }
 0x33e   :  { %v3331_v28 = vpop.f32.mrf.mxu0  ;;  %13693 = vmatpush3.bf16.msra.mxu1 %v17427_v2  ;;  %v4708_v39 = vrot.slane %v4706_v59, 5 }
 0x33f   :  { %13675 = vmatpush3.bf16.msra.mxu0 %v17489_v34  ;;  %13694 = vmatprep.subr.bf16.mxu1 %v19991_v0  ;;  %v3478_v28 = vld [vmem:[#allocation3] sm:$0x4] }
 0x340   :  { %v13399_v50 = vpop.f32.mrf.mxu0  ;;  %13676 = vmatprep.subr.bf16.mxu0 %v19991_v0 }
 0x342   :  { %13695 = vmatpush3.bf16.msra.mxu1 %v17438_v56 }
 0x343   :  { %13677 = vmatpush3.bf16.msra.mxu0 %v17498_v26  ;;  %13696 = vmatprep.subr.bf16.mxu1 %v19991_v0 }
 0x344   :  { %13678 = vmatprep.subr.bf16.mxu0 %v19991_v0 }
 0x346   :  { %13697 = vmatpush3.bf16.msra.mxu1 %v17451_v42 }
 0x347   :  { %13679 = vmatpush3.bf16.msra.mxu0 %v17507_v45  ;;  %13698 = vmatprep.subr.bf16.mxu1 %v19991_v0 }
 0x348   :  { %13680 = vmatprep.subr.bf16.mxu0 %v19991_v0 }
 0x34a   :  { %13699 = vmatpush3.bf16.msra.mxu1 %v17473_v35 }
 0x34b   :  { %13681 = vmatpush3.bf16.msra.mxu0 %v17516_v18  ;;  %13720 = vmatprep.subr.bf16.mxu1 %v19991_v0 }
 0x34c   :  { %13682 = vmatprep.subr.bf16.mxu0 %v19991_v0 }
 0x34d   :  { %v17701_v12 = vpop.f32.mrf.mxu1  ;;  %13701 = vmatmul.mubr.msk.bf16.vlgmr.msra.gmra.mxu1 %vm20144_vm0, %v4653_v29 }
 0x34e   :  { %13721 = vmatpush3.bf16.msra.mxu1 %v17349_v22  ;;  %13732 = vmatprep.mubr.msk.bf16.mxu1 %vm20028_vm11, %v19991_v0 }
 0x34f   :  { %13683 = vmatpush3.bf16.msra.mxu0 %v17531_v19  ;;  %v13446_v51 = vpop.f32.mrf.mxu1  ;;  %13722 = vmatprep.subr.bf16.mxu1 %v19991_v0 }
 0x350   :  { %13704 = vmatprep.subr.bf16.mxu0 %v19991_v0 }
 0x351   :  { %v3538_v38 = vpop.f32.mrf.mxu1 }
 0x352   :  { %v3431_v16 = vpop.f32.mrf.mxu0  ;;  %13685 = vmatmul.mubr.msk.bf16.vlgmr.msra.gmra.mxu0 %vm20146_vm6, %v4606_v24  ;;  %13723 = vmatpush3.bf16.msra.mxu1 %v17489_v34  ;;  %vm20155_vm6 = vmmov %vm20144_vm0 }
 0x353   :  { %v3437_v44 = vadd.f32 %v3431_v16, %v3375_v47  ;;  %13705 = vmatpush3.bf16.msra.mxu0 %v17543_v49  ;;  %v13447_v61 = vpop.f32.mrf.mxu1  ;;  %13724 = vmatprep.subr.bf16.mxu1 %v19991_v0  ;;  %v4709_v47 = vsel %vm20141_vm3, %v4708_v39, %v4707_v63  ;;  %v3688_v39 = vld [vmem:[#allocation3 + $0x18] sm:$0x1]  ;;  %vm20160_vm3 = vmmov %vm20153_vm10 }
 0x354   :  { %v13430_v57 = vpop.f32.mrf.mxu0  ;;  %13706 = vmatprep.subr.bf16.mxu0 %v19991_v0  ;;  %13716 = vmatprep.mubr.msk.bf16.mxu0 %vm20028_vm11, %v19991_v0  ;;  %v4710_v16 = vpack.c.b16 %v4709_v47, %v4709_v47 }
 0x355   :  { %v3438_v4 = vadd.f32 %v17721_v3, %v3437_v44 }
 0x356   :  { %v3434_v36 = vpop.f32.mrf.mxu0  ;;  %13725 = vmatpush3.bf16.msra.mxu1 %v17498_v26 }
 0x357   :  { %v3439_v55 = vmax.f32 %v3438_v4, 0.0  ;;  %13707 = vmatpush3.bf16.msra.mxu0 %v17559_v37  ;;  %13726 = vmatprep.subr.bf16.mxu1 %v19991_v0 }
 0x358   :  { %v13431_v40 = vpop.f32.mrf.mxu0  ;;  %13708 = vmatprep.subr.bf16.mxu0 %v19991_v0 }
 0x359   :  { %v3440_v27 = vpack.c.bf16 %v3439_v55, %v3439_v55 }
 0x35a   :  { %13727 = vmatpush3.bf16.msra.mxu1 %v17507_v45 }
 0x35b   :  { %v3448_v43 = vrot.slane %v3440_v27, %v15955_v32  ;;  %13709 = vmatpush3.bf16.msra.mxu0 %v17616_v6  ;;  %13728 = vmatprep.subr.bf16.mxu1 %v19991_v0 }
 0x35c   :  { %13710 = vmatprep.subr.bf16.mxu0 %v19991_v0 }
 0x35d   :  { %v3455_v33 = vrot.slane %v3448_v43, %v15955_v32 }
 0x35e   :  { %13729 = vmatpush3.bf16.msra.mxu1 %v17516_v18 }
 0x35f   :  { %v3457_v62 = vunpack.i.h.s16 %v3455_v33  ;;  %v11669_v58 = vpack.i.b16 %v3455_v33, %v3455_v33  ;;  %13711 = vmatpush3.bf16.msra.mxu0 %v17626_v46  ;;  %13730 = vmatprep.subr.bf16.mxu1 %v19991_v0 }
 0x360   :  { %13712 = vmatprep.subr.bf16.mxu0 %v19991_v0 }
 0x361   :  { %v3459_v50 = vpack.i.b16 %v3457_v62, %v3457_v62  ;;  %v3466_v8 = vrot.slane %v11669_v58, %v15986_v53  ;;  %v4955_v62 = vpop.permute.xlu0 %4954  ;;  %v4953_v58 = vpop.permute.xlu1 %4952 }
 0x362   :  { %13731 = vmatpush3.bf16.msra.mxu1 %v17531_v19  ;;  %v4956_v63 = vsel %vm20153_vm10, %v4953_v58, %v4955_v62  ;;  %vm20162_vm10 = vmmov %vm20158_vm5 }
 0x363   :  { %v3473_v23 = vrot.slane %v3459_v50, %v15986_v53  ;;  %v3479_v29 = vsel %vm17738_vm4, %v3466_v8, %v3478_v28  ;;  %13713 = vmatpush3.bf16.msra.mxu0 %v17636_v5  ;;  %13752 = vmatprep.subr.bf16.mxu1 %v19991_v0  ;;  %v3685_v28 = vld [vmem:[#allocation3 + $0x4] sm:$0x1] }
 0x364   :  { %3480 = vst [vmem:[#allocation3] sm:$0x4] %v3479_v29  ;;  %13714 = vmatprep.subr.bf16.mxu0 %v19991_v0 }
 0x365   :  { %v3482_v51 = vsel %vm17738_vm4, %v3473_v23, %v3481_v17  ;;  %v3639_v24 = vpop.f32.mrf.mxu1  ;;  %13733 = vmatmul.mubr.msk.bf16.vlgmr.msra.gmra.mxu1 %vm20151_vm9, %v4828_v48  ;;  %v4883_v48 = vpop.permute.xlu0 %4882  ;;  %vm20159_vm9 = vmmov %vm20144_vm0 }
 0x366   :  { %3483 = vst [vmem:[#allocation3 + $0x14] sm:$0x4] %v3482_v51  ;;  %13753 = vmatpush3.bf16.msra.mxu1 %v17543_v49  ;;  %13764 = vmatprep.mubr.msk.bf16.mxu1 %vm20028_vm11, %v19991_v0  ;;  %v4881_v51 = vpop.permute.xlu1 %4880 }
 0x367   :  { %13715 = vmatpush3.bf16.msra.mxu0 %v17655_v21  ;;  %v13478_v38 = vpop.f32.mrf.mxu1  ;;  %13754 = vmatprep.subr.bf16.mxu1 %v19991_v0 }
 0x368   :  { %13736 = vmatprep.subr.bf16.mxu0 %v19991_v0 }
 0x369   :  { %v3642_v44 = vpop.f32.mrf.mxu1 }
 0x36a   :  { %v3582_v61 = vpop.f32.mrf.mxu0  ;;  %13717 = vmatmul.mubr.msk.bf16.vlgmr.msra.gmra.mxu0 %vm20152_vm7, %v4710_v16  ;;  %13755 = vmatpush3.bf16.msra.mxu1 %v17559_v37  ;;  %v14992_v44 = vld [vmem:[#allocation2 + $0x4] ss:$0 sps:$4 sm:$0x44]   ;;  %vm20161_vm7 = vmmov %vm20144_vm0 }
 0x36b   :  { %v3583_v57 = vadd.f32 %v3582_v61, %v17701_v12  ;;  %13737 = vmatpush3.bf16.msra.mxu0 %v17406_v13  ;;  %v13479_v4 = vpop.f32.mrf.mxu1  ;;  %13756 = vmatprep.subr.bf16.mxu1 %v19991_v0  ;;  %v14993_v61 = vld [vmem:[#allocation2 + $0x1c] ss:$0 sps:$4 sm:$0x44]  }
 0x36c   :  { %v13462_v36 = vpop.f32.mrf.mxu0  ;;  %13738 = vmatprep.subr.bf16.mxu0 %v19991_v0  ;;  %13748 = vmatprep.mubr.msk.bf16.mxu0 %vm20028_vm11, %v19991_v0  ;;  %v5053_v4 = vunpack.c.l.b16 %v14992_v44 }
 0x36d   :  { %v3645_v55 = vadd.f32 %v3639_v24, %v3583_v57  ;;  %v4884_v24 = vsel %vm20154_vm13, %v4881_v51, %v4883_v48  ;;  %v5054_v36 = vunpack.c.l.b16 %v14993_v61  ;;  %vm20163_vm13 = vmmov %vm20160_vm3 }
 0x36e   :  { %v3585_v40 = vpop.f32.mrf.mxu0  ;;  %13757 = vmatpush3.bf16.msra.mxu1 %v17616_v6 }
 0x36f   :  { %v3646_v27 = vadd.f32 %v17721_v3, %v3645_v55  ;;  %13739 = vmatpush3.bf16.msra.mxu0 %v17418_v20  ;;  %13758 = vmatprep.subr.bf16.mxu1 %v19991_v0  ;;  %v5102_v55 = vrot.slane %v5053_v4, 4  ;;  %v5103_v40 = vrot.slane %v5054_v36, 3 }
 0x370   :  { %v13463_v12 = vpop.f32.mrf.mxu0  ;;  %13740 = vmatprep.subr.bf16.mxu0 %v19991_v0 }
 0x371   :  { %v3647_v52 = vmax.f32 %v3646_v27, 0.0  ;;  %v5055_v27 = vrot.slane %v5053_v4, 5 }
 0x372   :  { %13759 = vmatpush3.bf16.msra.mxu1 %v17626_v46 }
 0x373   :  { %v3648_v41 = vpack.c.bf16 %v3647_v52, %v3647_v52  ;;  %13741 = vmatpush3.bf16.msra.mxu0 %v17427_v2  ;;  %13760 = vmatprep.subr.bf16.mxu1 %v19991_v0 }
 0x374   :  { %13742 = vmatprep.subr.bf16.mxu0 %v19991_v0 }
 0x375   :  { %v3656_v43 = vrot.slane %v3648_v41, %v15955_v32 }
 0x376   :  { %13761 = vmatpush3.bf16.msra.mxu1 %v17636_v5 }
 0x377   :  { %v3663_v33 = vrot.slane %v3656_v43, %v15955_v32  ;;  %13743 = vmatpush3.bf16.msra.mxu0 %v17438_v56  ;;  %13762 = vmatprep.subr.bf16.mxu1 %v19991_v0 }
 0x378   :  { %13744 = vmatprep.subr.bf16.mxu0 %v19991_v0 }
 0x379   :  { %v3665_v60 = vunpack.i.h.s16 %v3663_v33  ;;  %v11677_v59 = vpack.i.b16 %v3663_v33, %v3663_v33 }
 0x37a   :  { %13763 = vmatpush3.bf16.msra.mxu1 %v17655_v21 }
 0x37b   :  { %v3667_v50 = vpack.i.b16 %v3665_v60, %v3665_v60  ;;  %v3674_v8 = vrot.slane %v11677_v59, %v15986_v53  ;;  %13745 = vmatpush3.bf16.msra.mxu0 %v17451_v42  ;;  %13784 = vmatprep.subr.bf16.mxu1 %v19991_v0 }
 0x37c   :  { %13746 = vmatprep.subr.bf16.mxu0 %v19991_v0 }
 0x37d   :  { %v3681_v17 = vrot.slane %v3667_v50, %v15986_v53  ;;  %v3686_v31 = vsel %vm17225_vm15, %v3674_v8, %v3685_v28  ;;  %v3813_v25 = vpop.f32.mrf.mxu1  ;;  %13765 = vmatmul.mubr.msk.bf16.vlgmr.msra.gmra.mxu1 %vm20144_vm0, %v4956_v63  ;;  %v14994_v63 = vld [vmem:[#allocation2 + $0x4] ss:$0 sps:$4 sm:$0x88]  }
 0x37e   :  { %3687 = vst [vmem:[#allocation3 + $0x4] sm:$0x1] %v3686_v31  ;;  %13785 = vmatpush3.bf16.msra.mxu1 %v17406_v13  ;;  %13796 = vmatprep.mubr.msk.bf16.mxu1 %vm20028_vm11, %v19991_v0  ;;  %v5157_v31 = vunpack.c.l.b16 %v14994_v63 }
 0x37f   :  { %v3689_v23 = vsel %vm17225_vm15, %v3681_v17, %v3688_v39  ;;  %13747 = vmatpush3.bf16.msra.mxu0 %v17473_v35  ;;  %v13510_v29 = vpop.f32.mrf.mxu1  ;;  %13786 = vmatprep.subr.bf16.mxu1 %v19991_v0  ;;  %v14995_v39 = vld [vmem:[#allocation2 + $0x1c] ss:$0 sps:$4 sm:$0x88]  }
 0x380   :  { %3690 = vst [vmem:[#allocation3 + $0x18] sm:$0x1] %v3689_v23  ;;  %13768 = vmatprep.subr.bf16.mxu0 %v19991_v0  ;;  %v5159_v51 = vrot.slane %v5157_v31, 6 }
 0x381   :  { %v3816_v47 = vpop.f32.mrf.mxu1 }
 0x382   :  { %v3757_v13 = vpop.f32.mrf.mxu0  ;;  %13749 = vmatmul.mubr.msk.bf16.vlgmr.msra.gmra.mxu0 %vm20155_vm6, %v4884_v24  ;;  %13787 = vmatpush3.bf16.msra.mxu1 %v17418_v20  ;;  %vm20164_vm6 = vmmov %vm20144_vm0 }
 0x383   :  { %13769 = vmatpush3.bf16.msra.mxu0 %v17349_v22  ;;  %v13511_v38 = vpop.f32.mrf.mxu1  ;;  %13788 = vmatprep.subr.bf16.mxu1 %v19991_v0  ;;  %v3814_v43 = vadd.f32 %v3813_v25, %v3757_v13  ;;  %v5158_v25 = vunpack.c.l.b16 %v14995_v39  ;;  %v5278_v13 = vpop.permute.xlu0 %5277  ;;  %v17927_v39 = vld [vmem:[%s19953_s3 + $0x8] sm:$0xff]  }
 0x384   :  { %v13494_v16 = vpop.f32.mrf.mxu0  ;;  %13770 = vmatprep.subr.bf16.mxu0 %v19991_v0  ;;  %13780 = vmatprep.mubr.msk.bf16.mxu0 %vm20028_vm11, %v19991_v0  ;;  %v5276_v38 = vpop.permute.xlu1 %5275 }
 0x385   :  { %v5160_v24 = vrot.slane %v5158_v25, 5  ;;  %v3930_v47 = vld [vmem:[#allocation3 + $0x4] sm:$0x1]  ;;  %v5279_v44 = vsel %vm20160_vm3, %v5276_v38, %v5278_v13 }
 0x386   :  { %v3760_v57 = vpop.f32.mrf.mxu0  ;;  %13789 = vmatpush3.bf16.msra.mxu1 %v17427_v2  ;;  %v5104_v2 = vsel %vm20156_vm12, %v5103_v40, %v5102_v55  ;;  %vm20165_vm12 = vmmov %vm20160_vm3 }
 0x387   :  { %13771 = vmatpush3.bf16.msra.mxu0 %v17489_v34  ;;  %13790 = vmatprep.subr.bf16.mxu1 %v19991_v0  ;;  %v5105_v12 = vpack.c.b16 %v5104_v2, %v5104_v2  ;;  %v3933_v61 = vld [vmem:[#allocation3 + $0x18] sm:$0x1]  ;;  %vm20168_vm3 = vmmov %vm20158_vm5 }
 0x388   :  { %v13495_v20 = vpop.f32.mrf.mxu0  ;;  %13772 = vmatprep.subr.bf16.mxu0 %v19991_v0 }
 0x389   :  { %v5161_v20 = vsel %vm20162_vm10, %v5160_v24, %v5159_v51  ;;  %v17947_v51 = vld [vmem:[%s19953_s3] sm:$0xff]   ;;  %vm20170_vm10 = vmmov %vm20168_vm3 }
 0x38a   :  { %13791 = vmatpush3.bf16.msra.mxu1 %v17438_v56  ;;  %v5056_v56 = vrot.slane %v5054_v36, 4  ;;  %v5162_v36 = vpack.c.b16 %v5161_v20, %v5161_v20  ;;  %v17969_v20 = vld [vmem:[%s19953_s3 + $0x50] sm:$0xff]  }
 0x38b   :  { %13773 = vmatpush3.bf16.msra.mxu0 %v17498_v26  ;;  %13792 = vmatprep.subr.bf16.mxu1 %v19991_v0 }
 0x38c   :  { %13774 = vmatprep.subr.bf16.mxu0 %v19991_v0  ;;  %v5057_v52 = vsel %vm20158_vm5, %v5056_v56, %v5055_v27 }
 0x38d   :  { %v5058_v41 = vpack.c.b16 %v5057_v52, %v5057_v52  ;;  %v17897_v52 = vld [vmem:[%s19953_s3 + $0x20] sm:$0xff]  }
 0x38e   :  { %13793 = vmatpush3.bf16.msra.mxu1 %v17451_v42 }
 0x38f   :  { %13775 = vmatpush3.bf16.msra.mxu0 %v17507_v45  ;;  %13794 = vmatprep.subr.bf16.mxu1 %v19991_v0 }
 0x390   :  { %13776 = vmatprep.subr.bf16.mxu0 %v19991_v0 }
 0x392   :  { %13795 = vmatpush3.bf16.msra.mxu1 %v17473_v35 }
 0x393   :  { %13777 = vmatpush3.bf16.msra.mxu0 %v17516_v18  ;;  %13816 = vmatprep.subr.bf16.mxu1 %v19991_v0 }
 0x394   :  { %13778 = vmatprep.subr.bf16.mxu0 %v19991_v0 }
 0x395   :  { %v17828_v42 = vpop.f32.mrf.mxu1  ;;  %13797 = vmatmul.mubr.msk.bf16.vlgmr.msra.gmra.mxu1 %vm20157_vm1, %v5105_v12  ;;  %vm20166_vm1 = vmmov %vm20144_vm0 }
 0x396   :  { %13817 = vmatpush3.bf16.msra.mxu1 %v17349_v22  ;;  %13828 = vmatprep.mubr.msk.bf16.mxu1 %vm20028_vm11, %v19991_v0 }
 0x397   :  { %13779 = vmatpush3.bf16.msra.mxu0 %v17531_v19  ;;  %v13542_v35 = vpop.f32.mrf.mxu1  ;;  %13818 = vmatprep.subr.bf16.mxu1 %v19991_v0 }
 0x398   :  { %13800 = vmatprep.subr.bf16.mxu0 %v19991_v0 }
 0x399   :  { %v3990_v33 = vpop.f32.mrf.mxu1 }
 0x39a   :  { %v3885_v60 = vpop.f32.mrf.mxu0  ;;  %13781 = vmatmul.mubr.msk.bf16.vlgmr.msra.gmra.mxu0 %vm20159_vm9, %v5058_v41  ;;  %13819 = vmatpush3.bf16.msra.mxu1 %v17489_v34  ;;  %v17906_v33 = vld [vmem:[%s19953_s3 + $0x18] sm:$0xff]   ;;  %vm20167_vm9 = vmmov %vm20144_vm0 }
 0x39b   :  { %v3891_v59 = vadd.f32 %v3885_v60, %v3814_v43  ;;  %13801 = vmatpush3.bf16.msra.mxu0 %v17543_v49  ;;  %v13543_v22 = vpop.f32.mrf.mxu1  ;;  %13820 = vmatprep.subr.bf16.mxu1 %v19991_v0 }
 0x39c   :  { %v13526_v62 = vpop.f32.mrf.mxu0  ;;  %13802 = vmatprep.subr.bf16.mxu0 %v19991_v0  ;;  %13812 = vmatprep.mubr.msk.bf16.mxu0 %vm20028_vm11, %v19991_v0  ;;  %v17917_v22 = vld [vmem:[%s19953_s3 + $0x10] sm:$0xff]  }
 0x39d   :  { %v3892_v58 = vadd.f32 %v17721_v3, %v3891_v59  ;;  %v5406_v62 = vpop.permute.xlu0 %5405 }
 0x39e   :  { %v3888_v28 = vpop.f32.mrf.mxu0  ;;  %13821 = vmatpush3.bf16.msra.mxu1 %v17498_v26 }
 0x39f   :  { %v3893_v50 = vmax.f32 %v3892_v58, 0.0  ;;  %13803 = vmatpush3.bf16.msra.mxu0 %v17559_v37  ;;  %13822 = vmatprep.subr.bf16.mxu1 %v19991_v0  ;;  %v5404_v58 = vpop.permute.xlu1 %5403 }
 0x3a0   :  { %v13527_v34 = vpop.f32.mrf.mxu0  ;;  %13804 = vmatprep.subr.bf16.mxu0 %v19991_v0 }
 0x3a1   :  { %v3894_v8 = vpack.c.bf16 %v3893_v50, %v3893_v50  ;;  %v4136_v34 = vld [vmem:[#allocation3 + $0x4] sm:$0x2] }
 0x3a2   :  { %13823 = vmatpush3.bf16.msra.mxu1 %v17507_v45 }
 0x3a3   :  { %v3902_v17 = vrot.slane %v3894_v8, %v15955_v32  ;;  %13805 = vmatpush3.bf16.msra.mxu0 %v17616_v6  ;;  %13824 = vmatprep.subr.bf16.mxu1 %v19991_v0 }
 0x3a4   :  { %13806 = vmatprep.subr.bf16.mxu0 %v19991_v0 }
 0x3a5   :  { %v3909_v26 = vrot.slane %v3902_v17, %v15955_v32  ;;  %v5407_v17 = vsel %vm20163_vm13, %v5404_v58, %v5406_v62  ;;  %vm20171_vm13 = vmmov %vm20168_vm3 }
 0x3a6   :  { %13825 = vmatpush3.bf16.msra.mxu1 %v17516_v18 }
 0x3a7   :  { %v3911_v23 = vunpack.i.h.s16 %v3909_v26  ;;  %v11689_v29 = vpack.i.b16 %v3909_v26, %v3909_v26  ;;  %13807 = vmatpush3.bf16.msra.mxu0 %v17626_v46  ;;  %13826 = vmatprep.subr.bf16.mxu1 %v19991_v0  ;;  %v4139_v26 = vld [vmem:[#allocation3 + $0x18] sm:$0x2] }
 0x3a8   :  { %13808 = vmatprep.subr.bf16.mxu0 %v19991_v0 }
 0x3a9   :  { %v3913_v45 = vpack.i.b16 %v3911_v23, %v3911_v23  ;;  %v3920_v48 = vrot.slane %v11689_v29, %v15986_v53  ;;  %v5334_v29 = vpop.permute.xlu0 %5333 }
 0x3aa   :  { %13827 = vmatpush3.bf16.msra.mxu1 %v17531_v19 }
 0x3ab   :  { %v3927_v18 = vrot.slane %v3913_v45, %v15986_v53  ;;  %v3931_v16 = vsel %vm15912_vm14, %v3920_v48, %v3930_v47  ;;  %13809 = vmatpush3.bf16.msra.mxu0 %v17636_v5  ;;  %13848 = vmatprep.subr.bf16.mxu1 %v19991_v0  ;;  %v5332_v45 = vpop.permute.xlu1 %5331 }
 0x3ac   :  { %3932 = vst [vmem:[#allocation3 + $0x4] sm:$0x1] %v3931_v16  ;;  %13810 = vmatprep.subr.bf16.mxu0 %v19991_v0  ;;  %v5335_v47 = vsel %vm20165_vm12, %v5332_v45, %v5334_v29  ;;  %vm20173_vm12 = vmmov %vm20168_vm3 }
 0x3ad   :  { %v3934_v19 = vsel %vm15912_vm14, %v3927_v18, %v3933_v61  ;;  %v4091_v57 = vpop.f32.mrf.mxu1  ;;  %13829 = vmatmul.mubr.msk.bf16.vlgmr.msra.gmra.mxu1 %vm20161_vm7, %v5279_v44  ;;  %v17958_v18 = vld [vmem:[%s19953_s3 + $0x58] sm:$0xff]   ;;  %v14996_v61 = vld [vmem:[#allocation2 + $0x8] ss:$0 sps:$4 sm:$0x44]   ;;  %vm20169_vm7 = vmmov %vm20144_vm0 }
 0x3ae   :  { %3935 = vst [vmem:[#allocation3 + $0x18] sm:$0x1] %v3934_v19  ;;  %13849 = vmatpush3.bf16.msra.mxu1 %v17543_v49  ;;  %13860 = vmatprep.mubr.msk.bf16.mxu1 %vm20028_vm11, %v19991_v0  ;;  %v17885_v49 = vld [vmem:[%s19953_s3 + $0x28] sm:$0xff]   ;;  %v14997_v19 = vld [vmem:[#allocation2 + $0x20] ss:$0 sps:$4 sm:$0x44]  }
 0x3af   :  { %13811 = vmatpush3.bf16.msra.mxu0 %v17655_v21  ;;  %v13574_v4 = vpop.f32.mrf.mxu1  ;;  %13850 = vmatprep.subr.bf16.mxu1 %v19991_v0 }
 0x3b0   :  { %13832 = vmatprep.subr.bf16.mxu0 %v19991_v0 }
 0x3b1   :  { %v4094_v55 = vpop.f32.mrf.mxu1 }
 0x3b2   :  { %v4034_v40 = vpop.f32.mrf.mxu0  ;;  %13813 = vmatmul.mubr.msk.bf16.vlgmr.msra.gmra.mxu0 %vm20144_vm0, %v5162_v36  ;;  %13851 = vmatpush3.bf16.msra.mxu1 %v17559_v37  ;;  %v5504_v36 = vunpack.c.l.b16 %v14996_v61  ;;  %v5505_v55 = vunpack.c.l.b16 %v14997_v19 }
 0x3b3   :  { %v4035_v2 = vadd.f32 %v4034_v40, %v17828_v42  ;;  %13833 = vmatpush3.bf16.msra.mxu0 %v17885_v49  ;;  %v13575_v27 = vpop.f32.mrf.mxu1  ;;  %13852 = vmatprep.subr.bf16.mxu1 %v19991_v0  ;;  %v17978_v40 = vld [vmem:[%s19953_s3 + $0x48] sm:$0xff]  }
 0x3b4   :  { %v13558_v56 = vpop.f32.mrf.mxu0  ;;  %13834 = vmatprep.subr.bf16.mxu0 %v19991_v0  ;;  %13844 = vmatprep.mubr.msk.bf16.mxu0 %vm20028_vm11, %v19991_v0  ;;  %v5554_v27 = vrot.slane %v5505_v55, 3 }
 0x3b5   :  { %v4097_v12 = vadd.f32 %v4091_v57, %v4035_v2  ;;  %v5553_v2 = vrot.slane %v5504_v36, 4  ;;  %v17987_v56 = vld [vmem:[%s19953_s3 + $0x40] sm:$0xff]  }
 0x3b6   :  { %v4037_v37 = vpop.f32.mrf.mxu0  ;;  %13853 = vmatpush3.bf16.msra.mxu1 %v17616_v6 }
 0x3b7   :  { %v4098_v42 = vadd.f32 %v17721_v3, %v4097_v12  ;;  %13835 = vmatpush3.bf16.msra.mxu0 %v17897_v52  ;;  %13854 = vmatprep.subr.bf16.mxu1 %v19991_v0  ;;  %v5555_v12 = vsel %vm20158_vm5, %v5554_v27, %v5553_v2  ;;  %v5506_v37 = vrot.slane %v5504_v36, 5  ;;  %vm20175_vm5 = vmmov %vm20144_vm0 }
 0x3b8   :  { %v13559_v35 = vpop.f32.mrf.mxu0  ;;  %13836 = vmatprep.subr.bf16.mxu0 %v19991_v0 }
 0x3b9   :  { %v4099_v41 = vmax.f32 %v4098_v42, 0.0  ;;  %v5507_v42 = vrot.slane %v5505_v55, 4  ;;  %v17997_v35 = vld [vmem:[%s19953_s3 + $0x38] sm:$0xff]  }
 0x3ba   :  { %13855 = vmatpush3.bf16.msra.mxu1 %v17626_v46 }
 0x3bb   :  { %v4100_v43 = vpack.c.bf16 %v4099_v41, %v4099_v41  ;;  %13837 = vmatpush3.bf16.msra.mxu0 %v17906_v33  ;;  %13856 = vmatprep.subr.bf16.mxu1 %v19991_v0  ;;  %v5556_v41 = vpack.c.b16 %v5555_v12, %v5555_v12 }
 0x3bc   :  { %13838 = vmatprep.subr.bf16.mxu0 %v19991_v0 }
 0x3bd   :  { %v4108_v60 = vrot.slane %v4100_v43, %v15955_v32 }
 0x3be   :  { %13857 = vmatpush3.bf16.msra.mxu1 %v17636_v5 }
 0x3bf   :  { %v4115_v59 = vrot.slane %v4108_v60, %v15955_v32  ;;  %13839 = vmatpush3.bf16.msra.mxu0 %v17917_v22  ;;  %13858 = vmatprep.subr.bf16.mxu1 %v19991_v0  ;;  %v5508_v60 = vsel %vm20168_vm3, %v5507_v42, %v5506_v37 }
 0x3c0   :  { %13840 = vmatprep.subr.bf16.mxu0 %v19991_v0  ;;  %v5509_v58 = vpack.c.b16 %v5508_v60, %v5508_v60 }
 0x3c1   :  { %v4117_v28 = vunpack.i.h.s16 %v4115_v59  ;;  %v11697_v50 = vpack.i.b16 %v4115_v59, %v4115_v59  ;;  %v18012_v59 = vld [vmem:[%s19953_s3 + $0x30] sm:$0xff]  }
 0x3c2   :  { %13859 = vmatpush3.bf16.msra.mxu1 %v17655_v21 }
 0x3c3   :  { %v4119_v8 = vpack.i.b16 %v4117_v28, %v4117_v28  ;;  %v4126_v63 = vrot.slane %v11697_v50, %v15986_v53  ;;  %13841 = vmatpush3.bf16.msra.mxu0 %v17927_v39  ;;  %13880 = vmatprep.subr.bf16.mxu1 %v19991_v0 }
 0x3c4   :  { %13842 = vmatprep.subr.bf16.mxu0 %v19991_v0 }
 0x3c5   :  { %v4133_v31 = vrot.slane %v4119_v8, %v15986_v53  ;;  %v4137_v25 = vsel %vm17581_vm2, %v4126_v63, %v4136_v34  ;;  %v17936_v23 = vpop.f32.mrf.mxu1  ;;  %13861 = vmatmul.mubr.msk.bf16.vlgmr.msra.gmra.mxu1 %vm20164_vm6, %v5407_v17  ;;  %v18023_v63 = vld [vmem:[%s19953_s3 + $0x88] sm:$0xff]   ;;  %vm20172_vm6 = vmmov %vm20144_vm0 }
 0x3c6   :  { %4138 = vst [vmem:[#allocation3 + $0x4] sm:$0x2] %v4137_v25  ;;  %13881 = vmatpush3.bf16.msra.mxu1 %v17885_v49  ;;  %13892 = vmatprep.mubr.msk.bf16.mxu1 %vm20028_vm11, %v19991_v0  ;;  %v18030_v25 = vld [vmem:[#allocation2 + $0x18] ss:$0 sps:$4 sm:$0x88]  }
 0x3c7   :  { %v4140_v48 = vsel %vm17581_vm2, %v4133_v31, %v4139_v26  ;;  %13843 = vmatpush3.bf16.msra.mxu0 %v17947_v51  ;;  %v13606_v24 = vpop.f32.mrf.mxu1  ;;  %13882 = vmatprep.subr.bf16.mxu1 %v19991_v0  ;;  %v18028_v31 = vld [vmem:[#allocation2] ss:$0 sps:$4 sm:$0x88]  }
 0x3c8   :  { %4141 = vst [vmem:[#allocation3 + $0x18] sm:$0x2] %v4140_v48  ;;  %13864 = vmatprep.subr.bf16.mxu0 %v19991_v0  ;;  %v18039_v48 = vld [vmem:[%s19953_s3 + $0x80] sm:$0xff]  }
 0x3c9   :  { %v4267_v13 = vpop.f32.mrf.mxu1 }
 0x3ca   :  { %v4208_v38 = vpop.f32.mrf.mxu0  ;;  %13845 = vmatmul.mubr.msk.bf16.vlgmr.msra.gmra.mxu0 %vm20166_vm1, %v5335_v47  ;;  %13883 = vmatpush3.bf16.msra.mxu1 %v17897_v52  ;;  %v5710_v47 = vunpack.c.l.b16 %v18028_v31  ;;  %v5711_v13 = vunpack.c.l.b16 %v18030_v25  ;;  %vm20174_vm1 = vmmov %vm20168_vm3  ;;  %v4590_v31 = vld [vmem:[#allocation3 + $0x18] sm:$0x4] }
 0x3cb   :  { %13865 = vmatpush3.bf16.msra.mxu0 %v17958_v18  ;;  %v13607_v16 = vpop.f32.mrf.mxu1  ;;  %13884 = vmatprep.subr.bf16.mxu1 %v19991_v0  ;;  %v4265_v28 = vadd.f32 %v17936_v23, %v4208_v38  ;;  %vm20177_vm3 = vmmov %vm20144_vm0 }
 0x3cc   :  { %v13590_v44 = vpop.f32.mrf.mxu0  ;;  %13866 = vmatprep.subr.bf16.mxu0 %v19991_v0  ;;  %13876 = vmatprep.mubr.msk.bf16.mxu0 %vm20028_vm11, %v19991_v0  ;;  %v15000_v16 = vld [vmem:[#allocation2 + $0x8] ss:$0 sps:$4 sm:$0x88]   ;;  %v5712_v19 = vrot.slane %v5710_v47, 7 }
 0x3cd   :  { %v15001_v44 = vld [vmem:[#allocation2 + $0x20] ss:$0 sps:$4 sm:$0x88]   ;;  %v5608_v36 = vunpack.c.l.b16 %v15000_v16  ;;  %v4381_v60 = vld [vmem:[#allocation3 + $0x4] sm:$0x2] }
 0x3ce   :  { %v4211_v57 = vpop.f32.mrf.mxu0  ;;  %13885 = vmatpush3.bf16.msra.mxu1 %v17906_v33  ;;  %v5609_v55 = vunpack.c.l.b16 %v15001_v44  ;;  %v18089_v44 = vld [vmem:[#allocation3 + $0x18] ss:$0 sps:$4 sm:$0x22]  }
 0x3cf   :  { %13867 = vmatpush3.bf16.msra.mxu0 %v17969_v20  ;;  %13886 = vmatprep.subr.bf16.mxu1 %v19991_v0  ;;  %v5713_v57 = vrot.slane %v5711_v13, 6  ;;  %v5610_v42 = vrot.slane %v5608_v36, 6 }
 0x3d0   :  { %v13591_v4 = vpop.f32.mrf.mxu0  ;;  %13868 = vmatprep.subr.bf16.mxu0 %v19991_v0 }
 0x3d2   :  { %13887 = vmatpush3.bf16.msra.mxu1 %v17917_v22 }
 0x3d3   :  { %13869 = vmatpush3.bf16.msra.mxu0 %v17978_v40  ;;  %13888 = vmatprep.subr.bf16.mxu1 %v19991_v0 }
 0x3d4   :  { %13870 = vmatprep.subr.bf16.mxu0 %v19991_v0 }
 0x3d6   :  { %13889 = vmatpush3.bf16.msra.mxu1 %v17927_v39 }
 0x3d7   :  { %13871 = vmatpush3.bf16.msra.mxu0 %v17987_v56  ;;  %13890 = vmatprep.subr.bf16.mxu1 %v19991_v0 }
 0x3d8   :  { %13872 = vmatprep.subr.bf16.mxu0 %v19991_v0 }
 0x3da   :  { %13891 = vmatpush3.bf16.msra.mxu1 %v17947_v51 }
 0x3db   :  { %13873 = vmatpush3.bf16.msra.mxu0 %v17997_v35  ;;  %13912 = vmatprep.subr.bf16.mxu1 %v19991_v0 }
 0x3dc   :  { %13874 = vmatprep.subr.bf16.mxu0 %v19991_v0 }
 0x3dd   :  { %v18002_v43 = vpop.f32.mrf.mxu1  ;;  %13893 = vmatmul.mubr.msk.bf16.vlgmr.msra.gmra.mxu1 %vm20167_vm9, %v5556_v41  ;;  %v5611_v41 = vrot.slane %v5609_v55, 5  ;;  %v15002_v55 = vld [vmem:[#allocation2 + $0xc] ss:$0 sps:$4 sm:$0x11]   ;;  %vm20176_vm9 = vmmov %vm20174_vm1 }
 0x3de   :  { %13913 = vmatpush3.bf16.msra.mxu1 %v17958_v18  ;;  %13924 = vmatprep.mubr.msk.bf16.mxu1 %vm20028_vm11, %v19991_v0 }
 0x3df   :  { %13875 = vmatpush3.bf16.msra.mxu0 %v18012_v59  ;;  %v13638_v62 = vpop.f32.mrf.mxu1  ;;  %13914 = vmatprep.subr.bf16.mxu1 %v19991_v0 }
 0x3e0   :  { %13896 = vmatprep.subr.bf16.mxu0 %v19991_v0 }
 0x3e1   :  { %v4441_v50 = vpop.f32.mrf.mxu1 }
 0x3e2   :  { %v4336_v34 = vpop.f32.mrf.mxu0  ;;  %13877 = vmatmul.mubr.msk.bf16.vlgmr.msra.gmra.mxu0 %vm20169_vm7, %v5509_v58  ;;  %13915 = vmatpush3.bf16.msra.mxu1 %v17969_v20  ;;  %vm20178_vm7 = vcmask 523264  }
 0x3e3   :  { %v4342_v8 = vadd.f32 %v4336_v34, %v4265_v28  ;;  %13897 = vmatpush3.bf16.msra.mxu0 %v18023_v63  ;;  %v13639_v17 = vpop.f32.mrf.mxu1  ;;  %13916 = vmatprep.subr.bf16.mxu1 %v19991_v0  ;;  %v4384_v28 = vld [vmem:[#allocation3 + $0x18] sm:$0x2] }
 0x3e4   :  { %v13622_v26 = vpop.f32.mrf.mxu0  ;;  %13898 = vmatprep.subr.bf16.mxu0 %v19991_v0  ;;  %13908 = vmatprep.mubr.msk.bf16.mxu0 %vm20028_vm11, %v19991_v0 }
 0x3e5   :  { %v4343_v23 = vadd.f32 %v17721_v3, %v4342_v8  ;;  %v5612_v8 = vsel %vm20171_vm13, %v5611_v41, %v5610_v42  ;;  %v5814_v41 = vunpack.c.l.b16 %v15002_v55  ;;  %vm20181_vm13 = vmmov %vm20177_vm3 }
 0x3e6   :  { %v4339_v29 = vpop.f32.mrf.mxu0  ;;  %13917 = vmatpush3.bf16.msra.mxu1 %v17978_v40  ;;  %v5613_v17 = vpack.c.b16 %v5612_v8, %v5612_v8  ;;  %v5759_v8 = vrot.slane %v5710_v47, 6 }
 0x3e7   :  { %v4344_v45 = vmax.f32 %v4343_v23, 0.0  ;;  %13899 = vmatpush3.bf16.msra.mxu0 %v18039_v48  ;;  %13918 = vmatprep.subr.bf16.mxu1 %v19991_v0 }
 0x3e8   :  { %v13623_v24 = vpop.f32.mrf.mxu0  ;;  %13900 = vmatprep.subr.bf16.mxu0 %v19991_v0 }
 0x3e9   :  { %v4345_v38 = vpack.c.bf16 %v4344_v45, %v4344_v45 }
 0x3ea   :  { %13919 = vmatpush3.bf16.msra.mxu1 %v17987_v56 }
 0x3eb   :  { %v4353_v61 = vrot.slane %v4345_v38, %v15955_v32  ;;  %13901 = vmatpush3.bf16.msra.mxu0 %v17616_v6  ;;  %13920 = vmatprep.subr.bf16.mxu1 %v19991_v0  ;;  %v5714_v6 = vsel %vm20170_vm10, %v5713_v57, %v5712_v19  ;;  %v15003_v38 = vld [vmem:[#allocation2 + $0x24] ss:$0 sps:$4 sm:$0x11]   ;;  %v18095_v19 = vld [vmem:[%s19953_s3 + $0x78] sm:$0xff]   ;;  %vm20179_vm10 = vmmov %vm20144_vm0 }
 0x3ec   :  { %13902 = vmatprep.subr.bf16.mxu0 %v19991_v0 }
 0x3ed   :  { %v4360_v4 = vrot.slane %v4353_v61, %v15955_v32 }
 0x3ee   :  { %13921 = vmatpush3.bf16.msra.mxu1 %v17997_v35 }
 0x3ef   :  { %v4362_v2 = vunpack.i.h.s16 %v4360_v4  ;;  %v11709_v27 = vpack.i.b16 %v4360_v4, %v4360_v4  ;;  %13903 = vmatpush3.bf16.msra.mxu0 %v17626_v46  ;;  %13922 = vmatprep.subr.bf16.mxu1 %v19991_v0  ;;  %v5715_v46 = vpack.c.b16 %v5714_v6, %v5714_v6  ;;  %v8505_v4 = vunpack.c.l.b16 %v18089_v44  ;;  %v19079_v44 = vld [vmem:[%s19955_s5 + $0xd8] sm:$0xff]  }
 0x3f0   :  { %13904 = vmatprep.subr.bf16.mxu0 %v19991_v0 }
 0x3f1   :  { %v4364_v12 = vpack.i.b16 %v4362_v2, %v4362_v2  ;;  %v4371_v37 = vrot.slane %v11709_v27, %v15986_v53  ;;  %v5815_v2 = vunpack.c.l.b16 %v15003_v38 }
 0x3f2   :  { %13923 = vmatpush3.bf16.msra.mxu1 %v18012_v59 }
 0x3f3   :  { %v4378_v62 = vrot.slane %v4364_v12, %v15986_v53  ;;  %v4382_v58 = vsel %vm17648_vm8, %v4371_v37, %v4381_v60  ;;  %13905 = vmatpush3.bf16.msra.mxu0 %v17636_v5  ;;  %13944 = vmatprep.subr.bf16.mxu1 %v19991_v0  ;;  %v9008_v12 = vrot.slane %v8505_v4, 2  ;;  %v5816_v60 = vrot.slane %v5815_v2, 7 }
 0x3f4   :  { %4383 = vst [vmem:[#allocation3 + $0x4] sm:$0x2] %v4382_v58  ;;  %13906 = vmatprep.subr.bf16.mxu0 %v19991_v0  ;;  %v18123_v58 = vld [vmem:[%s19953_s3 + $0x68] sm:$0xff]  }
 0x3f5   :  { %v4385_v50 = vsel %vm17648_vm8, %v4378_v62, %v4384_v28  ;;  %v4542_v34 = vpop.f32.mrf.mxu1  ;;  %13925 = vmatmul.mubr.msk.bf16.vlgmr.msra.gmra.mxu1 %vm20144_vm0, %v5715_v46  ;;  %v5817_v28 = vsel %vm20174_vm1, %v5816_v60, %v5814_v41  ;;  %vm20180_vm0 = vmmov %vm20178_vm7 }
 0x3f6   :  { %4386 = vst [vmem:[#allocation3 + $0x18] sm:$0x2] %v4385_v50  ;;  %13945 = vmatpush3.bf16.msra.mxu1 %v18023_v63  ;;  %13956 = vmatprep.mubr.msk.bf16.mxu1 %vm20028_vm11, %v19991_v0 }
 0x3f7   :  { %13907 = vmatpush3.bf16.msra.mxu0 %v17655_v21  ;;  %v13670_v5 = vpop.f32.mrf.mxu1  ;;  %13946 = vmatprep.subr.bf16.mxu1 %v19991_v0  ;;  %v18084_v21 = vld [vmem:[#allocation3 + $0x4] ss:$0 sps:$4 sm:$0x22]  }
 0x3f8   :  { %13928 = vmatprep.subr.bf16.mxu0 %v19991_v0  ;;  %v8504_v61 = vunpack.c.l.b16 %v18084_v21  ;;  %v5760_v5 = vrot.slane %v5711_v13, 5  ;;  %v19088_v21 = vld [vmem:[%s19955_s5 + $0xf8] sm:$0xff]  }
 0x3f9   :  { %v4545_v26 = vpop.f32.mrf.mxu1 }
 0x3fa   :  { %v4485_v23 = vpop.f32.mrf.mxu0  ;;  %13909 = vmatmul.mubr.msk.bf16.vlgmr.msra.gmra.mxu0 %vm20172_vm6, %v5613_v17  ;;  %13947 = vmatpush3.bf16.msra.mxu1 %v18039_v48  ;;  %v9007_v6 = vrot.slane %v8504_v61, 3  ;;  %v4587_v17 = vld [vmem:[#allocation3 + $0x4] sm:$0x4]  ;;  %v18138_v26 = vld [vmem:[%s19953_s3 + $0x60] sm:$0xff]   ;;  %vm20182_vm6 = vmmov %vm20174_vm1 }
 0x3fb   :  { %v4486_v29 = vadd.f32 %v4485_v23, %v18002_v43  ;;  %13929 = vmatpush3.bf16.msra.mxu0 %v17885_v49  ;;  %v13671_v45 = vpop.f32.mrf.mxu1  ;;  %13948 = vmatprep.subr.bf16.mxu1 %v19991_v0  ;;  %vm20184_vm1 = vmmov %vm20180_vm0 }
 0x3fc   :  { %v13654_v24 = vpop.f32.mrf.mxu0  ;;  %13930 = vmatprep.subr.bf16.mxu0 %v19991_v0  ;;  %13940 = vmatprep.mubr.msk.bf16.mxu0 %vm20028_vm11, %v19991_v0  ;;  %v18116_v42 = vsel %vm20173_vm12, %v9008_v12, %v9007_v6  ;;  %v5818_v45 = vpack.c.b16 %v5817_v28, %v5817_v28  ;;  %v5991_v12 = vpop.permute.xlu0 %5990  ;;  %vm20183_vm12 = vmmov %vm20177_vm3 }
 0x3fd   :  { %v4548_v16 = vadd.f32 %v4542_v34, %v4486_v29  ;;  %v5761_v24 = vsel %vm20176_vm9, %v5760_v5, %v5759_v8  ;;  %vm20186_vm9 = vmmov %vm20182_vm6 }
 0x3fe   :  { %v4488_v43 = vpop.f32.mrf.mxu0  ;;  %13949 = vmatpush3.bf16.msra.mxu1 %v18095_v19 }
 0x3ff   :  { %v4549_v57 = vadd.f32 %v17721_v3, %v4548_v16  ;;  %13931 = vmatpush3.bf16.msra.mxu0 %v17897_v52  ;;  %13950 = vmatprep.subr.bf16.mxu1 %v19991_v0  ;;  %v18110_v3 = vld [vmem:[%s19953_s3 + $0x70] sm:$0xff]   ;;  %v5762_v43 = vpack.c.b16 %v5761_v24, %v5761_v24 }
 0x400   :  { %v13655_v36 = vpop.f32.mrf.mxu0  ;;  %13932 = vmatprep.subr.bf16.mxu0 %v19991_v0 }
 0x401   :  { %v4550_v27 = vmax.f32 %v4549_v57, 0.0 }
 0x402   :  { %13951 = vmatpush3.bf16.msra.mxu1 %v18110_v3 }
 0x403   :  { %v4551_v37 = vpack.c.bf16 %v4550_v27, %v4550_v27  ;;  %13933 = vmatpush3.bf16.msra.mxu0 %v17906_v33  ;;  %13952 = vmatprep.subr.bf16.mxu1 %v19991_v0 }
 0x404   :  { %13934 = vmatprep.subr.bf16.mxu0 %v19991_v0 }
 0x405   :  { %v4559_v62 = vrot.slane %v4551_v37, %v15955_v32  ;;  %v5989_v37 = vpop.permute.xlu1 %5988 }
 0x406   :  { %13953 = vmatpush3.bf16.msra.mxu1 %v18123_v58  ;;  %v5992_v41 = vsel %vm20178_vm7, %v5989_v37, %v5991_v12  ;;  %v4794_v37 = vld [vmem:[#allocation3 + $0x8] sm:$0x1]  ;;  %vm20187_vm7 = vmmov %vm20182_vm6 }
 0x407   :  { %v4566_v46 = vrot.slane %v4559_v62, %v15955_v32  ;;  %13935 = vmatpush3.bf16.msra.mxu0 %v17917_v22  ;;  %13954 = vmatprep.subr.bf16.mxu1 %v19991_v0 }
 0x408   :  { %13936 = vmatprep.subr.bf16.mxu0 %v19991_v0 }
 0x409   :  { %v4568_v50 = vunpack.i.h.s16 %v4566_v46  ;;  %v11717_v34 = vpack.i.b16 %v4566_v46, %v4566_v46  ;;  %v5935_v46 = vpop.permute.xlu0 %5934  ;;  %v5933_v28 = vpop.permute.xlu1 %5932 }
 0x40a   :  { %13955 = vmatpush3.bf16.msra.mxu1 %v18138_v26 }
 0x40b   :  { %v4570_v23 = vpack.i.b16 %v4568_v50, %v4568_v50  ;;  %v4577_v29 = vrot.slane %v11717_v34, %v15986_v53  ;;  %13937 = vmatpush3.bf16.msra.mxu0 %v17927_v39  ;;  %13976 = vmatprep.subr.bf16.mxu1 %v19991_v0  ;;  %v5936_v50 = vsel %vm20180_vm0, %v5933_v28, %v5935_v46  ;;  %v4797_v28 = vld [vmem:[#allocation3 + $0x1c] sm:$0x1] }
 0x40c   :  { %13938 = vmatprep.subr.bf16.mxu0 %v19991_v0 }
 0x40d   :  { %v4584_v25 = vrot.slane %v4570_v23, %v15986_v53  ;;  %v4588_v47 = vsel %vm17738_vm4, %v4577_v29, %v4587_v17  ;;  %v4691_v13 = vpop.f32.mrf.mxu1  ;;  %13957 = vmatmul.mubr.msk.bf16.vlgmr.msra.gmra.mxu1 %vm20175_vm5, %v5818_v45  ;;  %v18197_v45 = vld [vmem:[#allocation2 + $0x4] ss:$0 sps:$4 sm:$0x88]   ;;  %vm20185_vm5 = vmmov %vm20177_vm3 }
 0x40e   :  { %4589 = vst [vmem:[#allocation3 + $0x4] sm:$0x4] %v4588_v47  ;;  %13977 = vmatpush3.bf16.msra.mxu1 %v17885_v49  ;;  %13988 = vmatprep.mubr.msk.bf16.mxu1 %vm20028_vm11, %v19991_v0 }
 0x40f   :  { %v4591_v38 = vsel %vm17738_vm4, %v4584_v25, %v4590_v31  ;;  %13939 = vmatpush3.bf16.msra.mxu0 %v17947_v51  ;;  %v13702_v16 = vpop.f32.mrf.mxu1  ;;  %13978 = vmatprep.subr.bf16.mxu1 %v19991_v0  ;;  %v18199_v31 = vld [vmem:[#allocation2 + $0x1c] ss:$0 sps:$4 sm:$0x88]   ;;  %v18206_v25 = vld [vmem:[%s19954_s4] ss:$0 sm:$0xff] }
 0x410   :  { %4592 = vst [vmem:[#allocation3 + $0x18] sm:$0x4] %v4591_v38  ;;  %13960 = vmatprep.subr.bf16.mxu0 %v19991_v0  ;;  %v6159_v16 = vunpack.c.l.b16 %v18197_v45 }
 0x411   :  { %v4694_v57 = vpop.f32.mrf.mxu1 }
 0x412   :  { %v4644_v36 = vpop.f32.mrf.mxu0  ;;  %13941 = vmatmul.mubr.msk.bf16.vlgmr.msra.gmra.mxu0 %vm20177_vm3, %v5762_v43  ;;  %13979 = vmatpush3.bf16.msra.mxu1 %v17897_v52  ;;  %v6160_v43 = vunpack.c.l.b16 %v18199_v31 }
 0x413   :  { %13961 = vmatpush3.bf16.msra.mxu0 %v17958_v18  ;;  %v13703_v55 = vpop.f32.mrf.mxu1  ;;  %13980 = vmatprep.subr.bf16.mxu1 %v19991_v0  ;;  %v4692_v34 = vadd.f32 %v4691_v13, %v4644_v36 }
 0x414   :  { %v13686_v2 = vpop.f32.mrf.mxu0  ;;  %13962 = vmatprep.subr.bf16.mxu0 %v19991_v0  ;;  %13972 = vmatprep.mubr.msk.bf16.mxu0 %vm20028_vm11, %v19991_v0  ;;  %v6161_v55 = vrot.slane %v6159_v16, 7 }
 0x415   :  { %v6162_v2 = vrot.slane %v6160_v43, 6 }
 0x416   :  { %v4647_v27 = vpop.f32.mrf.mxu0  ;;  %13981 = vmatpush3.bf16.msra.mxu1 %v17906_v33 }
 0x417   :  { %13963 = vmatpush3.bf16.msra.mxu0 %v17969_v20  ;;  %13982 = vmatprep.subr.bf16.mxu1 %v19991_v0 }
 0x418   :  { %v13687_v6 = vpop.f32.mrf.mxu0  ;;  %13964 = vmatprep.subr.bf16.mxu0 %v19991_v0 }
 0x41a   :  { %13983 = vmatpush3.bf16.msra.mxu1 %v17917_v22 }
 0x41b   :  { %13965 = vmatpush3.bf16.msra.mxu0 %v17978_v40  ;;  %13984 = vmatprep.subr.bf16.mxu1 %v19991_v0 }
 0x41c   :  { %13966 = vmatprep.subr.bf16.mxu0 %v19991_v0 }
 0x41e   :  { %13985 = vmatpush3.bf16.msra.mxu1 %v17927_v39 }
 0x41f   :  { %13967 = vmatpush3.bf16.msra.mxu0 %v17987_v56  ;;  %13986 = vmatprep.subr.bf16.mxu1 %v19991_v0 }
 0x420   :  { %13968 = vmatprep.subr.bf16.mxu0 %v19991_v0 }
 0x422   :  { %13987 = vmatpush3.bf16.msra.mxu1 %v17947_v51 }
 0x423   :  { %13969 = vmatpush3.bf16.msra.mxu0 %v17997_v35  ;;  %14008 = vmatprep.subr.bf16.mxu1 %v19991_v0 }
 0x424   :  { %13970 = vmatprep.subr.bf16.mxu0 %v19991_v0 }
 0x425   :  { %v18182_v60 = vpop.f32.mrf.mxu1  ;;  %13989 = vmatmul.mubr.msk.bf16.vlgmr.msra.gmra.mxu1 %vm20179_vm10, %v5992_v41  ;;  %v6163_v41 = vsel %vm20182_vm6, %v6162_v2, %v6161_v55  ;;  %v15007_v2 = vld [vmem:[#allocation2 + $0x28] ss:$0 sps:$4 sm:$0x11]   ;;  %vm20188_vm10 = vmmov %vm20177_vm3 }
 0x426   :  { %14009 = vmatpush3.bf16.msra.mxu1 %v17958_v18  ;;  %14020 = vmatprep.mubr.msk.bf16.mxu1 %vm20028_vm11, %v19991_v0  ;;  %vm20190_vm6 = vmmov %vm20180_vm0 }
 0x427   :  { %13971 = vmatpush3.bf16.msra.mxu0 %v18012_v59  ;;  %v13734_v62 = vpop.f32.mrf.mxu1  ;;  %14010 = vmatprep.subr.bf16.mxu1 %v19991_v0 }
 0x428   :  { %13992 = vmatprep.subr.bf16.mxu0 %v19991_v0 }
 0x429   :  { %v4869_v8 = vpop.f32.mrf.mxu1 }
 0x42a   :  { %v4748_v5 = vpop.f32.mrf.mxu0  ;;  %13973 = vmatmul.mubr.msk.bf16.vlgmr.msra.gmra.mxu0 %vm20181_vm13, %v5936_v50  ;;  %14011 = vmatpush3.bf16.msra.mxu1 %v17969_v20  ;;  %v6164_v8 = vpack.c.b16 %v6163_v41, %v6163_v41  ;;  %v6264_v41 = vunpack.c.l.b16 %v15007_v2  ;;  %vm20189_vm13 = vmmov %vm20177_vm3 }
 0x42b   :  { %v4754_v17 = vadd.f32 %v4748_v5, %v4692_v34  ;;  %13993 = vmatpush3.bf16.msra.mxu0 %v18023_v63  ;;  %v13735_v23 = vpop.f32.mrf.mxu1  ;;  %14012 = vmatprep.subr.bf16.mxu1 %v19991_v0 }
 0x42c   :  { %v13718_v29 = vpop.f32.mrf.mxu0  ;;  %13994 = vmatprep.subr.bf16.mxu0 %v19991_v0  ;;  %14004 = vmatprep.mubr.msk.bf16.mxu0 %vm20028_vm11, %v19991_v0 }
 0x42d   :  { %v4755_v47 = vadd.f32 %v18206_v25, %v4754_v17  ;;  %v6061_v29 = vpop.permute.xlu0 %6060 }
 0x42e   :  { %v4751_v13 = vpop.f32.mrf.mxu0  ;;  %14013 = vmatpush3.bf16.msra.mxu1 %v17978_v40 }
 0x42f   :  { %v4756_v24 = vmax.f32 %v4755_v47, 0.0  ;;  %13995 = vmatpush3.bf16.msra.mxu0 %v18039_v48  ;;  %14014 = vmatprep.subr.bf16.mxu1 %v19991_v0  ;;  %v6059_v47 = vpop.permute.xlu1 %6058 }
 0x430   :  { %v13719_v38 = vpop.f32.mrf.mxu0  ;;  %13996 = vmatprep.subr.bf16.mxu0 %v19991_v0  ;;  %v6062_v13 = vsel %vm20184_vm1, %v6059_v47, %v6061_v29  ;;  %v6208_v29 = vrot.slane %v6159_v16, 6  ;;  %v6209_v47 = vrot.slane %v6160_v43, 5  ;;  %vm20192_vm1 = vmmov %vm20187_vm7 }
 0x431   :  { %v4757_v57 = vpack.c.bf16 %v4756_v24, %v4756_v24 }
 0x432   :  { %14015 = vmatpush3.bf16.msra.mxu1 %v17987_v56  ;;  %v6210_v16 = vsel %vm20187_vm7, %v6209_v47, %v6208_v29  ;;  %v18335_v29 = vld [vmem:[#allocation2 + $0x20] ss:$0 sps:$4 sm:$0x88]   ;;  %vm20195_vm7 = vmmov %vm20192_vm1 }
 0x433   :  { %v4765_v36 = vrot.slane %v4757_v57, %v15955_v32  ;;  %13997 = vmatpush3.bf16.msra.mxu0 %v18095_v19  ;;  %14016 = vmatprep.subr.bf16.mxu1 %v19991_v0 }
 0x434   :  { %13998 = vmatprep.subr.bf16.mxu0 %v19991_v0 }
 0x435   :  { %v4772_v27 = vrot.slane %v4765_v36, %v15955_v32 }
 0x436   :  { %14017 = vmatpush3.bf16.msra.mxu1 %v17997_v35 }
 0x437   :  { %v4774_v6 = vunpack.i.h.s16 %v4772_v27  ;;  %v11725_v12 = vpack.i.b16 %v4772_v27, %v4772_v27  ;;  %13999 = vmatpush3.bf16.msra.mxu0 %v18110_v3  ;;  %14018 = vmatprep.subr.bf16.mxu1 %v19991_v0 }
 0x438   :  { %14000 = vmatprep.subr.bf16.mxu0 %v19991_v0 }
 0x439   :  { %v4776_v62 = vpack.i.b16 %v4774_v6, %v4774_v6  ;;  %v4783_v46 = vrot.slane %v11725_v12, %v15986_v53 }
 0x43a   :  { %14019 = vmatpush3.bf16.msra.mxu1 %v18012_v59 }
 0x43b   :  { %v4790_v50 = vrot.slane %v4776_v62, %v15986_v53  ;;  %v4795_v34 = vsel %vm17225_vm15, %v4783_v46, %v4794_v37  ;;  %14001 = vmatpush3.bf16.msra.mxu0 %v18123_v58  ;;  %14040 = vmatprep.subr.bf16.mxu1 %v19991_v0  ;;  %v15006_v37 = vld [vmem:[#allocation2 + $0x10] ss:$0 sps:$4 sm:$0x11]  }
 0x43c   :  { %4796 = vst [vmem:[#allocation3 + $0x8] sm:$0x1] %v4795_v34  ;;  %14002 = vmatprep.subr.bf16.mxu0 %v19991_v0 }
 0x43d   :  { %v4798_v5 = vsel %vm17225_vm15, %v4790_v50, %v4797_v28  ;;  %v4994_v17 = vpop.f32.mrf.mxu1  ;;  %14021 = vmatmul.mubr.msk.bf16.vlgmr.msra.gmra.mxu1 %vm20183_vm12, %v6164_v8  ;;  %v6263_v28 = vunpack.c.l.b16 %v15006_v37  ;;  %v6265_v50 = vrot.slane %v6264_v41, 7  ;;  %vm20191_vm12 = vmmov %vm20177_vm3 }
 0x43e   :  { %4799 = vst [vmem:[#allocation3 + $0x1c] sm:$0x1] %v4798_v5  ;;  %14041 = vmatpush3.bf16.msra.mxu1 %v18023_v63  ;;  %14052 = vmatprep.mubr.msk.bf16.mxu1 %vm20028_vm11, %v19991_v0 }
 0x43f   :  { %14003 = vmatpush3.bf16.msra.mxu0 %v18138_v26  ;;  %v13766_v23 = vpop.f32.mrf.mxu1  ;;  %14042 = vmatprep.subr.bf16.mxu1 %v19991_v0  ;;  %v6266_v5 = vsel %vm20186_vm9, %v6265_v50, %v6263_v28  ;;  %vm20194_vm9 = vmmov %vm20180_vm0 }
 0x440   :  { %14024 = vmatprep.subr.bf16.mxu0 %v19991_v0 }
 0x441   :  { %v4997_v24 = vpop.f32.mrf.mxu1 }
 0x442   :  { %v4922_v38 = vpop.f32.mrf.mxu0  ;;  %14005 = vmatmul.mubr.msk.bf16.vlgmr.msra.gmra.mxu0 %vm20185_vm5, %v6062_v13  ;;  %14043 = vmatpush3.bf16.msra.mxu1 %v18039_v48  ;;  %vm20193_vm5 = vmmov %vm20177_vm3 }
 0x443   :  { %v4923_v57 = vadd.f32 %v4922_v38, %v18182_v60  ;;  %14025 = vmatpush3.bf16.msra.mxu0 %v17885_v49  ;;  %v13767_v36 = vpop.f32.mrf.mxu1  ;;  %14044 = vmatprep.subr.bf16.mxu1 %v19991_v0  ;;  %v6267_v38 = vpack.c.b16 %v6266_v5, %v6266_v5 }
 0x444   :  { %v13750_v55 = vpop.f32.mrf.mxu0  ;;  %14026 = vmatprep.subr.bf16.mxu0 %v19991_v0  ;;  %14036 = vmatprep.mubr.msk.bf16.mxu0 %vm20028_vm11, %v19991_v0 }
 0x445   :  { %v5000_v27 = vadd.f32 %v4994_v17, %v4923_v57  ;;  %v5039_v57 = vld [vmem:[#allocation3 + $0x8] sm:$0x1]  ;;  %v5042_v43 = vld [vmem:[#allocation3 + $0x1c] sm:$0x1] }
 0x446   :  { %v4925_v6 = vpop.f32.mrf.mxu0  ;;  %14045 = vmatpush3.bf16.msra.mxu1 %v18095_v19 }
 0x447   :  { %v5001_v12 = vadd.f32 %v18206_v25, %v5000_v27  ;;  %14027 = vmatpush3.bf16.msra.mxu0 %v17897_v52  ;;  %14046 = vmatprep.subr.bf16.mxu1 %v19991_v0  ;;  %v6211_v27 = vpack.c.b16 %v6210_v16, %v6210_v16 }
 0x448   :  { %v13751_v60 = vpop.f32.mrf.mxu0  ;;  %14028 = vmatprep.subr.bf16.mxu0 %v19991_v0 }
 0x449   :  { %v5002_v62 = vmax.f32 %v5001_v12, 0.0 }
 0x44a   :  { %14047 = vmatpush3.bf16.msra.mxu1 %v18110_v3 }
 0x44b   :  { %v5003_v46 = vpack.c.bf16 %v5002_v62, %v5002_v62  ;;  %14029 = vmatpush3.bf16.msra.mxu0 %v17906_v33  ;;  %14048 = vmatprep.subr.bf16.mxu1 %v19991_v0 }
 0x44c   :  { %14030 = vmatprep.subr.bf16.mxu0 %v19991_v0 }
 0x44d   :  { %v5011_v34 = vrot.slane %v5003_v46, %v15955_v32 }
 0x44e   :  { %14049 = vmatpush3.bf16.msra.mxu1 %v18123_v58 }
 0x44f   :  { %v5018_v8 = vrot.slane %v5011_v34, %v15955_v32  ;;  %14031 = vmatpush3.bf16.msra.mxu0 %v17917_v22  ;;  %14050 = vmatprep.subr.bf16.mxu1 %v19991_v0 }
 0x450   :  { %14032 = vmatprep.subr.bf16.mxu0 %v19991_v0 }
 0x451   :  { %v5020_v17 = vunpack.i.h.s16 %v5018_v8  ;;  %v11737_v23 = vpack.i.b16 %v5018_v8, %v5018_v8 }
 0x452   :  { %14051 = vmatpush3.bf16.msra.mxu1 %v18138_v26 }
 0x453   :  { %v5022_v13 = vpack.i.b16 %v5020_v17, %v5020_v17  ;;  %v5029_v24 = vrot.slane %v11737_v23, %v15986_v53  ;;  %14033 = vmatpush3.bf16.msra.mxu0 %v17927_v39  ;;  %14072 = vmatprep.subr.bf16.mxu1 %v19991_v0  ;;  %v18333_v23 = vld [vmem:[#allocation2 + $0x8] ss:$0 sps:$4 sm:$0x88]  }
 0x454   :  { %14034 = vmatprep.subr.bf16.mxu0 %v19991_v0 }
 0x455   :  { %v5036_v36 = vrot.slane %v5022_v13, %v15986_v53  ;;  %v5040_v45 = vsel %vm15912_vm14, %v5029_v24, %v5039_v57  ;;  %v5143_v31 = vpop.f32.mrf.mxu1  ;;  %14053 = vmatmul.mubr.msk.bf16.vlgmr.msra.gmra.mxu1 %vm20177_vm3, %v6267_v38  ;;  %v6607_v38 = vunpack.c.l.b16 %v18333_v23  ;;  %v6608_v57 = vunpack.c.l.b16 %v18335_v29 }
 0x456   :  { %5041 = vst [vmem:[#allocation3 + $0x8] sm:$0x1] %v5040_v45  ;;  %14073 = vmatpush3.bf16.msra.mxu1 %v17885_v49  ;;  %14084 = vmatprep.mubr.msk.bf16.mxu1 %vm20028_vm11, %v19991_v0 }
 0x457   :  { %v5043_v55 = vsel %vm15912_vm14, %v5036_v36, %v5042_v43  ;;  %14035 = vmatpush3.bf16.msra.mxu0 %v17947_v51  ;;  %v13798_v2 = vpop.f32.mrf.mxu1  ;;  %14074 = vmatprep.subr.bf16.mxu1 %v19991_v0 }
 0x458   :  { %5044 = vst [vmem:[#allocation3 + $0x1c] sm:$0x1] %v5043_v55  ;;  %14056 = vmatprep.subr.bf16.mxu0 %v19991_v0  ;;  %v5245_v55 = vld [vmem:[#allocation3 + $0x8] sm:$0x2] }
 0x459   :  { %v5146_v6 = vpop.f32.mrf.mxu1 }
 0x45a   :  { %v5096_v12 = vpop.f32.mrf.mxu0  ;;  %14037 = vmatmul.mubr.msk.bf16.vlgmr.msra.gmra.mxu0 %vm20188_vm10, %v6211_v27  ;;  %14075 = vmatpush3.bf16.msra.mxu1 %v17897_v52  ;;  %v6439_v52 = vpop.permute.xlu0 %6438  ;;  %vm20196_vm10 = vmmov %vm20177_vm3 }
 0x45b   :  { %14057 = vmatpush3.bf16.msra.mxu0 %v17958_v18  ;;  %v13799_v49 = vpop.f32.mrf.mxu1  ;;  %14076 = vmatprep.subr.bf16.mxu1 %v19991_v0  ;;  %v5144_v50 = vadd.f32 %v5143_v31, %v5096_v12  ;;  %v6610_v31 = vrot.slane %v6608_v57, 6  ;;  %v5248_v12 = vld [vmem:[#allocation3 + $0x1c] sm:$0x2] }
 0x45c   :  { %v13782_v60 = vpop.f32.mrf.mxu0  ;;  %14058 = vmatprep.subr.bf16.mxu0 %v19991_v0  ;;  %14068 = vmatprep.mubr.msk.bf16.mxu0 %vm20028_vm11, %v19991_v0 }
 0x45e   :  { %v5099_v37 = vpop.f32.mrf.mxu0  ;;  %14077 = vmatpush3.bf16.msra.mxu1 %v17906_v33  ;;  %v6437_v33 = vpop.permute.xlu1 %6436 }
 0x45f   :  { %14059 = vmatpush3.bf16.msra.mxu0 %v17969_v20  ;;  %14078 = vmatprep.subr.bf16.mxu1 %v19991_v0 }
 0x460   :  { %v13783_v41 = vpop.f32.mrf.mxu0  ;;  %14060 = vmatprep.subr.bf16.mxu0 %v19991_v0 }
 0x462   :  { %14079 = vmatpush3.bf16.msra.mxu1 %v17917_v22  ;;  %v6440_v22 = vsel %vm20180_vm0, %v6437_v33, %v6439_v52  ;;  %v6381_v46 = vpop.permute.xlu1 %6380  ;;  %vm20197_vm0 = vmmov %vm20192_vm1 }
 0x463   :  { %14061 = vmatpush3.bf16.msra.mxu0 %v17978_v40  ;;  %14080 = vmatprep.subr.bf16.mxu1 %v19991_v0 }
 0x464   :  { %14062 = vmatprep.subr.bf16.mxu0 %v19991_v0 }
 0x466   :  { %14081 = vmatpush3.bf16.msra.mxu1 %v17927_v39  ;;  %v6383_v39 = vpop.permute.xlu0 %6382  ;;  %v6507_v33 = vpop.permute.xlu1 %6506 }
 0x467   :  { %14063 = vmatpush3.bf16.msra.mxu0 %v17987_v56  ;;  %14082 = vmatprep.subr.bf16.mxu1 %v19991_v0  ;;  %v6384_v28 = vsel %vm20190_vm6, %v6381_v46, %v6383_v39  ;;  %vm20199_vm6 = vmmov %vm20197_vm0 }
 0x468   :  { %14064 = vmatprep.subr.bf16.mxu0 %v19991_v0 }
 0x46a   :  { %14083 = vmatpush3.bf16.msra.mxu1 %v17947_v51  ;;  %v6509_v52 = vpop.permute.xlu0 %6508 }
 0x46b   :  { %14065 = vmatpush3.bf16.msra.mxu0 %v17997_v35  ;;  %14104 = vmatprep.subr.bf16.mxu1 %v19991_v0 }
 0x46c   :  { %14066 = vmatprep.subr.bf16.mxu0 %v19991_v0 }
 0x46d   :  { %v18318_v62 = vpop.f32.mrf.mxu1  ;;  %14085 = vmatmul.mubr.msk.bf16.vlgmr.msra.gmra.mxu1 %vm20189_vm13, %v6440_v22  ;;  %v6510_v22 = vsel %vm20194_vm9, %v6507_v33, %v6509_v52  ;;  %vm20198_vm13 = vmmov %vm20177_vm3 }
 0x46e   :  { %14105 = vmatpush3.bf16.msra.mxu1 %v17958_v18  ;;  %14116 = vmatprep.mubr.msk.bf16.mxu1 %vm20028_vm11, %v19991_v0 }
 0x46f   :  { %14067 = vmatpush3.bf16.msra.mxu0 %v18012_v59  ;;  %v13830_v51 = vpop.f32.mrf.mxu1  ;;  %14106 = vmatprep.subr.bf16.mxu1 %v19991_v0 }
 0x470   :  { %14088 = vmatprep.subr.bf16.mxu0 %v19991_v0  ;;  %v18385_v51 = vld [vmem:[%s19953_s3 + $0x28] sm:$0xff]  }
 0x471   :  { %v5320_v34 = vpop.f32.mrf.mxu1 }
 0x472   :  { %v5200_v8 = vpop.f32.mrf.mxu0  ;;  %14069 = vmatmul.mubr.msk.bf16.vlgmr.msra.gmra.mxu0 %vm20191_vm12, %v6384_v28  ;;  %14107 = vmatpush3.bf16.msra.mxu1 %v17969_v20  ;;  %v15011_v34 = vld [vmem:[#allocation2 + $0x2c] ss:$0 sps:$4 sm:$0x11]   ;;  %vm20200_vm12 = vmmov %vm20197_vm0 }
 0x473   :  { %v5206_v18 = vadd.f32 %v5200_v8, %v5144_v50  ;;  %14089 = vmatpush3.bf16.msra.mxu0 %v18023_v63  ;;  %v13831_v5 = vpop.f32.mrf.mxu1  ;;  %14108 = vmatprep.subr.bf16.mxu1 %v19991_v0 }
 0x474   :  { %v13814_v17 = vpop.f32.mrf.mxu0  ;;  %14090 = vmatprep.subr.bf16.mxu0 %v19991_v0  ;;  %14100 = vmatprep.mubr.msk.bf16.mxu0 %vm20028_vm11, %v19991_v0 }
 0x475   :  { %v5207_v47 = vadd.f32 %v18206_v25, %v5206_v18  ;;  %v18397_v18 = vld [vmem:[%s19953_s3 + $0x20] sm:$0xff]   ;;  %v15010_v17 = vld [vmem:[#allocation2 + $0x14] ss:$0 sps:$4 sm:$0x11]  }
 0x476   :  { %v5203_v13 = vpop.f32.mrf.mxu0  ;;  %14109 = vmatpush3.bf16.msra.mxu1 %v17978_v40  ;;  %v6609_v40 = vrot.slane %v6607_v38, 7 }
 0x477   :  { %v5208_v20 = vmax.f32 %v5207_v47, 0.0  ;;  %14091 = vmatpush3.bf16.msra.mxu0 %v18039_v48  ;;  %14110 = vmatprep.subr.bf16.mxu1 %v19991_v0  ;;  %v6712_v47 = vunpack.c.l.b16 %v15011_v34  ;;  %v18469_v34 = vld [vmem:[#allocation3 + $0x8] ss:$0 sps:$4 sm:$0x22]  }
 0x478   :  { %v13815_v24 = vpop.f32.mrf.mxu0  ;;  %14092 = vmatprep.subr.bf16.mxu0 %v19991_v0  ;;  %v6611_v2 = vsel %vm20192_vm1, %v6610_v31, %v6609_v40  ;;  %vm20201_vm1 = vmmov %vm20177_vm3 }
 0x479   :  { %v5209_v36 = vpack.c.bf16 %v5208_v20, %v5208_v20  ;;  %v6612_v60 = vpack.c.b16 %v6611_v2, %v6611_v2  ;;  %v18406_v24 = vld [vmem:[%s19953_s3 + $0x18] sm:$0xff]   ;;  %v6656_v2 = vrot.slane %v6607_v38, 6  ;;  %vm20203_vm9 = vmmov %vm20201_vm1 }
 0x47a   :  { %14111 = vmatpush3.bf16.msra.mxu1 %v17987_v56 }
 0x47b   :  { %v5217_v45 = vrot.slane %v5209_v36, %v15955_v32  ;;  %14093 = vmatpush3.bf16.msra.mxu0 %v18095_v19  ;;  %14112 = vmatprep.subr.bf16.mxu1 %v19991_v0  ;;  %v6711_v36 = vunpack.c.l.b16 %v15010_v17 }
 0x47c   :  { %14094 = vmatprep.subr.bf16.mxu0 %v19991_v0 }
 0x47d   :  { %v5224_v16 = vrot.slane %v5217_v45, %v15955_v32  ;;  %v6713_v45 = vrot.slane %v6712_v47, 7  ;;  %v15012_v47 = vld [vmem:[#allocation2 + $0xc] ss:$0 sps:$4 sm:$0x11]  }
 0x47e   :  { %14113 = vmatpush3.bf16.msra.mxu1 %v17997_v35 }
 0x47f   :  { %v5226_v43 = vunpack.i.h.s16 %v5224_v16  ;;  %v11745_v56 = vpack.i.b16 %v5224_v16, %v5224_v16  ;;  %14095 = vmatpush3.bf16.msra.mxu0 %v18110_v3  ;;  %14114 = vmatprep.subr.bf16.mxu1 %v19991_v0  ;;  %v18417_v16 = vld [vmem:[%s19953_s3 + $0x10] sm:$0xff]  }
 0x480   :  { %14096 = vmatprep.subr.bf16.mxu0 %v19991_v0 }
 0x481   :  { %v5228_v27 = vpack.i.b16 %v5226_v43, %v5226_v43  ;;  %v5235_v6 = vrot.slane %v11745_v56, %v15986_v53  ;;  %v6714_v43 = vsel %vm20195_vm7, %v6713_v45, %v6711_v36  ;;  %v18488_v36 = vld [vmem:[%s19953_s3 + $0x48] sm:$0xff]   ;;  %vm20205_vm7 = vmmov %vm20201_vm1 }
 0x482   :  { %14115 = vmatpush3.bf16.msra.mxu1 %v18012_v59 }
 0x483   :  { %v5242_v49 = vrot.slane %v5228_v27, %v15986_v53  ;;  %v5246_v35 = vsel %vm17581_vm2, %v5235_v6, %v5245_v55  ;;  %14097 = vmatpush3.bf16.msra.mxu0 %v18123_v58  ;;  %14136 = vmatprep.subr.bf16.mxu1 %v19991_v0  ;;  %v6657_v27 = vrot.slane %v6608_v57, 5 }
 0x484   :  { %5247 = vst [vmem:[#allocation3 + $0x8] sm:$0x2] %v5246_v35  ;;  %14098 = vmatprep.subr.bf16.mxu0 %v19991_v0  ;;  %v6715_v35 = vpack.c.b16 %v6714_v43, %v6714_v43 }
 0x485   :  { %v5249_v37 = vsel %vm17581_vm2, %v5242_v49, %v5248_v12  ;;  %v5445_v41 = vpop.f32.mrf.mxu1  ;;  %14117 = vmatmul.mubr.msk.bf16.vlgmr.msra.gmra.mxu1 %vm20193_vm5, %v6612_v60  ;;  %v18432_v49 = vld [vmem:[%s19953_s3 + $0x8] sm:$0xff]   ;;  %v6658_v60 = vsel %vm20197_vm0, %v6657_v27, %v6656_v2  ;;  %vm20202_vm5 = vmmov %vm20197_vm0 }
 0x486   :  { %5250 = vst [vmem:[#allocation3 + $0x1c] sm:$0x2] %v5249_v37  ;;  %14137 = vmatpush3.bf16.msra.mxu1 %v18023_v63  ;;  %14148 = vmatprep.mubr.msk.bf16.mxu1 %vm20028_vm11, %v19991_v0  ;;  %v6659_v33 = vpack.c.b16 %v6658_v60, %v6658_v60 }
 0x487   :  { %14099 = vmatpush3.bf16.msra.mxu0 %v18138_v26  ;;  %v13862_v59 = vpop.f32.mrf.mxu1  ;;  %14138 = vmatprep.subr.bf16.mxu1 %v19991_v0 }
 0x488   :  { %14120 = vmatprep.subr.bf16.mxu0 %v19991_v0  ;;  %v18452_v59 = vld [vmem:[%s19953_s3] sm:$0xff]  }
 0x489   :  { %v5448_v39 = vpop.f32.mrf.mxu1 }
 0x48a   :  { %v5373_v46 = vpop.f32.mrf.mxu0  ;;  %14101 = vmatmul.mubr.msk.bf16.vlgmr.msra.gmra.mxu0 %vm20177_vm3, %v6510_v22  ;;  %14139 = vmatpush3.bf16.msra.mxu1 %v18039_v48  ;;  %vm20204_vm3 = vcmask 523264  }
 0x48b   :  { %v5374_v63 = vadd.f32 %v5373_v46, %v18318_v62  ;;  %14121 = vmatpush3.bf16.msra.mxu0 %v18385_v51  ;;  %v13863_v28 = vpop.f32.mrf.mxu1  ;;  %14140 = vmatprep.subr.bf16.mxu1 %v19991_v0  ;;  %v5490_v23 = vld [vmem:[#allocation3 + $0x8] sm:$0x2] }
 0x48c   :  { %v13846_v50 = vpop.f32.mrf.mxu0  ;;  %14122 = vmatprep.subr.bf16.mxu0 %v19991_v0  ;;  %14132 = vmatprep.mubr.msk.bf16.mxu0 %vm20028_vm11, %v19991_v0  ;;  %v18462_v46 = vld [vmem:[%s19953_s3 + $0x58] sm:$0xff]  }
 0x48d   :  { %v5451_v48 = vadd.f32 %v5445_v41, %v5374_v63  ;;  %v5493_v37 = vld [vmem:[#allocation3 + $0x1c] sm:$0x2]  ;;  %v15013_v50 = vld [vmem:[#allocation2 + $0x24] ss:$0 sps:$4 sm:$0x11]  }
 0x48e   :  { %v5376_v8 = vpop.f32.mrf.mxu0  ;;  %14141 = vmatpush3.bf16.msra.mxu1 %v18095_v19 }
 0x48f   :  { %v5452_v62 = vadd.f32 %v18206_v25, %v5451_v48  ;;  %14123 = vmatpush3.bf16.msra.mxu0 %v18397_v18  ;;  %14142 = vmatprep.subr.bf16.mxu1 %v19991_v0  ;;  %v18475_v8 = vld [vmem:[%s19953_s3 + $0x50] sm:$0xff]  }
 0x490   :  { %v13847_v5 = vpop.f32.mrf.mxu0  ;;  %14124 = vmatprep.subr.bf16.mxu0 %v19991_v0 }
 0x491   :  { %v5453_v13 = vmax.f32 %v5452_v62, 0.0  ;;  %v18479_v62 = vld [vmem:[#allocation3 + $0x1c] ss:$0 sps:$4 sm:$0x22]   ;;  %v19984_v5 = vunpack.c.l.b16 %v18469_v34 }
 0x492   :  { %14143 = vmatpush3.bf16.msra.mxu1 %v18110_v3 }
 0x493   :  { %v5454_v20 = vpack.c.bf16 %v5453_v13, %v5453_v13  ;;  %14125 = vmatpush3.bf16.msra.mxu0 %v18406_v24  ;;  %14144 = vmatprep.subr.bf16.mxu1 %v19991_v0  ;;  %v6813_v13 = vunpack.c.l.b16 %v15013_v50  ;;  %v9154_v45 = vrot.slane %v19984_v5, 3  ;;  %v19148_v5 = vld [vmem:[%s19955_s5 + $0x118] sm:$0xff]  }
 0x494   :  { %14126 = vmatprep.subr.bf16.mxu0 %v19991_v0 }
 0x495   :  { %v5462_v40 = vrot.slane %v5454_v20, %v15955_v32  ;;  %v19985_v20 = vunpack.c.l.b16 %v18479_v62  ;;  %v6860_v43 = vrot.slane %v6813_v13, 7 }
 0x496   :  { %14145 = vmatpush3.bf16.msra.mxu1 %v18123_v58 }
 0x497   :  { %v5469_v31 = vrot.slane %v5462_v40, %v15955_v32  ;;  %14127 = vmatpush3.bf16.msra.mxu0 %v18417_v16  ;;  %14146 = vmatprep.subr.bf16.mxu1 %v19991_v0  ;;  %v9155_v40 = vrot.slane %v19985_v20, 2 }
 0x498   :  { %14128 = vmatprep.subr.bf16.mxu0 %v19991_v0 }
 0x499   :  { %v5471_v56 = vunpack.i.h.s16 %v5469_v31  ;;  %v11757_v55 = vpack.i.b16 %v5469_v31, %v5469_v31  ;;  %v6812_v31 = vunpack.c.l.b16 %v15012_v47 }
 0x49a   :  { %14147 = vmatpush3.bf16.msra.mxu1 %v18138_v26 }
 0x49b   :  { %v5473_v6 = vpack.i.b16 %v5471_v56, %v5471_v56  ;;  %v5480_v12 = vrot.slane %v11757_v55, %v15986_v53  ;;  %14129 = vmatpush3.bf16.msra.mxu0 %v18432_v49  ;;  %14168 = vmatprep.subr.bf16.mxu1 %v19991_v0  ;;  %v18498_v56 = vsel %vm20199_vm6, %v9155_v40, %v9154_v45  ;;  %v18504_v55 = vld [vmem:[%s19953_s3 + $0x40] sm:$0xff]   ;;  %v6814_v27 = vrot.slane %v6812_v31, 1 }
 0x49c   :  { %14130 = vmatprep.subr.bf16.mxu0 %v19991_v0  ;;  %v6861_v2 = vsel %vm20200_vm12, %v6860_v43, %v6812_v31  ;;  %v15015_v45 = vld [vmem:[#allocation2 + $0x24] ss:$0 sps:$4 sm:$0x22]   ;;  %vm20210_vm12 = vmmov %vm20204_vm3 }
 0x49d   :  { %v5487_v29 = vrot.slane %v5473_v6, %v15986_v53  ;;  %v5491_v38 = vsel %vm17648_vm8, %v5480_v12, %v5490_v23  ;;  %v18440_v57 = vpop.f32.mrf.mxu1  ;;  %14149 = vmatmul.mubr.msk.bf16.vlgmr.msra.gmra.mxu1 %vm20196_vm10, %v6715_v35  ;;  %v18514_v6 = vld [vmem:[%s19953_s3 + $0x38] sm:$0xff]   ;;  %v6862_v12 = vpack.c.b16 %v6861_v2, %v6861_v2  ;;  %v6815_v23 = vsel %vm20202_vm5, %v6813_v13, %v6814_v27  ;;  %v15014_v13 = vld [vmem:[#allocation2 + $0xc] ss:$0 sps:$4 sm:$0x22]   ;;  %vm20206_vm10 = vmmov %vm20197_vm0 }
 0x49e   :  { %5492 = vst [vmem:[#allocation3 + $0x8] sm:$0x2] %v5491_v38  ;;  %14169 = vmatpush3.bf16.msra.mxu1 %v18385_v51  ;;  %14180 = vmatprep.mubr.msk.bf16.mxu1 %vm20028_vm11, %v19991_v0  ;;  %v6816_v60 = vpack.c.b16 %v6815_v23, %v6815_v23  ;;  %v6914_v43 = vunpack.c.l.b16 %v15014_v13  ;;  %v6915_v2 = vunpack.c.l.b16 %v15015_v45  ;;  %v5696_v23 = vld [vmem:[#allocation3 + $0x8] sm:$0x4]  ;;  %vm20207_vm0 = vmmov %vm20201_vm1 }
 0x49f   :  { %v5494_v41 = vsel %vm17648_vm8, %v5487_v29, %v5493_v37  ;;  %14131 = vmatpush3.bf16.msra.mxu0 %v18452_v59  ;;  %v13894_v52 = vpop.f32.mrf.mxu1  ;;  %14170 = vmatprep.subr.bf16.mxu1 %v19991_v0  ;;  %v18529_v29 = vld [vmem:[%s19953_s3 + $0x30] sm:$0xff]   ;;  %vm20209_vm6 = vmmov %vm20207_vm0 }
 0x4a0   :  { %5495 = vst [vmem:[#allocation3 + $0x1c] sm:$0x2] %v5494_v41  ;;  %14152 = vmatprep.subr.bf16.mxu0 %v19991_v0 }
 0x4a1   :  { %v5597_v22 = vpop.f32.mrf.mxu1 }
 0x4a2   :  { %v5547_v39 = vpop.f32.mrf.mxu0  ;;  %14133 = vmatmul.mubr.msk.bf16.vlgmr.msra.gmra.mxu0 %vm20198_vm13, %v6659_v33  ;;  %14171 = vmatpush3.bf16.msra.mxu1 %v18397_v18  ;;  %v18540_v22 = vld [vmem:[%s19953_s3 + $0x88] sm:$0xff]   ;;  %vm20208_vm13 = vmmov %vm20204_vm3 }
 0x4a3   :  { %14153 = vmatpush3.bf16.msra.mxu0 %v18462_v46  ;;  %v13895_v63 = vpop.f32.mrf.mxu1  ;;  %14172 = vmatprep.subr.bf16.mxu1 %v19991_v0  ;;  %v5595_v37 = vadd.f32 %v18440_v57, %v5547_v39 }
 0x4a4   :  { %v13878_v28 = vpop.f32.mrf.mxu0  ;;  %14154 = vmatprep.subr.bf16.mxu0 %v19991_v0  ;;  %14164 = vmatprep.mubr.msk.bf16.mxu0 %vm20028_vm11, %v19991_v0 }
 0x4a6   :  { %v5550_v48 = vpop.f32.mrf.mxu0  ;;  %14173 = vmatpush3.bf16.msra.mxu1 %v18406_v24 }
 0x4a7   :  { %14155 = vmatpush3.bf16.msra.mxu0 %v18475_v8  ;;  %14174 = vmatprep.subr.bf16.mxu1 %v19991_v0  ;;  %v18552_v48 = vld [vmem:[%s19953_s3 + $0x80] sm:$0xff]  }
 0x4a8   :  { %v13879_v17 = vpop.f32.mrf.mxu0  ;;  %14156 = vmatprep.subr.bf16.mxu0 %v19991_v0 }
 0x4aa   :  { %14175 = vmatpush3.bf16.msra.mxu1 %v18417_v16 }
 0x4ab   :  { %14157 = vmatpush3.bf16.msra.mxu0 %v18488_v36  ;;  %14176 = vmatprep.subr.bf16.mxu1 %v19991_v0 }
 0x4ac   :  { %14158 = vmatprep.subr.bf16.mxu0 %v19991_v0 }
 0x4ae   :  { %14177 = vmatpush3.bf16.msra.mxu1 %v18432_v49 }
 0x4af   :  { %14159 = vmatpush3.bf16.msra.mxu0 %v18504_v55  ;;  %14178 = vmatprep.subr.bf16.mxu1 %v19991_v0 }
 0x4b0   :  { %14160 = vmatprep.subr.bf16.mxu0 %v19991_v0 }
 0x4b2   :  { %14179 = vmatpush3.bf16.msra.mxu1 %v18452_v59 }
 0x4b3   :  { %14161 = vmatpush3.bf16.msra.mxu0 %v18514_v6  ;;  %14200 = vmatprep.subr.bf16.mxu1 %v19991_v0 }
 0x4b4   :  { %14162 = vmatprep.subr.bf16.mxu0 %v19991_v0 }
 0x4b5   :  { %v18519_v35 = vpop.f32.mrf.mxu1  ;;  %14181 = vmatmul.mubr.msk.bf16.vlgmr.msra.gmra.mxu1 %vm20201_vm1, %v6862_v12  ;;  %vm20211_vm1 = vmmov %vm20207_vm0 }
 0x4b6   :  { %14201 = vmatpush3.bf16.msra.mxu1 %v18462_v46  ;;  %14212 = vmatprep.mubr.msk.bf16.mxu1 %vm20028_vm11, %v19991_v0 }
 0x4b7   :  { %14163 = vmatpush3.bf16.msra.mxu0 %v18529_v29  ;;  %v13926_v38 = vpop.f32.mrf.mxu1  ;;  %14202 = vmatprep.subr.bf16.mxu1 %v19991_v0 }
 0x4b8   :  { %14184 = vmatprep.subr.bf16.mxu0 %v19991_v0 }
 0x4b9   :  { %v5756_v41 = vpop.f32.mrf.mxu1 }
 0x4ba   :  { %v5651_v52 = vpop.f32.mrf.mxu0  ;;  %14165 = vmatmul.mubr.msk.bf16.vlgmr.msra.gmra.mxu0 %vm20203_vm9, %v6816_v60  ;;  %14203 = vmatpush3.bf16.msra.mxu1 %v18475_v8  ;;  %v6916_v60 = vrot.slane %v6914_v43, 2  ;;  %v5699_v41 = vld [vmem:[#allocation3 + $0x1c] sm:$0x4]  ;;  %vm20212_vm9 = vmmov %vm20207_vm0 }
 0x4bb   :  { %v5657_v33 = vadd.f32 %v5651_v52, %v5595_v37  ;;  %14185 = vmatpush3.bf16.msra.mxu0 %v18540_v22  ;;  %v13927_v63 = vpop.f32.mrf.mxu1  ;;  %14204 = vmatprep.subr.bf16.mxu1 %v19991_v0  ;;  %v6917_v37 = vrot.slane %v6915_v2, 1  ;;  %v7034_v52 = vpop.permute.xlu0 %7033  ;;  %v18597_v2 = vld [vmem:[%s19953_s3 + $0x78] sm:$0xff]  }
 0x4bc   :  { %v13910_v28 = vpop.f32.mrf.mxu0  ;;  %14186 = vmatprep.subr.bf16.mxu0 %v19991_v0  ;;  %14196 = vmatprep.mubr.msk.bf16.mxu0 %vm20028_vm11, %v19991_v0 }
 0x4bd   :  { %v5658_v57 = vadd.f32 %v18206_v25, %v5657_v33  ;;  %v7032_v33 = vpop.permute.xlu1 %7031 }
 0x4be   :  { %v5654_v39 = vpop.f32.mrf.mxu0  ;;  %14205 = vmatpush3.bf16.msra.mxu1 %v18488_v36  ;;  %v7035_v28 = vsel %vm20204_vm3, %v7032_v33, %v7034_v52  ;;  %vm20213_vm3 = vmmov %vm20202_vm5 }
 0x4bf   :  { %v5659_v50 = vmax.f32 %v5658_v57, 0.0  ;;  %14187 = vmatpush3.bf16.msra.mxu0 %v18552_v48  ;;  %14206 = vmatprep.subr.bf16.mxu1 %v19991_v0  ;;  %v7160_v52 = vpop.permute.xlu0 %7159 }
 0x4c0   :  { %v13911_v17 = vpop.f32.mrf.mxu0  ;;  %14188 = vmatprep.subr.bf16.mxu0 %v19991_v0 }
 0x4c1   :  { %v5660_v47 = vpack.c.bf16 %v5659_v50, %v5659_v50  ;;  %v6918_v50 = vsel %vm20206_vm10, %v6917_v37, %v6916_v60  ;;  %v7158_v33 = vpop.permute.xlu1 %7157  ;;  %vm20215_vm10 = vmmov %vm20210_vm12 }
 0x4c2   :  { %14207 = vmatpush3.bf16.msra.mxu1 %v18504_v55  ;;  %v6919_v17 = vpack.c.b16 %v6918_v50, %v6918_v50  ;;  %v5905_v50 = vld [vmem:[#allocation3 + $0x20] sm:$0x1] }
 0x4c3   :  { %v5668_v40 = vrot.slane %v5660_v47, %v15955_v32  ;;  %14189 = vmatpush3.bf16.msra.mxu0 %v18095_v19  ;;  %14208 = vmatprep.subr.bf16.mxu1 %v19991_v0 }
 0x4c4   :  { %14190 = vmatprep.subr.bf16.mxu0 %v19991_v0 }
 0x4c5   :  { %v5675_v31 = vrot.slane %v5668_v40, %v15955_v32 }
 0x4c6   :  { %14209 = vmatpush3.bf16.msra.mxu1 %v18514_v6 }
 0x4c7   :  { %v5677_v27 = vunpack.i.h.s16 %v5675_v31  ;;  %v11765_v12 = vpack.i.b16 %v5675_v31, %v5675_v31  ;;  %14191 = vmatpush3.bf16.msra.mxu0 %v18110_v3  ;;  %14210 = vmatprep.subr.bf16.mxu1 %v19991_v0 }
 0x4c8   :  { %14192 = vmatprep.subr.bf16.mxu0 %v19991_v0 }
 0x4c9   :  { %v5679_v19 = vpack.i.b16 %v5677_v27, %v5677_v27  ;;  %v5686_v38 = vrot.slane %v11765_v12, %v15986_v53 }
 0x4ca   :  { %14211 = vmatpush3.bf16.msra.mxu1 %v18529_v29 }
 0x4cb   :  { %v5693_v63 = vrot.slane %v5679_v19, %v15986_v53  ;;  %v5697_v3 = vsel %vm17738_vm4, %v5686_v38, %v5696_v23  ;;  %14193 = vmatpush3.bf16.msra.mxu0 %v18123_v58  ;;  %14232 = vmatprep.subr.bf16.mxu1 %v19991_v0  ;;  %v18607_v23 = vld [vmem:[%s19953_s3 + $0x70] sm:$0xff]   ;;  %v18617_v38 = vld [vmem:[%s19953_s3 + $0x68] sm:$0xff]  }
 0x4cc   :  { %5698 = vst [vmem:[#allocation3 + $0x8] sm:$0x4] %v5697_v3  ;;  %14194 = vmatprep.subr.bf16.mxu0 %v19991_v0  ;;  %v18627_v3 = vld [vmem:[%s19953_s3 + $0x60] sm:$0xff]  }
 0x4cd   :  { %v5700_v57 = vsel %vm17738_vm4, %v5693_v63, %v5699_v41  ;;  %v5856_v39 = vpop.f32.mrf.mxu1  ;;  %14213 = vmatmul.mubr.msk.bf16.vlgmr.msra.gmra.mxu1 %vm20205_vm7, %v7035_v28  ;;  %v5902_v63 = vld [vmem:[#allocation3 + $0xc] sm:$0x1]  ;;  %vm20214_vm7 = vmmov %vm20207_vm0 }
 0x4ce   :  { %5701 = vst [vmem:[#allocation3 + $0x1c] sm:$0x4] %v5700_v57  ;;  %14233 = vmatpush3.bf16.msra.mxu1 %v18540_v22  ;;  %14244 = vmatprep.mubr.msk.bf16.mxu1 %vm20028_vm11, %v19991_v0 }
 0x4cf   :  { %14195 = vmatpush3.bf16.msra.mxu0 %v18138_v26  ;;  %v13958_v58 = vpop.f32.mrf.mxu1  ;;  %14234 = vmatprep.subr.bf16.mxu1 %v19991_v0 }
 0x4d0   :  { %14216 = vmatprep.subr.bf16.mxu0 %v19991_v0 }
 0x4d1   :  { %v5859_v47 = vpop.f32.mrf.mxu1 }
 0x4d2   :  { %v5800_v13 = vpop.f32.mrf.mxu0  ;;  %14197 = vmatmul.mubr.msk.bf16.vlgmr.msra.gmra.mxu0 %vm20207_vm0, %v6919_v17  ;;  %14235 = vmatpush3.bf16.msra.mxu1 %v18552_v48 }
 0x4d3   :  { %v5801_v45 = vadd.f32 %v5800_v13, %v18519_v35  ;;  %14217 = vmatpush3.bf16.msra.mxu0 %v18385_v51  ;;  %v13959_v40 = vpop.f32.mrf.mxu1  ;;  %14236 = vmatprep.subr.bf16.mxu1 %v19991_v0 }
 0x4d4   :  { %v13942_v26 = vpop.f32.mrf.mxu0  ;;  %14218 = vmatprep.subr.bf16.mxu0 %v19991_v0  ;;  %14228 = vmatprep.mubr.msk.bf16.mxu0 %vm20028_vm11, %v19991_v0  ;;  %v7088_v40 = vpop.permute.xlu0 %7087 }
 0x4d5   :  { %v5862_v31 = vadd.f32 %v5856_v39, %v5801_v45  ;;  %v7161_v39 = vsel %vm20208_vm13, %v7158_v33, %v7160_v52  ;;  %v7086_v26 = vpop.permute.xlu1 %7085  ;;  %vm20216_vm13 = vmmov %vm20213_vm3 }
 0x4d6   :  { %v5803_v43 = vpop.f32.mrf.mxu0  ;;  %14237 = vmatpush3.bf16.msra.mxu1 %v18597_v2 }
 0x4d7   :  { %v5863_v35 = vadd.f32 %v18206_v25, %v5862_v31  ;;  %14219 = vmatpush3.bf16.msra.mxu0 %v18397_v18  ;;  %14238 = vmatprep.subr.bf16.mxu1 %v19991_v0  ;;  %v7089_v31 = vsel %vm20210_vm12, %v7086_v26, %v7088_v40  ;;  %vm20218_vm12 = vmmov %vm20215_vm10 }
 0x4d8   :  { %v13943_v27 = vpop.f32.mrf.mxu0  ;;  %14220 = vmatprep.subr.bf16.mxu0 %v19991_v0 }
 0x4d9   :  { %v5864_v12 = vmax.f32 %v5863_v35, 0.0 }
 0x4da   :  { %14239 = vmatpush3.bf16.msra.mxu1 %v18607_v23 }
 0x4db   :  { %v5865_v19 = vpack.c.bf16 %v5864_v12, %v5864_v12  ;;  %14221 = vmatpush3.bf16.msra.mxu0 %v18406_v24  ;;  %14240 = vmatprep.subr.bf16.mxu1 %v19991_v0 }
 0x4dc   :  { %14222 = vmatprep.subr.bf16.mxu0 %v19991_v0 }
 0x4dd   :  { %v5873_v25 = vrot.slane %v5865_v19, %v15955_v32  ;;  %v15017_v19 = vld [vmem:[#allocation2 + $0x28] ss:$0 sps:$4 sm:$0x11]  }
 0x4de   :  { %14241 = vmatpush3.bf16.msra.mxu1 %v18617_v38 }
 0x4df   :  { %v5880_v60 = vrot.slane %v5873_v25, %v15955_v32  ;;  %14223 = vmatpush3.bf16.msra.mxu0 %v18417_v16  ;;  %14242 = vmatprep.subr.bf16.mxu1 %v19991_v0 }
 0x4e0   :  { %14224 = vmatprep.subr.bf16.mxu0 %v19991_v0 }
 0x4e1   :  { %v5882_v37 = vunpack.i.h.s16 %v5880_v60  ;;  %v11773_v41 = vpack.i.b16 %v5880_v60, %v5880_v60 }
 0x4e2   :  { %14243 = vmatpush3.bf16.msra.mxu1 %v18627_v3 }
 0x4e3   :  { %v5884_v28 = vpack.i.b16 %v5882_v37, %v5882_v37  ;;  %v5891_v57 = vrot.slane %v11773_v41, %v15986_v53  ;;  %14225 = vmatpush3.bf16.msra.mxu0 %v18432_v49  ;;  %14264 = vmatprep.subr.bf16.mxu1 %v19991_v0  ;;  %v15016_v37 = vld [vmem:[#allocation2 + $0x10] ss:$0 sps:$4 sm:$0x11]   ;;  %v7259_v41 = vunpack.c.l.b16 %v15017_v19 }
 0x4e4   :  { %14226 = vmatprep.subr.bf16.mxu0 %v19991_v0  ;;  %v7258_v52 = vunpack.c.l.b16 %v15016_v37  ;;  %v15019_v37 = vld [vmem:[#allocation2 + $0x28] ss:$0 sps:$4 sm:$0x22]  }
 0x4e5   :  { %v5898_v58 = vrot.slane %v5884_v28, %v15986_v53  ;;  %v5903_v17 = vsel %vm17225_vm15, %v5891_v57, %v5902_v63  ;;  %v6030_v47 = vpop.f32.mrf.mxu1  ;;  %14245 = vmatmul.mubr.msk.bf16.vlgmr.msra.gmra.mxu1 %vm20209_vm6, %v7161_v39  ;;  %v7306_v33 = vrot.slane %v7259_v41, 7  ;;  %vm20217_vm6 = vmmov %vm20207_vm0 }
 0x4e6   :  { %5904 = vst [vmem:[#allocation3 + $0xc] sm:$0x1] %v5903_v17  ;;  %14265 = vmatpush3.bf16.msra.mxu1 %v18385_v51  ;;  %14276 = vmatprep.mubr.msk.bf16.mxu1 %vm20028_vm11, %v19991_v0  ;;  %v7260_v28 = vrot.slane %v7258_v52, 1 }
 0x4e7   :  { %v5906_v13 = vsel %vm17225_vm15, %v5898_v58, %v5905_v50  ;;  %14227 = vmatpush3.bf16.msra.mxu0 %v18452_v59  ;;  %v13990_v45 = vpop.f32.mrf.mxu1  ;;  %14266 = vmatprep.subr.bf16.mxu1 %v19991_v0  ;;  %v7307_v63 = vsel %vm20202_vm5, %v7306_v33, %v7258_v52  ;;  %vm20220_vm5 = vmmov %vm20215_vm10 }
 0x4e8   :  { %5907 = vst [vmem:[#allocation3 + $0x20] sm:$0x1] %v5906_v13  ;;  %14248 = vmatprep.subr.bf16.mxu0 %v19991_v0  ;;  %v7308_v57 = vpack.c.b16 %v7307_v63, %v7307_v63  ;;  %v7261_v50 = vsel %vm20213_vm3, %v7259_v41, %v7260_v28  ;;  %v7361_v63 = vunpack.c.l.b16 %v15019_v37 }
 0x4e9   :  { %v6033_v43 = vpop.f32.mrf.mxu1  ;;  %v7262_v17 = vpack.c.b16 %v7261_v50, %v7261_v50 }
 0x4ea   :  { %v5974_v35 = vpop.f32.mrf.mxu0  ;;  %14229 = vmatmul.mubr.msk.bf16.vlgmr.msra.gmra.mxu0 %vm20211_vm1, %v7089_v31  ;;  %14267 = vmatpush3.bf16.msra.mxu1 %v18397_v18  ;;  %vm20219_vm1 = vmmov %vm20207_vm0 }
 0x4eb   :  { %14249 = vmatpush3.bf16.msra.mxu0 %v18462_v46  ;;  %v13991_v27 = vpop.f32.mrf.mxu1  ;;  %14268 = vmatprep.subr.bf16.mxu1 %v19991_v0  ;;  %v6031_v13 = vadd.f32 %v6030_v47, %v5974_v35  ;;  %v18692_v47 = vld [vmem:[%s19954_s4] ss:$0 sm:$0xff] }
 0x4ec   :  { %v13974_v12 = vpop.f32.mrf.mxu0  ;;  %14250 = vmatprep.subr.bf16.mxu0 %v19991_v0  ;;  %14260 = vmatprep.mubr.msk.bf16.mxu0 %vm20028_vm11, %v19991_v0 }
 0x4ee   :  { %v5977_v25 = vpop.f32.mrf.mxu0  ;;  %14269 = vmatpush3.bf16.msra.mxu1 %v18406_v24 }
 0x4ef   :  { %14251 = vmatpush3.bf16.msra.mxu0 %v18475_v8  ;;  %14270 = vmatprep.subr.bf16.mxu1 %v19991_v0 }
 0x4f0   :  { %v13975_v60 = vpop.f32.mrf.mxu0  ;;  %14252 = vmatprep.subr.bf16.mxu0 %v19991_v0 }
 0x4f1   :  { %v15018_v60 = vld [vmem:[#allocation2 + $0x10] ss:$0 sps:$4 sm:$0x22]  }
 0x4f2   :  { %14271 = vmatpush3.bf16.msra.mxu1 %v18417_v16  ;;  %v7360_v33 = vunpack.c.l.b16 %v15018_v60 }
 0x4f3   :  { %14253 = vmatpush3.bf16.msra.mxu0 %v18488_v36  ;;  %14272 = vmatprep.subr.bf16.mxu1 %v19991_v0 }
 0x4f4   :  { %14254 = vmatprep.subr.bf16.mxu0 %v19991_v0 }
 0x4f6   :  { %14273 = vmatpush3.bf16.msra.mxu1 %v18432_v49 }
 0x4f7   :  { %14255 = vmatpush3.bf16.msra.mxu0 %v18504_v55  ;;  %14274 = vmatprep.subr.bf16.mxu1 %v19991_v0 }
 0x4f8   :  { %14256 = vmatprep.subr.bf16.mxu0 %v19991_v0 }
 0x4fa   :  { %14275 = vmatpush3.bf16.msra.mxu1 %v18452_v59 }
 0x4fb   :  { %14257 = vmatpush3.bf16.msra.mxu0 %v18514_v6  ;;  %14296 = vmatprep.subr.bf16.mxu1 %v19991_v0 }
 0x4fc   :  { %14258 = vmatprep.subr.bf16.mxu0 %v19991_v0 }
 0x4fd   :  { %v18672_v39 = vpop.f32.mrf.mxu1  ;;  %14277 = vmatmul.mubr.msk.bf16.vlgmr.msra.gmra.mxu1 %vm20212_vm9, %v7308_v57  ;;  %vm20221_vm9 = vmmov %vm20207_vm0 }
 0x4fe   :  { %14297 = vmatpush3.bf16.msra.mxu1 %v18462_v46  ;;  %14308 = vmatprep.mubr.msk.bf16.mxu1 %vm20028_vm11, %v19991_v0 }
 0x4ff   :  { %14259 = vmatpush3.bf16.msra.mxu0 %v18529_v29  ;;  %v14022_v58 = vpop.f32.mrf.mxu1  ;;  %14298 = vmatprep.subr.bf16.mxu1 %v19991_v0 }
 0x500   :  { %14280 = vmatprep.subr.bf16.mxu0 %v19991_v0 }
 0x501   :  { %v6205_v45 = vpop.f32.mrf.mxu1 }
 0x502   :  { %v6100_v40 = vpop.f32.mrf.mxu0  ;;  %14261 = vmatmul.mubr.msk.bf16.vlgmr.msra.gmra.mxu0 %vm20214_vm7, %v7262_v17  ;;  %14299 = vmatpush3.bf16.msra.mxu1 %v18475_v8  ;;  %v7362_v17 = vrot.slane %v7360_v33, 2  ;;  %v6145_v45 = vld [vmem:[#allocation3 + $0xc] sm:$0x1]  ;;  %vm20222_vm7 = vmmov %vm20207_vm0 }
 0x503   :  { %v6106_v26 = vadd.f32 %v6100_v40, %v6031_v13  ;;  %14281 = vmatpush3.bf16.msra.mxu0 %v18540_v22  ;;  %v14023_v31 = vpop.f32.mrf.mxu1  ;;  %14300 = vmatprep.subr.bf16.mxu1 %v19991_v0  ;;  %v7363_v13 = vrot.slane %v7361_v63, 1  ;;  %v7479_v40 = vpop.permute.xlu0 %7478 }
 0x504   :  { %v14006_v43 = vpop.f32.mrf.mxu0  ;;  %14282 = vmatprep.subr.bf16.mxu0 %v19991_v0  ;;  %14292 = vmatprep.mubr.msk.bf16.mxu0 %vm20028_vm11, %v19991_v0 }
 0x505   :  { %v6107_v35 = vadd.f32 %v18692_v47, %v6106_v26  ;;  %v7477_v26 = vpop.permute.xlu1 %7476 }
 0x506   :  { %v6103_v27 = vpop.f32.mrf.mxu0  ;;  %14301 = vmatpush3.bf16.msra.mxu1 %v18488_v36 }
 0x507   :  { %v6108_v12 = vmax.f32 %v6107_v35, 0.0  ;;  %14283 = vmatpush3.bf16.msra.mxu0 %v18552_v48  ;;  %14302 = vmatprep.subr.bf16.mxu1 %v19991_v0  ;;  %v7480_v35 = vsel %vm20215_vm10, %v7477_v26, %v7479_v40  ;;  %v6148_v27 = vld [vmem:[#allocation3 + $0x20] sm:$0x1]  ;;  %v7605_v26 = vpop.permute.xlu0 %7604  ;;  %vm20223_vm10 = vmmov %vm20213_vm3 }
 0x508   :  { %v14007_v19 = vpop.f32.mrf.mxu0  ;;  %14284 = vmatprep.subr.bf16.mxu0 %v19991_v0 }
 0x509   :  { %v6109_v25 = vpack.c.bf16 %v6108_v12, %v6108_v12 }
 0x50a   :  { %14303 = vmatpush3.bf16.msra.mxu1 %v18504_v55 }
 0x50b   :  { %v6117_v41 = vrot.slane %v6109_v25, %v15955_v32  ;;  %14285 = vmatpush3.bf16.msra.mxu0 %v18597_v2  ;;  %14304 = vmatprep.subr.bf16.mxu1 %v19991_v0  ;;  %v7364_v25 = vsel %vm20216_vm13, %v7363_v13, %v7362_v17  ;;  %vm20224_vm13 = vmmov %vm20213_vm3 }
 0x50c   :  { %14286 = vmatprep.subr.bf16.mxu0 %v19991_v0  ;;  %v7365_v37 = vpack.c.b16 %v7364_v25, %v7364_v25 }
 0x50d   :  { %v6124_v52 = vrot.slane %v6117_v41, %v15955_v32 }
 0x50e   :  { %14305 = vmatpush3.bf16.msra.mxu1 %v18514_v6 }
 0x50f   :  { %v6126_v28 = vunpack.i.h.s16 %v6124_v52  ;;  %v11785_v57 = vpack.i.b16 %v6124_v52, %v6124_v52  ;;  %14287 = vmatpush3.bf16.msra.mxu0 %v18607_v23  ;;  %14306 = vmatprep.subr.bf16.mxu1 %v19991_v0 }
 0x510   :  { %14288 = vmatprep.subr.bf16.mxu0 %v19991_v0 }
 0x511   :  { %v6128_v50 = vpack.i.b16 %v6126_v28, %v6126_v28  ;;  %v6135_v58 = vrot.slane %v11785_v57, %v15986_v53 }
 0x512   :  { %14307 = vmatpush3.bf16.msra.mxu1 %v18529_v29 }
 0x513   :  { %v6142_v31 = vrot.slane %v6128_v50, %v15986_v53  ;;  %v6146_v43 = vsel %vm15912_vm14, %v6135_v58, %v6145_v45  ;;  %14289 = vmatpush3.bf16.msra.mxu0 %v18617_v38  ;;  %14328 = vmatprep.subr.bf16.mxu1 %v19991_v0 }
 0x514   :  { %6147 = vst [vmem:[#allocation3 + $0xc] sm:$0x1] %v6146_v43  ;;  %14290 = vmatprep.subr.bf16.mxu0 %v19991_v0 }
 0x515   :  { %v6149_v12 = vsel %vm15912_vm14, %v6142_v31, %v6148_v27  ;;  %v6305_v19 = vpop.f32.mrf.mxu1  ;;  %14309 = vmatmul.mubr.msk.bf16.vlgmr.msra.gmra.mxu1 %vm20207_vm0, %v7480_v35  ;;  %v7603_v31 = vpop.permute.xlu1 %7602  ;;  %v6350_v27 = vld [vmem:[#allocation3 + $0xc] sm:$0x2] }
 0x516   :  { %6150 = vst [vmem:[#allocation3 + $0x20] sm:$0x1] %v6149_v12  ;;  %14329 = vmatpush3.bf16.msra.mxu1 %v18540_v22  ;;  %14340 = vmatprep.mubr.msk.bf16.mxu1 %vm20028_vm11, %v19991_v0  ;;  %v7606_v25 = vsel %vm20218_vm12, %v7603_v31, %v7605_v26  ;;  %vm20226_vm12 = vmmov %vm20213_vm3 }
 0x517   :  { %14291 = vmatpush3.bf16.msra.mxu0 %v18627_v3  ;;  %v14054_v60 = vpop.f32.mrf.mxu1  ;;  %14330 = vmatprep.subr.bf16.mxu1 %v19991_v0 }
 0x518   :  { %14312 = vmatprep.subr.bf16.mxu0 %v19991_v0  ;;  %v6353_v60 = vld [vmem:[#allocation3 + $0x20] sm:$0x2] }
 0x519   :  { %v6308_v41 = vpop.f32.mrf.mxu1 }
 0x51a   :  { %v6249_v52 = vpop.f32.mrf.mxu0  ;;  %14293 = vmatmul.mubr.msk.bf16.vlgmr.msra.gmra.mxu0 %vm20217_vm6, %v7365_v37  ;;  %14331 = vmatpush3.bf16.msra.mxu1 %v18552_v48  ;;  %vm20225_vm6 = vmmov %vm20220_vm5 }
 0x51b   :  { %v6250_v33 = vadd.f32 %v6249_v52, %v18672_v39  ;;  %14313 = vmatpush3.bf16.msra.mxu0 %v18385_v51  ;;  %v14055_v63 = vpop.f32.mrf.mxu1  ;;  %14332 = vmatprep.subr.bf16.mxu1 %v19991_v0 }
 0x51c   :  { %v14038_v28 = vpop.f32.mrf.mxu0  ;;  %14314 = vmatprep.subr.bf16.mxu0 %v19991_v0  ;;  %14324 = vmatprep.mubr.msk.bf16.mxu0 %vm20028_vm11, %v19991_v0  ;;  %v7531_v63 = vpop.permute.xlu1 %7530 }
 0x51d   :  { %v6311_v57 = vadd.f32 %v6305_v19, %v6250_v33  ;;  %v7533_v33 = vpop.permute.xlu0 %7532 }
 0x51e   :  { %v6252_v50 = vpop.f32.mrf.mxu0  ;;  %14333 = vmatpush3.bf16.msra.mxu1 %v18597_v2 }
 0x51f   :  { %v6312_v58 = vadd.f32 %v18692_v47, %v6311_v57  ;;  %14315 = vmatpush3.bf16.msra.mxu0 %v18397_v18  ;;  %14334 = vmatprep.subr.bf16.mxu1 %v19991_v0  ;;  %v7534_v50 = vsel %vm20220_vm5, %v7531_v63, %v7533_v33  ;;  %vm20228_vm5 = vmmov %vm20207_vm0 }
 0x520   :  { %v14039_v39 = vpop.f32.mrf.mxu0  ;;  %14316 = vmatprep.subr.bf16.mxu0 %v19991_v0 }
 0x521   :  { %v6313_v17 = vmax.f32 %v6312_v58, 0.0 }
 0x522   :  { %14335 = vmatpush3.bf16.msra.mxu1 %v18607_v23 }
 0x523   :  { %v6314_v13 = vpack.c.bf16 %v6313_v17, %v6313_v17  ;;  %14317 = vmatpush3.bf16.msra.mxu0 %v18406_v24  ;;  %14336 = vmatprep.subr.bf16.mxu1 %v19991_v0 }
 0x524   :  { %14318 = vmatprep.subr.bf16.mxu0 %v19991_v0 }
 0x525   :  { %v6322_v45 = vrot.slane %v6314_v13, %v15955_v32  ;;  %v15021_v13 = vld [vmem:[#allocation2 + $0x2c] ss:$0 sps:$4 sm:$0x11]  }
 0x526   :  { %14337 = vmatpush3.bf16.msra.mxu1 %v18617_v38 }
 0x527   :  { %v6329_v40 = vrot.slane %v6322_v45, %v15955_v32  ;;  %14319 = vmatpush3.bf16.msra.mxu0 %v18417_v16  ;;  %14338 = vmatprep.subr.bf16.mxu1 %v19991_v0 }
 0x528   :  { %14320 = vmatprep.subr.bf16.mxu0 %v19991_v0 }
 0x529   :  { %v6331_v43 = vunpack.i.h.s16 %v6329_v40  ;;  %v11793_v35 = vpack.i.b16 %v6329_v40, %v6329_v40  ;;  %v7704_v40 = vunpack.c.l.b16 %v15021_v13  ;;  %v15032_v13 = vld [vmem:[#allocation2 + $0x2c] ss:$0 sps:$4 sm:$0x22]  }
 0x52a   :  { %14339 = vmatpush3.bf16.msra.mxu1 %v18627_v3 }
 0x52b   :  { %v6333_v12 = vpack.i.b16 %v6331_v43, %v6331_v43  ;;  %v6340_v19 = vrot.slane %v11793_v35, %v15986_v53  ;;  %14321 = vmatpush3.bf16.msra.mxu0 %v18432_v49  ;;  %14360 = vmatprep.subr.bf16.mxu1 %v19991_v0  ;;  %v7751_v31 = vrot.slane %v7704_v40, 7  ;;  %v18811_v43 = vld [vmem:[%s19955_s5 + $0x30] sm:$0xff]  }
 0x52c   :  { %14322 = vmatprep.subr.bf16.mxu0 %v19991_v0 }
 0x52d   :  { %v6347_v37 = vrot.slane %v6333_v12, %v15986_v53  ;;  %v6351_v41 = vsel %vm17581_vm2, %v6340_v19, %v6350_v27  ;;  %v18760_v52 = vpop.f32.mrf.mxu1  ;;  %14341 = vmatmul.mubr.msk.bf16.vlgmr.msra.gmra.mxu1 %vm20219_vm1, %v7606_v25  ;;  %v18818_v27 = vld [vmem:[#allocation3 + $0x14] ss:$0 sps:$4 sm:$0x11]   ;;  %vm20227_vm1 = vmmov %vm20213_vm3 }
 0x52e   :  { %6352 = vst [vmem:[#allocation3 + $0xc] sm:$0x2] %v6351_v41  ;;  %14361 = vmatpush3.bf16.msra.mxu1 %v18385_v51  ;;  %14372 = vmatprep.mubr.msk.bf16.mxu1 %vm20028_vm11, %v19991_v0 }
 0x52f   :  { %v6354_v28 = vsel %vm17581_vm2, %v6347_v37, %v6353_v60  ;;  %14323 = vmatpush3.bf16.msra.mxu0 %v18452_v59  ;;  %v14086_v57 = vpop.f32.mrf.mxu1  ;;  %14362 = vmatprep.subr.bf16.mxu1 %v19991_v0 }
 0x530   :  { %6355 = vst [vmem:[#allocation3 + $0x20] sm:$0x2] %v6354_v28  ;;  %14344 = vmatprep.subr.bf16.mxu0 %v19991_v0 }
 0x531   :  { %v6481_v58 = vpop.f32.mrf.mxu1 }
 0x532   :  { %v6422_v39 = vpop.f32.mrf.mxu0  ;;  %14325 = vmatmul.mubr.msk.bf16.vlgmr.msra.gmra.mxu0 %vm20221_vm9, %v7534_v50  ;;  %14363 = vmatpush3.bf16.msra.mxu1 %v18397_v18  ;;  %vm20230_vm9 = vmmov %vm20225_vm6 }
 0x533   :  { %14345 = vmatpush3.bf16.msra.mxu0 %v18462_v46  ;;  %v14087_v51 = vpop.f32.mrf.mxu1  ;;  %14364 = vmatprep.subr.bf16.mxu1 %v19991_v0  ;;  %v15020_v46 = vld [vmem:[#allocation2 + $0x14] ss:$0 sps:$4 sm:$0x11]   ;;  %v6479_v19 = vadd.f32 %v18760_v52, %v6422_v39  ;;  %v8120_v52 = vunpack.c.l.b16 %v18818_v27  ;;  %v18876_v27 = vld [vmem:[%s19955_s5 + $0x8] sm:$0xff]  }
 0x534   :  { %v14070_v17 = vpop.f32.mrf.mxu0  ;;  %14346 = vmatprep.subr.bf16.mxu0 %v19991_v0  ;;  %14356 = vmatprep.mubr.msk.bf16.mxu0 %vm20028_vm11, %v19991_v0  ;;  %v7703_v26 = vunpack.c.l.b16 %v15020_v46 }
 0x535   :  { %v15031_v17 = vld [vmem:[#allocation2 + $0x14] ss:$0 sps:$4 sm:$0x22]  }
 0x536   :  { %v6425_v45 = vpop.f32.mrf.mxu0  ;;  %14365 = vmatpush3.bf16.msra.mxu1 %v18406_v24  ;;  %v7752_v24 = vsel %vm20213_vm3, %v7751_v31, %v7703_v26  ;;  %v18864_v31 = vld [vmem:[%s19955_s5 + $0x10] sm:$0xff]   ;;  %vm20232_vm3 = vmmov %vm20227_vm1 }
 0x537   :  { %14347 = vmatpush3.bf16.msra.mxu0 %v18475_v8  ;;  %14366 = vmatprep.subr.bf16.mxu1 %v19991_v0  ;;  %v7705_v8 = vrot.slane %v7703_v26, 1  ;;  %v18852_v45 = vld [vmem:[%s19955_s5 + $0x18] sm:$0xff]   ;;  %v7806_v26 = vunpack.c.l.b16 %v15032_v13  ;;  %v18921_v13 = vld [vmem:[%s19955_s5 + $0x50] sm:$0xff]  }
 0x538   :  { %v14071_v18 = vpop.f32.mrf.mxu0  ;;  %14348 = vmatprep.subr.bf16.mxu0 %v19991_v0 }
 0x53a   :  { %14367 = vmatpush3.bf16.msra.mxu1 %v18417_v16  ;;  %v18796_v16 = vld [vmem:[%s19955_s5 + $0x38] sm:$0xff]  }
 0x53b   :  { %14349 = vmatpush3.bf16.msra.mxu0 %v18488_v36  ;;  %14368 = vmatprep.subr.bf16.mxu1 %v19991_v0  ;;  %v7753_v36 = vpack.c.b16 %v7752_v24, %v7752_v24 }
 0x53c   :  { %14350 = vmatprep.subr.bf16.mxu0 %v19991_v0 }
 0x53e   :  { %14369 = vmatpush3.bf16.msra.mxu1 %v18432_v49  ;;  %v18801_v49 = vld [vmem:[#allocation3] ss:$0 sps:$4 sm:$0x11]  }
 0x53f   :  { %14351 = vmatpush3.bf16.msra.mxu0 %v18504_v55  ;;  %14370 = vmatprep.subr.bf16.mxu1 %v19991_v0  ;;  %v8119_v12 = vunpack.c.l.b16 %v18801_v49 }
 0x540   :  { %14352 = vmatprep.subr.bf16.mxu0 %v19991_v0 }
 0x541   :  { %v8121_v63 = vrot.slane %v8119_v12, 1 }
 0x542   :  { %14371 = vmatpush3.bf16.msra.mxu1 %v18452_v59  ;;  %v7706_v59 = vsel %vm20223_vm10, %v7704_v40, %v7705_v8  ;;  %v7805_v40 = vunpack.c.l.b16 %v15031_v17  ;;  %vm20235_vm10 = vmmov %vm20227_vm1 }
 0x543   :  { %14353 = vmatpush3.bf16.msra.mxu0 %v18514_v6  ;;  %14392 = vmatprep.subr.bf16.mxu1 %v19991_v0  ;;  %v7707_v35 = vpack.c.b16 %v7706_v59, %v7706_v59  ;;  %v8122_v39 = vsel %vm20224_vm13, %v8120_v52, %v8121_v63 }
 0x544   :  { %14354 = vmatprep.subr.bf16.mxu0 %v19991_v0  ;;  %v7807_v59 = vrot.slane %v7805_v40, 2 }
 0x545   :  { %v18803_v55 = vpop.f32.mrf.mxu1  ;;  %14373 = vmatmul.mubr.msk.bf16.vlgmr.msra.gmra.mxu1 %vm20222_vm7, %v7753_v36  ;;  %vm20234_vm7 = vmmov %vm20227_vm1 }
 0x546   :  { %14393 = vmatpush3.bf16.msra.mxu1 %v18796_v16  ;;  %14400 = vmatprep.mubr.msk.bf16.mxu1 %vm20028_vm11, %v19991_v0 }
 0x547   :  { %14355 = vmatpush3.bf16.msra.mxu0 %v18529_v29  ;;  %v14118_v6 = vpop.f32.mrf.mxu1  ;;  %14394 = vmatprep.subr.bf16.mxu1 %v19991_v0  ;;  %v18827_v29 = vld [vmem:[%s19955_s5 + $0x28] sm:$0xff]  }
 0x548   :  { %14376 = vmatprep.subr.bf16.mxu0 %v19991_v0  ;;  %v7808_v6 = vrot.slane %v7806_v26, 1  ;;  %v18932_v26 = vld [vmem:[#allocation3 + $0x20] ss:$0 sps:$4 sm:$0x22]  }
 0x549   :  { %v6653_v25 = vpop.f32.mrf.mxu1  ;;  %20231 = vst [vmem:[#allocation12_spill] sm:$0xff] %v18932_v26 }
 0x54a   :  { %v6548_v60 = vpop.f32.mrf.mxu0  ;;  %14357 = vmatmul.mubr.msk.bf16.vlgmr.msra.gmra.mxu0 %vm20207_vm0, %v7707_v35  ;;  %14395 = vmatpush3.bf16.msra.mxu1 %v18811_v43  ;;  %v6593_v35 = vld [vmem:[#allocation3 + $0xc] sm:$0x2]  ;;  %v6596_v25 = vld [vmem:[#allocation3 + $0x20] sm:$0x2]  ;;  %vm20236_vm0 = vmmov %vm20225_vm6 }
 0x54b   :  { %v6554_v37 = vadd.f32 %v6548_v60, %v6479_v19  ;;  %14377 = vmatpush3.bf16.msra.mxu0 %v18540_v22  ;;  %v14119_v41 = vpop.f32.mrf.mxu1  ;;  %14396 = vmatprep.subr.bf16.mxu1 %v19991_v0  ;;  %v18842_v22 = vld [vmem:[%s19955_s5 + $0x20] sm:$0xff]   ;;  %v8192_v60 = vrot.slane %v8120_v52, 7  ;;  %v18898_v52 = vld [vmem:[%s19955_s5 + $0x58] sm:$0xff]   ;;  %vm20237_vm13 = vmmov %vm20236_vm0 }
 0x54c   :  { %v14102_v33 = vpop.f32.mrf.mxu0  ;;  %14378 = vmatprep.subr.bf16.mxu0 %v19991_v0  ;;  %14388 = vmatprep.mubr.msk.bf16.mxu0 %vm20028_vm11, %v19991_v0 }
 0x54d   :  { %v6555_v28 = vadd.f32 %v18692_v47, %v6554_v37  ;;  %v7809_v33 = vsel %vm20226_vm12, %v7808_v6, %v7807_v59  ;;  %v18949_v59 = vld [vmem:[%s19955_s5 + $0x48] sm:$0xff]   ;;  %vm20239_vm12 = vmmov %vm20227_vm1 }
 0x54e   :  { %v6551_v57 = vpop.f32.mrf.mxu0  ;;  %14397 = vmatpush3.bf16.msra.mxu1 %v18827_v29 }
 0x54f   :  { %v6556_v50 = vmax.f32 %v6555_v28, 0.0  ;;  %14379 = vmatpush3.bf16.msra.mxu0 %v18552_v48  ;;  %14398 = vmatprep.subr.bf16.mxu1 %v19991_v0  ;;  %v8123_v48 = vpack.c.b16 %v8122_v39, %v8122_v39  ;;  %v7810_v28 = vpack.c.b16 %v7809_v33, %v7809_v33  ;;  %v8193_v57 = vsel %vm20227_vm1, %v8192_v60, %v8119_v12  ;;  %v18965_v33 = vld [vmem:[%s19955_s5 + $0x68] sm:$0xff]  }
 0x550   :  { %v14103_v58 = vpop.f32.mrf.mxu0  ;;  %14380 = vmatprep.subr.bf16.mxu0 %v19991_v0  ;;  %v8194_v12 = vpack.c.b16 %v8193_v57, %v8193_v57  ;;  %v18972_v57 = vld [vmem:[%s19955_s5 + $0x40] sm:$0xff]  }
 0x551   :  { %v6557_v51 = vpack.c.bf16 %v6556_v50, %v6556_v50  ;;  %v18904_v58 = vld [vmem:[#allocation3 + $0x14] ss:$0 sps:$4 sm:$0x22]  }
 0x552   :  { %14399 = vmatpush3.bf16.msra.mxu1 %v18842_v22  ;;  %v19983_v40 = vunpack.c.l.b16 %v18904_v58 }
 0x553   :  { %v6565_v18 = vrot.slane %v6557_v51, %v15955_v32  ;;  %14381 = vmatpush3.bf16.msra.mxu0 %v18597_v2  ;;  %14404 = vmatprep.subr.bf16.mxu1 %v19991_v0  ;;  %v18913_v51 = vld [vmem:[#allocation3] ss:$0 sps:$4 sm:$0x22]  }
 0x554   :  { %14382 = vmatprep.subr.bf16.mxu0 %v19991_v0  ;;  %v19982_v6 = vunpack.c.l.b16 %v18913_v51  ;;  %v8273_v60 = vrot.slane %v19983_v40, 1 }
 0x555   :  { %v6572_v46 = vrot.slane %v6565_v18, %v15955_v32  ;;  %14401 = vmatmul.mubr.msk.bf16.vlgmr.msra.gmra.mxu1 %vm20225_vm6, %v8123_v48  ;;  %v18923_v18 = vld [vmem:[#allocation3 + $0xc] ss:$0 sps:$4 sm:$0x22]   ;;  %vm20238_vm6 = vmmov %vm20227_vm1 }
 0x556   :  { %14405 = vmatpush3.bf16.msra.mxu1 %v18852_v45  ;;  %14412 = vmatprep.mubr.msk.bf16.mxu1 %vm20028_vm11, %v19991_v0  ;;  %20229 = vst [vmem:[#allocation11_spill] sm:$0xff] %v18923_v18  ;;  %vm20240_vm1 = vmmov %vm20236_vm0 }
 0x557   :  { %v6574_v2 = vunpack.i.h.s16 %v6572_v46  ;;  %v11805_v24 = vpack.i.b16 %v6572_v46, %v6572_v46  ;;  %14383 = vmatpush3.bf16.msra.mxu0 %v18607_v23  ;;  %14406 = vmatprep.subr.bf16.mxu1 %v19991_v0 }
 0x558   :  { %14384 = vmatprep.subr.bf16.mxu0 %v19991_v0 }
 0x559   :  { %v6576_v8 = vpack.i.b16 %v6574_v2, %v6574_v2  ;;  %v6583_v36 = vrot.slane %v11805_v24, %v15986_v53  ;;  %v19978_v2 = vunpack.c.l.b16 %v18923_v18 }
 0x55a   :  { %14407 = vmatpush3.bf16.msra.mxu1 %v18864_v31 }
 0x55b   :  { %v6590_v19 = vrot.slane %v6576_v8, %v15986_v53  ;;  %v6594_v23 = vsel %vm17648_vm8, %v6583_v36, %v6593_v35  ;;  %14385 = vmatpush3.bf16.msra.mxu0 %v18617_v38  ;;  %14408 = vmatprep.subr.bf16.mxu1 %v19991_v0  ;;  %v18891_v38 = vld [vmem:[%s19955_s5] sm:$0xff]   ;;  %v18939_v8 = vld [vmem:[%s19955_s5 + $0x70] sm:$0xff]   ;;  %v19979_v35 = vunpack.c.l.b16 %v18932_v26 }
 0x55c   :  { %6595 = vst [vmem:[#allocation3 + $0xc] sm:$0x2] %v6594_v23  ;;  %14386 = vmatprep.subr.bf16.mxu0 %v19991_v0 }
 0x55d   :  { %v6597_v37 = vsel %vm17648_vm8, %v6590_v19, %v6596_v25  ;;  %v6753_v41 = vpop.f32.mrf.mxu1 }
 0x55e   :  { %6598 = vst [vmem:[#allocation3 + $0x20] sm:$0x2] %v6597_v37  ;;  %14409 = vmatpush3.bf16.msra.mxu1 %v18876_v27  ;;  %v10603_v37 = vrot.slane %v19978_v2, 3  ;;  %v19131_v2 = vld [vmem:[%s19955_s5 + $0xc0] sm:$0xff]  }
 0x55f   :  { %14387 = vmatpush3.bf16.msra.mxu0 %v18627_v3  ;;  %v14150_v63 = vpop.f32.mrf.mxu1  ;;  %14410 = vmatprep.subr.bf16.mxu1 %v19991_v0  ;;  %v18911_v3 = vld [vmem:[%s19955_s5 + $0x78] sm:$0xff]  }
 0x560   :  { %14416 = vmatprep.subr.bf16.mxu0 %v19991_v0  ;;  %v15045_v63 = vld [vmem:[#allocation3 + $0x4] ss:$0 sps:$4 sm:$0x11]  }
 0x561   :  { %v6756_v50 = vpop.f32.mrf.mxu1 }
 0x562   :  { %v6697_v39 = vpop.f32.mrf.mxu0  ;;  %14389 = vmatmul.mubr.msk.bf16.vlgmr.msra.gmra.mxu0 %vm20228_vm5, %v7810_v28  ;;  %14411 = vmatpush3.bf16.msra.mxu1 %v18891_v38  ;;  %v8272_v50 = vrot.slane %v19982_v6, 2  ;;  %vm20241_vm5 = vmmov %vm20236_vm0  ;;  %v19141_v6 = vld [vmem:[%s19955_s5 + $0xe0] sm:$0xff]  }
 0x563   :  { %v6698_v17 = vadd.f32 %v6697_v39, %v18803_v55  ;;  %14417 = vmatpush3.bf16.msra.mxu0 %v18898_v52  ;;  %v14151_v49 = vpop.f32.mrf.mxu1  ;;  %14428 = vmatprep.subr.bf16.mxu1 %v19991_v0  ;;  %v18928_v55 = vld [vmem:[#allocation3 + $0x18] ss:$0 sps:$4 sm:$0x11]  }
 0x564   :  { %v14134_v48 = vpop.f32.mrf.mxu0  ;;  %14418 = vmatprep.subr.bf16.mxu0 %v19991_v0  ;;  %14424 = vmatprep.mubr.msk.bf16.mxu0 %vm20028_vm11, %v19991_v0  ;;  %v8353_v23 = vunpack.c.l.b16 %v18928_v55 }
 0x565   :  { %v6759_v46 = vadd.f32 %v6753_v41, %v6698_v17  ;;  %14413 = vmatmul.mubr.msk.bf16.vlgmr.msra.gmra.mxu1 %vm20230_vm9, %v8194_v12  ;;  %v10604_v41 = vrot.slane %v19979_v35, 2  ;;  %v8274_v12 = vsel %vm20234_vm7, %v8273_v60, %v8272_v50  ;;  %v18988_v48 = vld [vmem:[%s19955_s5 + $0x60] sm:$0xff]   ;;  %vm20242_vm9 = vmmov %vm20232_vm3 }
 0x566   :  { %v6700_v24 = vpop.f32.mrf.mxu0  ;;  %14429 = vmatpush3.bf16.msra.mxu1 %v18911_v3  ;;  %14436 = vmatprep.mubr.msk.bf16.mxu1 %vm20028_vm11, %v19991_v0  ;;  %v8354_v17 = vrot.slane %v8353_v23, 7  ;;  %vm20244_vm7 = vmmov %vm20236_vm0 }
 0x567   :  { %v6760_v36 = vadd.f32 %v18692_v47, %v6759_v46  ;;  %14419 = vmatpush3.bf16.msra.mxu0 %v18921_v13  ;;  %14430 = vmatprep.subr.bf16.mxu1 %v19991_v0  ;;  %v18977_v39 = vsel %vm20232_vm3, %v10604_v41, %v10603_v37  ;;  %v8352_v46 = vunpack.c.l.b16 %v15045_v63  ;;  %v6798_v41 = vld [vmem:[#allocation3 + $0xc] sm:$0x4] }
 0x568   :  { %v14135_v19 = vpop.f32.mrf.mxu0  ;;  %14420 = vmatprep.subr.bf16.mxu0 %v19991_v0  ;;  %20233 = vst [vmem:[#allocation13_spill] sm:$0xff] %v18977_v39  ;;  %v19008_v63 = vld [vmem:[%s19955_s5 + $0xb8] sm:$0xff]  }
 0x569   :  { %v6761_v25 = vmax.f32 %v6760_v36, 0.0  ;;  %v18996_v36 = vld [vmem:[%s19955_s5 + $0x98] sm:$0xff]   ;;  %v18998_v19 = vpack.c.b16 %v8274_v12, %v8274_v12  ;;  %v6801_v12 = vld [vmem:[#allocation3 + $0x20] sm:$0x4] }
 0x56a   :  { %14431 = vmatpush3.bf16.msra.mxu1 %v18939_v8 }
 0x56b   :  { %v6762_v28 = vpack.c.bf16 %v6761_v25, %v6761_v25  ;;  %14421 = vmatpush3.bf16.msra.mxu0 %v18949_v59  ;;  %14432 = vmatprep.subr.bf16.mxu1 %v19991_v0  ;;  %v8355_v25 = vsel %vm20235_vm10, %v8354_v17, %v8352_v46  ;;  %v19016_v17 = vld [vmem:[%s19955_s5 + $0x90] sm:$0xff]   ;;  %vm20245_vm10 = vmmov %vm20236_vm0 }
 0x56c   :  { %14422 = vmatprep.subr.bf16.mxu0 %v19991_v0 }
 0x56d   :  { %v6770_v49 = vrot.slane %v6762_v28, %v15955_v32 }
 0x56e   :  { %14433 = vmatpush3.bf16.msra.mxu1 %v18965_v33 }
 0x56f   :  { %v6777_v24 = vrot.slane %v6770_v49, %v15955_v32  ;;  %14423 = vmatpush3.bf16.msra.mxu0 %v18972_v57  ;;  %14434 = vmatprep.subr.bf16.mxu1 %v19991_v0  ;;  %v8356_v49 = vpack.c.b16 %v8355_v25, %v8355_v25  ;;  %v19031_v25 = vld [vmem:[%s19955_s5 + $0xb0] sm:$0xff]  }
 0x570   :  { %14440 = vmatprep.subr.bf16.mxu0 %v19991_v0 }
 0x571   :  { %v6779_v60 = vunpack.i.h.s16 %v6777_v24  ;;  %v11813_v37 = vpack.i.b16 %v6777_v24, %v6777_v24 }
 0x572   :  { %14425 = vmatmul.mubr.msk.bf16.vlgmr.msra.gmra.mxu0 %vm20236_vm0, %v18998_v19  ;;  %14435 = vmatpush3.bf16.msra.mxu1 %v18988_v48  ;;  %vm20249_vm0 = vmmov %vm20232_vm3 }
 0x573   :  { %v6781_v28 = vpack.i.b16 %v6779_v60, %v6779_v60  ;;  %v6788_v50 = vrot.slane %v11813_v37, %v15986_v53  ;;  %14441 = vmatpush3.bf16.msra.mxu0 %v18996_v36  ;;  %14452 = vmatprep.subr.bf16.mxu1 %v19991_v0 }
 0x574   :  { %14442 = vmatprep.subr.bf16.mxu0 %v19991_v0  ;;  %14448 = vmatprep.mubr.msk.bf16.mxu0 %vm20028_vm11, %v19991_v0 }
 0x575   :  { %v6795_v24 = vrot.slane %v6781_v28, %v15986_v53  ;;  %v6799_v60 = vsel %vm17738_vm4, %v6788_v50, %v6798_v41  ;;  %v19024_v37 = vpop.f32.mrf.mxu1  ;;  %14437 = vmatmul.mubr.msk.bf16.vlgmr.msra.gmra.mxu1 %vm20237_vm13, %v8356_v49  ;;  %v19042_v50 = vld [vmem:[%s19955_s5 + $0x88] sm:$0xff]   ;;  %vm20251_vm13 = vmmov %vm20249_vm0 }
 0x576   :  { %6800 = vst [vmem:[#allocation3 + $0xc] sm:$0x4] %v6799_v60  ;;  %14453 = vmatpush3.bf16.msra.mxu1 %v19008_v63  ;;  %14460 = vmatprep.mubr.msk.bf16.mxu1 %vm20028_vm11, %v19991_v0  ;;  %v8425_v60 = vrot.slane %v8352_v46, 1 }
 0x577   :  { %v6802_v28 = vsel %vm17738_vm4, %v6795_v24, %v6801_v12  ;;  %14443 = vmatpush3.bf16.msra.mxu0 %v19016_v17  ;;  %v14182_v41 = vpop.f32.mrf.mxu1  ;;  %14454 = vmatprep.subr.bf16.mxu1 %v19991_v0  ;;  %v19051_v12 = vld [vmem:[%s19955_s5 + $0xa8] sm:$0xff]  }
 0x578   :  { %6803 = vst [vmem:[#allocation3 + $0x20] sm:$0x4] %v6802_v28  ;;  %14444 = vmatprep.subr.bf16.mxu0 %v19991_v0  ;;  %v19058_v28 = vld [vmem:[%s19955_s5 + $0x80] sm:$0xff]   ;;  %v8507_v41 = vrot.slane %v8505_v4, 1 }
 0x579   :  { %v6903_v49 = vpop.f32.mrf.mxu1 }
 0x57a   :  { %v19045_v15 = vpop.f32.mrf.mxu0  ;;  %14455 = vmatpush3.bf16.msra.mxu1 %v19031_v25  ;;  %v8426_v49 = vsel %vm20238_vm6, %v8353_v23, %v8425_v60  ;;  %v15064_v23 = vld [vmem:[#allocation3 + $0x1c] ss:$0 sps:$4 sm:$0x11]   ;;  %v19097_v60 = vld [vmem:[%s19955_s5 + $0xd0] sm:$0xff]   ;;  %vm20252_vm6 = vmmov %vm20240_vm1 }
 0x57b   :  { %14445 = vmatpush3.bf16.msra.mxu0 %v19042_v50  ;;  %v14183_v24 = vpop.f32.mrf.mxu1  ;;  %14456 = vmatprep.subr.bf16.mxu1 %v19991_v0  ;;  %v8427_v4 = vpack.c.b16 %v8426_v49, %v8426_v49  ;;  %v8587_v49 = vunpack.c.l.b16 %v15064_v23  ;;  %v19124_v23 = vld [vmem:[%s19955_s5 + $0xe8] sm:$0xff]  }
 0x57c   :  { %v14166_v46 = vpop.f32.mrf.mxu0  ;;  %14446 = vmatprep.subr.bf16.mxu0 %v19991_v0  ;;  %v19070_v24 = vld [vmem:[%s19955_s5 + $0xa0] sm:$0xff]  }
 0x57d   :  { %v8506_v46 = vrot.slane %v8504_v61, 2 }
 0x57e   :  { %v6857_v14 = vpop.f32.mrf.mxu0  ;;  %14457 = vmatpush3.bf16.msra.mxu1 %v19051_v12 }
 0x57f   :  { %14447 = vmatpush3.bf16.msra.mxu0 %v19058_v28  ;;  %14458 = vmatprep.subr.bf16.mxu1 %v19991_v0  ;;  %v8508_v55 = vsel %vm20239_vm12, %v8507_v41, %v8506_v46  ;;  %v15063_v41 = vld [vmem:[#allocation3 + $0x8] ss:$0 sps:$4 sm:$0x11]   ;;  %v19108_v46 = vld [vmem:[%s19955_s5 + $0xf0] sm:$0xff]   ;;  %vm20253_vm12 = vmmov %vm20240_vm1 }
 0x580   :  { %v14167_v14 = vpop.f32.mrf.mxu0  ;;  %14464 = vmatprep.subr.bf16.mxu0 %v19991_v0  ;;  %v19091_v61 = vpack.c.b16 %v8508_v55, %v8508_v55  ;;  %v8588_v55 = vrot.slane %v8587_v49, 7 }
 0x581   :  { %v19117_v14 = vld [vmem:[%s19955_s5 + $0xc8] sm:$0xff]  }
 0x582   :  { %14449 = vmatmul.mubr.msk.bf16.vlgmr.msra.gmra.mxu0 %vm20240_vm1, %v8427_v4  ;;  %14459 = vmatpush3.bf16.msra.mxu1 %v19070_v24  ;;  %v8586_v4 = vunpack.c.l.b16 %v15063_v41 }
 0x583   :  { %14465 = vmatpush3.bf16.msra.mxu0 %v19079_v44  ;;  %14476 = vmatprep.subr.bf16.mxu1 %v19991_v0 }
 0x584   :  { %14466 = vmatprep.subr.bf16.mxu0 %v19991_v0  ;;  %14472 = vmatprep.mubr.msk.bf16.mxu0 %vm20028_vm11, %v19991_v0  ;;  %v8659_v41 = vrot.slane %v8586_v4, 1  ;;  %v8589_v1 = vsel %vm20242_vm9, %v8588_v55, %v8586_v4  ;;  %v6901_v55 = vadd.f32 %v19024_v37, %v19045_v15  ;;  %v19182_v37 = vld [vmem:[%s19955_s5 + $0x108] sm:$0xff]   ;;  %vm20256_vm9 = vmmov %vm20240_vm1 }
 0x585   :  { %14461 = vmatmul.mubr.msk.bf16.vlgmr.msra.gmra.mxu1 %vm20241_vm5, %v19091_v61  ;;  %v19150_v20 = vpack.c.b16 %v8589_v1, %v8589_v1  ;;  %vm20255_vm5 = vmmov %vm20240_vm1 }
 0x586   :  { %14477 = vmatpush3.bf16.msra.mxu1 %v19088_v21  ;;  %14484 = vmatprep.mubr.msk.bf16.mxu1 %vm20028_vm11, %v19991_v0  ;;  %v8660_v4 = vsel %vm20232_vm3, %v8587_v49, %v8659_v41  ;;  %v19166_v49 = vld [vmem:[%s19955_s5 + $0x110] sm:$0xff]   ;;  %vm20258_vm3 = vmmov %vm20249_vm0 }
 0x587   :  { %14467 = vmatpush3.bf16.msra.mxu0 %v19097_v60  ;;  %14478 = vmatprep.subr.bf16.mxu1 %v19991_v0  ;;  %20243 = vst [vmem:[#allocation14_spill] sm:$0xff] %v19150_v20  ;;  %v19160_v1 = vpack.c.b16 %v8660_v4, %v8660_v4 }
 0x588   :  { %14468 = vmatprep.subr.bf16.mxu0 %v19991_v0 }
 0x58a   :  { %14479 = vmatpush3.bf16.msra.mxu1 %v19108_v46 }
 0x58b   :  { %14469 = vmatpush3.bf16.msra.mxu0 %v19117_v14  ;;  %14480 = vmatprep.subr.bf16.mxu1 %v19991_v0 }
 0x58c   :  { %14470 = vmatprep.subr.bf16.mxu0 %v19991_v0 }
 0x58d   :  { %v19134_v35 = vpop.f32.mrf.mxu1 }
 0x58e   :  { %14481 = vmatpush3.bf16.msra.mxu1 %v19124_v23 }
 0x58f   :  { %14471 = vmatpush3.bf16.msra.mxu0 %v19131_v2  ;;  %v14214_v40 = vpop.f32.mrf.mxu1  ;;  %14482 = vmatprep.subr.bf16.mxu1 %v19991_v0 }
 0x590   :  { %14488 = vmatprep.subr.bf16.mxu0 %v19991_v0 }
 0x591   :  { %v7076_v10 = vpop.f32.mrf.mxu1 }
 0x592   :  { %v6957_v39 = vpop.f32.mrf.mxu0  ;;  %14473 = vmatmul.mubr.msk.bf16.vlgmr.msra.gmra.mxu0 %vm20244_vm7, %v19150_v20  ;;  %14483 = vmatpush3.bf16.msra.mxu1 %v19141_v6  ;;  %vm20259_vm7 = vmmov %vm20240_vm1 }
 0x593   :  { %v6963_v40 = vadd.f32 %v6957_v39, %v6901_v55  ;;  %14489 = vmatpush3.bf16.msra.mxu0 %v19148_v5  ;;  %v14215_v18 = vpop.f32.mrf.mxu1  ;;  %14500 = vmatprep.subr.bf16.mxu1 %v19991_v0  ;;  %v20246_v55 = vunpack.c.l.b16 %v18479_v62  ;;  %v20248_v62 = vunpack.c.l.b16 %v18904_v58 }
 0x594   :  { %v14198_v10 = vpop.f32.mrf.mxu0  ;;  %14490 = vmatprep.subr.bf16.mxu0 %v19991_v0  ;;  %14496 = vmatprep.mubr.msk.bf16.mxu0 %vm20028_vm11, %v19991_v0 }
 0x595   :  { %v6964_v15 = vadd.f32 %v18692_v47, %v6963_v40  ;;  %14485 = vmatmul.mubr.msk.bf16.vlgmr.msra.gmra.mxu1 %vm20245_vm10, %v19160_v1  ;;  %v19194_v10 = vld [vmem:[%s19955_s5 + $0x100] sm:$0xff]   ;;  %vm20260_vm10 = vmmov %vm20240_vm1 }
 0x596   :  { %v6960_v18 = vpop.f32.mrf.mxu0  ;;  %14501 = vmatpush3.bf16.msra.mxu1 %v18796_v16  ;;  %14508 = vmatprep.mubr.msk.bf16.mxu1 %vm20028_vm11, %v19991_v0  ;;  %v8741_v16 = vrot.slane %v20246_v55, 1 }
 0x597   :  { %v6965_v39 = vmax.f32 %v6964_v15, 0.0  ;;  %14491 = vmatpush3.bf16.msra.mxu0 %v19166_v49  ;;  %14502 = vmatprep.subr.bf16.mxu1 %v19991_v0  ;;  %v20247_v15 = vunpack.c.l.b16 %v18469_v34  ;;  %v7003_v34 = vld [vmem:[#allocation3 + $0x10] sm:$0x1] }
 0x598   :  { %v14199_v41 = vpop.f32.mrf.mxu0  ;;  %14492 = vmatprep.subr.bf16.mxu0 %v19991_v0 }
 0x599   :  { %v6966_v4 = vpack.c.bf16 %v6965_v39, %v6965_v39  ;;  %v8740_v18 = vrot.slane %v20247_v15, 2  ;;  %v8822_v39 = vrot.slane %v20248_v62, 2 }
 0x59a   :  { %14503 = vmatpush3.bf16.msra.mxu1 %v18811_v43 }
 0x59b   :  { %v6974_v40 = vrot.slane %v6966_v4, %v15955_v32  ;;  %14493 = vmatpush3.bf16.msra.mxu0 %v19182_v37  ;;  %14504 = vmatprep.subr.bf16.mxu1 %v19991_v0  ;;  %v8742_v41 = vsel %vm20249_vm0, %v8741_v16, %v8740_v18  ;;  %v20250_v4 = vunpack.c.l.b16 %v18913_v51 }
 0x59c   :  { %14494 = vmatprep.subr.bf16.mxu0 %v19991_v0  ;;  %v19208_v15 = vpack.c.b16 %v8742_v41, %v8742_v41 }
 0x59d   :  { %v6981_v43 = vrot.slane %v6974_v40, %v15955_v32  ;;  %v8821_v55 = vrot.slane %v20250_v4, 3 }
 0x59e   :  { %14505 = vmatpush3.bf16.msra.mxu1 %v18827_v29  ;;  %v7006_v29 = vld [vmem:[#allocation3 + $0x24] sm:$0x1] }
 0x59f   :  { %v6983_v26 = vunpack.i.h.s16 %v6981_v43  ;;  %v11821_v20 = vpack.i.b16 %v6981_v43, %v6981_v43  ;;  %14495 = vmatpush3.bf16.msra.mxu0 %v19194_v10  ;;  %14506 = vmatprep.subr.bf16.mxu1 %v19991_v0  ;;  %v8823_v58 = vsel %vm20251_vm13, %v8822_v39, %v8821_v55  ;;  %vm20261_vm13 = vmmov %vm20240_vm1 }
 0x5a0   :  { %14512 = vmatprep.subr.bf16.mxu0 %v19991_v0  ;;  %v8824_v62 = vpack.c.b16 %v8823_v58, %v8823_v58 }
 0x5a1   :  { %v6985_v40 = vpack.i.b16 %v6983_v26, %v6983_v26  ;;  %v6992_v16 = vrot.slane %v11821_v20, %v15986_v53  ;;  %v15073_v20 = vld [vmem:[#allocation3 + $0x14] ss:$0 sps:$4 sm:$0x44]  }
 0x5a2   :  { %14497 = vmatmul.mubr.msk.bf16.vlgmr.msra.gmra.mxu0 %vm20252_vm6, %v19208_v15  ;;  %14507 = vmatpush3.bf16.msra.mxu1 %v18842_v22  ;;  %v8917_v43 = vunpack.c.l.b16 %v15073_v20  ;;  %vm20263_vm6 = vmmov %vm20240_vm1 }
 0x5a3   :  { %v6999_v51 = vrot.slane %v6985_v40, %v15986_v53  ;;  %v7004_v18 = vsel %vm17225_vm15, %v6992_v16, %v7003_v34  ;;  %14513 = vmatpush3.bf16.msra.mxu0 %v18852_v45  ;;  %14524 = vmatprep.subr.bf16.mxu1 %v19991_v0  ;;  %v15072_v45 = vld [vmem:[#allocation3] ss:$0 sps:$4 sm:$0x44]  }
 0x5a4   :  { %7005 = vst [vmem:[#allocation3 + $0x10] sm:$0x1] %v7004_v18  ;;  %14514 = vmatprep.subr.bf16.mxu0 %v19991_v0  ;;  %14520 = vmatprep.mubr.msk.bf16.mxu0 %vm20028_vm11, %v19991_v0  ;;  %v8916_v4 = vunpack.c.l.b16 %v15072_v45  ;;  %v15075_v45 = vld [vmem:[#allocation3 + $0x18] ss:$0 sps:$4 sm:$0x44]  }
 0x5a5   :  { %v7007_v22 = vsel %vm17225_vm15, %v6999_v51, %v7006_v29  ;;  %v7199_v26 = vpop.f32.mrf.mxu1  ;;  %14509 = vmatmul.mubr.msk.bf16.vlgmr.msra.gmra.mxu1 %vm20253_vm12, %v8824_v62  ;;  %vm20254_vm15 = vmmov %vm20249_vm0 }
 0x5a6   :  { %7008 = vst [vmem:[#allocation3 + $0x24] sm:$0x1] %v7007_v22  ;;  %14525 = vmatpush3.bf16.msra.mxu1 %v18898_v52  ;;  %14532 = vmatprep.mubr.msk.bf16.mxu1 %vm20028_vm11, %v19991_v0  ;;  %v8918_v16 = vrot.slane %v8916_v4, 4  ;;  %vm20268_vm12 = vmmov %vm20249_vm0 }
 0x5a7   :  { %14515 = vmatpush3.bf16.msra.mxu0 %v18864_v31  ;;  %v14246_v39 = vpop.f32.mrf.mxu1  ;;  %14526 = vmatprep.subr.bf16.mxu1 %v19991_v0  ;;  %v8919_v31 = vrot.slane %v8917_v43, 3 }
 0x5a8   :  { %14516 = vmatprep.subr.bf16.mxu0 %v19991_v0 }
 0x5a9   :  { %v7202_v7 = vpop.f32.mrf.mxu1 }
 0x5aa   :  { %v7127_v41 = vpop.f32.mrf.mxu0  ;;  %14527 = vmatpush3.bf16.msra.mxu1 %v18921_v13 }
 0x5ab   :  { %v7128_v55 = vadd.f32 %v7127_v41, %v19134_v35  ;;  %14517 = vmatpush3.bf16.msra.mxu0 %v18876_v27  ;;  %v14247_v52 = vpop.f32.mrf.mxu1  ;;  %14528 = vmatprep.subr.bf16.mxu1 %v19991_v0  ;;  %v8920_v27 = vsel %vm20254_vm15, %v8919_v31, %v8918_v16  ;;  %vm20269_vm15 = vmmov %vm20240_vm1 }
 0x5ac   :  { %v14230_v34 = vpop.f32.mrf.mxu0  ;;  %14518 = vmatprep.subr.bf16.mxu0 %v19991_v0 }
 0x5ad   :  { %v7205_v58 = vadd.f32 %v7199_v26, %v7128_v55  ;;  %v7247_v22 = vld [vmem:[#allocation3 + $0x24] sm:$0x1] }
 0x5ae   :  { %v7130_v40 = vpop.f32.mrf.mxu0  ;;  %14529 = vmatpush3.bf16.msra.mxu1 %v18949_v59  ;;  %v8921_v59 = vpack.c.b16 %v8920_v27, %v8920_v27 }
 0x5af   :  { %v7206_v29 = vadd.f32 %v18692_v47, %v7205_v58  ;;  %14519 = vmatpush3.bf16.msra.mxu0 %v18891_v38  ;;  %14530 = vmatprep.subr.bf16.mxu1 %v19991_v0  ;;  %v19323_v58 = vld [vmem:[%s19954_s4] ss:$0 sm:$0xff] }
 0x5b0   :  { %v14231_v13 = vpop.f32.mrf.mxu0  ;;  %14536 = vmatprep.subr.bf16.mxu0 %v19991_v0 }
 0x5b1   :  { %v7207_v35 = vmax.f32 %v7206_v29, 0.0  ;;  %v19331_v13 = vpack.c.b16 %v18498_v56, %v18498_v56 }
 0x5b2   :  { %14521 = vmatmul.mubr.msk.bf16.vlgmr.msra.gmra.mxu0 %vm20240_vm1, %v18998_v19  ;;  %14531 = vmatpush3.bf16.msra.mxu1 %v18972_v57 }
 0x5b3   :  { %v7208_v51 = vpack.c.bf16 %v7207_v35, %v7207_v35  ;;  %14537 = vmatpush3.bf16.msra.mxu0 %v18911_v3  ;;  %14548 = vmatprep.subr.bf16.mxu1 %v19991_v0 }
 0x5b4   :  { %14538 = vmatprep.subr.bf16.mxu0 %v19991_v0  ;;  %14544 = vmatprep.mubr.msk.bf16.mxu0 %vm20028_vm11, %v19991_v0 }
 0x5b5   :  { %v7216_v47 = vrot.slane %v7208_v51, %v15955_v32  ;;  %14533 = vmatmul.mubr.msk.bf16.vlgmr.msra.gmra.mxu1 %vm20255_vm5, %v8921_v59  ;;  %vm20274_vm5 = vmmov %vm20249_vm0 }
 0x5b6   :  { %14549 = vmatpush3.bf16.msra.mxu1 %v18996_v36  ;;  %14556 = vmatprep.mubr.msk.bf16.mxu1 %vm20028_vm11, %v19991_v0  ;;  %v7244_v36 = vld [vmem:[#allocation3 + $0x10] sm:$0x1] }
 0x5b7   :  { %v7223_v38 = vrot.slane %v7216_v47, %v15955_v32  ;;  %14539 = vmatpush3.bf16.msra.mxu0 %v18939_v8  ;;  %14550 = vmatprep.subr.bf16.mxu1 %v19991_v0 }
 0x5b8   :  { %14540 = vmatprep.subr.bf16.mxu0 %v19991_v0 }
 0x5b9   :  { %v7225_v3 = vunpack.i.h.s16 %v7223_v38  ;;  %v11833_v57 = vpack.i.b16 %v7223_v38, %v7223_v38  ;;  %v7448_v38 = vld [vmem:[#allocation3 + $0x10] sm:$0x2] }
 0x5ba   :  { %14551 = vmatpush3.bf16.msra.mxu1 %v19016_v17 }
 0x5bb   :  { %v7227_v19 = vpack.i.b16 %v7225_v3, %v7225_v3  ;;  %v7234_v18 = vrot.slane %v11833_v57, %v15986_v53  ;;  %14541 = vmatpush3.bf16.msra.mxu0 %v18965_v33  ;;  %14552 = vmatprep.subr.bf16.mxu1 %v19991_v0 }
 0x5bc   :  { %14542 = vmatprep.subr.bf16.mxu0 %v19991_v0 }
 0x5bd   :  { %v7241_v8 = vrot.slane %v7227_v19, %v15986_v53  ;;  %v7245_v62 = vsel %vm15912_vm14, %v7234_v18, %v7244_v36  ;;  %v7346_v20 = vpop.f32.mrf.mxu1 }
 0x5be   :  { %7246 = vst [vmem:[#allocation3 + $0x10] sm:$0x1] %v7245_v62  ;;  %14553 = vmatpush3.bf16.msra.mxu1 %v19042_v50  ;;  %v15074_v50 = vld [vmem:[#allocation3 + $0x4] ss:$0 sps:$4 sm:$0x44]  }
 0x5bf   :  { %v7248_v17 = vsel %vm15912_vm14, %v7241_v8, %v7247_v22  ;;  %14543 = vmatpush3.bf16.msra.mxu0 %v18988_v48  ;;  %v14278_v33 = vpop.f32.mrf.mxu1  ;;  %14554 = vmatprep.subr.bf16.mxu1 %v19991_v0  ;;  %v9010_v48 = vpack.c.b16 %v18116_v42, %v18116_v42  ;;  %vm20257_vm14 = vmmov %vm20240_vm1  ;;  %v9063_v42 = vunpack.c.l.b16 %v15074_v50 }
 0x5c0   :  { %7249 = vst [vmem:[#allocation3 + $0x24] sm:$0x1] %v7248_v17  ;;  %14560 = vmatprep.subr.bf16.mxu0 %v19991_v0 }
 0x5c1   :  { %v7349_v26 = vpop.f32.mrf.mxu1  ;;  %v9065_v41 = vrot.slane %v9063_v42, 4 }
 0x5c2   :  { %v7300_v39 = vpop.f32.mrf.mxu0  ;;  %14545 = vmatmul.mubr.msk.bf16.vlgmr.msra.gmra.mxu0 %vm20256_vm9, %v19091_v61  ;;  %14555 = vmatpush3.bf16.msra.mxu1 %v19058_v28  ;;  %v9064_v61 = vunpack.c.l.b16 %v15075_v45  ;;  %vm20275_vm9 = vmmov %vm20249_vm0 }
 0x5c3   :  { %14561 = vmatpush3.bf16.msra.mxu0 %v19008_v63  ;;  %v14279_v11 = vpop.f32.mrf.mxu1  ;;  %14572 = vmatprep.subr.bf16.mxu1 %v19991_v0 }
 0x5c4   :  { %v14262_v43 = vpop.f32.mrf.mxu0  ;;  %14562 = vmatprep.subr.bf16.mxu0 %v19991_v0  ;;  %14568 = vmatprep.mubr.msk.bf16.mxu0 %vm20028_vm11, %v19991_v0  ;;  %v9066_v28 = vrot.slane %v9064_v61, 3 }
 0x5c5   :  { %14557 = vmatmul.mubr.msk.bf16.vlgmr.msra.gmra.mxu1 %vm20257_vm14, %v9010_v48  ;;  %vm20276_vm14 = vmmov %vm20240_vm1 }
 0x5c6   :  { %v7303_v7 = vpop.f32.mrf.mxu0  ;;  %14573 = vmatpush3.bf16.msra.mxu1 %v19079_v44  ;;  %14580 = vmatprep.mubr.msk.bf16.mxu1 %vm20028_vm11, %v19991_v0  ;;  %v9067_v44 = vsel %vm20258_vm3, %v9066_v28, %v9065_v41  ;;  %vm20277_vm3 = vmmov %vm20240_vm1 }
 0x5c7   :  { %14563 = vmatpush3.bf16.msra.mxu0 %v19031_v25  ;;  %14574 = vmatprep.subr.bf16.mxu1 %v19991_v0  ;;  %v9068_v25 = vpack.c.b16 %v9067_v44, %v9067_v44 }
 0x5c8   :  { %v14263_v63 = vpop.f32.mrf.mxu0  ;;  %14564 = vmatprep.subr.bf16.mxu0 %v19991_v0 }
 0x5ca   :  { %14575 = vmatpush3.bf16.msra.mxu1 %v19097_v60 }
 0x5cb   :  { %14565 = vmatpush3.bf16.msra.mxu0 %v19051_v12  ;;  %14576 = vmatprep.subr.bf16.mxu1 %v19991_v0  ;;  %v15077_v12 = vld [vmem:[#allocation3 + $0x1c] ss:$0 sps:$4 sm:$0x44]  }
 0x5cc   :  { %14566 = vmatprep.subr.bf16.mxu0 %v19991_v0  ;;  %v9211_v60 = vunpack.c.l.b16 %v15077_v12 }
 0x5ce   :  { %14577 = vmatpush3.bf16.msra.mxu1 %v19117_v14  ;;  %v7347_v14 = vadd.f32 %v7346_v20, %v7300_v39 }
 0x5cf   :  { %14567 = vmatpush3.bf16.msra.mxu0 %v19070_v24  ;;  %14578 = vmatprep.subr.bf16.mxu1 %v19991_v0 }
 0x5d0   :  { %14584 = vmatprep.subr.bf16.mxu0 %v19991_v0 }
 0x5d2   :  { %14569 = vmatmul.mubr.msk.bf16.vlgmr.msra.gmra.mxu0 %vm20259_vm7, %v9068_v25  ;;  %14579 = vmatpush3.bf16.msra.mxu1 %v19131_v2  ;;  %v15076_v2 = vld [vmem:[#allocation3 + $0x8] ss:$0 sps:$4 sm:$0x44]   ;;  %vm20278_vm7 = vmmov %vm20249_vm0 }
 0x5d3   :  { %14585 = vmatpush3.bf16.msra.mxu0 %v19088_v21  ;;  %14596 = vmatprep.subr.bf16.mxu1 %v19991_v0  ;;  %v9210_v52 = vunpack.c.l.b16 %v15076_v2 }
 0x5d4   :  { %14586 = vmatprep.subr.bf16.mxu0 %v19991_v0  ;;  %14592 = vmatprep.mubr.msk.bf16.mxu0 %vm20028_vm11, %v19991_v0 }
 0x5d5   :  { %v7518_v24 = vpop.f32.mrf.mxu1  ;;  %14581 = vmatmul.mubr.msk.bf16.vlgmr.msra.gmra.mxu1 %vm20260_vm10, %v19208_v15  ;;  %vm20279_vm10 = vmmov %vm20249_vm0 }
 0x5d6   :  { %14597 = vmatpush3.bf16.msra.mxu1 %v19148_v5  ;;  %14604 = vmatprep.mubr.msk.bf16.mxu1 %vm20028_vm11, %v19991_v0 }
 0x5d7   :  { %14587 = vmatpush3.bf16.msra.mxu0 %v19108_v46  ;;  %v14310_v21 = vpop.f32.mrf.mxu1  ;;  %14598 = vmatprep.subr.bf16.mxu1 %v19991_v0  ;;  %v9213_v46 = vrot.slane %v9211_v60, 3 }
 0x5d8   :  { %14588 = vmatprep.subr.bf16.mxu0 %v19991_v0 }
 0x5d9   :  { %v7521_v4 = vpop.f32.mrf.mxu1 }
 0x5da   :  { %v7403_v55 = vpop.f32.mrf.mxu0  ;;  %14599 = vmatpush3.bf16.msra.mxu1 %v19166_v49  ;;  %v9212_v49 = vrot.slane %v9210_v52, 4  ;;  %v15080_v52 = vld [vmem:[#allocation4 + $0x1e4] ss:$16 sps:$4 sm:$0xff]  }
 0x5db   :  { %v7409_v34 = vadd.f32 %v7403_v55, %v7347_v14  ;;  %14589 = vmatpush3.bf16.msra.mxu0 %v19124_v23  ;;  %v14311_v5 = vpop.f32.mrf.mxu1  ;;  %14600 = vmatprep.subr.bf16.mxu1 %v19991_v0  ;;  %v15078_v55 = vld [vmem:[#allocation4 + $0x1e0] ss:$16 sps:$4 sm:$0xff]  }
 0x5dc   :  { %v14294_v31 = vpop.f32.mrf.mxu0  ;;  %14590 = vmatprep.subr.bf16.mxu0 %v19991_v0  ;;  %v9214_v27 = vsel %vm20249_vm0, %v9213_v46, %v9212_v49  ;;  %v19360_v46 = vld [vmem:[#allocation3 + $0x10] ss:$0 sps:$4 sm:$0x22]  }
 0x5dd   :  { %v7410_v40 = vadd.f32 %v19323_v58, %v7409_v34  ;;  %v19338_v51 = vpack.c.b16 %v9214_v27, %v9214_v27  ;;  %v15081_v34 = vld [vmem:[#allocation4 + $0x1e8] ss:$16 sps:$4 sm:$0xff]   ;;  %v15083_v31 = vld [vmem:[#allocation4 + $0x1ec] ss:$16 sps:$4 sm:$0xff]   ;;  %v10142_v49 = vunpack.c.l.b16 %v19360_v46  ;;  %v15086_v27 = vld [vmem:[#allocation4 + $0x1c4] ss:$16 sps:$4 sm:$0xff]  }
 0x5de   :  { %v7406_v16 = vpop.f32.mrf.mxu0  ;;  %14601 = vmatpush3.bf16.msra.mxu1 %v19182_v37  ;;  %v15182_v46 = vld [vmem:[#allocation4 + $0x2e0] ss:$16 sps:$4 sm:$0xff]  }
 0x5df   :  { %v7411_v29 = vmax.f32 %v7410_v40, 0.0  ;;  %14591 = vmatpush3.bf16.msra.mxu0 %v19141_v6  ;;  %14602 = vmatprep.subr.bf16.mxu1 %v19991_v0  ;;  %v20262_v6 = vmov 0   ;;  %v19362_v16 = vld [vmem:[#allocation3 + $0x24] ss:$0 sps:$4 sm:$0x22]  }
 0x5e0   :  { %v14295_v23 = vpop.f32.mrf.mxu0  ;;  %9423 = vmatprep.subr.bf16.mxu0 %v15080_v52  ;;  %v15117_v52 = vld [vmem:[#allocation4 + $0x128] ss:$16 sps:$4 sm:$0xff]  }
 0x5e1   :  { %v7412_v35 = vpack.c.bf16 %v7411_v29, %v7411_v29  ;;  %v10143_v29 = vunpack.c.l.b16 %v19362_v16  ;;  %v15084_v23 = vld [vmem:[#allocation4 + $0x1c0] ss:$16 sps:$4 sm:$0xff]  }
 0x5e2   :  { %14593 = vmatmul.mubr.msk.bf16.vlgmr.msra.gmra.mxu0 %vm20261_vm13, %v19331_v13  ;;  %14603 = vmatpush3.bf16.msra.mxu1 %v19194_v10  ;;  %v7451_v10 = vld [vmem:[#allocation3 + $0x24] sm:$0x2] }
 0x5e3   :  { %v7420_v37 = vrot.slane %v7412_v35, %v15955_v32  ;;  %9455 = vmatprep.mubr.bf16.mxu0 %v20262_v6  ;;  %9464 = vmatprep.subr.bf16.mxu1 %v15083_v31  ;;  %v15087_v35 = vld [vmem:[#allocation4 + $0x1c8] ss:$16 sps:$4 sm:$0xff]   ;;  %v15125_v31 = vld [vmem:[#allocation4 + $0x10c] ss:$16 sps:$4 sm:$0xff]  }
 0x5e4   :  { %9424 = vmatpush1.bf16.msra.mxu0 %v15078_v55  ;;  %v15116_v55 = vld [vmem:[#allocation4 + $0x124] ss:$16 sps:$4 sm:$0xff]  }
 0x5e5   :  { %v7427_v59 = vrot.slane %v7420_v37, %v15955_v32  ;;  %14605 = vmatmul.mubr.msk.bf16.vlgmr.msra.gmra.mxu1 %vm20263_vm6, %v19338_v51  ;;  %v15089_v37 = vld [vmem:[#allocation4 + $0x1cc] ss:$16 sps:$4 sm:$0xff]   ;;  %9425 = vmatprep.subr.bf16.mxu0 %v15086_v27  ;;  %v7893_v27 = vld [vmem:[#allocation3 + $0x10] sm:$0x4] }
 0x5e6   :  { %9496 = vmatprep.mubr.bf16.mxu1 %v20262_v6  ;;  %9465 = vmatpush1.bf16.msra.mxu1 %v15081_v34  ;;  %v15119_v34 = vld [vmem:[#allocation4 + $0x12c] ss:$16 sps:$4 sm:$0xff]  }
 0x5e7   :  { %v7429_v56 = vunpack.i.h.s16 %v7427_v59  ;;  %v11841_v47 = vpack.i.b16 %v7427_v59, %v7427_v59  ;;  %v10750_v59 = vrot.slane %v10142_v49, 3  ;;  %9466 = vmatprep.subr.bf16.mxu1 %v15089_v37  ;;  %v15128_v37 = vld [vmem:[#allocation4 + $0xe4] ss:$16 sps:$4 sm:$0xff]  }
 0x5e8   :  { %9426 = vmatpush1.bf16.msra.mxu0 %v15084_v23  ;;  %v15120_v23 = vld [vmem:[#allocation4 + $0x100] ss:$16 sps:$4 sm:$0xff]  }
 0x5e9   :  { %v7431_v3 = vpack.i.b16 %v7429_v56, %v7429_v56  ;;  %v7438_v57 = vrot.slane %v11841_v47, %v15986_v53  ;;  %v10751_v56 = vrot.slane %v10143_v29, 2 }
 0x5ea   :  { %9467 = vmatpush1.bf16.msra.mxu1 %v15087_v35  ;;  %v15123_v35 = vld [vmem:[#allocation4 + $0x108] ss:$16 sps:$4 sm:$0xff]  }
 0x5eb   :  { %v7445_v19 = vrot.slane %v7431_v3, %v15986_v53  ;;  %v7449_v18 = vsel %vm17581_vm2, %v7438_v57, %v7448_v38  ;;  %v15090_v38 = vld [vmem:[#allocation4 + $0x1a0] ss:$16 sps:$4 sm:$0xff]   ;;  %v15092_v3 = vld [vmem:[#allocation4 + $0x1a4] ss:$16 sps:$4 sm:$0xff]  }
 0x5ec   :  { %7450 = vst [vmem:[#allocation3 + $0x10] sm:$0x2] %v7449_v18  ;;  %v15095_v18 = vld [vmem:[#allocation4 + $0x1ac] ss:$16 sps:$4 sm:$0xff]   ;;  %9427 = vmatprep.subr.bf16.mxu0 %v15092_v3 }
 0x5ed   :  { %v7452_v36 = vsel %vm17581_vm2, %v7445_v19, %v7451_v10  ;;  %v7644_v8 = vpop.f32.mrf.mxu1  ;;  %vm20264_vm2 = vmmov %vm20249_vm0  ;;  %v15093_v19 = vld [vmem:[#allocation4 + $0x1a8] ss:$16 sps:$4 sm:$0xff]   ;;  %9468 = vmatprep.subr.bf16.mxu1 %v15095_v18  ;;  %9428 = vmatpush1.bf16.msra.mxu0 %v15090_v38 }
 0x5ee   :  { %7453 = vst [vmem:[#allocation3 + $0x24] sm:$0x2] %v7452_v36  ;;  %v19371_v57 = vsel %vm20264_vm2, %v10751_v56, %v10750_v59  ;;  %9469 = vmatpush1.bf16.msra.mxu1 %v15093_v19  ;;  %vm20280_vm0 = vmmov %vm20240_vm1 }
 0x5ef   :  { %v14342_v62 = vpop.f32.mrf.mxu1  ;;  %vm20281_vm13 = vmmov %vm20280_vm0 }
 0x5f0   :  { %v15096_v62 = vld [vmem:[#allocation4 + $0x180] ss:$16 sps:$4 sm:$0xff]   ;;  %vm20285_vm6 = vmmov %vm20264_vm2 }
 0x5f1   :  { %v7647_v20 = vpop.f32.mrf.mxu1  ;;  %vm20288_vm2 = vmmov %vm20280_vm0 }
 0x5f2   :  { %v7572_v22 = vpop.f32.mrf.mxu0  ;;  %v15101_v20 = vld [vmem:[#allocation4 + $0x18c] ss:$16 sps:$4 sm:$0xff]  }
 0x5f3   :  { %v7573_v17 = vadd.f32 %v7572_v22, %v7518_v24  ;;  %v14343_v33 = vpop.f32.mrf.mxu1  ;;  %v7689_v41 = vld [vmem:[#allocation3 + $0x10] sm:$0x2]  ;;  %9470 = vmatprep.subr.bf16.mxu1 %v15101_v20 }
 0x5f4   :  { %v14326_v26 = vpop.f32.mrf.mxu0  ;;  %v15104_v33 = vld [vmem:[#allocation4 + $0x164] ss:$16 sps:$4 sm:$0xff]  }
 0x5f5   :  { %v7650_v45 = vadd.f32 %v7644_v8, %v7573_v17  ;;  %v7692_v24 = vld [vmem:[#allocation3 + $0x24] sm:$0x2]  ;;  %v15098_v8 = vld [vmem:[#allocation4 + $0x184] ss:$16 sps:$4 sm:$0xff]   ;;  %v15099_v17 = vld [vmem:[#allocation4 + $0x188] ss:$16 sps:$4 sm:$0xff]  }
 0x5f6   :  { %v7575_v39 = vpop.f32.mrf.mxu0  ;;  %9429 = vmatprep.subr.bf16.mxu0 %v15098_v8  ;;  %v15107_v26 = vld [vmem:[#allocation4 + $0x16c] ss:$16 sps:$4 sm:$0xff]   ;;  %9471 = vmatpush1.bf16.msra.mxu1 %v15099_v17 }
 0x5f7   :  { %v7651_v11 = vadd.f32 %v19323_v58, %v7650_v45  ;;  %9430 = vmatpush1.bf16.msra.mxu0 %v15096_v62  ;;  %v15102_v45 = vld [vmem:[#allocation4 + $0x160] ss:$16 sps:$4 sm:$0xff]   ;;  %v15105_v39 = vld [vmem:[#allocation4 + $0x168] ss:$16 sps:$4 sm:$0xff]   ;;  %9472 = vmatprep.subr.bf16.mxu1 %v15107_v26 }
 0x5f8   :  { %v14327_v48 = vpop.f32.mrf.mxu0  ;;  %9431 = vmatprep.subr.bf16.mxu0 %v15104_v33 }
 0x5f9   :  { %v7652_v50 = vmax.f32 %v7651_v11, 0.0 }
 0x5fa   :  { %9473 = vmatpush1.bf16.msra.mxu1 %v15105_v39 }
 0x5fb   :  { %v7653_v43 = vpack.c.bf16 %v7652_v50, %v7652_v50  ;;  %9432 = vmatpush1.bf16.msra.mxu0 %v15102_v45 }
 0x5fd   :  { %v7661_v61 = vrot.slane %v7653_v43, %v15955_v32  ;;  %v15108_v43 = vld [vmem:[#allocation4 + $0x140] ss:$16 sps:$4 sm:$0xff]  }
 0x5ff   :  { %v7668_v30 = vrot.slane %v7661_v61, %v15955_v32  ;;  %v15110_v61 = vld [vmem:[#allocation4 + $0x144] ss:$16 sps:$4 sm:$0xff]  }
 0x600   :  { %9433 = vmatprep.subr.bf16.mxu0 %v15110_v61 }
 0x601   :  { %v7670_v7 = vunpack.i.h.s16 %v7668_v30  ;;  %v11853_v42 = vpack.i.b16 %v7668_v30, %v7668_v30  ;;  %v15111_v30 = vld [vmem:[#allocation4 + $0x148] ss:$16 sps:$4 sm:$0xff]   ;;  %9434 = vmatpush1.bf16.msra.mxu0 %v15108_v43 }
 0x602   :  { %9435 = vmatprep.subr.bf16.mxu0 %v15116_v55 }
 0x603   :  { %v7672_v63 = vpack.i.b16 %v7670_v7, %v7670_v7  ;;  %v7679_v28 = vrot.slane %v11853_v42, %v15986_v53  ;;  %v15113_v42 = vld [vmem:[#allocation4 + $0x14c] ss:$16 sps:$4 sm:$0xff]  }
 0x604   :  { %9474 = vmatprep.subr.bf16.mxu1 %v15113_v42 }
 0x605   :  { %v7686_v44 = vrot.slane %v7672_v63, %v15986_v53  ;;  %v7690_v25 = vsel %vm17648_vm8, %v7679_v28, %v7689_v41  ;;  %v7791_v12 = vpop.f32.mrf.mxu1  ;;  %9475 = vmatpush1.bf16.msra.mxu1 %v15111_v30 }
 0x606   :  { %7691 = vst [vmem:[#allocation3 + $0x10] sm:$0x2] %v7690_v25  ;;  %9476 = vmatprep.subr.bf16.mxu1 %v15119_v34 }
 0x607   :  { %v7693_v2 = vsel %vm17648_vm8, %v7686_v44, %v7692_v24  ;;  %v14374_v21 = vpop.f32.mrf.mxu1  ;;  %vm20265_vm8 = vmmov %vm20240_vm1 }
 0x608   :  { %7694 = vst [vmem:[#allocation3 + $0x24] sm:$0x2] %v7693_v2 }
 0x609   :  { %v7794_v60 = vpop.f32.mrf.mxu1  ;;  %9477 = vmatpush1.bf16.msra.mxu1 %v15117_v52 }
 0x60a   :  { %v7745_v14 = vpop.f32.mrf.mxu0  ;;  %9478 = vmatprep.subr.bf16.mxu1 %v15125_v31 }
 0x60b   :  { %v14375_v4 = vpop.f32.mrf.mxu1  ;;  %v7792_v11 = vadd.f32 %v7791_v12, %v7745_v14 }
 0x60c   :  { %v14358_v5 = vpop.f32.mrf.mxu0  ;;  %v15114_v4 = vld [vmem:[#allocation4 + $0x120] ss:$16 sps:$4 sm:$0xff]  }
 0x60d   :  { %v15122_v5 = vld [vmem:[#allocation4 + $0x104] ss:$16 sps:$4 sm:$0xff]   ;;  %9436 = vmatpush1.bf16.msra.mxu0 %v15114_v4  ;;  %9479 = vmatpush1.bf16.msra.mxu1 %v15123_v35 }
 0x60e   :  { %v7748_v40 = vpop.f32.mrf.mxu0  ;;  %9437 = vmatprep.subr.bf16.mxu0 %v15122_v5 }
 0x610   :  { %v14359_v54 = vpop.f32.mrf.mxu0 }
 0x611   :  { %9438 = vmatpush1.bf16.msra.mxu0 %v15120_v23 }
 0x612   :  { %9665 = vmatprep.subr.bf16.mxu0 %v15128_v37 }
 0x615   :  { %v8186_v47 = vpop.f32.mrf.mxu1 }
 0x617   :  { %v14402_v10 = vpop.f32.mrf.mxu1 }
 0x619   :  { %v8189_v36 = vpop.f32.mrf.mxu1 }
 0x61b   :  { %v14403_v22 = vpop.f32.mrf.mxu1 }
 0x622   :  { %v7848_v48 = vpop.f32.mrf.mxu0 }
 0x623   :  { %v7854_v50 = vadd.f32 %v7848_v48, %v7792_v11 }
 0x624   :  { %v14390_v7 = vpop.f32.mrf.mxu0 }
 0x625   :  { %v7855_v63 = vadd.f32 %v19323_v58, %v7854_v50  ;;  %v8256_v28 = vpop.f32.mrf.mxu1 }
 0x626   :  { %v7851_v41 = vpop.f32.mrf.mxu0  ;;  %v8257_v44 = vadd.f32 %v8256_v28, %v8186_v47  ;;  %v15131_v47 = vld [vmem:[#allocation4 + $0xec] ss:$16 sps:$4 sm:$0xff]  }
 0x627   :  { %v7856_v25 = vmax.f32 %v7855_v63, 0.0  ;;  %v14414_v24 = vpop.f32.mrf.mxu1  ;;  %9706 = vmatprep.subr.bf16.mxu1 %v15131_v47 }
 0x628   :  { %v14391_v12 = vpop.f32.mrf.mxu0 }
 0x629   :  { %v7857_v2 = vpack.c.bf16 %v7856_v25, %v7856_v25  ;;  %v8259_v21 = vpop.f32.mrf.mxu1 }
 0x62b   :  { %v7865_v60 = vrot.slane %v7857_v2, %v15955_v32  ;;  %v14415_v14 = vpop.f32.mrf.mxu1 }
 0x62d   :  { %v7872_v58 = vrot.slane %v7865_v60, %v15955_v32  ;;  %v7896_v32 = vld [vmem:[#allocation3 + $0x24] sm:$0x4] }
 0x62f   :  { %v7874_v40 = vunpack.i.h.s16 %v7872_v58  ;;  %v11861_v54 = vpack.i.b16 %v7872_v58, %v7872_v58 }
 0x631   :  { %v7876_v59 = vpack.i.b16 %v7874_v40, %v7874_v40  ;;  %v7883_v56 = vrot.slane %v11861_v54, %v15986_v53 }
 0x632   :  { %v8337_v38 = vpop.f32.mrf.mxu0 }
 0x633   :  { %v7890_v3 = vrot.slane %v7876_v59, %v15986_v53  ;;  %v7894_v10 = vsel %vm17738_vm4, %v7883_v56, %v7893_v27  ;;  %v8343_v19 = vadd.f32 %v8337_v38, %v8257_v44 }
 0x634   :  { %7895 = vst [vmem:[#allocation3 + $0x10] sm:$0x4] %v7894_v10  ;;  %v14426_v18 = vpop.f32.mrf.mxu0 }
 0x635   :  { %v7897_v36 = vsel %vm17738_vm4, %v7890_v3, %v7896_v32  ;;  %v8418_v8 = vpop.f32.mrf.mxu1  ;;  %vm20267_vm4 = vmmov %vm20240_vm1 }
 0x636   :  { %7898 = vst [vmem:[#allocation3 + $0x24] sm:$0x4] %v7897_v36  ;;  %v8340_v62 = vpop.f32.mrf.mxu0  ;;  %v8424_v20 = vadd.f32 %v8418_v8, %v8343_v19 }
 0x637   :  { %v14438_v22 = vpop.f32.mrf.mxu1 }
 0x638   :  { %v14427_v17 = vpop.f32.mrf.mxu0 }
 0x639   :  { %v8421_v53 = vpop.f32.mrf.mxu1 }
 0x63b   :  { %v14439_v33 = vpop.f32.mrf.mxu1 }
 0x642   :  { %v8489_v26 = vpop.f32.mrf.mxu0 }
 0x643   :  { %v8495_v45 = vadd.f32 %v8489_v26, %v8424_v20 }
 0x644   :  { %v14450_v39 = vpop.f32.mrf.mxu0 }
 0x645   :  { %v8571_v11 = vpop.f32.mrf.mxu1 }
 0x646   :  { %v8492_v48 = vpop.f32.mrf.mxu0  ;;  %v8577_v50 = vadd.f32 %v8571_v11, %v8495_v45 }
 0x647   :  { %v14462_v43 = vpop.f32.mrf.mxu1 }
 0x648   :  { %v14451_v61 = vpop.f32.mrf.mxu0 }
 0x649   :  { %v8574_v30 = vpop.f32.mrf.mxu1 }
 0x64b   :  { %v14463_v9 = vpop.f32.mrf.mxu1 }
 0x652   :  { %v8652_v7 = vpop.f32.mrf.mxu0 }
 0x653   :  { %v8658_v42 = vadd.f32 %v8652_v7, %v8577_v50 }
 0x654   :  { %v14474_v63 = vpop.f32.mrf.mxu0 }
 0x655   :  { %v8723_v28 = vpop.f32.mrf.mxu1  ;;  %v19387_v63 = vld [vmem:[%s19956_s6] ss:$0 sm:$0xff] }
 0x656   :  { %v8655_v41 = vpop.f32.mrf.mxu0  ;;  %v8729_v44 = vadd.f32 %v8723_v28, %v8658_v42 }
 0x657   :  { %v14486_v25 = vpop.f32.mrf.mxu1 }
 0x658   :  { %v14475_v24 = vpop.f32.mrf.mxu0 }
 0x659   :  { %v8726_v12 = vpop.f32.mrf.mxu1 }
 0x65b   :  { %v14487_v2 = vpop.f32.mrf.mxu1 }
 0x65c   :  { %v15126_v2 = vld [vmem:[#allocation4 + $0xe0] ss:$16 sps:$4 sm:$0xff]  }
 0x662   :  { %v8805_v21 = vpop.f32.mrf.mxu0 }
 0x663   :  { %v19382_v60 = vadd.f32 %v8805_v21, %v8729_v44  ;;  %v15129_v21 = vld [vmem:[#allocation4 + $0xe8] ss:$16 sps:$4 sm:$0xff]  }
 0x664   :  { %v14498_v14 = vpop.f32.mrf.mxu0 }
 0x665   :  { %v8862_v4 = vpop.f32.mrf.mxu1 }
 0x666   :  { %v8808_v55 = vpop.f32.mrf.mxu0 }
 0x667   :  { %v14510_v52 = vpop.f32.mrf.mxu1  ;;  %v15137_v55 = vld [vmem:[#allocation4 + $0xcc] ss:$16 sps:$4 sm:$0xff]  }
 0x668   :  { %v14499_v58 = vpop.f32.mrf.mxu0  ;;  %v15132_v52 = vld [vmem:[#allocation4 + $0xc0] ss:$16 sps:$4 sm:$0xff]  }
 0x669   :  { %v8865_v34 = vpop.f32.mrf.mxu1  ;;  %v15135_v58 = vld [vmem:[#allocation4 + $0xc8] ss:$16 sps:$4 sm:$0xff]  }
 0x66a   :  { %v15140_v34 = vld [vmem:[#allocation4 + $0xa4] ss:$16 sps:$4 sm:$0xff]  }
 0x66b   :  { %v14511_v5 = vpop.f32.mrf.mxu1 }
 0x66c   :  { %v15143_v5 = vld [vmem:[#allocation4 + $0xac] ss:$16 sps:$4 sm:$0xff]  }
 0x672   :  { %v8902_v31 = vpop.f32.mrf.mxu0 }
 0x673   :  { %v8903_v17 = vadd.f32 %v8902_v31, %v8862_v4  ;;  %v15134_v4 = vld [vmem:[#allocation4 + $0xc4] ss:$16 sps:$4 sm:$0xff]   ;;  %v15138_v31 = vld [vmem:[#allocation4 + $0xa0] ss:$16 sps:$4 sm:$0xff]  }
 0x674   :  { %v14522_v40 = vpop.f32.mrf.mxu0 }
 0x675   :  { %v8959_v54 = vpop.f32.mrf.mxu1  ;;  %v15141_v40 = vld [vmem:[#allocation4 + $0xa8] ss:$16 sps:$4 sm:$0xff]  }
 0x676   :  { %v8905_v23 = vpop.f32.mrf.mxu0  ;;  %v8965_v26 = vadd.f32 %v8959_v54, %v8903_v17  ;;  %v15146_v54 = vld [vmem:[#allocation4 + $0x84] ss:$16 sps:$4 sm:$0xff]   ;;  %v15168_v17 = vld [vmem:[#allocation4] ss:$16 sps:$4 sm:$0xff]  }
 0x677   :  { %v14534_v27 = vpop.f32.mrf.mxu1  ;;  %v15149_v23 = vld [vmem:[#allocation4 + $0x8c] ss:$16 sps:$4 sm:$0xff]  }
 0x678   :  { %v14523_v35 = vpop.f32.mrf.mxu0  ;;  %v15144_v27 = vld [vmem:[#allocation4 + $0x80] ss:$16 sps:$4 sm:$0xff]  }
 0x679   :  { %v8962_v37 = vpop.f32.mrf.mxu1  ;;  %v15147_v35 = vld [vmem:[#allocation4 + $0x88] ss:$16 sps:$4 sm:$0xff]  }
 0x67a   :  { %v15152_v37 = vld [vmem:[#allocation4 + $0x64] ss:$16 sps:$4 sm:$0xff]  }
 0x67b   :  { %v14535_v59 = vpop.f32.mrf.mxu1 }
 0x67c   :  { %v15155_v59 = vld [vmem:[#allocation4 + $0x6c] ss:$16 sps:$4 sm:$0xff]  }
 0x682   :  { %v9000_v56 = vpop.f32.mrf.mxu0 }
 0x683   :  { %v9006_v39 = vadd.f32 %v9000_v56, %v8965_v26  ;;  %v15150_v56 = vld [vmem:[#allocation4 + $0x60] ss:$16 sps:$4 sm:$0xff]  }
 0x684   :  { %v14546_v47 = vpop.f32.mrf.mxu0 }
 0x685   :  { %v9048_v32 = vpop.f32.mrf.mxu1  ;;  %v15153_v47 = vld [vmem:[#allocation4 + $0x68] ss:$16 sps:$4 sm:$0xff]  }
 0x686   :  { %v9003_v38 = vpop.f32.mrf.mxu0  ;;  %v9054_v11 = vadd.f32 %v9048_v32, %v9006_v39  ;;  %v15158_v32 = vld [vmem:[#allocation4 + $0x44] ss:$16 sps:$4 sm:$0xff]   ;;  %v19417_v39 = vld [vmem:[%s19955_s5 + $0x30] sm:$0xff]  }
 0x687   :  { %v14558_v3 = vpop.f32.mrf.mxu1  ;;  %v15161_v38 = vld [vmem:[#allocation4 + $0x4c] ss:$16 sps:$4 sm:$0xff]  }
 0x688   :  { %v14547_v10 = vpop.f32.mrf.mxu0  ;;  %v15156_v3 = vld [vmem:[#allocation4 + $0x40] ss:$16 sps:$4 sm:$0xff]  }
 0x689   :  { %v9051_v19 = vpop.f32.mrf.mxu1  ;;  %v15159_v10 = vld [vmem:[#allocation4 + $0x48] ss:$16 sps:$4 sm:$0xff]  }
 0x68a   :  { %v15164_v19 = vld [vmem:[#allocation4 + $0x24] ss:$16 sps:$4 sm:$0xff]  }
 0x68b   :  { %v14559_v18 = vpop.f32.mrf.mxu1 }
 0x68c   :  { %v15167_v18 = vld [vmem:[#allocation4 + $0x2c] ss:$16 sps:$4 sm:$0xff]  }
 0x692   :  { %v9106_v36 = vpop.f32.mrf.mxu0 }
 0x693   :  { %v9112_v48 = vadd.f32 %v9106_v36, %v9054_v11  ;;  %v15162_v36 = vld [vmem:[#allocation4 + $0x20] ss:$16 sps:$4 sm:$0xff]   ;;  %v19423_v11 = vld [vmem:[%s19955_s5 + $0x10] sm:$0xff]  }
 0x694   :  { %v14570_v8 = vpop.f32.mrf.mxu0 }
 0x695   :  { %v9147_v62 = vpop.f32.mrf.mxu1  ;;  %v15165_v8 = vld [vmem:[#allocation4 + $0x28] ss:$16 sps:$4 sm:$0xff]  }
 0x696   :  { %v9109_v20 = vpop.f32.mrf.mxu0  ;;  %v9153_v50 = vadd.f32 %v9147_v62, %v9112_v48  ;;  %v8818_v62 = vadd.f32 %v19387_v63, %v19382_v60  ;;  %v19399_v60 = vld [vmem:[%s19955_s5 + $0x38] sm:$0xff]   ;;  %v19431_v48 = vld [vmem:[%s19955_s5 + $0x28] sm:$0xff]  }
 0x697   :  { %v14582_v22 = vpop.f32.mrf.mxu1  ;;  %v15170_v20 = vld [vmem:[#allocation4 + $0x4] ss:$16 sps:$4 sm:$0xff]  }
 0x698   :  { %v14571_v53 = vpop.f32.mrf.mxu0  ;;  %v15173_v22 = vld [vmem:[#allocation4 + $0xc] ss:$16 sps:$4 sm:$0xff]  }
 0x699   :  { %v9150_v33 = vpop.f32.mrf.mxu1  ;;  %v15171_v53 = vld [vmem:[#allocation4 + $0x8] ss:$16 sps:$4 sm:$0xff]  }
 0x69a   :  { %v8819_v33 = vmax.f32 %v8818_v62, 0.0  ;;  %v19604_v62 = vld [vmem:[%s19955_s5 + $0xf8] sm:$0xff]  }
 0x69b   :  { %v14583_v45 = vpop.f32.mrf.mxu1 }
 0x69c   :  { %v8820_v26 = vpack.c.bf16 %v8819_v33, %v8819_v33  ;;  %v19405_v45 = vld [vmem:[%s19955_s5 + $0x18] sm:$0xff]  }
 0x6a2   :  { %v9195_v43 = vpop.f32.mrf.mxu0 }
 0x6a3   :  { %v9201_v61 = vadd.f32 %v9195_v43, %v9153_v50  ;;  %v19437_v50 = vld [vmem:[%s19955_s5 + $0x8] sm:$0xff]   ;;  %v19445_v43 = vld [vmem:[%s19955_s5 + $0x20] sm:$0xff]  }
 0x6a4   :  { %v14594_v30 = vpop.f32.mrf.mxu0 }
 0x6a5   :  { %v9253_v9 = vpop.f32.mrf.mxu1  ;;  %v15175_v30 = vld [vmem:[#allocation3 + $0x20] ss:$0 sps:$4 sm:$0x11]  }
 0x6a6   :  { %v9198_v7 = vpop.f32.mrf.mxu0  ;;  %v9259_v42 = vadd.f32 %v9253_v9, %v9201_v61  ;;  %v19451_v61 = vld [vmem:[%s19955_s5] sm:$0xff]  }
 0x6a7   :  { %v14606_v28 = vpop.f32.mrf.mxu1  ;;  %v20266_v9 = vld [vmem:[#allocation14_spill] sm:$0xff] }
 0x6a8   :  { %v9260_v41 = vadd.f32 %v19387_v63, %v9259_v42  ;;  %v14595_v44 = vpop.f32.mrf.mxu0  ;;  %v19463_v7 = vld [vmem:[%s19955_s5 + $0x58] sm:$0xff]   ;;  %v19481_v28 = vld [vmem:[%s19955_s5 + $0x50] sm:$0xff]  }
 0x6a9   :  { %v9256_v25 = vpop.f32.mrf.mxu1  ;;  %v19469_v42 = vld [vmem:[%s19955_s5 + $0x78] sm:$0xff]  }
 0x6aa   :  { %v9261_v24 = vmax.f32 %v9260_v41, 0.0  ;;  %v19487_v41 = vld [vmem:[%s19955_s5 + $0x70] sm:$0xff]   ;;  %v15174_v44 = vld [vmem:[#allocation3 + $0xc] ss:$0 sps:$4 sm:$0x11]  }
 0x6ab   :  { %v14607_v12 = vpop.f32.mrf.mxu1 }
 0x6ac   :  { %v9262_v14 = vpack.c.bf16 %v9261_v24, %v9261_v24  ;;  %v19495_v24 = vld [vmem:[%s19955_s5 + $0x48] sm:$0xff]  }
 0x6ad   :  { %v19501_v12 = vld [vmem:[%s19955_s5 + $0x68] sm:$0xff]  }
 0x6ae   :  { %9456 = vmatmul.mubr.bf16.vlgmr.msra.gmra.mxu0 %v9262_v14  ;;  %9497 = vmatmul.mubr.bf16.vlgmr.msra.gmra.mxu1 %v9262_v14  ;;  %v19510_v14 = vld [vmem:[%s19955_s5 + $0x40] sm:$0xff]  }
 0x6af   :  { %9666 = vmatpush1.bf16.msra.mxu0 %v15126_v2  ;;  %9707 = vmatpush1.bf16.msra.mxu1 %v15129_v21  ;;  %v9876_v2 = vunpack.c.l.b16 %v15174_v44 }
 0x6b0   :  { %9667 = vmatprep.subr.bf16.mxu0 %v15134_v4  ;;  %9708 = vmatprep.subr.bf16.mxu1 %v15137_v55  ;;  %v19516_v4 = vld [vmem:[%s19955_s5 + $0x60] sm:$0xff]  }
 0x6b1   :  { %9697 = vmatprep.mubr.bf16.mxu0 %v20262_v6  ;;  %9738 = vmatprep.mubr.bf16.mxu1 %v20262_v6 }
 0x6b3   :  { %9668 = vmatpush1.bf16.msra.mxu0 %v15132_v52  ;;  %9709 = vmatpush1.bf16.msra.mxu1 %v15135_v58  ;;  %v19527_v52 = vld [vmem:[%s19955_s5 + $0x98] sm:$0xff]  }
 0x6b4   :  { %9669 = vmatprep.subr.bf16.mxu0 %v15140_v34  ;;  %9710 = vmatprep.subr.bf16.mxu1 %v15143_v5  ;;  %v19533_v58 = vld [vmem:[%s19955_s5 + $0xb8] sm:$0xff]   ;;  %v19545_v34 = vld [vmem:[%s19955_s5 + $0x90] sm:$0xff]  }
 0x6b5   :  { %v19551_v5 = vld [vmem:[%s19955_s5 + $0xb0] sm:$0xff]  }
 0x6b7   :  { %9670 = vmatpush1.bf16.msra.mxu0 %v15138_v31  ;;  %9711 = vmatpush1.bf16.msra.mxu1 %v15141_v40  ;;  %v9925_v31 = vrot.slane %v9876_v2, 1  ;;  %v20270_v40 = vld [vmem:[#allocation12_spill] sm:$0xff] }
 0x6b8   :  { %9671 = vmatprep.subr.bf16.mxu0 %v15146_v54  ;;  %9712 = vmatprep.subr.bf16.mxu1 %v15149_v23  ;;  %v20271_v54 = vunpack.c.l.b16 %v20270_v40  ;;  %v19671_v40 = vld [vmem:[%s19955_s5 + $0x110] sm:$0xff]  }
 0x6b9   :  { %20283 = vst [vmem:[#allocation12_spill] sm:$0xff] %v19671_v40 }
 0x6ba   :  { %v9983_v23 = vrot.slane %v20271_v54, 1  ;;  %v10145_v54 = vrot.slane %v10143_v29, 1  ;;  %v15185_v29 = vld [vmem:[#allocation4 + $0x2e8] ss:$16 sps:$4 sm:$0xff]  }
 0x6bb   :  { %9672 = vmatpush1.bf16.msra.mxu0 %v15144_v27  ;;  %9713 = vmatpush1.bf16.msra.mxu1 %v15147_v35  ;;  %v19561_v27 = vld [vmem:[%s19955_s5 + $0x88] sm:$0xff]  }
 0x6bc   :  { %9673 = vmatprep.subr.bf16.mxu0 %v15152_v37  ;;  %9714 = vmatprep.subr.bf16.mxu1 %v15155_v59  ;;  %v19567_v35 = vld [vmem:[%s19955_s5 + $0xa8] sm:$0xff]  }
 0x6bd   :  { %v20272_v37 = vld [vmem:[#allocation11_spill] sm:$0xff] }
 0x6be   :  { %v20273_v59 = vunpack.c.l.b16 %v20272_v37  ;;  %v10144_v37 = vrot.slane %v10142_v49, 2  ;;  %v15184_v49 = vld [vmem:[#allocation4 + $0x2e4] ss:$16 sps:$4 sm:$0xff]  }
 0x6bf   :  { %9674 = vmatpush1.bf16.msra.mxu0 %v15150_v56  ;;  %9715 = vmatpush1.bf16.msra.mxu1 %v15153_v47 }
 0x6c0   :  { %9675 = vmatprep.subr.bf16.mxu0 %v15158_v32  ;;  %9716 = vmatprep.subr.bf16.mxu1 %v15161_v38  ;;  %v9982_v56 = vrot.slane %v20273_v59, 2  ;;  %v19579_v38 = vld [vmem:[%s19955_s5 + $0x80] sm:$0xff]   ;;  %v10146_v59 = vsel %vm20285_vm6, %v10145_v54, %v10144_v37  ;;  %v15208_v54 = vld [vmem:[#allocation4 + $0x264] ss:$16 sps:$4 sm:$0xff]  }
 0x6c1   :  { %v19693_v16 = vpack.c.b16 %v10146_v59, %v10146_v59  ;;  %v15211_v37 = vld [vmem:[#allocation4 + $0x26c] ss:$16 sps:$4 sm:$0xff]   ;;  %v15206_v59 = vld [vmem:[#allocation4 + $0x260] ss:$16 sps:$4 sm:$0xff]  }
 0x6c2   :  { %v9984_v32 = vsel %vm20275_vm9, %v9983_v23, %v9982_v56  ;;  %v19680_v23 = vld [vmem:[%s19955_s5 + $0x108] sm:$0xff]   ;;  %v19690_v56 = vld [vmem:[%s19955_s5 + $0x100] sm:$0xff]   ;;  %vm20301_vm9 = vmmov %vm20280_vm0 }
 0x6c3   :  { %9676 = vmatpush1.bf16.msra.mxu0 %v15156_v3  ;;  %9717 = vmatpush1.bf16.msra.mxu1 %v15159_v10  ;;  %v19585_v3 = vld [vmem:[%s19955_s5 + $0xa0] sm:$0xff]   ;;  %20284 = vst [vmem:[#allocation11_spill] sm:$0xff] %v19680_v23  ;;  %20286 = vst [vmem:[#allocation15_spill] sm:$0xff] %v19690_v56 }
 0x6c4   :  { %9677 = vmatprep.subr.bf16.mxu0 %v15164_v19  ;;  %9718 = vmatprep.subr.bf16.mxu1 %v15167_v18  ;;  %v19588_v19 = vpack.c.b16 %v9984_v32, %v9984_v32  ;;  %v15178_v18 = vld [vmem:[#allocation3 + $0x10] ss:$0 sps:$4 sm:$0x11]   ;;  %20287 = vst [vmem:[#allocation16_spill] sm:$0xff] %v19693_v16  ;;  %v15190_v32 = vld [vmem:[#allocation4 + $0x2c4] ss:$16 sps:$4 sm:$0xff]  }
 0x6c7   :  { %9678 = vmatpush1.bf16.msra.mxu0 %v15162_v36  ;;  %9719 = vmatpush1.bf16.msra.mxu1 %v15165_v8  ;;  %v15179_v36 = vld [vmem:[#allocation3 + $0x24] ss:$0 sps:$4 sm:$0x11]   ;;  %v19598_v8 = vld [vmem:[%s19955_s5 + $0xd8] sm:$0xff]  }
 0x6c8   :  { %9679 = vmatprep.subr.bf16.mxu0 %v15170_v20  ;;  %9720 = vmatprep.subr.bf16.mxu1 %v15173_v22  ;;  %v10038_v20 = vunpack.c.l.b16 %v15178_v18  ;;  %v10039_v22 = vunpack.c.l.b16 %v15179_v36  ;;  %v15188_v18 = vld [vmem:[#allocation4 + $0x2c0] ss:$16 sps:$4 sm:$0xff]   ;;  %v15191_v36 = vld [vmem:[#allocation4 + $0x2c8] ss:$16 sps:$4 sm:$0xff]  }
 0x6ca   :  { %v10040_v33 = vrot.slane %v10039_v22, 7 }
 0x6cb   :  { %9680 = vmatpush1.bf16.msra.mxu0 %v15168_v17  ;;  %9721 = vmatpush1.bf16.msra.mxu1 %v15171_v53  ;;  %v19616_v17 = vld [vmem:[%s19955_s5 + $0xd0] sm:$0xff]  }
 0x6cc   :  { %14608 = vmatprep.subr.bf16.mxu0 %v19991_v0  ;;  %14620 = vmatprep.subr.bf16.mxu1 %v19991_v0  ;;  %v19622_v53 = vld [vmem:[%s19955_s5 + $0xf0] sm:$0xff]  }
 0x6ce   :  { %9698 = vmatmul.mubr.bf16.vlgmr.msra.gmra.mxu0 %v8820_v26  ;;  %9739 = vmatmul.mubr.bf16.vlgmr.msra.gmra.mxu1 %v8820_v26  ;;  %v10087_v26 = vrot.slane %v10038_v20, 1 }
 0x6cf   :  { %14609 = vmatpush3.bf16.msra.mxu0 %v19399_v60  ;;  %14621 = vmatpush3.bf16.msra.mxu1 %v19405_v45 }
 0x6d0   :  { %14610 = vmatprep.subr.bf16.mxu0 %v19991_v0  ;;  %14622 = vmatprep.subr.bf16.mxu1 %v19991_v0  ;;  %v10088_v44 = vsel %vm20279_vm10, %v10039_v22, %v10087_v26  ;;  %v15196_v22 = vld [vmem:[#allocation4 + $0x2a4] ss:$16 sps:$4 sm:$0xff]   ;;  %v15199_v26 = vld [vmem:[#allocation4 + $0x2ac] ss:$16 sps:$4 sm:$0xff]   ;;  %vm11482_vm10 = vcmask 74752  }
 0x6d1   :  { %14616 = vmatprep.mubr.msk.bf16.mxu0 %vm20028_vm11, %v19991_v0  ;;  %14628 = vmatprep.mubr.msk.bf16.mxu1 %vm20028_vm11, %v19991_v0 }
 0x6d3   :  { %14611 = vmatpush3.bf16.msra.mxu0 %v19417_v39  ;;  %14623 = vmatpush3.bf16.msra.mxu1 %v19423_v11 }
 0x6d4   :  { %14612 = vmatprep.subr.bf16.mxu0 %v19991_v0  ;;  %14624 = vmatprep.subr.bf16.mxu1 %v19991_v0 }
 0x6d7   :  { %14613 = vmatpush3.bf16.msra.mxu0 %v19431_v48  ;;  %14625 = vmatpush3.bf16.msra.mxu1 %v19437_v50 }
 0x6d8   :  { %14614 = vmatprep.subr.bf16.mxu0 %v19991_v0  ;;  %14626 = vmatprep.subr.bf16.mxu1 %v19991_v0 }
 0x6db   :  { %14615 = vmatpush3.bf16.msra.mxu0 %v19445_v43  ;;  %14627 = vmatpush3.bf16.msra.mxu1 %v19451_v61 }
 0x6dc   :  { %14632 = vmatprep.subr.bf16.mxu0 %v19991_v0  ;;  %14644 = vmatprep.subr.bf16.mxu1 %v19991_v0 }
 0x6de   :  { %14617 = vmatmul.mubr.msk.bf16.vlgmr.msra.gmra.mxu0 %vm20265_vm8, %v19160_v1  ;;  %14629 = vmatmul.mubr.msk.bf16.vlgmr.msra.gmra.mxu1 %vm20267_vm4, %v20266_v9  ;;  %v9877_v1 = vunpack.c.l.b16 %v15175_v30  ;;  %v19630_v30 = vld [vmem:[%s19955_s5 + $0xc8] sm:$0xff]   ;;  %vm20294_vm8 = vmmov %vm20280_vm0 }
 0x6df   :  { %14633 = vmatpush3.bf16.msra.mxu0 %v19463_v7  ;;  %14645 = vmatpush3.bf16.msra.mxu1 %v19469_v42  ;;  %v19636_v9 = vld [vmem:[%s19955_s5 + $0xe8] sm:$0xff]   ;;  %vm20295_vm4 = vmmov %vm20280_vm0 }
 0x6e0   :  { %14634 = vmatprep.subr.bf16.mxu0 %v19991_v0  ;;  %14646 = vmatprep.subr.bf16.mxu1 %v19991_v0  ;;  %v9878_v25 = vrot.slane %v9877_v1, 7  ;;  %v9926_v47 = vsel %vm20274_vm5, %v9877_v1, %v9925_v31  ;;  %v10041_v1 = vsel %vm20278_vm7, %v10040_v33, %v10038_v20  ;;  %v19661_v31 = vld [vmem:[%s19955_s5 + $0x118] sm:$0xff]   ;;  %v15197_v33 = vld [vmem:[#allocation4 + $0x2a8] ss:$16 sps:$4 sm:$0xff]  }
 0x6e1   :  { %14640 = vmatprep.mubr.msk.bf16.mxu0 %vm20028_vm11, %v19991_v0  ;;  %14652 = vmatprep.mubr.msk.bf16.mxu1 %vm20028_vm11, %v19991_v0  ;;  %v9927_v10 = vpack.c.b16 %v9926_v47, %v9926_v47  ;;  %20282 = vst [vmem:[#allocation14_spill] sm:$0xff] %v19661_v31  ;;  %v15187_v47 = vld [vmem:[#allocation4 + $0x2ec] ss:$16 sps:$4 sm:$0xff]   ;;  %v15194_v20 = vld [vmem:[#allocation4 + $0x2a0] ss:$16 sps:$4 sm:$0xff]  }
 0x6e2   :  { %v9879_v21 = vsel %vm20268_vm12, %v9878_v25, %v9876_v2  ;;  %v19646_v25 = vld [vmem:[%s19955_s5 + $0xc0] sm:$0xff]   ;;  %vm20296_vm12 = vmmov %vm20280_vm0 }
 0x6e3   :  { %14635 = vmatpush3.bf16.msra.mxu0 %v19481_v28  ;;  %14647 = vmatpush3.bf16.msra.mxu1 %v19487_v41  ;;  %v9880_v55 = vpack.c.b16 %v9879_v21, %v9879_v21  ;;  %v19652_v2 = vld [vmem:[%s19955_s5 + $0xe0] sm:$0xff]   ;;  %v10042_v21 = vpack.c.b16 %v10041_v1, %v10041_v1  ;;  %v15202_v1 = vld [vmem:[#allocation4 + $0x284] ss:$16 sps:$4 sm:$0xff]  }
 0x6e4   :  { %14636 = vmatprep.subr.bf16.mxu0 %v19991_v0  ;;  %14648 = vmatprep.subr.bf16.mxu1 %v19991_v0 }
 0x6e7   :  { %14637 = vmatpush3.bf16.msra.mxu0 %v19495_v24  ;;  %14649 = vmatpush3.bf16.msra.mxu1 %v19501_v12 }
 0x6e8   :  { %14638 = vmatprep.subr.bf16.mxu0 %v19991_v0  ;;  %14650 = vmatprep.subr.bf16.mxu1 %v19991_v0 }
 0x6eb   :  { %14639 = vmatpush3.bf16.msra.mxu0 %v19510_v14  ;;  %14651 = vmatpush3.bf16.msra.mxu1 %v19516_v4 }
 0x6ec   :  { %14656 = vmatprep.subr.bf16.mxu0 %v19991_v0  ;;  %14668 = vmatprep.subr.bf16.mxu1 %v19991_v0 }
 0x6ee   :  { %14641 = vmatmul.mubr.msk.bf16.vlgmr.msra.gmra.mxu0 %vm20269_vm15, %v19208_v15  ;;  %14653 = vmatmul.mubr.msk.bf16.vlgmr.msra.gmra.mxu1 %vm20240_vm1, %v9880_v55  ;;  %v10089_v55 = vpack.c.b16 %v10088_v44, %v10088_v44  ;;  %v15205_v44 = vld [vmem:[#allocation4 + $0x28c] ss:$16 sps:$4 sm:$0xff]   ;;  %vm20297_vm15 = vmmov %vm20280_vm0 }
 0x6ef   :  { %14657 = vmatpush3.bf16.msra.mxu0 %v19527_v52  ;;  %14669 = vmatpush3.bf16.msra.mxu1 %v19533_v58  ;;  %vm20298_vm1 = vmmov %vm20274_vm5 }
 0x6f0   :  { %14658 = vmatprep.subr.bf16.mxu0 %v19991_v0  ;;  %14670 = vmatprep.subr.bf16.mxu1 %v19991_v0  ;;  %vm20300_vm5 = vmmov %vm20280_vm0 }
 0x6f1   :  { %14664 = vmatprep.mubr.msk.bf16.mxu0 %vm20028_vm11, %v19991_v0  ;;  %14676 = vmatprep.mubr.msk.bf16.mxu1 %vm20028_vm11, %v19991_v0  ;;  %vm20309_vm7 = vmmov %vm20298_vm1 }
 0x6f3   :  { %14659 = vmatpush3.bf16.msra.mxu0 %v19545_v34  ;;  %14671 = vmatpush3.bf16.msra.mxu1 %v19551_v5 }
 0x6f4   :  { %14660 = vmatprep.subr.bf16.mxu0 %v19991_v0  ;;  %14672 = vmatprep.subr.bf16.mxu1 %v19991_v0 }
 0x6f7   :  { %14661 = vmatpush3.bf16.msra.mxu0 %v19561_v27  ;;  %14673 = vmatpush3.bf16.msra.mxu1 %v19567_v35 }
 0x6f8   :  { %14662 = vmatprep.subr.bf16.mxu0 %v19991_v0  ;;  %14674 = vmatprep.subr.bf16.mxu1 %v19991_v0 }
 0x6fb   :  { %14663 = vmatpush3.bf16.msra.mxu0 %v19579_v38  ;;  %14675 = vmatpush3.bf16.msra.mxu1 %v19585_v3 }
 0x6fc   :  { %14680 = vmatprep.subr.bf16.mxu0 %v19991_v0  ;;  %14692 = vmatprep.subr.bf16.mxu1 %v19991_v0 }
 0x6fe   :  { %14665 = vmatmul.mubr.msk.bf16.vlgmr.msra.gmra.mxu0 %vm20276_vm14, %v9927_v10  ;;  %14677 = vmatmul.mubr.msk.bf16.vlgmr.msra.gmra.mxu1 %vm20277_vm3, %v19588_v19  ;;  %v15193_v10 = vld [vmem:[#allocation4 + $0x2cc] ss:$16 sps:$4 sm:$0xff]   ;;  %vm20303_vm14 = vmmov %vm20280_vm0 }
 0x6ff   :  { %14681 = vmatpush3.bf16.msra.mxu0 %v19598_v8  ;;  %14693 = vmatpush3.bf16.msra.mxu1 %v19604_v62  ;;  %vm20304_vm3 = vmmov %vm20280_vm0 }
 0x700   :  { %14682 = vmatprep.subr.bf16.mxu0 %v19991_v0  ;;  %14694 = vmatprep.subr.bf16.mxu1 %v19991_v0 }
 0x701   :  { %14688 = vmatprep.mubr.msk.bf16.mxu0 %vm20028_vm11, %v19991_v0  ;;  %14700 = vmatprep.mubr.msk.bf16.mxu1 %vm20028_vm11, %v19991_v0 }
 0x703   :  { %14683 = vmatpush3.bf16.msra.mxu0 %v19616_v17  ;;  %14695 = vmatpush3.bf16.msra.mxu1 %v19622_v53 }
 0x704   :  { %14684 = vmatprep.subr.bf16.mxu0 %v19991_v0  ;;  %14696 = vmatprep.subr.bf16.mxu1 %v19991_v0 }
 0x707   :  { %14685 = vmatpush3.bf16.msra.mxu0 %v19630_v30  ;;  %14697 = vmatpush3.bf16.msra.mxu1 %v19636_v9 }
 0x708   :  { %14686 = vmatprep.subr.bf16.mxu0 %v19991_v0  ;;  %14698 = vmatprep.subr.bf16.mxu1 %v19991_v0 }
 0x70b   :  { %14687 = vmatpush3.bf16.msra.mxu0 %v19646_v25  ;;  %14699 = vmatpush3.bf16.msra.mxu1 %v19652_v2 }
 0x70c   :  { %14704 = vmatprep.subr.bf16.mxu0 %v19991_v0  ;;  %10355 = vmatprep.subr.bf16.mxu1 %v15184_v49  ;;  %v15214_v49 = vld [vmem:[#allocation4 + $0x244] ss:$16 sps:$4 sm:$0xff]  }
 0x70e   :  { %14689 = vmatmul.mubr.msk.bf16.vlgmr.msra.gmra.mxu0 %vm20280_vm0, %v10042_v21  ;;  %14701 = vmatmul.mubr.msk.bf16.vlgmr.msra.gmra.mxu1 %vm20281_vm13, %v10089_v55  ;;  %v15200_v21 = vld [vmem:[#allocation4 + $0x280] ss:$16 sps:$4 sm:$0xff]   ;;  %v15203_v55 = vld [vmem:[#allocation4 + $0x288] ss:$16 sps:$4 sm:$0xff]  }
 0x70f   :  { %14705 = vmatpush3.bf16.msra.mxu0 %v19661_v31  ;;  %14712 = vmatprep.mubr.msk.bf16.mxu0 %vm20028_vm11, %v19991_v0 }
 0x710   :  { %14706 = vmatprep.subr.bf16.mxu0 %v19991_v0  ;;  %10387 = vmatprep.mubr.bf16.mxu1 %v20262_v6 }
 0x711   :  { %10356 = vmatpush1.bf16.msra.mxu1 %v15182_v46  ;;  %v15209_v46 = vld [vmem:[#allocation4 + $0x268] ss:$16 sps:$4 sm:$0xff]  }
 0x712   :  { %10357 = vmatprep.subr.bf16.mxu1 %v15190_v32  ;;  %v15215_v32 = vld [vmem:[#allocation4 + $0x248] ss:$16 sps:$4 sm:$0xff]  }
 0x713   :  { %14707 = vmatpush3.bf16.msra.mxu0 %v19671_v40 }
 0x714   :  { %14708 = vmatprep.subr.bf16.mxu0 %v19991_v0 }
 0x715   :  { %10358 = vmatpush1.bf16.msra.mxu1 %v15188_v18  ;;  %v15220_v18 = vld [vmem:[#allocation4 + $0x224] ss:$16 sps:$4 sm:$0xff]  }
 0x716   :  { %10359 = vmatprep.subr.bf16.mxu1 %v15196_v22  ;;  %v15226_v22 = vld [vmem:[#allocation4 + $0x204] ss:$16 sps:$4 sm:$0xff]  }
 0x717   :  { %14709 = vmatpush3.bf16.msra.mxu0 %v19680_v23 }
 0x718   :  { %14710 = vmatprep.subr.bf16.mxu0 %v19991_v0 }
 0x719   :  { %10360 = vmatpush1.bf16.msra.mxu1 %v15194_v20  ;;  %v15223_v20 = vld [vmem:[#allocation4 + $0x22c] ss:$16 sps:$4 sm:$0xff]  }
 0x71a   :  { %10361 = vmatprep.subr.bf16.mxu1 %v15202_v1  ;;  %v15227_v1 = vld [vmem:[#allocation4 + $0x208] ss:$16 sps:$4 sm:$0xff]  }
 0x71b   :  { %14711 = vmatpush3.bf16.msra.mxu0 %v19690_v56 }
 0x71c   :  { %10396 = vmatprep.subr.bf16.mxu0 %v15187_v47  ;;  %v15212_v47 = vld [vmem:[#allocation4 + $0x240] ss:$16 sps:$4 sm:$0xff]  }
 0x71d   :  { %10362 = vmatpush1.bf16.msra.mxu1 %v15200_v21 }
 0x71e   :  { %14713 = vmatmul.mubr.msk.bf16.vlgmr.msra.gmra.mxu0 %vm20288_vm2, %v19693_v16  ;;  %10363 = vmatprep.subr.bf16.mxu1 %v15208_v54 }
 0x71f   :  { %10428 = vmatprep.mubr.bf16.mxu0 %v20262_v6  ;;  %10397 = vmatpush1.bf16.msra.mxu0 %v15185_v29  ;;  %v15217_v29 = vld [vmem:[#allocation4 + $0x24c] ss:$16 sps:$4 sm:$0xff]  }
 0x720   :  { %10398 = vmatprep.subr.bf16.mxu0 %v15193_v10  ;;  %v15218_v10 = vld [vmem:[#allocation4 + $0x220] ss:$16 sps:$4 sm:$0xff]  }
 0x721   :  { %10364 = vmatpush1.bf16.msra.mxu1 %v15206_v59 }
 0x722   :  { %10365 = vmatprep.subr.bf16.mxu1 %v15214_v49 }
 0x723   :  { %10399 = vmatpush1.bf16.msra.mxu0 %v15191_v36  ;;  %v15221_v36 = vld [vmem:[#allocation4 + $0x228] ss:$16 sps:$4 sm:$0xff]  }
 0x724   :  { %10400 = vmatprep.subr.bf16.mxu0 %v15199_v26  ;;  %v15224_v26 = vld [vmem:[#allocation4 + $0x200] ss:$16 sps:$4 sm:$0xff]  }
 0x725   :  { %10366 = vmatpush1.bf16.msra.mxu1 %v15212_v47 }
 0x726   :  { %10367 = vmatprep.subr.bf16.mxu1 %v15220_v18 }
 0x727   :  { %10401 = vmatpush1.bf16.msra.mxu0 %v15197_v33  ;;  %v15229_v33 = vld [vmem:[#allocation4 + $0x20c] ss:$16 sps:$4 sm:$0xff]  }
 0x728   :  { %10402 = vmatprep.subr.bf16.mxu0 %v15205_v44 }
 0x729   :  { %10368 = vmatpush1.bf16.msra.mxu1 %v15218_v10 }
 0x72a   :  { %10369 = vmatprep.subr.bf16.mxu1 %v15226_v22 }
 0x72b   :  { %10403 = vmatpush1.bf16.msra.mxu0 %v15203_v55 }
 0x72c   :  { %10404 = vmatprep.subr.bf16.mxu0 %v15211_v37 }
 0x72d   :  { %10370 = vmatpush1.bf16.msra.mxu1 %v15224_v26 }
 0x72e   :  { %14716 = vmatprep.subr.bf16.mxu1 %v19991_v0 }
 0x72f   :  { %10405 = vmatpush1.bf16.msra.mxu0 %v15209_v46 }
 0x730   :  { %10406 = vmatprep.subr.bf16.mxu0 %v15217_v29 }
 0x733   :  { %10407 = vmatpush1.bf16.msra.mxu0 %v15215_v32 }
 0x734   :  { %10408 = vmatprep.subr.bf16.mxu0 %v15223_v20 }
 0x737   :  { %10409 = vmatpush1.bf16.msra.mxu0 %v15221_v36 }
 0x738   :  { %10410 = vmatprep.subr.bf16.mxu0 %v15229_v33 }
 0x73b   :  { %10411 = vmatpush1.bf16.msra.mxu0 %v15227_v1 }
 0x73c   :  { %14728 = vmatprep.subr.bf16.mxu0 %v19991_v0 }
 0x76e   :  { %v9457_v44 = vpop.f32.mrf.mxu0  ;;  %v9498_v21 = vpop.f32.mrf.mxu1 }
 0x770   :  { %v9459_v55 = vpop.f32.mrf.mxu0  ;;  %v9500_v54 = vpop.f32.mrf.mxu1 }
 0x772   :  { %v9461_v37 = vpop.f32.mrf.mxu0  ;;  %v9502_v59 = vpop.f32.mrf.mxu1 }
 0x774   :  { %v9462_v46 = vpop.f32.mrf.mxu0  ;;  %v9503_v49 = vpop.f32.mrf.mxu1 }
 0x78e   :  { %v9699_v29 = vpop.f32.mrf.mxu0  ;;  %v9740_v47 = vpop.f32.mrf.mxu1 }
 0x78f   :  { %v19700_v32 = vadd.f32 %v9699_v29, %v9457_v44  ;;  %v19702_v10 = vadd.f32 %v9740_v47, %v9498_v21 }
 0x790   :  { %v9701_v18 = vpop.f32.mrf.mxu0  ;;  %v9742_v36 = vpop.f32.mrf.mxu1 }
 0x791   :  { %20289 = vst [vmem:[#allocation17_spill] sm:$0xff] %v19700_v32  ;;  %20290 = vst [vmem:[#allocation18_spill] sm:$0xff] %v19702_v10  ;;  %v19704_v20 = vadd.f32 %v9701_v18, %v9459_v55  ;;  %v19706_v22 = vadd.f32 %v9742_v36, %v9500_v54 }
 0x792   :  { %v9703_v33 = vpop.f32.mrf.mxu0  ;;  %v9744_v26 = vpop.f32.mrf.mxu1 }
 0x793   :  { %20291 = vst [vmem:[#allocation19_spill] sm:$0xff] %v19704_v20  ;;  %20292 = vst [vmem:[#allocation20_spill] sm:$0xff] %v19706_v22 }
 0x794   :  { %v9704_v1 = vpop.f32.mrf.mxu0  ;;  %v9745_v0 = vpop.f32.mrf.mxu1 }
 0x79e   :  { %v9781_v37 = vpop.f32.mrf.mxu0  ;;  %v9821_v59 = vpop.f32.mrf.mxu1 }
 0x7a0   :  { %v14618_v46 = vpop.f32.mrf.mxu0  ;;  %v14630_v49 = vpop.f32.mrf.mxu1 }
 0x7a2   :  { %v9784_v56 = vpop.f32.mrf.mxu0  ;;  %v9824_v23 = vpop.f32.mrf.mxu1 }
 0x7a3   :  { %v9822_v56 = vadd.f32 %v9821_v59, %v9781_v37 }
 0x7a4   :  { %v14619_v44 = vpop.f32.mrf.mxu0  ;;  %v14631_v29 = vpop.f32.mrf.mxu1 }
 0x7ae   :  { %v9861_v21 = vpop.f32.mrf.mxu0  ;;  %v9918_v47 = vpop.f32.mrf.mxu1 }
 0x7af   :  { %v9867_v23 = vadd.f32 %v9861_v21, %v9822_v56  ;;  %v15261_v56 = vld [vmem:[#allocation4 + $0x368] ss:$16 sps:$4 sm:$0xff]  }
 0x7b0   :  { %v14642_v10 = vpop.f32.mrf.mxu0  ;;  %v14654_v32 = vpop.f32.mrf.mxu1 }
 0x7b1   :  { %v9924_v10 = vadd.f32 %v9918_v47, %v9867_v23  ;;  %v15260_v47 = vld [vmem:[#allocation4 + $0x364] ss:$16 sps:$4 sm:$0xff]  }
 0x7b2   :  { %v9864_v55 = vpop.f32.mrf.mxu0  ;;  %v9921_v18 = vpop.f32.mrf.mxu1  ;;  %v15266_v23 = vld [vmem:[#allocation4 + $0x344] ss:$16 sps:$4 sm:$0xff]  }
 0x7b4   :  { %v14643_v54 = vpop.f32.mrf.mxu0  ;;  %v14655_v36 = vpop.f32.mrf.mxu1 }
 0x7be   :  { %v9965_v33 = vpop.f32.mrf.mxu0  ;;  %v10023_v26 = vpop.f32.mrf.mxu1 }
 0x7bf   :  { %v9971_v18 = vadd.f32 %v9965_v33, %v9924_v10  ;;  %v15263_v33 = vld [vmem:[#allocation4 + $0x36c] ss:$16 sps:$4 sm:$0xff]   ;;  %v15267_v10 = vld [vmem:[#allocation4 + $0x348] ss:$16 sps:$4 sm:$0xff]  }
 0x7c0   :  { %v14666_v1 = vpop.f32.mrf.mxu0  ;;  %v14678_v0 = vpop.f32.mrf.mxu1 }
 0x7c1   :  { %v10029_v31 = vadd.f32 %v10023_v26, %v9971_v18  ;;  %v15258_v26 = vld [vmem:[#allocation4 + $0x360] ss:$16 sps:$4 sm:$0xff]   ;;  %v15273_v18 = vld [vmem:[#allocation4 + $0x328] ss:$16 sps:$4 sm:$0xff]  }
 0x7c2   :  { %v9968_v22 = vpop.f32.mrf.mxu0  ;;  %v10026_v20 = vpop.f32.mrf.mxu1 }
 0x7c4   :  { %v14667_v46 = vpop.f32.mrf.mxu0  ;;  %v14679_v49 = vpop.f32.mrf.mxu1 }
 0x7ce   :  { %v10080_v44 = vpop.f32.mrf.mxu0  ;;  %v10127_v29 = vpop.f32.mrf.mxu1 }
 0x7cf   :  { %v10086_v16 = vadd.f32 %v10080_v44, %v10029_v31  ;;  %v15257_v31 = vld [vmem:[#allocation4 + $0x38c] ss:$16 sps:$4 sm:$0xff]  }
 0x7d0   :  { %v14690_v40 = vpop.f32.mrf.mxu0  ;;  %v14702_v6 = vpop.f32.mrf.mxu1  ;;  %v15269_v44 = vld [vmem:[#allocation4 + $0x34c] ss:$16 sps:$4 sm:$0xff]  }
 0x7d1   :  { %v10133_v1 = vadd.f32 %v10127_v29, %v10086_v16  ;;  %v20293_v6 = vmov 0.0   ;;  %v15252_v40 = vld [vmem:[#allocation4 + $0x380] ss:$16 sps:$4 sm:$0xff]   ;;  %v15255_v16 = vld [vmem:[#allocation4 + $0x388] ss:$16 sps:$4 sm:$0xff]  }
 0x7d2   :  { %v10083_v32 = vpop.f32.mrf.mxu0  ;;  %v10130_v55 = vpop.f32.mrf.mxu1  ;;  %v15264_v29 = vld [vmem:[#allocation4 + $0x340] ss:$16 sps:$4 sm:$0xff]  }
 0x7d3   :  { %v15270_v32 = vld [vmem:[#allocation4 + $0x320] ss:$16 sps:$4 sm:$0xff]   ;;  %v15272_v55 = vld [vmem:[#allocation4 + $0x324] ss:$16 sps:$4 sm:$0xff]  }
 0x7d4   :  { %v14691_v54 = vpop.f32.mrf.mxu0  ;;  %v14703_v36 = vpop.f32.mrf.mxu1 }
 0x7d5   :  { %v15275_v54 = vld [vmem:[#allocation4 + $0x32c] ss:$16 sps:$4 sm:$0xff]   ;;  %v15278_v36 = vld [vmem:[#allocation4 + $0x304] ss:$16 sps:$4 sm:$0xff]  }
 0x7de   :  { %v10185_v0 = vpop.f32.mrf.mxu0 }
 0x7df   :  { %v10191_v22 = vadd.f32 %v10185_v0, %v10133_v1  ;;  %v15281_v1 = vld [vmem:[#allocation4 + $0x30c] ss:$16 sps:$4 sm:$0xff]   ;;  %v15276_v0 = vld [vmem:[#allocation4 + $0x300] ss:$16 sps:$4 sm:$0xff]  }
 0x7e0   :  { %v14714_v20 = vpop.f32.mrf.mxu0 }
 0x7e1   :  { %v10192_v46 = vadd.f32 %v19387_v63, %v10191_v22  ;;  %v15279_v22 = vld [vmem:[#allocation4 + $0x308] ss:$16 sps:$4 sm:$0xff]   ;;  %v15282_v20 = vld [vmem:[%s19959_s9 + $0x78] sm:$0xff]  }
 0x7e2   :  { %v10188_v37 = vpop.f32.mrf.mxu0 }
 0x7e3   :  { %v10193_v59 = vmax.f32 %v10192_v46, 0.0  ;;  %v15283_v46 = vld [vmem:[%s19959_s9 + $0xf8] sm:$0xff]  }
 0x7e4   :  { %v14715_v21 = vpop.f32.mrf.mxu0 }
 0x7e5   :  { %v10194_v49 = vpack.c.bf16 %v10193_v59, %v10193_v59  ;;  %v20312_v21 = vld [vmem:[#allocation17_spill] sm:$0xff] }
 0x7e7   :  { %10388 = vmatmul.mubr.bf16.vlgmr.msra.gmra.mxu1 %v10194_v49  ;;  %10429 = vmatmul.mubr.bf16.vlgmr.msra.gmra.mxu0 %v10194_v49 }
 0x7e8   :  { %14717 = vmatpush3.bf16.msra.mxu1 %v19399_v60  ;;  %14729 = vmatpush3.bf16.msra.mxu0 %v19405_v45 }
 0x7e9   :  { %14718 = vmatprep.subr.bf16.mxu1 %v20293_v6  ;;  %14730 = vmatprep.subr.bf16.mxu0 %v20293_v6 }
 0x7ea   :  { %14724 = vmatprep.mubr.msk.bf16.mxu1 %vm20028_vm11, %v20293_v6  ;;  %14736 = vmatprep.mubr.msk.bf16.mxu0 %vm20028_vm11, %v20293_v6 }
 0x7ec   :  { %14719 = vmatpush3.bf16.msra.mxu1 %v19417_v39  ;;  %14731 = vmatpush3.bf16.msra.mxu0 %v19423_v11  ;;  %v20299_v11 = vld [vmem:[#allocation13_spill] sm:$0xff] }
 0x7ed   :  { %14720 = vmatprep.subr.bf16.mxu1 %v20293_v6  ;;  %14732 = vmatprep.subr.bf16.mxu0 %v20293_v6 }
 0x7f0   :  { %14721 = vmatpush3.bf16.msra.mxu1 %v19431_v48  ;;  %14733 = vmatpush3.bf16.msra.mxu0 %v19437_v50  ;;  %v10606_v48 = vpack.c.b16 %v20299_v11, %v20299_v11 }
 0x7f1   :  { %14722 = vmatprep.subr.bf16.mxu1 %v20293_v6  ;;  %14734 = vmatprep.subr.bf16.mxu0 %v20293_v6 }
 0x7f4   :  { %14723 = vmatpush3.bf16.msra.mxu1 %v19445_v43  ;;  %14735 = vmatpush3.bf16.msra.mxu0 %v19451_v61  ;;  %v10753_v43 = vpack.c.b16 %v19371_v57, %v19371_v57  ;;  %v15233_v61 = vld [vmem:[#allocation3 + $0x24] ss:$0 sps:$4 sm:$0x44]   ;;  %v20307_v57 = vld [vmem:[#allocation12_spill] sm:$0xff] }
 0x7f5   :  { %14740 = vmatprep.subr.bf16.mxu1 %v20293_v6  ;;  %14752 = vmatprep.subr.bf16.mxu0 %v20293_v6 }
 0x7f7   :  { %14725 = vmatmul.mubr.msk.bf16.vlgmr.msra.gmra.mxu1 %vm20294_vm8, %v19331_v13  ;;  %14737 = vmatmul.mubr.msk.bf16.vlgmr.msra.gmra.mxu0 %vm20295_vm4, %v19208_v15  ;;  %v15231_v15 = vld [vmem:[#allocation3 + $0x20] ss:$0 sps:$4 sm:$0x44]   ;;  %v15230_v13 = vld [vmem:[#allocation3 + $0xc] ss:$0 sps:$4 sm:$0x44]  }
 0x7f8   :  { %14741 = vmatpush3.bf16.msra.mxu1 %v19463_v7  ;;  %14753 = vmatpush3.bf16.msra.mxu0 %v19469_v42  ;;  %v10660_v63 = vunpack.c.l.b16 %v15231_v15  ;;  %v20302_v7 = vld [vmem:[#allocation16_spill] sm:$0xff]  ;;  %v20305_v42 = vld [vmem:[#allocation14_spill] sm:$0xff] }
 0x7f9   :  { %14742 = vmatprep.subr.bf16.mxu1 %v20293_v6  ;;  %14754 = vmatprep.subr.bf16.mxu0 %v20293_v6 }
 0x7fa   :  { %14748 = vmatprep.mubr.msk.bf16.mxu1 %vm20028_vm11, %v20293_v6  ;;  %14760 = vmatprep.mubr.msk.bf16.mxu0 %vm20028_vm11, %v20293_v6  ;;  %v10662_v60 = vrot.slane %v10660_v63, 3 }
 0x7fc   :  { %14743 = vmatpush3.bf16.msra.mxu1 %v19481_v28  ;;  %14755 = vmatpush3.bf16.msra.mxu0 %v19487_v41  ;;  %v15232_v28 = vld [vmem:[#allocation3 + $0x10] ss:$0 sps:$4 sm:$0x44]   ;;  %v20306_v41 = vmov 0  }
 0x7fd   :  { %14744 = vmatprep.subr.bf16.mxu1 %v20293_v6  ;;  %14756 = vmatprep.subr.bf16.mxu0 %v20293_v6 }
 0x800   :  { %14745 = vmatpush3.bf16.msra.mxu1 %v19495_v24  ;;  %14757 = vmatpush3.bf16.msra.mxu0 %v19501_v12  ;;  %v10807_v24 = vunpack.c.l.b16 %v15233_v61  ;;  %v10806_v12 = vunpack.c.l.b16 %v15232_v28 }
 0x801   :  { %14746 = vmatprep.subr.bf16.mxu1 %v20293_v6  ;;  %14758 = vmatprep.subr.bf16.mxu0 %v20293_v6 }
 0x804   :  { %14747 = vmatpush3.bf16.msra.mxu1 %v19510_v14  ;;  %14759 = vmatpush3.bf16.msra.mxu0 %v19516_v4  ;;  %v10809_v14 = vrot.slane %v10807_v24, 3  ;;  %v20308_v4 = vld [vmem:[#allocation11_spill] sm:$0xff] }
 0x805   :  { %14764 = vmatprep.subr.bf16.mxu1 %v20293_v6  ;;  %14776 = vmatprep.subr.bf16.mxu0 %v20293_v6 }
 0x807   :  { %14749 = vmatmul.mubr.msk.bf16.vlgmr.msra.gmra.mxu1 %vm20296_vm12, %v19338_v51  ;;  %14761 = vmatmul.mubr.msk.bf16.vlgmr.msra.gmra.mxu0 %vm20297_vm15, %v19588_v19  ;;  %v10659_v51 = vunpack.c.l.b16 %v15230_v13  ;;  %v15242_v19 = vld [vmem:[#allocation4 + $0x3c4] ss:$16 sps:$4 sm:$0xff]  }
 0x808   :  { %14765 = vmatpush3.bf16.msra.mxu1 %v19527_v52  ;;  %14777 = vmatpush3.bf16.msra.mxu0 %v19533_v58  ;;  %v10808_v52 = vrot.slane %v10806_v12, 4 }
 0x809   :  { %14766 = vmatprep.subr.bf16.mxu1 %v20293_v6  ;;  %14778 = vmatprep.subr.bf16.mxu0 %v20293_v6  ;;  %v10661_v45 = vrot.slane %v10659_v51, 4  ;;  %v20314_v51 = vld [vmem:[#allocation19_spill] sm:$0xff] }
 0x80a   :  { %14772 = vmatprep.mubr.msk.bf16.mxu1 %vm20028_vm11, %v20293_v6  ;;  %14784 = vmatprep.mubr.msk.bf16.mxu0 %vm20028_vm11, %v20293_v6  ;;  %v10810_v58 = vsel %vm20309_vm7, %v10809_v14, %v10808_v52 }
 0x80b   :  { %v10663_v39 = vsel %vm20298_vm1, %v10662_v60, %v10661_v45  ;;  %v20315_v45 = vld [vmem:[#allocation20_spill] sm:$0xff] }
 0x80c   :  { %14767 = vmatpush3.bf16.msra.mxu1 %v19545_v34  ;;  %14779 = vmatpush3.bf16.msra.mxu0 %v19551_v5  ;;  %v10664_v50 = vpack.c.b16 %v10663_v39, %v10663_v39  ;;  %v20310_v34 = vld [vmem:[#allocation15_spill] sm:$0xff]  ;;  %v10811_v5 = vpack.c.b16 %v10810_v58, %v10810_v58 }
 0x80d   :  { %14768 = vmatprep.subr.bf16.mxu1 %v20293_v6  ;;  %14780 = vmatprep.subr.bf16.mxu0 %v20293_v6 }
 0x810   :  { %14769 = vmatpush3.bf16.msra.mxu1 %v19561_v27  ;;  %14781 = vmatpush3.bf16.msra.mxu0 %v19567_v35  ;;  %v15234_v27 = vld [vmem:[#allocation4 + $0x3e0] ss:$16 sps:$4 sm:$0xff]   ;;  %v15236_v35 = vld [vmem:[#allocation4 + $0x3e4] ss:$16 sps:$4 sm:$0xff]  }
 0x811   :  { %14770 = vmatprep.subr.bf16.mxu1 %v20293_v6  ;;  %14782 = vmatprep.subr.bf16.mxu0 %v20293_v6 }
 0x814   :  { %14771 = vmatpush3.bf16.msra.mxu1 %v19579_v38  ;;  %14783 = vmatpush3.bf16.msra.mxu0 %v19585_v3  ;;  %v15237_v38 = vld [vmem:[#allocation4 + $0x3e8] ss:$16 sps:$4 sm:$0xff]   ;;  %v15239_v3 = vld [vmem:[#allocation4 + $0x3ec] ss:$16 sps:$4 sm:$0xff]  }
 0x815   :  { %14788 = vmatprep.subr.bf16.mxu1 %v20293_v6  ;;  %14800 = vmatprep.subr.bf16.mxu0 %v20293_v6 }
 0x817   :  { %14773 = vmatmul.mubr.msk.bf16.vlgmr.msra.gmra.mxu1 %vm20300_vm5, %v10606_v48  ;;  %14785 = vmatmul.mubr.msk.bf16.vlgmr.msra.gmra.mxu0 %vm20301_vm9, %v10664_v50 }
 0x818   :  { %14789 = vmatpush3.bf16.msra.mxu1 %v19598_v8  ;;  %14801 = vmatpush3.bf16.msra.mxu0 %v19604_v62  ;;  %v15245_v8 = vld [vmem:[#allocation4 + $0x3cc] ss:$16 sps:$4 sm:$0xff]   ;;  %v15240_v62 = vld [vmem:[#allocation4 + $0x3c0] ss:$16 sps:$4 sm:$0xff]  }
 0x819   :  { %14790 = vmatprep.subr.bf16.mxu1 %v20293_v6  ;;  %14802 = vmatprep.subr.bf16.mxu0 %v20293_v6 }
 0x81a   :  { %14796 = vmatprep.mubr.msk.bf16.mxu1 %vm20028_vm11, %v20293_v6  ;;  %14808 = vmatprep.mubr.msk.bf16.mxu0 %vm20028_vm11, %v20293_v6 }
 0x81c   :  { %14791 = vmatpush3.bf16.msra.mxu1 %v19616_v17  ;;  %14803 = vmatpush3.bf16.msra.mxu0 %v19622_v53  ;;  %v15243_v17 = vld [vmem:[#allocation4 + $0x3c8] ss:$16 sps:$4 sm:$0xff]   ;;  %v15246_v53 = vld [vmem:[#allocation4 + $0x3a0] ss:$16 sps:$4 sm:$0xff]  }
 0x81d   :  { %14792 = vmatprep.subr.bf16.mxu1 %v20293_v6  ;;  %14804 = vmatprep.subr.bf16.mxu0 %v20293_v6 }
 0x820   :  { %14793 = vmatpush3.bf16.msra.mxu1 %v19630_v30  ;;  %14805 = vmatpush3.bf16.msra.mxu0 %v19636_v9  ;;  %v15248_v30 = vld [vmem:[#allocation4 + $0x3a4] ss:$16 sps:$4 sm:$0xff]   ;;  %v15249_v9 = vld [vmem:[#allocation4 + $0x3a8] ss:$16 sps:$4 sm:$0xff]  }
 0x821   :  { %14794 = vmatprep.subr.bf16.mxu1 %v20293_v6  ;;  %14806 = vmatprep.subr.bf16.mxu0 %v20293_v6 }
 0x824   :  { %14795 = vmatpush3.bf16.msra.mxu1 %v19646_v25  ;;  %14807 = vmatpush3.bf16.msra.mxu0 %v19652_v2  ;;  %v15251_v25 = vld [vmem:[#allocation4 + $0x3ac] ss:$16 sps:$4 sm:$0xff]   ;;  %v15254_v2 = vld [vmem:[#allocation4 + $0x384] ss:$16 sps:$4 sm:$0xff]  }
 0x825   :  { %14812 = vmatprep.subr.bf16.mxu1 %v20293_v6  ;;  %11019 = vmatprep.subr.bf16.mxu0 %v15236_v35 }
 0x827   :  { %14797 = vmatmul.mubr.msk.bf16.vlgmr.msra.gmra.mxu1 %vm20303_vm14, %v20302_v7  ;;  %14809 = vmatmul.mubr.msk.bf16.vlgmr.msra.gmra.mxu0 %vm20304_vm3, %v10753_v43 }
 0x828   :  { %14813 = vmatpush3.bf16.msra.mxu1 %v20305_v42  ;;  %14820 = vmatprep.mubr.msk.bf16.mxu1 %vm20028_vm11, %v20293_v6  ;;  %vm20311_vm11 = vmmov %vm20280_vm0 }
 0x829   :  { %14814 = vmatprep.subr.bf16.mxu1 %v20293_v6  ;;  %11051 = vmatprep.mubr.bf16.mxu0 %v20306_v41 }
 0x82a   :  { %11020 = vmatpush1.bf16.msra.mxu0 %v15234_v27 }
 0x82b   :  { %11021 = vmatprep.subr.bf16.mxu0 %v15242_v19 }
 0x82c   :  { %14815 = vmatpush3.bf16.msra.mxu1 %v20307_v57 }
 0x82d   :  { %14816 = vmatprep.subr.bf16.mxu1 %v20293_v6 }
 0x82e   :  { %11022 = vmatpush1.bf16.msra.mxu0 %v15240_v62 }
 0x82f   :  { %11023 = vmatprep.subr.bf16.mxu0 %v15248_v30 }
 0x830   :  { %14817 = vmatpush3.bf16.msra.mxu1 %v20308_v4 }
 0x831   :  { %14818 = vmatprep.subr.bf16.mxu1 %v20293_v6  ;;  %v20313_v6 = vld [vmem:[#allocation18_spill] sm:$0xff] }
 0x832   :  { %11024 = vmatpush1.bf16.msra.mxu0 %v15246_v53 }
 0x833   :  { %11025 = vmatprep.subr.bf16.mxu0 %v15254_v2 }
 0x834   :  { %14819 = vmatpush3.bf16.msra.mxu1 %v20310_v34 }
 0x835   :  { %11060 = vmatprep.subr.bf16.mxu1 %v15239_v3 }
 0x836   :  { %11026 = vmatpush1.bf16.msra.mxu0 %v15252_v40 }
 0x837   :  { %14821 = vmatmul.mubr.msk.bf16.vlgmr.msra.gmra.mxu1 %vm20311_vm11, %v10811_v5  ;;  %11027 = vmatprep.subr.bf16.mxu0 %v15260_v47 }
 0x838   :  { %11092 = vmatprep.mubr.bf16.mxu1 %v20306_v41  ;;  %11061 = vmatpush1.bf16.msra.mxu1 %v15237_v38 }
 0x839   :  { %11062 = vmatprep.subr.bf16.mxu1 %v15245_v8 }
 0x83a   :  { %11028 = vmatpush1.bf16.msra.mxu0 %v15258_v26 }
 0x83b   :  { %11029 = vmatprep.subr.bf16.mxu0 %v15266_v23 }
 0x83c   :  { %11063 = vmatpush1.bf16.msra.mxu1 %v15243_v17 }
 0x83d   :  { %11064 = vmatprep.subr.bf16.mxu1 %v15251_v25 }
 0x83e   :  { %11030 = vmatpush1.bf16.msra.mxu0 %v15264_v29 }
 0x83f   :  { %11031 = vmatprep.subr.bf16.mxu0 %v15272_v55 }
 0x840   :  { %11065 = vmatpush1.bf16.msra.mxu1 %v15249_v9 }
 0x841   :  { %11066 = vmatprep.subr.bf16.mxu1 %v15257_v31 }
 0x842   :  { %11032 = vmatpush1.bf16.msra.mxu0 %v15270_v32 }
 0x843   :  { %11033 = vmatprep.subr.bf16.mxu0 %v15278_v36  ;;  %v15441_v36 = vld [vmem:[%s19956_s6] ss:$0 sm:$0xff]  ;;  %s15504_s6 = smov [#allocation7]  }
 0x844   :  { %11067 = vmatpush1.bf16.msra.mxu1 %v15255_v16  ;;  %s11490_s30 = sshll.u32 %s15504_s6, 4  ;;  %s11491_s30 = int_to_ptr.vmem [resolvable:$true] %s11490_s30 }
 0x845   :  { %11068 = vmatprep.subr.bf16.mxu1 %v15263_v33  ;;  %s15462_s12 = scalar_lea.vmem %s11491_s30, 32  ;;  %p15467_p6 = scmp.lt.s32.totalorder %s11491_s30, %s11491_s30 }
 0x846   :  { %11034 = vmatpush1.bf16.msra.mxu0 %v15276_v0  ;;  %p15463_p5 = scmp.ne.s32.totalorder %s11491_s30, %s15462_s12  ;;  %p15468_p7 = scmp.lt.s32.totalorder %s15462_s12, %s15462_s12 }
 0x847   :  { %12972 = vmatprep.subr.bf16.mxu0 %v15282_v20 }
 0x848   :  { %11069 = vmatpush1.bf16.msra.mxu1 %v15261_v56  ;;  %p15469_p8 = por %p15468_p7, %p15467_p6 }
 0x849   :  { %11070 = vmatprep.subr.bf16.mxu1 %v15269_v44 }
 0x84a   :  { %p15470_p9 = pnand %p15469_p8, %p15463_p5 }
 0x84c   :  { %11071 = vmatpush1.bf16.msra.mxu1 %v15267_v10 }
 0x84d   :  { %11072 = vmatprep.subr.bf16.mxu1 %v15275_v54 }
 0x850   :  { %11073 = vmatpush1.bf16.msra.mxu1 %v15273_v18 }
 0x851   :  { %11074 = vmatprep.subr.bf16.mxu1 %v15281_v1 }
 0x854   :  { %11075 = vmatpush1.bf16.msra.mxu1 %v15279_v22 }
 0x855   :  { %12994 = vmatprep.subr.bf16.mxu1 %v15283_v46  ;;  %v15284_v46 = vld [vmem:[%s19959_s9 + $0x38] sm:$0xff]  }
 0x8a7   :  { %v10389_v37 = vpop.f32.mrf.mxu1  ;;  %v10430_v59 = vpop.f32.mrf.mxu0 }
 0x8a8   :  { %v19826_v49 = vadd.f32 %v10389_v37, %v20312_v21  ;;  %v19829_v15 = vadd.f32 %v10430_v59, %v20313_v6  ;;  %v15285_v37 = vld [vmem:[%s19959_s9 + $0xb8] sm:$0xff]   ;;  %v15286_v21 = vld [vmem:[%s19959_s9 + $0x70] sm:$0xff]  }
 0x8a9   :  { %v10391_v13 = vpop.f32.mrf.mxu1  ;;  %v10432_v63 = vpop.f32.mrf.mxu0  ;;  %v15287_v6 = vld [vmem:[%s19959_s9 + $0xf0] sm:$0xff]  }
 0x8aa   :  { %v19832_v60 = vadd.f32 %v10391_v13, %v20314_v51  ;;  %v19835_v39 = vadd.f32 %v10432_v63, %v20315_v45  ;;  %v15288_v13 = vld [vmem:[%s19959_s9 + $0x30] sm:$0xff]   ;;  %v15290_v51 = vld [vmem:[%s19959_s9 + $0x68] sm:$0xff]  }
 0x8ab   :  { %v10393_v11 = vpop.f32.mrf.mxu1  ;;  %v10434_v48 = vpop.f32.mrf.mxu0  ;;  %v15289_v63 = vld [vmem:[%s19959_s9 + $0xb0] sm:$0xff]   ;;  %v15291_v45 = vld [vmem:[%s19959_s9 + $0xe8] sm:$0xff]  }
 0x8ac   :  { %v15292_v11 = vld [vmem:[%s19959_s9 + $0x28] sm:$0xff]  }
 0x8ad   :  { %v10394_v50 = vpop.f32.mrf.mxu1  ;;  %v10435_v43 = vpop.f32.mrf.mxu0  ;;  %v15293_v48 = vld [vmem:[%s19959_s9 + $0xa8] sm:$0xff]  }
 0x8ae   :  { %v15294_v50 = vld [vmem:[%s19959_s9 + $0x60] sm:$0xff]  }
 0x8af   :  { %v15295_v43 = vld [vmem:[%s19959_s9 + $0xe0] sm:$0xff]  }
 0x8b7   :  { %v10475_v61 = vpop.f32.mrf.mxu1  ;;  %v10515_v7 = vpop.f32.mrf.mxu0 }
 0x8b8   :  { %v10516_v9 = vadd.f32 %v10515_v7, %v10475_v61  ;;  %v15296_v61 = vld [vmem:[%s19959_s9 + $0x20] sm:$0xff]  }
 0x8b9   :  { %v14726_v42 = vpop.f32.mrf.mxu1  ;;  %v14738_v28 = vpop.f32.mrf.mxu0  ;;  %v15297_v7 = vld [vmem:[%s19959_s9 + $0xa0] sm:$0xff]  }
 0x8ba   :  { %v15298_v42 = vld [vmem:[%s19959_s9 + $0x58] sm:$0xff]  }
 0x8bb   :  { %v10478_v41 = vpop.f32.mrf.mxu1  ;;  %v10518_v24 = vpop.f32.mrf.mxu0  ;;  %v15299_v28 = vld [vmem:[%s19959_s9 + $0xd8] sm:$0xff]  }
 0x8bc   :  { %v15300_v41 = vld [vmem:[%s19959_s9 + $0x18] sm:$0xff]  }
 0x8bd   :  { %v14727_v57 = vpop.f32.mrf.mxu1  ;;  %v14739_v12 = vpop.f32.mrf.mxu0  ;;  %v15301_v24 = vld [vmem:[%s19959_s9 + $0x98] sm:$0xff]  }
 0x8be   :  { %v15302_v57 = vld [vmem:[%s19959_s9 + $0x50] sm:$0xff]  }
 0x8bf   :  { %v15303_v12 = vld [vmem:[%s19959_s9 + $0xd0] sm:$0xff]  }
 0x8c7   :  { %v10555_v14 = vpop.f32.mrf.mxu1  ;;  %v10596_v4 = vpop.f32.mrf.mxu0 }
 0x8c8   :  { %v10561_v25 = vadd.f32 %v10555_v14, %v10516_v9  ;;  %v15304_v14 = vld [vmem:[%s19959_s9 + $0x10] sm:$0xff]  }
 0x8c9   :  { %v14750_v52 = vpop.f32.mrf.mxu1  ;;  %v14762_v58 = vpop.f32.mrf.mxu0 }
 0x8ca   :  { %v10602_v47 = vadd.f32 %v10596_v4, %v10561_v25  ;;  %v15305_v4 = vld [vmem:[%s19959_s9 + $0x90] sm:$0xff]   ;;  %v15306_v52 = vld [vmem:[%s19959_s9 + $0x48] sm:$0xff]  }
 0x8cb   :  { %v10558_v34 = vpop.f32.mrf.mxu1  ;;  %v10599_v5 = vpop.f32.mrf.mxu0  ;;  %v15307_v58 = vld [vmem:[%s19959_s9 + $0xc8] sm:$0xff]  }
 0x8cc   :  { %v15308_v34 = vld [vmem:[%s19959_s9 + $0x8] sm:$0xff]  }
 0x8cd   :  { %v14751_v27 = vpop.f32.mrf.mxu1  ;;  %v14763_v35 = vpop.f32.mrf.mxu0  ;;  %v15309_v5 = vld [vmem:[%s19959_s9 + $0x88] sm:$0xff]  }
 0x8ce   :  { %v15310_v27 = vld [vmem:[%s19959_s9 + $0x40] sm:$0xff]  }
 0x8cf   :  { %v15311_v35 = vld [vmem:[%s19959_s9 + $0xc0] sm:$0xff]  }
 0x8d7   :  { %v10644_v38 = vpop.f32.mrf.mxu1  ;;  %v10702_v3 = vpop.f32.mrf.mxu0 }
 0x8d8   :  { %v10650_v56 = vadd.f32 %v10644_v38, %v10602_v47  ;;  %v15312_v38 = vld [vmem:[%s19959_s9] sm:$0xff]  }
 0x8d9   :  { %v14774_v19 = vpop.f32.mrf.mxu1  ;;  %v14786_v8 = vpop.f32.mrf.mxu0 }
 0x8da   :  { %v10708_v29 = vadd.f32 %v10702_v3, %v10650_v56  ;;  %v15313_v3 = vld [vmem:[%s19959_s9 + $0x80] sm:$0xff]  }
 0x8db   :  { %v10647_v62 = vpop.f32.mrf.mxu1  ;;  %v10705_v17 = vpop.f32.mrf.mxu0  ;;  %v11105_v19 = vld [vmem:[%s19958_s8] sm:$0xf] }
 0x8dc   :  { %v20316_v8 = vld [vmem:[#allocation10_spill] sm:$0xff] }
 0x8dd   :  { %v14775_v53 = vpop.f32.mrf.mxu1  ;;  %v14787_v30 = vpop.f32.mrf.mxu0  ;;  %v11121_v62 = vsub.s32 3, %v20316_v8  ;;  %v20317_v17 = vsub.s32 0, %v20316_v8 }
 0x8de   :  { %v20318_v30 = vsub.s32 2, %v20316_v8 }
 0x8df   :  { %v11110_v53 = vrot.slane %v11105_v19, %v20317_v17 }
 0x8e0   :  { %v11118_v9 = vrot.slane %v11105_v19, %v20318_v30 }
 0x8e7   :  { %v10743_v2 = vpop.f32.mrf.mxu1  ;;  %v10791_v31 = vpop.f32.mrf.mxu0 }
 0x8e8   :  { %v10749_v10 = vadd.f32 %v10743_v2, %v10708_v29 }
 0x8e9   :  { %v14798_v40 = vpop.f32.mrf.mxu1  ;;  %v14810_v16 = vpop.f32.mrf.mxu0 }
 0x8ea   :  { %v10797_v32 = vadd.f32 %v10791_v31, %v10749_v10  ;;  %v20319_v16 = vsub.s32 1, %v20316_v8 }
 0x8eb   :  { %v10746_v33 = vpop.f32.mrf.mxu1  ;;  %v10794_v26 = vpop.f32.mrf.mxu0 }
 0x8ec   :  { %v11114_v47 = vrot.slane %v11105_v19, %v20319_v16  ;;  %v11122_v33 = vrot.slane %v11105_v19, %v11121_v62 }
 0x8ed   :  { %v14799_v23 = vpop.f32.mrf.mxu1  ;;  %v14811_v44 = vpop.f32.mrf.mxu0 }
 0x8f7   :  { %v10849_v55 = vpop.f32.mrf.mxu1 }
 0x8f8   :  { %v10855_v18 = vadd.f32 %v10849_v55, %v10797_v32 }
 0x8f9   :  { %v14822_v54 = vpop.f32.mrf.mxu1 }
 0x8fa   :  { %v10856_v1 = vadd.f32 %v15441_v36, %v10855_v18 }
 0x8fb   :  { %v10852_v0 = vpop.f32.mrf.mxu1 }
 0x8fc   :  { %v10857_v22 = vmax.f32 %v10856_v1, 0.0 }
 0x8fd   :  { %v14823_v20 = vpop.f32.mrf.mxu1 }
 0x8fe   :  { %v10858_v59 = vpack.c.bf16 %v10857_v22, %v10857_v22 }
 0x900   :  { %11052 = vmatmul.mubr.bf16.vlgmr.msra.gmra.mxu0 %v10858_v59  ;;  %11093 = vmatmul.mubr.bf16.vlgmr.msra.gmra.mxu1 %v10858_v59 }
 0x901   :  { %12973 = vmatpush3.bf16.msra.mxu0 %v15284_v46  ;;  %12995 = vmatpush3.bf16.msra.mxu1 %v15285_v37 }
 0x902   :  { %12974 = vmatprep.subr.bf16.mxu0 %v15286_v21  ;;  %12996 = vmatprep.subr.bf16.mxu1 %v15287_v6  ;;  %v12157_v21 = vld [vmem:[%s19960_s10] ss:$0 sm:$0xff] }
 0x905   :  { %12975 = vmatpush3.bf16.msra.mxu0 %v15288_v13  ;;  %12997 = vmatpush3.bf16.msra.mxu1 %v15289_v63 }
 0x906   :  { %12976 = vmatprep.subr.bf16.mxu0 %v15290_v51  ;;  %12998 = vmatprep.subr.bf16.mxu1 %v15291_v45 }
 0x909   :  { %12977 = vmatpush3.bf16.msra.mxu0 %v15292_v11  ;;  %12999 = vmatpush3.bf16.msra.mxu1 %v15293_v48 }
 0x90a   :  { %12978 = vmatprep.subr.bf16.mxu0 %v15294_v50  ;;  %13000 = vmatprep.subr.bf16.mxu1 %v15295_v43 }
 0x90d   :  { %12979 = vmatpush3.bf16.msra.mxu0 %v15296_v61  ;;  %13001 = vmatpush3.bf16.msra.mxu1 %v15297_v7 }
 0x90e   :  { %12980 = vmatprep.subr.bf16.mxu0 %v15298_v42  ;;  %13002 = vmatprep.subr.bf16.mxu1 %v15299_v28 }
 0x911   :  { %12981 = vmatpush3.bf16.msra.mxu0 %v15300_v41  ;;  %13003 = vmatpush3.bf16.msra.mxu1 %v15301_v24 }
 0x912   :  { %12982 = vmatprep.subr.bf16.mxu0 %v15302_v57  ;;  %13004 = vmatprep.subr.bf16.mxu1 %v15303_v12 }
 0x915   :  { %12983 = vmatpush3.bf16.msra.mxu0 %v15304_v14  ;;  %13005 = vmatpush3.bf16.msra.mxu1 %v15305_v4 }
 0x916   :  { %12984 = vmatprep.subr.bf16.mxu0 %v15306_v52  ;;  %13006 = vmatprep.subr.bf16.mxu1 %v15307_v58 }
 0x919   :  { %12985 = vmatpush3.bf16.msra.mxu0 %v15308_v34  ;;  %13007 = vmatpush3.bf16.msra.mxu1 %v15309_v5 }
 0x91a   :  { %12986 = vmatprep.subr.bf16.mxu0 %v15310_v27  ;;  %13008 = vmatprep.subr.bf16.mxu1 %v15311_v35 }
 0x91d   :  { %12987 = vmatpush3.bf16.msra.mxu0 %v15312_v38  ;;  %13009 = vmatpush3.bf16.msra.mxu1 %v15313_v3 }
 0x9c0   :  { %v11053_v25 = vpop.f32.mrf.mxu0  ;;  %v11094_v2 = vpop.f32.mrf.mxu1 }
 0x9c1   :  { %v11101_v31 = vadd.f32 %v11053_v25, %v19826_v49  ;;  %v11103_v40 = vadd.f32 %v11094_v2, %v19829_v15 }
 0x9c2   :  { %v11055_v26 = vpop.f32.mrf.mxu0  ;;  %v11096_v56 = vpop.f32.mrf.mxu1 }
 0x9c3   :  { %v11127_v23 = vadd.f32 %v11110_v53, %v11101_v31  ;;  %v11129_v44 = vadd.f32 %v11118_v9, %v11103_v40  ;;  %v11102_v29 = vadd.f32 %v11055_v26, %v19832_v60  ;;  %v11104_v10 = vadd.f32 %v11096_v56, %v19835_v39 }
 0x9c4   :  { %v11057_v32 = vpop.f32.mrf.mxu0  ;;  %v11098_v55 = vpop.f32.mrf.mxu1 }
 0x9c5   :  { %v11128_v18 = vadd.f32 %v11114_v47, %v11102_v29  ;;  %v11130_v54 = vadd.f32 %v11122_v33, %v11104_v10  ;;  %v11131_v36 = vmax.f32 %v11127_v23, 0.0  ;;  %v11133_v49 = vmax.f32 %v11129_v44, 0.0 }
 0x9c6   :  { %v11058_v1 = vpop.f32.mrf.mxu0  ;;  %v11099_v15 = vpop.f32.mrf.mxu1 }
 0x9c7   :  { %v11132_v0 = vmax.f32 %v11128_v18, 0.0  ;;  %v11134_v22 = vmax.f32 %v11130_v54, 0.0  ;;  %v11135_v37 = vpack.c.bf16 %v11131_v36, %v11131_v36  ;;  %v11137_v59 = vpack.c.bf16 %v11133_v49, %v11133_v49 }
 0x9c9   :  { %v11136_v20 = vpack.c.bf16 %v11132_v0, %v11132_v0  ;;  %v11138_v46 = vpack.c.bf16 %v11134_v22, %v11134_v22 }
 0x9cb   :  { %11434 = vmatprep.mubr.bf16.mxu0 %v11136_v20  ;;  %11474 = vmatprep.mubr.bf16.mxu1 %v11138_v46 }
 0x9cc   :  { %11435 = vmatmul.mubr.bf16.vlgmr.msra.gmra.mxu0 %v11135_v37  ;;  %11475 = vmatmul.mubr.bf16.vlgmr.msra.gmra.mxu1 %v11137_v59 }
 0xa8c   :  { %v12988_v60 = vpop.f32.mrf.mxu0  ;;  %v13010_v39 = vpop.f32.mrf.mxu1 }
 0xa8e   :  { %v12989_v6 = vpop.f32.mrf.mxu0  ;;  %v13011_v13 = vpop.f32.mrf.mxu1 }
 0xa8f   :  { %v12990_v63 = vadd.f32 %v12989_v6, %v12988_v60  ;;  %v13012_v48 = vadd.f32 %v13011_v13, %v13010_v39 }
 0xa90   :  { %v12991_v51 = vpop.f32.mrf.mxu0  ;;  %v13013_v45 = vpop.f32.mrf.mxu1 }
 0xa91   :  { %v11437_v11 = vadd.f32 %v12990_v63, %v12157_v21 }
 0xa92   :  { %v12992_v50 = vpop.f32.mrf.mxu0  ;;  %v13014_v43 = vpop.f32.mrf.mxu1 }
 0xa93   :  { %v11477_v61 = vadd.f32 %v13012_v48, %v11437_v11 }
 0xa95   :  { %11483 = vst.msk [vmem:[#allocation7] sm:$0x3] %vm11482_vm10, %v11477_v61 }
 0xa96   :  { %15473 = shalt.err (!%p15470_p9)
}
 0xa97   :  { %11493 = dma.vmem_to_hbm [thread:$0]  %s11491_s30, 32, %s19961_s11, [#allocation6]  }
 0xa98   :  { %15484 = dma.done.wait [#allocation6], 32  }
 0xa99   :  { %15485 = vsyncadd [#allocation6], 4294967264 }
 0xa9a   :  { %11497 = vsyncpa [#allocation5], 1 }
 0xa9b   :  { %11498 = vsyncpa [#allocation6], 1 }

</bundles_post_ra>
